<compile_context>
chip_gen: v7x
topology: tpu7x:2x2x1
jax: 0.10.0
libtpu: 0.0.40
codegen_flags: <defaults>
</compile_context>

<pallas_src>
import functools

import jax
import jax.numpy as jnp
from jax import lax
from jax.experimental import pallas as pl
from jax.experimental.pallas import tpu as pltpu

_VMEM_LIMIT = 48 * 1024 * 1024   # explicit scoped-VMEM cap (safe on v5e/v6e/v7x)


def _round_up(n, m):
    return ((n + m - 1) // m) * m


# ----------------------------------------------------------------------------
# Conv3x3 (pad=1, stride=1) + folded BatchNorm + ReLU + AvgPool2d((2,1)) fused.
# Grid = (batch,); each invocation convolves one whole (halo-padded) image.
# ----------------------------------------------------------------------------
def _conv_kernel(x_ref, w_ref, b_ref, o_ref, *, H, W, Cin, in_kernel_gather):
    Hp, _, Cout = o_ref.shape
    if in_kernel_gather:
        # Build the 9 taps from the halo'd VMEM block; accumulate 9 MXU matmuls.
        acc = None
        for idx in range(9):
            kh, kw = divmod(idx, 3)
            tap = x_ref[pl.ds(kh, H), pl.ds(kw, W), :].reshape(H * W, Cin)
            part = jnp.dot(tap, w_ref[pl.ds(idx * Cin, Cin), :],
                           preferred_element_type=jnp.float32)
            acc = part if acc is None else acc + part
    else:
        # Pre-gathered (tiny-Cin first layer): one big-K matmul.
        x = x_ref[...]
        acc = jnp.dot(x.reshape(H * W, x.shape[-1]), w_ref[...],
                      preferred_element_type=jnp.float32)
    y = jnp.maximum(acc + b_ref[...], 0.0)                        # BN shift + ReLU
    y = y[: Hp * 2 * W].reshape(Hp, 2, W, Cout)                   # floor like torch
    o_ref[...] = ((y[:, 0] + y[:, 1]) * 0.5).astype(o_ref.dtype)  # AvgPool (2,1)


def conv3x3_bn_relu_pool(x_nhwc, w_flat, bias):
    """x: (B,H,W,Cin) bf16; w_flat: (9*Cin, Cout) bf16 (BN scale folded);
    bias: (1, Cout) f32 (conv bias + BN shift)  ->  (B, H//2, W, Cout) bf16."""
    B, H, W, Cin = x_nhwc.shape
    Cout = w_flat.shape[-1]
    Hp = H // 2
    in_kernel_gather = Cin >= 8
    xp = jnp.pad(x_nhwc, ((0, 0), (1, 1), (1, 1), (0, 0)))
    if in_kernel_gather:
        xin = xp
        Hin, Win, Kin = H + 2, W + 2, Cin
        w_use = w_flat
    else:
        # Tiny-Cin layer: XLA-side im2col (negligible bytes), lane-padded K.
        xin = jnp.concatenate(
            [xp[:, kh:kh + H, kw:kw + W, :] for kh in range(3) for kw in range(3)],
            axis=-1)
        K = 9 * Cin
        Kp = _round_up(K, 128)
        if Kp > K:
            xin = jnp.pad(xin, ((0, 0), (0, 0), (0, 0), (0, Kp - K)))
            w_use = jnp.pad(w_flat, ((0, Kp - K), (0, 0)))
        else:
            w_use = w_flat
        Hin, Win, Kin = H, W, Kp
    return pl.pallas_call(
        functools.partial(_conv_kernel, H=H, W=W, Cin=Cin,
                          in_kernel_gather=in_kernel_gather),
        out_shape=jax.ShapeDtypeStruct((B, Hp, W, Cout), jnp.bfloat16),
        grid=(B,),
        in_specs=[
            pl.BlockSpec((None, Hin, Win, Kin), lambda b: (b, 0, 0, 0)),
            pl.BlockSpec(w_use.shape, lambda b: (0, 0)),
            pl.BlockSpec((1, Cout), lambda b: (0, 0)),
        ],
        out_specs=pl.BlockSpec((None, Hp, W, Cout), lambda b: (b, 0, 0, 0)),
        compiler_params=pltpu.CompilerParams(
            dimension_semantics=("parallel",),
            vmem_limit_bytes=_VMEM_LIMIT),
    )(xin, w_use, bias)


# ----------------------------------------------------------------------------
# Hoisted input projections: (M,K)@(K,N)+b, M-tiled, bf16 in / f32 accumulate.
# Dual variant consumes the fwd/bwd LSTM halves separately (no concat) and
# optionally fuses log_softmax (used for the final FC).
# ----------------------------------------------------------------------------
def _matmul_bias_kernel(a_ref, w_ref, b_ref, o_ref):
    o_ref[...] = (jnp.dot(a_ref[...], w_ref[...],
                          preferred_element_type=jnp.float32)
                  + b_ref[...]).astype(o_ref.dtype)


def matmul_bias(a, w, b, out_dtype=jnp.float32):
    M, K = a.shape
    N = w.shape[1]
    TM = min(1024, _round_up(M, 8))
    Mp = _round_up(M, TM)
    if Mp > M:
        a = jnp.pad(a, ((0, Mp - M), (0, 0)))
    out = pl.pallas_call(
        _matmul_bias_kernel,
        out_shape=jax.ShapeDtypeStruct((Mp, N), out_dtype),
        grid=(Mp // TM,),
        in_specs=[pl.BlockSpec((TM, K), lambda i: (i, 0)),
                  pl.BlockSpec((K, N), lambda i: (0, 0)),
                  pl.BlockSpec((1, N), lambda i: (0, 0))],
        out_specs=pl.BlockSpec((TM, N), lambda i: (i, 0)),
        compiler_params=pltpu.CompilerParams(
            dimension_semantics=("parallel",),
            vmem_limit_bytes=_VMEM_LIMIT),
    )(a, w, b)
    return out[:M]


def _dual_matmul_bias_kernel(a_ref, b2_ref, wa_ref, wb_ref, bias_ref, o_ref,
                             *, log_softmax):
    z = (jnp.dot(a_ref[...], wa_ref[...], preferred_element_type=jnp.float32)
         + jnp.dot(b2_ref[...], wb_ref[...], preferred_element_type=jnp.float32)
         + bias_ref[...])
    if log_softmax:
        m = jnp.max(z, axis=-1, keepdims=True)
        lse = jnp.log(jnp.sum(jnp.exp(z - m), axis=-1, keepdims=True))
        z = z - m - lse
    o_ref[...] = z.astype(o_ref.dtype)


def dual_matmul_bias(a, b2, wa, wb, bias, *, log_softmax=False,
                     out_dtype=jnp.float32):
    M, Ka = a.shape
    Kb = b2.shape[1]
    N = wa.shape[1]
    TM = min(1024, _round_up(M, 8))
    Mp = _round_up(M, TM)
    if Mp > M:
        a = jnp.pad(a, ((0, Mp - M), (0, 0)))
        b2 = jnp.pad(b2, ((0, Mp - M), (0, 0)))
    out = pl.pallas_call(
        functools.partial(_dual_matmul_bias_kernel, log_softmax=log_softmax),
        out_shape=jax.ShapeDtypeStruct((Mp, N), out_dtype),
        grid=(Mp // TM,),
        in_specs=[pl.BlockSpec((TM, Ka), lambda i: (i, 0)),
                  pl.BlockSpec((TM, Kb), lambda i: (i, 0)),
                  pl.BlockSpec((Ka, N), lambda i: (0, 0)),
                  pl.BlockSpec((Kb, N), lambda i: (0, 0)),
                  pl.BlockSpec((1, N), lambda i: (0, 0))],
        out_specs=pl.BlockSpec((TM, N), lambda i: (i, 0)),
        compiler_params=pltpu.CompilerParams(
            dimension_semantics=("parallel",),
            vmem_limit_bytes=_VMEM_LIMIT),
    )(a, b2, wa, wb, bias)
    return out[:M]


# ----------------------------------------------------------------------------
# Bidirectional LSTM recurrence.  xw = X@Wih+bias is precomputed (bf16); only
# h@Whh sits in the serial loop.  Both directions are interleaved inside ONE
# time loop (two independent matmuls per step hide each other's latency on
# 1-TC chips); the backward direction uses reversed index_maps + reversed
# in-chunk order.  Gate order: (i, f, o, g).
# ----------------------------------------------------------------------------
def _bilstm_kernel(xwf_ref, xwb_ref, whhf_ref, whhb_ref, outf_ref, outb_ref,
                   hf, cf, hb, cb):
    Tc = xwf_ref.shape[0]
    Hh = hf.shape[-1]

    @pl.when(pl.program_id(0) == 0)
    def _():
        hf[...] = jnp.zeros_like(hf)
        cf[...] = jnp.zeros_like(cf)
        hb[...] = jnp.zeros_like(hb)
        cb[...] = jnp.zeros_like(cb)

    def gates(z, c_prev):
        s = jax.nn.sigmoid(z[:, :3 * Hh])          # i, f, o in one contiguous slice
        i_g = s[:, :Hh]
        f_g = s[:, Hh:2 * Hh]
        o_g = s[:, 2 * Hh:3 * Hh]
        g = jnp.tanh(z[:, 3 * Hh:])
        c = f_g * c_prev + i_g * g
        h = o_g * jnp.tanh(c)
        return h, c

    def step(i, carry):
        rb = Tc - 1 - i                            # backward walks the chunk in reverse
        zf = (xwf_ref[pl.ds(i, 1)][0].astype(jnp.float32)
              + jnp.dot(hf[...].astype(jnp.bfloat16), whhf_ref[...],
                        preferred_element_type=jnp.float32))
        zb = (xwb_ref[pl.ds(rb, 1)][0].astype(jnp.float32)
              + jnp.dot(hb[...].astype(jnp.bfloat16), whhb_ref[...],
                        preferred_element_type=jnp.float32))
        h_f, c_f = gates(zf, cf[...])
        h_b, c_b = gates(zb, cb[...])
        hf[...] = h_f
        cf[...] = c_f
        hb[...] = h_b
        cb[...] = c_b
        outf_ref[pl.ds(i, 1)] = h_f[None].astype(outf_ref.dtype)
        outb_ref[pl.ds(rb, 1)] = h_b[None].astype(outb_ref.dtype)
        return carry

    lax.fori_loop(0, Tc, step, 0, unroll=True)


def bilstm_recurrence(xw_tbd, whh_2, time_chunk=16):
    """xw: (T,B,8Hh) bf16 (cols: fwd i,f,o,g then bwd i,f,o,g);
    whh: (2,Hh,4Hh) bf16  ->  (fwd, bwd) hidden sequences, each (T,B,Hh) bf16."""
    T, B, eightH = xw_tbd.shape
    Hh = eightH // 8
    Tc = min(time_chunk, T)
    Tp = _round_up(T, Tc)
    if Tp > T:
        # -1e9 rows: sigmoid gates -> 0 exactly, so padded steps keep c = h = 0
        # (safe for the backward direction which sees the padding first).
        xw_tbd = jnp.pad(xw_tbd, ((0, Tp - T), (0, 0), (0, 0)),
                         constant_values=-1e9)
    nT = Tp // Tc
    outf, outb = pl.pallas_call(
        _bilstm_kernel,
        out_shape=(jax.ShapeDtypeStruct((Tp, B, Hh), jnp.bfloat16),
                   jax.ShapeDtypeStruct((Tp, B, Hh), jnp.bfloat16)),
        grid=(nT,),
        in_specs=[
            pl.BlockSpec((Tc, B, 4 * Hh), lambda t: (t, 0, 0)),            # fwd gates
            pl.BlockSpec((Tc, B, 4 * Hh), lambda t: (nT - 1 - t, 0, 1)),   # bwd gates
            pl.BlockSpec((None, Hh, 4 * Hh), lambda t: (0, 0, 0)),         # Whh fwd
            pl.BlockSpec((None, Hh, 4 * Hh), lambda t: (1, 0, 0)),         # Whh bwd
        ],
        out_specs=[pl.BlockSpec((Tc, B, Hh), lambda t: (t, 0, 0)),
                   pl.BlockSpec((Tc, B, Hh), lambda t: (nT - 1 - t, 0, 0))],
        scratch_shapes=[pltpu.VMEM((B, Hh), jnp.float32),    # h fwd
                        pltpu.VMEM((B, Hh), jnp.float32),    # c fwd
                        pltpu.VMEM((B, Hh), jnp.float32),    # h bwd
                        pltpu.VMEM((B, Hh), jnp.float32)],   # c bwd
        compiler_params=pltpu.CompilerParams(
            dimension_semantics=("arbitrary",)),
    )(xw_tbd, xw_tbd, whh_2, whh_2)
    if Tp > T:
        outf = outf[:T]
        outb = outb[:T]
    return outf, outb


# ----------------------------------------------------------------------------
# Full forward pass
# ----------------------------------------------------------------------------
def forward(x_nchw, params):
    x = jnp.transpose(x_nchw, (0, 2, 3, 1)).astype(jnp.bfloat16)   # NCHW -> NHWC
    for blk in params['cnn']:
        x = conv3x3_bn_relu_pool(x, blk['w'], blk['b'])
    # TODO(synk): dropout = identity, BN uses running stats (eval-mode semantics).
    B, Hf, W, C = x.shape
    T = W
    D = C * Hf
    # torch: (B,C,H,W).permute(0,3,1,2).reshape(B,W,C*H) => feature idx = c*Hf+h.
    # Single XLA transpose straight into the time-major (T*B, D) layout.
    seq = jnp.transpose(x, (2, 0, 3, 1)).reshape(T * B, D)

    h_f = h_b = None
    Hh_prev = None
    for li, lp in enumerate(params['lstm']):
        Hh = lp['whh'].shape[-1] // 4
        wih = lp['wih']                                            # (Din, 8Hh) bf16
        if li == 0:
            xw = matmul_bias(seq, wih, lp['b'], out_dtype=jnp.bfloat16)
        else:   # consume fwd/bwd halves separately (no concat materialized)
            xw = dual_matmul_bias(h_f, h_b, wih[:Hh_prev], wih[Hh_prev:],
                                  lp['b'], out_dtype=jnp.bfloat16)
        hf_seq, hb_seq = bilstm_recurrence(xw.reshape(T, B, 8 * Hh), lp['whh'])
        h_f = hf_seq.reshape(T * B, Hh)
        h_b = hb_seq.reshape(T * B, Hh)
        Hh_prev = Hh

    # Final Linear + log_softmax with a lane-dense (128-padded) class dim.
    C_cls = params['fc_b'].shape[0]
    Cp = _round_up(C_cls, 128)
    fcw = params['fc_w'].astype(jnp.bfloat16)                      # (2Hh, C)
    wa = jnp.pad(fcw[:Hh_prev], ((0, 0), (0, Cp - C_cls)))
    wb = jnp.pad(fcw[Hh_prev:], ((0, 0), (0, Cp - C_cls)))
    bias = jnp.pad(params['fc_b'].reshape(1, C_cls),
                   ((0, 0), (0, Cp - C_cls)), constant_values=-1e30)
    logp = dual_matmul_bias(h_f, h_b, wa, wb, bias, log_softmax=True,
                            out_dtype=jnp.float32)
    logp = logp[:, :C_cls].reshape(T, B, C_cls).transpose(1, 0, 2)  # (B, W, C)
    return logp, W


# ----------------------------------------------------------------------------
# Deterministic parameter construction (eval-mode BN folded into weights/bias).
# ----------------------------------------------------------------------------
def init_params(key, num_classes, input_channels, hidden_size, num_lstm_layers=2):
    keys = iter(jax.random.split(key, 64))

    def nrm(shape, s=0.1):
        return jax.random.normal(next(keys), shape, jnp.float32) * s

    eps = 1e-5
    cnn = []
    cin = input_channels
    for cout in (32, 64, 128, 128):
        w = nrm((3, 3, cin, cout))
        b_conv = nrm((cout,))
        gamma = 1.0 + nrm((cout,))
        beta = nrm((cout,))
        running_mean = nrm((cout,))
        running_var = jnp.abs(1.0 + nrm((cout,)))
        scale = gamma / jnp.sqrt(running_var + eps)
        shift = beta - running_mean * scale + b_conv * scale
        # Fold BN scale into the conv weights, BN shift (+conv bias) into one bias.
        w_folded = (w * scale).reshape(9 * cin, cout).astype(jnp.bfloat16)
        cnn.append(dict(w=w_folded, b=shift.reshape(1, cout)))
        cin = cout

    Hh = hidden_size
    lstm = []
    d_in = 128 * 2
    for _ in range(num_lstm_layers):
        # Gate order (i, f, o, g) = column permutation of torch's (i, f, g, o);
        # porting torch weights would permute the 4H gate blocks accordingly.
        wih_f = nrm((d_in, 4 * Hh))
        wih_b = nrm((d_in, 4 * Hh))
        whh_f = nrm((Hh, 4 * Hh))
        whh_b = nrm((Hh, 4 * Hh))
        b_f = nrm((4 * Hh,)) + nrm((4 * Hh,))       # b_ih + b_hh
        b_b = nrm((4 * Hh,)) + nrm((4 * Hh,))
        lstm.append(dict(
            wih=jnp.concatenate([wih_f, wih_b], axis=1).astype(jnp.bfloat16),
            whh=jnp.stack([whh_f, whh_b], axis=0).astype(jnp.bfloat16),
            b=jnp.concatenate([b_f, b_b]).reshape(1, 8 * Hh),
        ))
        d_in = 2 * Hh

    fc_w = nrm((2 * Hh, num_classes))
    fc_b = nrm((num_classes,))
    return dict(cnn=cnn, lstm=lstm, fc_w=fc_w, fc_b=fc_b)


if __name__ == "__main__":
    key = jax.random.PRNGKey(0)
    k_in, k_par = jax.random.split(key)

    # H must be 32 so that after 4 height-halving pools channels*height = 128*2
    # = 256, matching the LSTM input_size of the PyTorch module; hidden_size=128
    # is the module default and keeps all LSTM lane layouts 128-dense.
    B, Cin, H, W = 2, 1, 32, 8
    num_classes, hidden_size = 16, 128

    x = jax.random.normal(k_in, (B, Cin, H, W), jnp.float32)       # NCHW like PyTorch
    params = init_params(k_par, num_classes, Cin, hidden_size)

    fwd = jax.jit(forward)
    out, width = fwd(x, params)
    out = jax.block_until_ready(out)

    assert out.shape == (B, W, num_classes), out.shape
    assert int(width) == W
    # rows of log_softmax should exp-sum to ~1
    assert jnp.allclose(jnp.exp(out).sum(-1), 1.0, atol=1e-3)
    print("KERNEL_OK")
</pallas_src>

<mosaic_0001>
module attributes {stable_mosaic.version = 11 : i64} {
  func.func @_conv_kernel(%arg0: i32, %arg1: memref<1x32x8x128xbf16, #tpu.memory_space<vmem>>, %arg2: memref<128x32xbf16, #tpu.memory_space<vmem>>, %arg3: memref<1x32xf32, #tpu.memory_space<vmem>>, %arg4: memref<1x16x8x32xbf16, #tpu.memory_space<vmem>>) attributes {dimension_semantics = [#tpu.dimension_semantics<parallel>], iteration_bounds = array<i64: 2>, scalar_prefetch = 0 : i64, scratch_operands = 0 : i64, tpu.core_type = #tpu.core_type<tc>, window_params = [{transform_indices = @transform_0, window_bounds = array<i64: 1, 32, 8, 128>}, {pipeline_mode = #tpu.pipeline_mode<synchronous>, transform_indices = @transform_1, window_bounds = array<i64: 128, 32>}, {pipeline_mode = #tpu.pipeline_mode<synchronous>, transform_indices = @transform_2, window_bounds = array<i64: 1, 32>}, {transform_indices = @transform_3, window_bounds = array<i64: 1, 16, 8, 32>}]} {
    %c0 = arith.constant 0 : index
    %c0_0 = arith.constant 0 : index
    %c0_1 = arith.constant 0 : index
    %c0_2 = arith.constant 0 : index
    %0 = vector.load %arg1[%c0, %c0_0, %c0_1, %c0_2] : memref<1x32x8x128xbf16, #tpu.memory_space<vmem>>, vector<1x32x8x128xbf16>
    %1 = vector.shape_cast %0 : vector<1x32x8x128xbf16> to vector<32x8x128xbf16>
    %2 = vector.shape_cast %1 : vector<32x8x128xbf16> to vector<256x128xbf16>
    %c0_3 = arith.constant 0 : index
    %c0_4 = arith.constant 0 : index
    %3 = vector.load %arg2[%c0_3, %c0_4] : memref<128x32xbf16, #tpu.memory_space<vmem>>, vector<128x32xbf16>
    %cst = arith.constant dense<0.000000e+00> : vector<256x32xf32>
    %4 = tpu.matmul %2, %3, %cst {dimension_numbers = #tpu.dot_dimension_numbers<[1], [0], [0], [1], [0, 0, 1, 1], [], []>} : vector<256x128xbf16>, vector<128x32xbf16>, vector<256x32xf32> -> vector<256x32xf32>
    %c0_5 = arith.constant 0 : index
    %c0_6 = arith.constant 0 : index
    %5 = vector.load %arg3[%c0_5, %c0_6] : memref<1x32xf32, #tpu.memory_space<vmem>>, vector<1x32xf32>
    %6 = vector.broadcast %5 : vector<1x32xf32> to vector<256x32xf32>
    %7 = arith.addf %4, %6 : vector<256x32xf32>
    %cst_7 = arith.constant 0.000000e+00 : f32
    %8 = vector.broadcast %cst_7 : f32 to vector<256x32xf32>
    %9 = arith.maximumf %7, %8 : vector<256x32xf32>
    %10 = vector.shape_cast %9 : vector<256x32xf32> to vector<16x2x8x32xf32>
    %11 = vector.extract_strided_slice %10 {offsets = [0, 0, 0, 0], sizes = [16, 1, 8, 32], strides = [1, 1, 1, 1]} : vector<16x2x8x32xf32> to vector<16x1x8x32xf32>
    %12 = vector.shape_cast %11 : vector<16x1x8x32xf32> to vector<16x8x32xf32>
    %13 = vector.extract_strided_slice %10 {offsets = [0, 1, 0, 0], sizes = [16, 1, 8, 32], strides = [1, 1, 1, 1]} : vector<16x2x8x32xf32> to vector<16x1x8x32xf32>
    %14 = vector.shape_cast %13 : vector<16x1x8x32xf32> to vector<16x8x32xf32>
    %15 = arith.addf %12, %14 : vector<16x8x32xf32>
    %cst_8 = arith.constant 5.000000e-01 : f32
    %16 = vector.broadcast %cst_8 : f32 to vector<16x8x32xf32>
    %17 = arith.mulf %15, %16 : vector<16x8x32xf32>
    %18 = arith.truncf %17 : vector<16x8x32xf32> to vector<16x8x32xbf16>
    %c0_9 = arith.constant 0 : index
    %c0_10 = arith.constant 0 : index
    %c0_11 = arith.constant 0 : index
    %c0_12 = arith.constant 0 : index
    %19 = vector.load %arg4[%c0_9, %c0_10, %c0_11, %c0_12] : memref<1x16x8x32xbf16, #tpu.memory_space<vmem>>, vector<1x16x8x32xbf16>
    %20 = vector.shape_cast %19 : vector<1x16x8x32xbf16> to vector<16x8x32xbf16>
    %21 = vector.shape_cast %18 : vector<16x8x32xbf16> to vector<1x16x8x32xbf16>
    tpu.vector_store %arg4[%c0_9, %c0_10, %c0_11, %c0_12], %21 {strides = array<i32>} : memref<1x16x8x32xbf16, #tpu.memory_space<vmem>>, vector<1x16x8x32xbf16>,
    return
  }
  func.func @transform_0(%arg0: i32) -> (i32, i32, i32, i32) {
    %c0_i32 = arith.constant 0 : i32
    %c0_i32_0 = arith.constant 0 : i32
    %c0_i32_1 = arith.constant 0 : i32
    %c0_i32_2 = arith.constant 0 : i32
    return %arg0, %c0_i32, %c0_i32_0, %c0_i32_1 : i32, i32, i32, i32
  }
  func.func @transform_1(%arg0: i32) -> (i32, i32) {
    %c0_i32 = arith.constant 0 : i32
    %c0_i32_0 = arith.constant 0 : i32
    %c0_i32_1 = arith.constant 0 : i32
    return %c0_i32, %c0_i32_0 : i32, i32
  }
  func.func @transform_2(%arg0: i32) -> (i32, i32) {
    %c0_i32 = arith.constant 0 : i32
    %c0_i32_0 = arith.constant 0 : i32
    %c0_i32_1 = arith.constant 0 : i32
    return %c0_i32, %c0_i32_0 : i32, i32
  }
  func.func @transform_3(%arg0: i32) -> (i32, i32, i32, i32) {
    %c0_i32 = arith.constant 0 : i32
    %c0_i32_0 = arith.constant 0 : i32
    %c0_i32_1 = arith.constant 0 : i32
    %c0_i32_2 = arith.constant 0 : i32
    return %arg0, %c0_i32, %c0_i32_0, %c0_i32_1 : i32, i32, i32, i32
  }
}

module attributes {stable_mosaic.version = 11 : i64} {
  func.func @_conv_kernel(%arg0: i32, %arg1: memref<1x18x10x32xbf16, #tpu.memory_space<vmem>>, %arg2: memref<288x64xbf16, #tpu.memory_space<vmem>>, %arg3: memref<1x64xf32, #tpu.memory_space<vmem>>, %arg4: memref<1x8x8x64xbf16, #tpu.memory_space<vmem>>) attributes {dimension_semantics = [#tpu.dimension_semantics<parallel>], iteration_bounds = array<i64: 2>, scalar_prefetch = 0 : i64, scratch_operands = 0 : i64, tpu.core_type = #tpu.core_type<tc>, window_params = [{transform_indices = @transform_0, window_bounds = array<i64: 1, 18, 10, 32>}, {pipeline_mode = #tpu.pipeline_mode<synchronous>, transform_indices = @transform_1, window_bounds = array<i64: 288, 64>}, {pipeline_mode = #tpu.pipeline_mode<synchronous>, transform_indices = @transform_2, window_bounds = array<i64: 1, 64>}, {transform_indices = @transform_3, window_bounds = array<i64: 1, 8, 8, 64>}]} {
    %c0 = arith.constant 0 : index
    %c0_0 = arith.constant 0 : index
    %c0_1 = arith.constant 0 : index
    %c0_2 = arith.constant 0 : index
    %0 = vector.load %arg1[%c0, %c0_0, %c0_1, %c0_2] : memref<1x18x10x32xbf16, #tpu.memory_space<vmem>>, vector<1x16x8x32xbf16>
    %1 = vector.shape_cast %0 : vector<1x16x8x32xbf16> to vector<16x8x32xbf16>
    %2 = vector.shape_cast %1 : vector<16x8x32xbf16> to vector<128x32xbf16>
    %c0_3 = arith.constant 0 : index
    %c0_4 = arith.constant 0 : index
    %3 = vector.load %arg2[%c0_3, %c0_4] : memref<288x64xbf16, #tpu.memory_space<vmem>>, vector<32x64xbf16>
    %cst = arith.constant dense<0.000000e+00> : vector<128x64xf32>
    %4 = tpu.matmul %2, %3, %cst {dimension_numbers = #tpu.dot_dimension_numbers<[1], [0], [0], [1], [0, 0, 1, 1], [], []>} : vector<128x32xbf16>, vector<32x64xbf16>, vector<128x64xf32> -> vector<128x64xf32>
    %c0_5 = arith.constant 0 : index
    %c0_6 = arith.constant 0 : index
    %c1 = arith.constant 1 : index
    %c0_7 = arith.constant 0 : index
    %5 = vector.load %arg1[%c0_5, %c0_6, %c1, %c0_7] : memref<1x18x10x32xbf16, #tpu.memory_space<vmem>>, vector<1x16x8x32xbf16>
    %6 = vector.shape_cast %5 : vector<1x16x8x32xbf16> to vector<16x8x32xbf16>
    %7 = vector.shape_cast %6 : vector<16x8x32xbf16> to vector<128x32xbf16>
    %c32 = arith.constant 32 : index
    %c0_8 = arith.constant 0 : index
    %8 = vector.load %arg2[%c32, %c0_8] : memref<288x64xbf16, #tpu.memory_space<vmem>>, vector<32x64xbf16>
    %cst_9 = arith.constant dense<0.000000e+00> : vector<128x64xf32>
    %9 = tpu.matmul %7, %8, %cst_9 {dimension_numbers = #tpu.dot_dimension_numbers<[1], [0], [0], [1], [0, 0, 1, 1], [], []>} : vector<128x32xbf16>, vector<32x64xbf16>, vector<128x64xf32> -> vector<128x64xf32>
    %10 = arith.addf %4, %9 : vector<128x64xf32>
    %c0_10 = arith.constant 0 : index
    %c0_11 = arith.constant 0 : index
    %c2 = arith.constant 2 : index
    %c0_12 = arith.constant 0 : index
    %11 = vector.load %arg1[%c0_10, %c0_11, %c2, %c0_12] : memref<1x18x10x32xbf16, #tpu.memory_space<vmem>>, vector<1x16x8x32xbf16>
    %12 = vector.shape_cast %11 : vector<1x16x8x32xbf16> to vector<16x8x32xbf16>
    %13 = vector.shape_cast %12 : vector<16x8x32xbf16> to vector<128x32xbf16>
    %c64 = arith.constant 64 : index
    %c0_13 = arith.constant 0 : index
    %14 = vector.load %arg2[%c64, %c0_13] : memref<288x64xbf16, #tpu.memory_space<vmem>>, vector<32x64xbf16>
    %cst_14 = arith.constant dense<0.000000e+00> : vector<128x64xf32>
    %15 = tpu.matmul %13, %14, %cst_14 {dimension_numbers = #tpu.dot_dimension_numbers<[1], [0], [0], [1], [0, 0, 1, 1], [], []>} : vector<128x32xbf16>, vector<32x64xbf16>, vector<128x64xf32> -> vector<128x64xf32>
    %16 = arith.addf %10, %15 : vector<128x64xf32>
    %c0_15 = arith.constant 0 : index
    %c1_16 = arith.constant 1 : index
    %c0_17 = arith.constant 0 : index
    %c0_18 = arith.constant 0 : index
    %17 = vector.load %arg1[%c0_15, %c1_16, %c0_17, %c0_18] : memref<1x18x10x32xbf16, #tpu.memory_space<vmem>>, vector<1x16x8x32xbf16>
    %18 = vector.shape_cast %17 : vector<1x16x8x32xbf16> to vector<16x8x32xbf16>
    %19 = vector.shape_cast %18 : vector<16x8x32xbf16> to vector<128x32xbf16>
    %c96 = arith.constant 96 : index
    %c0_19 = arith.constant 0 : index
    %20 = vector.load %arg2[%c96, %c0_19] : memref<288x64xbf16, #tpu.memory_space<vmem>>, vector<32x64xbf16>
    %cst_20 = arith.constant dense<0.000000e+00> : vector<128x64xf32>
    %21 = tpu.matmul %19, %20, %cst_20 {dimension_numbers = #tpu.dot_dimension_numbers<[1], [0], [0], [1], [0, 0, 1, 1], [], []>} : vector<128x32xbf16>, vector<32x64xbf16>, vector<128x64xf32> -> vector<128x64xf32>
    %22 = arith.addf %16, %21 : vector<128x64xf32>
    %c0_21 = arith.constant 0 : index
    %c1_22 = arith.constant 1 : index
    %c1_23 = arith.constant 1 : index
    %c0_24 = arith.constant 0 : index
    %23 = vector.load %arg1[%c0_21, %c1_22, %c1_23, %c0_24] : memref<1x18x10x32xbf16, #tpu.memory_space<vmem>>, vector<1x16x8x32xbf16>
    %24 = vector.shape_cast %23 : vector<1x16x8x32xbf16> to vector<16x8x32xbf16>
    %25 = vector.shape_cast %24 : vector<16x8x32xbf16> to vector<128x32xbf16>
    %c128 = arith.constant 128 : index
    %c0_25 = arith.constant 0 : index
    %26 = vector.load %arg2[%c128, %c0_25] : memref<288x64xbf16, #tpu.memory_space<vmem>>, vector<32x64xbf16>
    %cst_26 = arith.constant dense<0.000000e+00> : vector<128x64xf32>
    %27 = tpu.matmul %25, %26, %cst_26 {dimension_numbers = #tpu.dot_dimension_numbers<[1], [0], [0], [1], [0, 0, 1, 1], [], []>} : vector<128x32xbf16>, vector<32x64xbf16>, vector<128x64xf32> -> vector<128x64xf32>
    %28 = arith.addf %22, %27 : vector<128x64xf32>
    %c0_27 = arith.constant 0 : index
    %c1_28 = arith.constant 1 : index
    %c2_29 = arith.constant 2 : index
    %c0_30 = arith.constant 0 : index
    %29 = vector.load %arg1[%c0_27, %c1_28, %c2_29, %c0_30] : memref<1x18x10x32xbf16, #tpu.memory_space<vmem>>, vector<1x16x8x32xbf16>
    %30 = vector.shape_cast %29 : vector<1x16x8x32xbf16> to vector<16x8x32xbf16>
    %31 = vector.shape_cast %30 : vector<16x8x32xbf16> to vector<128x32xbf16>
    %c160 = arith.constant 160 : index
    %c0_31 = arith.constant 0 : index
    %32 = vector.load %arg2[%c160, %c0_31] : memref<288x64xbf16, #tpu.memory_space<vmem>>, vector<32x64xbf16>
    %cst_32 = arith.constant dense<0.000000e+00> : vector<128x64xf32>
    %33 = tpu.matmul %31, %32, %cst_32 {dimension_numbers = #tpu.dot_dimension_numbers<[1], [0], [0], [1], [0, 0, 1, 1], [], []>} : vector<128x32xbf16>, vector<32x64xbf16>, vector<128x64xf32> -> vector<128x64xf32>
    %34 = arith.addf %28, %33 : vector<128x64xf32>
    %c0_33 = arith.constant 0 : index
    %c2_34 = arith.constant 2 : index
    %c0_35 = arith.constant 0 : index
    %c0_36 = arith.constant 0 : index
    %35 = vector.load %arg1[%c0_33, %c2_34, %c0_35, %c0_36] : memref<1x18x10x32xbf16, #tpu.memory_space<vmem>>, vector<1x16x8x32xbf16>
    %36 = vector.shape_cast %35 : vector<1x16x8x32xbf16> to vector<16x8x32xbf16>
    %37 = vector.shape_cast %36 : vector<16x8x32xbf16> to vector<128x32xbf16>
    %c192 = arith.constant 192 : index
    %c0_37 = arith.constant 0 : index
    %38 = vector.load %arg2[%c192, %c0_37] : memref<288x64xbf16, #tpu.memory_space<vmem>>, vector<32x64xbf16>
    %cst_38 = arith.constant dense<0.000000e+00> : vector<128x64xf32>
    %39 = tpu.matmul %37, %38, %cst_38 {dimension_numbers = #tpu.dot_dimension_numbers<[1], [0], [0], [1], [0, 0, 1, 1], [], []>} : vector<128x32xbf16>, vector<32x64xbf16>, vector<128x64xf32> -> vector<128x64xf32>
    %40 = arith.addf %34, %39 : vector<128x64xf32>
    %c0_39 = arith.constant 0 : index
    %c2_40 = arith.constant 2 : index
    %c1_41 = arith.constant 1 : index
    %c0_42 = arith.constant 0 : index
    %41 = vector.load %arg1[%c0_39, %c2_40, %c1_41, %c0_42] : memref<1x18x10x32xbf16, #tpu.memory_space<vmem>>, vector<1x16x8x32xbf16>
    %42 = vector.shape_cast %41 : vector<1x16x8x32xbf16> to vector<16x8x32xbf16>
    %43 = vector.shape_cast %42 : vector<16x8x32xbf16> to vector<128x32xbf16>
    %c224 = arith.constant 224 : index
    %c0_43 = arith.constant 0 : index
    %44 = vector.load %arg2[%c224, %c0_43] : memref<288x64xbf16, #tpu.memory_space<vmem>>, vector<32x64xbf16>
    %cst_44 = arith.constant dense<0.000000e+00> : vector<128x64xf32>
    %45 = tpu.matmul %43, %44, %cst_44 {dimension_numbers = #tpu.dot_dimension_numbers<[1], [0], [0], [1], [0, 0, 1, 1], [], []>} : vector<128x32xbf16>, vector<32x64xbf16>, vector<128x64xf32> -> vector<128x64xf32>
    %46 = arith.addf %40, %45 : vector<128x64xf32>
    %c0_45 = arith.constant 0 : index
    %c2_46 = arith.constant 2 : index
    %c2_47 = arith.constant 2 : index
    %c0_48 = arith.constant 0 : index
    %47 = vector.load %arg1[%c0_45, %c2_46, %c2_47, %c0_48] : memref<1x18x10x32xbf16, #tpu.memory_space<vmem>>, vector<1x16x8x32xbf16>
    %48 = vector.shape_cast %47 : vector<1x16x8x32xbf16> to vector<16x8x32xbf16>
    %49 = vector.shape_cast %48 : vector<16x8x32xbf16> to vector<128x32xbf16>
    %c256 = arith.constant 256 : index
    %c0_49 = arith.constant 0 : index
    %50 = vector.load %arg2[%c256, %c0_49] : memref<288x64xbf16, #tpu.memory_space<vmem>>, vector<32x64xbf16>
    %cst_50 = arith.constant dense<0.000000e+00> : vector<128x64xf32>
    %51 = tpu.matmul %49, %50, %cst_50 {dimension_numbers = #tpu.dot_dimension_numbers<[1], [0], [0], [1], [0, 0, 1, 1], [], []>} : vector<128x32xbf16>, vector<32x64xbf16>, vector<128x64xf32> -> vector<128x64xf32>
    %52 = arith.addf %46, %51 : vector<128x64xf32>
    %c0_51 = arith.constant 0 : index
    %c0_52 = arith.constant 0 : index
    %53 = vector.load %arg3[%c0_51, %c0_52] : memref<1x64xf32, #tpu.memory_space<vmem>>, vector<1x64xf32>
    %54 = vector.broadcast %53 : vector<1x64xf32> to vector<128x64xf32>
    %55 = arith.addf %52, %54 : vector<128x64xf32>
    %cst_53 = arith.constant 0.000000e+00 : f32
    %56 = vector.broadcast %cst_53 : f32 to vector<128x64xf32>
    %57 = arith.maximumf %55, %56 : vector<128x64xf32>
    %58 = vector.shape_cast %57 : vector<128x64xf32> to vector<8x2x8x64xf32>
    %59 = vector.extract_strided_slice %58 {offsets = [0, 0, 0, 0], sizes = [8, 1, 8, 64], strides = [1, 1, 1, 1]} : vector<8x2x8x64xf32> to vector<8x1x8x64xf32>
    %60 = vector.shape_cast %59 : vector<8x1x8x64xf32> to vector<8x8x64xf32>
    %61 = vector.extract_strided_slice %58 {offsets = [0, 1, 0, 0], sizes = [8, 1, 8, 64], strides = [1, 1, 1, 1]} : vector<8x2x8x64xf32> to vector<8x1x8x64xf32>
    %62 = vector.shape_cast %61 : vector<8x1x8x64xf32> to vector<8x8x64xf32>
    %63 = arith.addf %60, %62 : vector<8x8x64xf32>
    %cst_54 = arith.constant 5.000000e-01 : f32
    %64 = vector.broadcast %cst_54 : f32 to vector<8x8x64xf32>
    %65 = arith.mulf %63, %64 : vector<8x8x64xf32>
    %66 = arith.truncf %65 : vector<8x8x64xf32> to vector<8x8x64xbf16>
    %c0_55 = arith.constant 0 : index
    %c0_56 = arith.constant 0 : index
    %c0_57 = arith.constant 0 : index
    %c0_58 = arith.constant 0 : index
    %67 = vector.load %arg4[%c0_55, %c0_56, %c0_57, %c0_58] : memref<1x8x8x64xbf16, #tpu.memory_space<vmem>>, vector<1x8x8x64xbf16>
    %68 = vector.shape_cast %67 : vector<1x8x8x64xbf16> to vector<8x8x64xbf16>
    %69 = vector.shape_cast %66 : vector<8x8x64xbf16> to vector<1x8x8x64xbf16>
    tpu.vector_store %arg4[%c0_55, %c0_56, %c0_57, %c0_58], %69 {strides = array<i32>} : memref<1x8x8x64xbf16, #tpu.memory_space<vmem>>, vector<1x8x8x64xbf16>,
    return
  }
  func.func @transform_0(%arg0: i32) -> (i32, i32, i32, i32) {
    %c0_i32 = arith.constant 0 : i32
    %c0_i32_0 = arith.constant 0 : i32
    %c0_i32_1 = arith.constant 0 : i32
    %c0_i32_2 = arith.constant 0 : i32
    return %arg0, %c0_i32, %c0_i32_0, %c0_i32_1 : i32, i32, i32, i32
  }
  func.func @transform_1(%arg0: i32) -> (i32, i32) {
    %c0_i32 = arith.constant 0 : i32
    %c0_i32_0 = arith.constant 0 : i32
    %c0_i32_1 = arith.constant 0 : i32
    return %c0_i32, %c0_i32_0 : i32, i32
  }
  func.func @transform_2(%arg0: i32) -> (i32, i32) {
    %c0_i32 = arith.constant 0 : i32
    %c0_i32_0 = arith.constant 0 : i32
    %c0_i32_1 = arith.constant 0 : i32
    return %c0_i32, %c0_i32_0 : i32, i32
  }
  func.func @transform_3(%arg0: i32) -> (i32, i32, i32, i32) {
    %c0_i32 = arith.constant 0 : i32
    %c0_i32_0 = arith.constant 0 : i32
    %c0_i32_1 = arith.constant 0 : i32
    %c0_i32_2 = arith.constant 0 : i32
    return %arg0, %c0_i32, %c0_i32_0, %c0_i32_1 : i32, i32, i32, i32
  }
}

module attributes {stable_mosaic.version = 11 : i64} {
  func.func @_conv_kernel(%arg0: i32, %arg1: memref<1x10x10x64xbf16, #tpu.memory_space<vmem>>, %arg2: memref<576x128xbf16, #tpu.memory_space<vmem>>, %arg3: memref<1x128xf32, #tpu.memory_space<vmem>>, %arg4: memref<1x4x8x128xbf16, #tpu.memory_space<vmem>>) attributes {dimension_semantics = [#tpu.dimension_semantics<parallel>], iteration_bounds = array<i64: 2>, scalar_prefetch = 0 : i64, scratch_operands = 0 : i64, tpu.core_type = #tpu.core_type<tc>, window_params = [{transform_indices = @transform_0, window_bounds = array<i64: 1, 10, 10, 64>}, {pipeline_mode = #tpu.pipeline_mode<synchronous>, transform_indices = @transform_1, window_bounds = array<i64: 576, 128>}, {pipeline_mode = #tpu.pipeline_mode<synchronous>, transform_indices = @transform_2, window_bounds = array<i64: 1, 128>}, {transform_indices = @transform_3, window_bounds = array<i64: 1, 4, 8, 128>}]} {
    %c0 = arith.constant 0 : index
    %c0_0 = arith.constant 0 : index
    %c0_1 = arith.constant 0 : index
    %c0_2 = arith.constant 0 : index
    %0 = vector.load %arg1[%c0, %c0_0, %c0_1, %c0_2] : memref<1x10x10x64xbf16, #tpu.memory_space<vmem>>, vector<1x8x8x64xbf16>
    %1 = vector.shape_cast %0 : vector<1x8x8x64xbf16> to vector<8x8x64xbf16>
    %2 = vector.shape_cast %1 : vector<8x8x64xbf16> to vector<64x64xbf16>
    %c0_3 = arith.constant 0 : index
    %c0_4 = arith.constant 0 : index
    %3 = vector.load %arg2[%c0_3, %c0_4] : memref<576x128xbf16, #tpu.memory_space<vmem>>, vector<64x128xbf16>
    %cst = arith.constant dense<0.000000e+00> : vector<64x128xf32>
    %4 = tpu.matmul %2, %3, %cst {dimension_numbers = #tpu.dot_dimension_numbers<[1], [0], [0], [1], [0, 0, 1, 1], [], []>} : vector<64x64xbf16>, vector<64x128xbf16>, vector<64x128xf32> -> vector<64x128xf32>
    %c0_5 = arith.constant 0 : index
    %c0_6 = arith.constant 0 : index
    %c1 = arith.constant 1 : index
    %c0_7 = arith.constant 0 : index
    %5 = vector.load %arg1[%c0_5, %c0_6, %c1, %c0_7] : memref<1x10x10x64xbf16, #tpu.memory_space<vmem>>, vector<1x8x8x64xbf16>
    %6 = vector.shape_cast %5 : vector<1x8x8x64xbf16> to vector<8x8x64xbf16>
    %7 = vector.shape_cast %6 : vector<8x8x64xbf16> to vector<64x64xbf16>
    %c64 = arith.constant 64 : index
    %c0_8 = arith.constant 0 : index
    %8 = vector.load %arg2[%c64, %c0_8] : memref<576x128xbf16, #tpu.memory_space<vmem>>, vector<64x128xbf16>
    %cst_9 = arith.constant dense<0.000000e+00> : vector<64x128xf32>
    %9 = tpu.matmul %7, %8, %cst_9 {dimension_numbers = #tpu.dot_dimension_numbers<[1], [0], [0], [1], [0, 0, 1, 1], [], []>} : vector<64x64xbf16>, vector<64x128xbf16>, vector<64x128xf32> -> vector<64x128xf32>
    %10 = arith.addf %4, %9 : vector<64x128xf32>
    %c0_10 = arith.constant 0 : index
    %c0_11 = arith.constant 0 : index
    %c2 = arith.constant 2 : index
    %c0_12 = arith.constant 0 : index
    %11 = vector.load %arg1[%c0_10, %c0_11, %c2, %c0_12] : memref<1x10x10x64xbf16, #tpu.memory_space<vmem>>, vector<1x8x8x64xbf16>
    %12 = vector.shape_cast %11 : vector<1x8x8x64xbf16> to vector<8x8x64xbf16>
    %13 = vector.shape_cast %12 : vector<8x8x64xbf16> to vector<64x64xbf16>
    %c128 = arith.constant 128 : index
    %c0_13 = arith.constant 0 : index
    %14 = vector.load %arg2[%c128, %c0_13] : memref<576x128xbf16, #tpu.memory_space<vmem>>, vector<64x128xbf16>
    %cst_14 = arith.constant dense<0.000000e+00> : vector<64x128xf32>
    %15 = tpu.matmul %13, %14, %cst_14 {dimension_numbers = #tpu.dot_dimension_numbers<[1], [0], [0], [1], [0, 0, 1, 1], [], []>} : vector<64x64xbf16>, vector<64x128xbf16>, vector<64x128xf32> -> vector<64x128xf32>
    %16 = arith.addf %10, %15 : vector<64x128xf32>
    %c0_15 = arith.constant 0 : index
    %c1_16 = arith.constant 1 : index
    %c0_17 = arith.constant 0 : index
    %c0_18 = arith.constant 0 : index
    %17 = vector.load %arg1[%c0_15, %c1_16, %c0_17, %c0_18] : memref<1x10x10x64xbf16, #tpu.memory_space<vmem>>, vector<1x8x8x64xbf16>
    %18 = vector.shape_cast %17 : vector<1x8x8x64xbf16> to vector<8x8x64xbf16>
    %19 = vector.shape_cast %18 : vector<8x8x64xbf16> to vector<64x64xbf16>
    %c192 = arith.constant 192 : index
    %c0_19 = arith.constant 0 : index
    %20 = vector.load %arg2[%c192, %c0_19] : memref<576x128xbf16, #tpu.memory_space<vmem>>, vector<64x128xbf16>
    %cst_20 = arith.constant dense<0.000000e+00> : vector<64x128xf32>
    %21 = tpu.matmul %19, %20, %cst_20 {dimension_numbers = #tpu.dot_dimension_numbers<[1], [0], [0], [1], [0, 0, 1, 1], [], []>} : vector<64x64xbf16>, vector<64x128xbf16>, vector<64x128xf32> -> vector<64x128xf32>
    %22 = arith.addf %16, %21 : vector<64x128xf32>
    %c0_21 = arith.constant 0 : index
    %c1_22 = arith.constant 1 : index
    %c1_23 = arith.constant 1 : index
    %c0_24 = arith.constant 0 : index
    %23 = vector.load %arg1[%c0_21, %c1_22, %c1_23, %c0_24] : memref<1x10x10x64xbf16, #tpu.memory_space<vmem>>, vector<1x8x8x64xbf16>
    %24 = vector.shape_cast %23 : vector<1x8x8x64xbf16> to vector<8x8x64xbf16>
    %25 = vector.shape_cast %24 : vector<8x8x64xbf16> to vector<64x64xbf16>
    %c256 = arith.constant 256 : index
    %c0_25 = arith.constant 0 : index
    %26 = vector.load %arg2[%c256, %c0_25] : memref<576x128xbf16, #tpu.memory_space<vmem>>, vector<64x128xbf16>
    %cst_26 = arith.constant dense<0.000000e+00> : vector<64x128xf32>
    %27 = tpu.matmul %25, %26, %cst_26 {dimension_numbers = #tpu.dot_dimension_numbers<[1], [0], [0], [1], [0, 0, 1, 1], [], []>} : vector<64x64xbf16>, vector<64x128xbf16>, vector<64x128xf32> -> vector<64x128xf32>
    %28 = arith.addf %22, %27 : vector<64x128xf32>
    %c0_27 = arith.constant 0 : index
    %c1_28 = arith.constant 1 : index
    %c2_29 = arith.constant 2 : index
    %c0_30 = arith.constant 0 : index
    %29 = vector.load %arg1[%c0_27, %c1_28, %c2_29, %c0_30] : memref<1x10x10x64xbf16, #tpu.memory_space<vmem>>, vector<1x8x8x64xbf16>
    %30 = vector.shape_cast %29 : vector<1x8x8x64xbf16> to vector<8x8x64xbf16>
    %31 = vector.shape_cast %30 : vector<8x8x64xbf16> to vector<64x64xbf16>
    %c320 = arith.constant 320 : index
    %c0_31 = arith.constant 0 : index
    %32 = vector.load %arg2[%c320, %c0_31] : memref<576x128xbf16, #tpu.memory_space<vmem>>, vector<64x128xbf16>
    %cst_32 = arith.constant dense<0.000000e+00> : vector<64x128xf32>
    %33 = tpu.matmul %31, %32, %cst_32 {dimension_numbers = #tpu.dot_dimension_numbers<[1], [0], [0], [1], [0, 0, 1, 1], [], []>} : vector<64x64xbf16>, vector<64x128xbf16>, vector<64x128xf32> -> vector<64x128xf32>
    %34 = arith.addf %28, %33 : vector<64x128xf32>
    %c0_33 = arith.constant 0 : index
    %c2_34 = arith.constant 2 : index
    %c0_35 = arith.constant 0 : index
    %c0_36 = arith.constant 0 : index
    %35 = vector.load %arg1[%c0_33, %c2_34, %c0_35, %c0_36] : memref<1x10x10x64xbf16, #tpu.memory_space<vmem>>, vector<1x8x8x64xbf16>
    %36 = vector.shape_cast %35 : vector<1x8x8x64xbf16> to vector<8x8x64xbf16>
    %37 = vector.shape_cast %36 : vector<8x8x64xbf16> to vector<64x64xbf16>
    %c384 = arith.constant 384 : index
    %c0_37 = arith.constant 0 : index
    %38 = vector.load %arg2[%c384, %c0_37] : memref<576x128xbf16, #tpu.memory_space<vmem>>, vector<64x128xbf16>
    %cst_38 = arith.constant dense<0.000000e+00> : vector<64x128xf32>
    %39 = tpu.matmul %37, %38, %cst_38 {dimension_numbers = #tpu.dot_dimension_numbers<[1], [0], [0], [1], [0, 0, 1, 1], [], []>} : vector<64x64xbf16>, vector<64x128xbf16>, vector<64x128xf32> -> vector<64x128xf32>
    %40 = arith.addf %34, %39 : vector<64x128xf32>
    %c0_39 = arith.constant 0 : index
    %c2_40 = arith.constant 2 : index
    %c1_41 = arith.constant 1 : index
    %c0_42 = arith.constant 0 : index
    %41 = vector.load %arg1[%c0_39, %c2_40, %c1_41, %c0_42] : memref<1x10x10x64xbf16, #tpu.memory_space<vmem>>, vector<1x8x8x64xbf16>
    %42 = vector.shape_cast %41 : vector<1x8x8x64xbf16> to vector<8x8x64xbf16>
    %43 = vector.shape_cast %42 : vector<8x8x64xbf16> to vector<64x64xbf16>
    %c448 = arith.constant 448 : index
    %c0_43 = arith.constant 0 : index
    %44 = vector.load %arg2[%c448, %c0_43] : memref<576x128xbf16, #tpu.memory_space<vmem>>, vector<64x128xbf16>
    %cst_44 = arith.constant dense<0.000000e+00> : vector<64x128xf32>
    %45 = tpu.matmul %43, %44, %cst_44 {dimension_numbers = #tpu.dot_dimension_numbers<[1], [0], [0], [1], [0, 0, 1, 1], [], []>} : vector<64x64xbf16>, vector<64x128xbf16>, vector<64x128xf32> -> vector<64x128xf32>
    %46 = arith.addf %40, %45 : vector<64x128xf32>
    %c0_45 = arith.constant 0 : index
    %c2_46 = arith.constant 2 : index
    %c2_47 = arith.constant 2 : index
    %c0_48 = arith.constant 0 : index
    %47 = vector.load %arg1[%c0_45, %c2_46, %c2_47, %c0_48] : memref<1x10x10x64xbf16, #tpu.memory_space<vmem>>, vector<1x8x8x64xbf16>
    %48 = vector.shape_cast %47 : vector<1x8x8x64xbf16> to vector<8x8x64xbf16>
    %49 = vector.shape_cast %48 : vector<8x8x64xbf16> to vector<64x64xbf16>
    %c512 = arith.constant 512 : index
    %c0_49 = arith.constant 0 : index
    %50 = vector.load %arg2[%c512, %c0_49] : memref<576x128xbf16, #tpu.memory_space<vmem>>, vector<64x128xbf16>
    %cst_50 = arith.constant dense<0.000000e+00> : vector<64x128xf32>
    %51 = tpu.matmul %49, %50, %cst_50 {dimension_numbers = #tpu.dot_dimension_numbers<[1], [0], [0], [1], [0, 0, 1, 1], [], []>} : vector<64x64xbf16>, vector<64x128xbf16>, vector<64x128xf32> -> vector<64x128xf32>
    %52 = arith.addf %46, %51 : vector<64x128xf32>
    %c0_51 = arith.constant 0 : index
    %c0_52 = arith.constant 0 : index
    %53 = vector.load %arg3[%c0_51, %c0_52] : memref<1x128xf32, #tpu.memory_space<vmem>>, vector<1x128xf32>
    %54 = vector.broadcast %53 : vector<1x128xf32> to vector<64x128xf32>
    %55 = arith.addf %52, %54 : vector<64x128xf32>
    %cst_53 = arith.constant 0.000000e+00 : f32
    %56 = vector.broadcast %cst_53 : f32 to vector<64x128xf32>
    %57 = arith.maximumf %55, %56 : vector<64x128xf32>
    %58 = vector.shape_cast %57 : vector<64x128xf32> to vector<4x2x8x128xf32>
    %59 = vector.extract_strided_slice %58 {offsets = [0, 0, 0, 0], sizes = [4, 1, 8, 128], strides = [1, 1, 1, 1]} : vector<4x2x8x128xf32> to vector<4x1x8x128xf32>
    %60 = vector.shape_cast %59 : vector<4x1x8x128xf32> to vector<4x8x128xf32>
    %61 = vector.extract_strided_slice %58 {offsets = [0, 1, 0, 0], sizes = [4, 1, 8, 128], strides = [1, 1, 1, 1]} : vector<4x2x8x128xf32> to vector<4x1x8x128xf32>
    %62 = vector.shape_cast %61 : vector<4x1x8x128xf32> to vector<4x8x128xf32>
    %63 = arith.addf %60, %62 : vector<4x8x128xf32>
    %cst_54 = arith.constant 5.000000e-01 : f32
    %64 = vector.broadcast %cst_54 : f32 to vector<4x8x128xf32>
    %65 = arith.mulf %63, %64 : vector<4x8x128xf32>
    %66 = arith.truncf %65 : vector<4x8x128xf32> to vector<4x8x128xbf16>
    %c0_55 = arith.constant 0 : index
    %c0_56 = arith.constant 0 : index
    %c0_57 = arith.constant 0 : index
    %c0_58 = arith.constant 0 : index
    %67 = vector.load %arg4[%c0_55, %c0_56, %c0_57, %c0_58] : memref<1x4x8x128xbf16, #tpu.memory_space<vmem>>, vector<1x4x8x128xbf16>
    %68 = vector.shape_cast %67 : vector<1x4x8x128xbf16> to vector<4x8x128xbf16>
    %69 = vector.shape_cast %66 : vector<4x8x128xbf16> to vector<1x4x8x128xbf16>
    tpu.vector_store %arg4[%c0_55, %c0_56, %c0_57, %c0_58], %69 {strides = array<i32>} : memref<1x4x8x128xbf16, #tpu.memory_space<vmem>>, vector<1x4x8x128xbf16>,
    return
  }
  func.func @transform_0(%arg0: i32) -> (i32, i32, i32, i32) {
    %c0_i32 = arith.constant 0 : i32
    %c0_i32_0 = arith.constant 0 : i32
    %c0_i32_1 = arith.constant 0 : i32
    %c0_i32_2 = arith.constant 0 : i32
    return %arg0, %c0_i32, %c0_i32_0, %c0_i32_1 : i32, i32, i32, i32
  }
  func.func @transform_1(%arg0: i32) -> (i32, i32) {
    %c0_i32 = arith.constant 0 : i32
    %c0_i32_0 = arith.constant 0 : i32
    %c0_i32_1 = arith.constant 0 : i32
    return %c0_i32, %c0_i32_0 : i32, i32
  }
  func.func @transform_2(%arg0: i32) -> (i32, i32) {
    %c0_i32 = arith.constant 0 : i32
    %c0_i32_0 = arith.constant 0 : i32
    %c0_i32_1 = arith.constant 0 : i32
    return %c0_i32, %c0_i32_0 : i32, i32
  }
  func.func @transform_3(%arg0: i32) -> (i32, i32, i32, i32) {
    %c0_i32 = arith.constant 0 : i32
    %c0_i32_0 = arith.constant 0 : i32
    %c0_i32_1 = arith.constant 0 : i32
    %c0_i32_2 = arith.constant 0 : i32
    return %arg0, %c0_i32, %c0_i32_0, %c0_i32_1 : i32, i32, i32, i32
  }
}

module attributes {stable_mosaic.version = 11 : i64} {
  func.func @_conv_kernel(%arg0: i32, %arg1: memref<1x6x10x128xbf16, #tpu.memory_space<vmem>>, %arg2: memref<1152x128xbf16, #tpu.memory_space<vmem>>, %arg3: memref<1x128xf32, #tpu.memory_space<vmem>>, %arg4: memref<1x2x8x128xbf16, #tpu.memory_space<vmem>>) attributes {dimension_semantics = [#tpu.dimension_semantics<parallel>], iteration_bounds = array<i64: 2>, scalar_prefetch = 0 : i64, scratch_operands = 0 : i64, tpu.core_type = #tpu.core_type<tc>, window_params = [{transform_indices = @transform_0, window_bounds = array<i64: 1, 6, 10, 128>}, {pipeline_mode = #tpu.pipeline_mode<synchronous>, transform_indices = @transform_1, window_bounds = array<i64: 1152, 128>}, {pipeline_mode = #tpu.pipeline_mode<synchronous>, transform_indices = @transform_2, window_bounds = array<i64: 1, 128>}, {transform_indices = @transform_3, window_bounds = array<i64: 1, 2, 8, 128>}]} {
    %c0 = arith.constant 0 : index
    %c0_0 = arith.constant 0 : index
    %c0_1 = arith.constant 0 : index
    %c0_2 = arith.constant 0 : index
    %0 = vector.load %arg1[%c0, %c0_0, %c0_1, %c0_2] : memref<1x6x10x128xbf16, #tpu.memory_space<vmem>>, vector<1x4x8x128xbf16>
    %1 = vector.shape_cast %0 : vector<1x4x8x128xbf16> to vector<4x8x128xbf16>
    %2 = vector.shape_cast %1 : vector<4x8x128xbf16> to vector<32x128xbf16>
    %c0_3 = arith.constant 0 : index
    %c0_4 = arith.constant 0 : index
    %3 = vector.load %arg2[%c0_3, %c0_4] : memref<1152x128xbf16, #tpu.memory_space<vmem>>, vector<128x128xbf16>
    %cst = arith.constant dense<0.000000e+00> : vector<32x128xf32>
    %4 = tpu.matmul %2, %3, %cst {dimension_numbers = #tpu.dot_dimension_numbers<[1], [0], [0], [1], [0, 0, 1, 1], [], []>} : vector<32x128xbf16>, vector<128x128xbf16>, vector<32x128xf32> -> vector<32x128xf32>
    %c0_5 = arith.constant 0 : index
    %c0_6 = arith.constant 0 : index
    %c1 = arith.constant 1 : index
    %c0_7 = arith.constant 0 : index
    %5 = vector.load %arg1[%c0_5, %c0_6, %c1, %c0_7] : memref<1x6x10x128xbf16, #tpu.memory_space<vmem>>, vector<1x4x8x128xbf16>
    %6 = vector.shape_cast %5 : vector<1x4x8x128xbf16> to vector<4x8x128xbf16>
    %7 = vector.shape_cast %6 : vector<4x8x128xbf16> to vector<32x128xbf16>
    %c128 = arith.constant 128 : index
    %c0_8 = arith.constant 0 : index
    %8 = vector.load %arg2[%c128, %c0_8] : memref<1152x128xbf16, #tpu.memory_space<vmem>>, vector<128x128xbf16>
    %cst_9 = arith.constant dense<0.000000e+00> : vector<32x128xf32>
    %9 = tpu.matmul %7, %8, %cst_9 {dimension_numbers = #tpu.dot_dimension_numbers<[1], [0], [0], [1], [0, 0, 1, 1], [], []>} : vector<32x128xbf16>, vector<128x128xbf16>, vector<32x128xf32> -> vector<32x128xf32>
    %10 = arith.addf %4, %9 : vector<32x128xf32>
    %c0_10 = arith.constant 0 : index
    %c0_11 = arith.constant 0 : index
    %c2 = arith.constant 2 : index
    %c0_12 = arith.constant 0 : index
    %11 = vector.load %arg1[%c0_10, %c0_11, %c2, %c0_12] : memref<1x6x10x128xbf16, #tpu.memory_space<vmem>>, vector<1x4x8x128xbf16>
    %12 = vector.shape_cast %11 : vector<1x4x8x128xbf16> to vector<4x8x128xbf16>
    %13 = vector.shape_cast %12 : vector<4x8x128xbf16> to vector<32x128xbf16>
    %c256 = arith.constant 256 : index
    %c0_13 = arith.constant 0 : index
    %14 = vector.load %arg2[%c256, %c0_13] : memref<1152x128xbf16, #tpu.memory_space<vmem>>, vector<128x128xbf16>
    %cst_14 = arith.constant dense<0.000000e+00> : vector<32x128xf32>
    %15 = tpu.matmul %13, %14, %cst_14 {dimension_numbers = #tpu.dot_dimension_numbers<[1], [0], [0], [1], [0, 0, 1, 1], [], []>} : vector<32x128xbf16>, vector<128x128xbf16>, vector<32x128xf32> -> vector<32x128xf32>
    %16 = arith.addf %10, %15 : vector<32x128xf32>
    %c0_15 = arith.constant 0 : index
    %c1_16 = arith.constant 1 : index
    %c0_17 = arith.constant 0 : index
    %c0_18 = arith.constant 0 : index
    %17 = vector.load %arg1[%c0_15, %c1_16, %c0_17, %c0_18] : memref<1x6x10x128xbf16, #tpu.memory_space<vmem>>, vector<1x4x8x128xbf16>
    %18 = vector.shape_cast %17 : vector<1x4x8x128xbf16> to vector<4x8x128xbf16>
    %19 = vector.shape_cast %18 : vector<4x8x128xbf16> to vector<32x128xbf16>
    %c384 = arith.constant 384 : index
    %c0_19 = arith.constant 0 : index
    %20 = vector.load %arg2[%c384, %c0_19] : memref<1152x128xbf16, #tpu.memory_space<vmem>>, vector<128x128xbf16>
    %cst_20 = arith.constant dense<0.000000e+00> : vector<32x128xf32>
    %21 = tpu.matmul %19, %20, %cst_20 {dimension_numbers = #tpu.dot_dimension_numbers<[1], [0], [0], [1], [0, 0, 1, 1], [], []>} : vector<32x128xbf16>, vector<128x128xbf16>, vector<32x128xf32> -> vector<32x128xf32>
    %22 = arith.addf %16, %21 : vector<32x128xf32>
    %c0_21 = arith.constant 0 : index
    %c1_22 = arith.constant 1 : index
    %c1_23 = arith.constant 1 : index
    %c0_24 = arith.constant 0 : index
    %23 = vector.load %arg1[%c0_21, %c1_22, %c1_23, %c0_24] : memref<1x6x10x128xbf16, #tpu.memory_space<vmem>>, vector<1x4x8x128xbf16>
    %24 = vector.shape_cast %23 : vector<1x4x8x128xbf16> to vector<4x8x128xbf16>
    %25 = vector.shape_cast %24 : vector<4x8x128xbf16> to vector<32x128xbf16>
    %c512 = arith.constant 512 : index
    %c0_25 = arith.constant 0 : index
    %26 = vector.load %arg2[%c512, %c0_25] : memref<1152x128xbf16, #tpu.memory_space<vmem>>, vector<128x128xbf16>
    %cst_26 = arith.constant dense<0.000000e+00> : vector<32x128xf32>
    %27 = tpu.matmul %25, %26, %cst_26 {dimension_numbers = #tpu.dot_dimension_numbers<[1], [0], [0], [1], [0, 0, 1, 1], [], []>} : vector<32x128xbf16>, vector<128x128xbf16>, vector<32x128xf32> -> vector<32x128xf32>
    %28 = arith.addf %22, %27 : vector<32x128xf32>
    %c0_27 = arith.constant 0 : index
    %c1_28 = arith.constant 1 : index
    %c2_29 = arith.constant 2 : index
    %c0_30 = arith.constant 0 : index
    %29 = vector.load %arg1[%c0_27, %c1_28, %c2_29, %c0_30] : memref<1x6x10x128xbf16, #tpu.memory_space<vmem>>, vector<1x4x8x128xbf16>
    %30 = vector.shape_cast %29 : vector<1x4x8x128xbf16> to vector<4x8x128xbf16>
    %31 = vector.shape_cast %30 : vector<4x8x128xbf16> to vector<32x128xbf16>
    %c640 = arith.constant 640 : index
    %c0_31 = arith.constant 0 : index
    %32 = vector.load %arg2[%c640, %c0_31] : memref<1152x128xbf16, #tpu.memory_space<vmem>>, vector<128x128xbf16>
    %cst_32 = arith.constant dense<0.000000e+00> : vector<32x128xf32>
    %33 = tpu.matmul %31, %32, %cst_32 {dimension_numbers = #tpu.dot_dimension_numbers<[1], [0], [0], [1], [0, 0, 1, 1], [], []>} : vector<32x128xbf16>, vector<128x128xbf16>, vector<32x128xf32> -> vector<32x128xf32>
    %34 = arith.addf %28, %33 : vector<32x128xf32>
    %c0_33 = arith.constant 0 : index
    %c2_34 = arith.constant 2 : index
    %c0_35 = arith.constant 0 : index
    %c0_36 = arith.constant 0 : index
    %35 = vector.load %arg1[%c0_33, %c2_34, %c0_35, %c0_36] : memref<1x6x10x128xbf16, #tpu.memory_space<vmem>>, vector<1x4x8x128xbf16>
    %36 = vector.shape_cast %35 : vector<1x4x8x128xbf16> to vector<4x8x128xbf16>
    %37 = vector.shape_cast %36 : vector<4x8x128xbf16> to vector<32x128xbf16>
    %c768 = arith.constant 768 : index
    %c0_37 = arith.constant 0 : index
    %38 = vector.load %arg2[%c768, %c0_37] : memref<1152x128xbf16, #tpu.memory_space<vmem>>, vector<128x128xbf16>
    %cst_38 = arith.constant dense<0.000000e+00> : vector<32x128xf32>
    %39 = tpu.matmul %37, %38, %cst_38 {dimension_numbers = #tpu.dot_dimension_numbers<[1], [0], [0], [1], [0, 0, 1, 1], [], []>} : vector<32x128xbf16>, vector<128x128xbf16>, vector<32x128xf32> -> vector<32x128xf32>
    %40 = arith.addf %34, %39 : vector<32x128xf32>
    %c0_39 = arith.constant 0 : index
    %c2_40 = arith.constant 2 : index
    %c1_41 = arith.constant 1 : index
    %c0_42 = arith.constant 0 : index
    %41 = vector.load %arg1[%c0_39, %c2_40, %c1_41, %c0_42] : memref<1x6x10x128xbf16, #tpu.memory_space<vmem>>, vector<1x4x8x128xbf16>
    %42 = vector.shape_cast %41 : vector<1x4x8x128xbf16> to vector<4x8x128xbf16>
    %43 = vector.shape_cast %42 : vector<4x8x128xbf16> to vector<32x128xbf16>
    %c896 = arith.constant 896 : index
    %c0_43 = arith.constant 0 : index
    %44 = vector.load %arg2[%c896, %c0_43] : memref<1152x128xbf16, #tpu.memory_space<vmem>>, vector<128x128xbf16>
    %cst_44 = arith.constant dense<0.000000e+00> : vector<32x128xf32>
    %45 = tpu.matmul %43, %44, %cst_44 {dimension_numbers = #tpu.dot_dimension_numbers<[1], [0], [0], [1], [0, 0, 1, 1], [], []>} : vector<32x128xbf16>, vector<128x128xbf16>, vector<32x128xf32> -> vector<32x128xf32>
    %46 = arith.addf %40, %45 : vector<32x128xf32>
    %c0_45 = arith.constant 0 : index
    %c2_46 = arith.constant 2 : index
    %c2_47 = arith.constant 2 : index
    %c0_48 = arith.constant 0 : index
    %47 = vector.load %arg1[%c0_45, %c2_46, %c2_47, %c0_48] : memref<1x6x10x128xbf16, #tpu.memory_space<vmem>>, vector<1x4x8x128xbf16>
    %48 = vector.shape_cast %47 : vector<1x4x8x128xbf16> to vector<4x8x128xbf16>
    %49 = vector.shape_cast %48 : vector<4x8x128xbf16> to vector<32x128xbf16>
    %c1024 = arith.constant 1024 : index
    %c0_49 = arith.constant 0 : index
    %50 = vector.load %arg2[%c1024, %c0_49] : memref<1152x128xbf16, #tpu.memory_space<vmem>>, vector<128x128xbf16>
    %cst_50 = arith.constant dense<0.000000e+00> : vector<32x128xf32>
    %51 = tpu.matmul %49, %50, %cst_50 {dimension_numbers = #tpu.dot_dimension_numbers<[1], [0], [0], [1], [0, 0, 1, 1], [], []>} : vector<32x128xbf16>, vector<128x128xbf16>, vector<32x128xf32> -> vector<32x128xf32>
    %52 = arith.addf %46, %51 : vector<32x128xf32>
    %c0_51 = arith.constant 0 : index
    %c0_52 = arith.constant 0 : index
    %53 = vector.load %arg3[%c0_51, %c0_52] : memref<1x128xf32, #tpu.memory_space<vmem>>, vector<1x128xf32>
    %54 = vector.broadcast %53 : vector<1x128xf32> to vector<32x128xf32>
    %55 = arith.addf %52, %54 : vector<32x128xf32>
    %cst_53 = arith.constant 0.000000e+00 : f32
    %56 = vector.broadcast %cst_53 : f32 to vector<32x128xf32>
    %57 = arith.maximumf %55, %56 : vector<32x128xf32>
    %58 = vector.shape_cast %57 : vector<32x128xf32> to vector<2x2x8x128xf32>
    %59 = vector.extract_strided_slice %58 {offsets = [0, 0, 0, 0], sizes = [2, 1, 8, 128], strides = [1, 1, 1, 1]} : vector<2x2x8x128xf32> to vector<2x1x8x128xf32>
    %60 = vector.shape_cast %59 : vector<2x1x8x128xf32> to vector<2x8x128xf32>
    %61 = vector.extract_strided_slice %58 {offsets = [0, 1, 0, 0], sizes = [2, 1, 8, 128], strides = [1, 1, 1, 1]} : vector<2x2x8x128xf32> to vector<2x1x8x128xf32>
    %62 = vector.shape_cast %61 : vector<2x1x8x128xf32> to vector<2x8x128xf32>
    %63 = arith.addf %60, %62 : vector<2x8x128xf32>
    %cst_54 = arith.constant 5.000000e-01 : f32
    %64 = vector.broadcast %cst_54 : f32 to vector<2x8x128xf32>
    %65 = arith.mulf %63, %64 : vector<2x8x128xf32>
    %66 = arith.truncf %65 : vector<2x8x128xf32> to vector<2x8x128xbf16>
    %c0_55 = arith.constant 0 : index
    %c0_56 = arith.constant 0 : index
    %c0_57 = arith.constant 0 : index
    %c0_58 = arith.constant 0 : index
    %67 = vector.load %arg4[%c0_55, %c0_56, %c0_57, %c0_58] : memref<1x2x8x128xbf16, #tpu.memory_space<vmem>>, vector<1x2x8x128xbf16>
    %68 = vector.shape_cast %67 : vector<1x2x8x128xbf16> to vector<2x8x128xbf16>
    %69 = vector.shape_cast %66 : vector<2x8x128xbf16> to vector<1x2x8x128xbf16>
    tpu.vector_store %arg4[%c0_55, %c0_56, %c0_57, %c0_58], %69 {strides = array<i32>} : memref<1x2x8x128xbf16, #tpu.memory_space<vmem>>, vector<1x2x8x128xbf16>,
    return
  }
  func.func @transform_0(%arg0: i32) -> (i32, i32, i32, i32) {
    %c0_i32 = arith.constant 0 : i32
    %c0_i32_0 = arith.constant 0 : i32
    %c0_i32_1 = arith.constant 0 : i32
    %c0_i32_2 = arith.constant 0 : i32
    return %arg0, %c0_i32, %c0_i32_0, %c0_i32_1 : i32, i32, i32, i32
  }
  func.func @transform_1(%arg0: i32) -> (i32, i32) {
    %c0_i32 = arith.constant 0 : i32
    %c0_i32_0 = arith.constant 0 : i32
    %c0_i32_1 = arith.constant 0 : i32
    return %c0_i32, %c0_i32_0 : i32, i32
  }
  func.func @transform_2(%arg0: i32) -> (i32, i32) {
    %c0_i32 = arith.constant 0 : i32
    %c0_i32_0 = arith.constant 0 : i32
    %c0_i32_1 = arith.constant 0 : i32
    return %c0_i32, %c0_i32_0 : i32, i32
  }
  func.func @transform_3(%arg0: i32) -> (i32, i32, i32, i32) {
    %c0_i32 = arith.constant 0 : i32
    %c0_i32_0 = arith.constant 0 : i32
    %c0_i32_1 = arith.constant 0 : i32
    %c0_i32_2 = arith.constant 0 : i32
    return %arg0, %c0_i32, %c0_i32_0, %c0_i32_1 : i32, i32, i32, i32
  }
}

module attributes {stable_mosaic.version = 11 : i64} {
  func.func @_matmul_bias_kernel(%arg0: i32, %arg1: memref<16x256xbf16, #tpu.memory_space<vmem>>, %arg2: memref<256x1024xbf16, #tpu.memory_space<vmem>>, %arg3: memref<1x1024xf32, #tpu.memory_space<vmem>>, %arg4: memref<16x1024xbf16, #tpu.memory_space<vmem>>) attributes {dimension_semantics = [#tpu.dimension_semantics<parallel>], iteration_bounds = array<i64: 1>, scalar_prefetch = 0 : i64, scratch_operands = 0 : i64, tpu.core_type = #tpu.core_type<tc>, window_params = [{transform_indices = @transform_0, window_bounds = array<i64: 16, 256>}, {pipeline_mode = #tpu.pipeline_mode<synchronous>, transform_indices = @transform_1, window_bounds = array<i64: 256, 1024>}, {pipeline_mode = #tpu.pipeline_mode<synchronous>, transform_indices = @transform_2, window_bounds = array<i64: 1, 1024>}, {transform_indices = @transform_3, window_bounds = array<i64: 16, 1024>}]} {
    %c0 = arith.constant 0 : index
    %c0_0 = arith.constant 0 : index
    %0 = vector.load %arg1[%c0, %c0_0] : memref<16x256xbf16, #tpu.memory_space<vmem>>, vector<16x256xbf16>
    %c0_1 = arith.constant 0 : index
    %c0_2 = arith.constant 0 : index
    %1 = vector.load %arg2[%c0_1, %c0_2] : memref<256x1024xbf16, #tpu.memory_space<vmem>>, vector<256x1024xbf16>
    %cst = arith.constant dense<0.000000e+00> : vector<16x1024xf32>
    %2 = tpu.matmul %0, %1, %cst {dimension_numbers = #tpu.dot_dimension_numbers<[1], [0], [0], [1], [0, 0, 1, 1], [], []>} : vector<16x256xbf16>, vector<256x1024xbf16>, vector<16x1024xf32> -> vector<16x1024xf32>
    %c0_3 = arith.constant 0 : index
    %c0_4 = arith.constant 0 : index
    %3 = vector.load %arg3[%c0_3, %c0_4] : memref<1x1024xf32, #tpu.memory_space<vmem>>, vector<1x1024xf32>
    %4 = vector.broadcast %3 : vector<1x1024xf32> to vector<16x1024xf32>
    %5 = arith.addf %2, %4 : vector<16x1024xf32>
    %6 = arith.truncf %5 : vector<16x1024xf32> to vector<16x1024xbf16>
    %c0_5 = arith.constant 0 : index
    %c0_6 = arith.constant 0 : index
    %7 = vector.load %arg4[%c0_5, %c0_6] : memref<16x1024xbf16, #tpu.memory_space<vmem>>, vector<16x1024xbf16>
    tpu.vector_store %arg4[%c0_5, %c0_6], %6 {strides = array<i32>} : memref<16x1024xbf16, #tpu.memory_space<vmem>>, vector<16x1024xbf16>,
    return
  }
  func.func @transform_0(%arg0: i32) -> (i32, i32) {
    %c0_i32 = arith.constant 0 : i32
    %c0_i32_0 = arith.constant 0 : i32
    return %arg0, %c0_i32 : i32, i32
  }
  func.func @transform_1(%arg0: i32) -> (i32, i32) {
    %c0_i32 = arith.constant 0 : i32
    %c0_i32_0 = arith.constant 0 : i32
    %c0_i32_1 = arith.constant 0 : i32
    return %c0_i32, %c0_i32_0 : i32, i32
  }
  func.func @transform_2(%arg0: i32) -> (i32, i32) {
    %c0_i32 = arith.constant 0 : i32
    %c0_i32_0 = arith.constant 0 : i32
    %c0_i32_1 = arith.constant 0 : i32
    return %c0_i32, %c0_i32_0 : i32, i32
  }
  func.func @transform_3(%arg0: i32) -> (i32, i32) {
    %c0_i32 = arith.constant 0 : i32
    %c0_i32_0 = arith.constant 0 : i32
    return %arg0, %c0_i32 : i32, i32
  }
}

module attributes {stable_mosaic.version = 11 : i64} {
  func.func @_bilstm_kernel(%arg0: i32, %arg1: memref<8x2x512xbf16, #tpu.memory_space<vmem>>, %arg2: memref<8x2x512xbf16, #tpu.memory_space<vmem>>, %arg3: memref<1x128x512xbf16, #tpu.memory_space<vmem>>, %arg4: memref<1x128x512xbf16, #tpu.memory_space<vmem>>, %arg5: memref<8x2x128xbf16, #tpu.memory_space<vmem>>, %arg6: memref<8x2x128xbf16, #tpu.memory_space<vmem>>, %arg7: memref<2x128xf32, #tpu.memory_space<vmem>>, %arg8: memref<2x128xf32, #tpu.memory_space<vmem>>, %arg9: memref<2x128xf32, #tpu.memory_space<vmem>>, %arg10: memref<2x128xf32, #tpu.memory_space<vmem>>) attributes {dimension_semantics = [#tpu.dimension_semantics<arbitrary>], iteration_bounds = array<i64: 1>, scalar_prefetch = 0 : i64, scratch_operands = 4 : i64, tpu.core_type = #tpu.core_type<tc>, window_params = [{transform_indices = @transform_0, window_bounds = array<i64: 8, 2, 512>}, {transform_indices = @transform_1, window_bounds = array<i64: 8, 2, 512>}, {transform_indices = @transform_2, window_bounds = array<i64: 1, 128, 512>}, {transform_indices = @transform_3, window_bounds = array<i64: 1, 128, 512>}, {transform_indices = @transform_4, window_bounds = array<i64: 8, 2, 128>}, {transform_indices = @transform_5, window_bounds = array<i64: 8, 2, 128>}]} {
    %c0_i32 = arith.constant 0 : i32
    %0 = arith.cmpi eq, %arg0, %c0_i32 : i32
    %1 = arith.extui %0 : i1 to i32
    %c0_i32_0 = arith.constant 0 : i32
    %2 = arith.cmpi ne, %1, %c0_i32_0 : i32
    scf.if %2 {
      %cst_280 = arith.constant 0.000000e+00 : f32
      %539 = vector.broadcast %cst_280 : f32 to vector<2x128xf32>
      %c0_281 = arith.constant 0 : index
      %c0_282 = arith.constant 0 : index
      %540 = vector.load %arg7[%c0_281, %c0_282] : memref<2x128xf32, #tpu.memory_space<vmem>>, vector<2x128xf32>
      tpu.vector_store %arg7[%c0_281, %c0_282], %539 {strides = array<i32>} : memref<2x128xf32, #tpu.memory_space<vmem>>, vector<2x128xf32>,
      %cst_283 = arith.constant 0.000000e+00 : f32
      %541 = vector.broadcast %cst_283 : f32 to vector<2x128xf32>
      %c0_284 = arith.constant 0 : index
      %c0_285 = arith.constant 0 : index
      %542 = vector.load %arg8[%c0_284, %c0_285] : memref<2x128xf32, #tpu.memory_space<vmem>>, vector<2x128xf32>
      tpu.vector_store %arg8[%c0_284, %c0_285], %541 {strides = array<i32>} : memref<2x128xf32, #tpu.memory_space<vmem>>, vector<2x128xf32>,
      %cst_286 = arith.constant 0.000000e+00 : f32
      %543 = vector.broadcast %cst_286 : f32 to vector<2x128xf32>
      %c0_287 = arith.constant 0 : index
      %c0_288 = arith.constant 0 : index
      %544 = vector.load %arg9[%c0_287, %c0_288] : memref<2x128xf32, #tpu.memory_space<vmem>>, vector<2x128xf32>
      tpu.vector_store %arg9[%c0_287, %c0_288], %543 {strides = array<i32>} : memref<2x128xf32, #tpu.memory_space<vmem>>, vector<2x128xf32>,
      %cst_289 = arith.constant 0.000000e+00 : f32
      %545 = vector.broadcast %cst_289 : f32 to vector<2x128xf32>
      %c0_290 = arith.constant 0 : index
      %c0_291 = arith.constant 0 : index
      %546 = vector.load %arg10[%c0_290, %c0_291] : memref<2x128xf32, #tpu.memory_space<vmem>>, vector<2x128xf32>
      tpu.vector_store %arg10[%c0_290, %c0_291], %545 {strides = array<i32>} : memref<2x128xf32, #tpu.memory_space<vmem>>, vector<2x128xf32>,
    } else {
    }
    %c0_i32_1 = arith.constant 0 : i32
    %c7_i32 = arith.constant 7 : i32
    %3 = arith.subi %c7_i32, %c0_i32_1 : i32
    %4 = arith.index_cast %c0_i32_1 : i32 to index
    %c0 = arith.constant 0 : index
    %c0_2 = arith.constant 0 : index
    %5 = vector.load %arg1[%4, %c0, %c0_2] : memref<8x2x512xbf16, #tpu.memory_space<vmem>>, vector<1x2x512xbf16>
    %6 = vector.shape_cast %5 : vector<1x2x512xbf16> to vector<2x512xbf16>
    %7 = arith.extf %6 : vector<2x512xbf16> to vector<2x512xf32>
    %c0_3 = arith.constant 0 : index
    %c0_4 = arith.constant 0 : index
    %8 = vector.load %arg7[%c0_3, %c0_4] : memref<2x128xf32, #tpu.memory_space<vmem>>, vector<2x128xf32>
    %9 = arith.truncf %8 : vector<2x128xf32> to vector<2x128xbf16>
    %c0_5 = arith.constant 0 : index
    %c0_6 = arith.constant 0 : index
    %c0_7 = arith.constant 0 : index
    %10 = vector.load %arg3[%c0_5, %c0_6, %c0_7] : memref<1x128x512xbf16, #tpu.memory_space<vmem>>, vector<1x128x512xbf16>
    %11 = vector.shape_cast %10 : vector<1x128x512xbf16> to vector<128x512xbf16>
    %cst = arith.constant dense<0.000000e+00> : vector<2x512xf32>
    %12 = tpu.matmul %9, %11, %cst {dimension_numbers = #tpu.dot_dimension_numbers<[1], [0], [0], [1], [0, 0, 1, 1], [], []>} : vector<2x128xbf16>, vector<128x512xbf16>, vector<2x512xf32> -> vector<2x512xf32>
    %13 = arith.addf %7, %12 : vector<2x512xf32>
    %14 = arith.index_cast %3 : i32 to index
    %c0_8 = arith.constant 0 : index
    %c0_9 = arith.constant 0 : index
    %15 = vector.load %arg2[%14, %c0_8, %c0_9] : memref<8x2x512xbf16, #tpu.memory_space<vmem>>, vector<1x2x512xbf16>
    %16 = vector.shape_cast %15 : vector<1x2x512xbf16> to vector<2x512xbf16>
    %17 = arith.extf %16 : vector<2x512xbf16> to vector<2x512xf32>
    %c0_10 = arith.constant 0 : index
    %c0_11 = arith.constant 0 : index
    %18 = vector.load %arg9[%c0_10, %c0_11] : memref<2x128xf32, #tpu.memory_space<vmem>>, vector<2x128xf32>
    %19 = arith.truncf %18 : vector<2x128xf32> to vector<2x128xbf16>
    %c0_12 = arith.constant 0 : index
    %c0_13 = arith.constant 0 : index
    %c0_14 = arith.constant 0 : index
    %20 = vector.load %arg4[%c0_12, %c0_13, %c0_14] : memref<1x128x512xbf16, #tpu.memory_space<vmem>>, vector<1x128x512xbf16>
    %21 = vector.shape_cast %20 : vector<1x128x512xbf16> to vector<128x512xbf16>
    %cst_15 = arith.constant dense<0.000000e+00> : vector<2x512xf32>
    %22 = tpu.matmul %19, %21, %cst_15 {dimension_numbers = #tpu.dot_dimension_numbers<[1], [0], [0], [1], [0, 0, 1, 1], [], []>} : vector<2x128xbf16>, vector<128x512xbf16>, vector<2x512xf32> -> vector<2x512xf32>
    %23 = arith.addf %17, %22 : vector<2x512xf32>
    %c0_16 = arith.constant 0 : index
    %c0_17 = arith.constant 0 : index
    %24 = vector.load %arg8[%c0_16, %c0_17] : memref<2x128xf32, #tpu.memory_space<vmem>>, vector<2x128xf32>
    %25 = vector.extract_strided_slice %13 {offsets = [0, 0], sizes = [2, 384], strides = [1, 1]} : vector<2x512xf32> to vector<2x384xf32>
    %26 = arith.negf %25 : vector<2x384xf32>
    %27 = math.exp %26 : vector<2x384xf32>
    %cst_18 = arith.constant 1.000000e+00 : f32
    %28 = vector.broadcast %cst_18 : f32 to vector<2x384xf32>
    %29 = arith.addf %28, %27 : vector<2x384xf32>
    %30 = arith.divf %28, %29 : vector<2x384xf32>
    %31 = vector.extract_strided_slice %30 {offsets = [0, 0], sizes = [2, 128], strides = [1, 1]} : vector<2x384xf32> to vector<2x128xf32>
    %32 = vector.extract_strided_slice %30 {offsets = [0, 128], sizes = [2, 128], strides = [1, 1]} : vector<2x384xf32> to vector<2x128xf32>
    %33 = vector.extract_strided_slice %30 {offsets = [0, 256], sizes = [2, 128], strides = [1, 1]} : vector<2x384xf32> to vector<2x128xf32>
    %34 = vector.extract_strided_slice %13 {offsets = [0, 384], sizes = [2, 128], strides = [1, 1]} : vector<2x512xf32> to vector<2x128xf32>
    %35 = math.tanh %34 : vector<2x128xf32>
    %36 = arith.mulf %32, %24 : vector<2x128xf32>
    %37 = arith.mulf %31, %35 : vector<2x128xf32>
    %38 = arith.addf %36, %37 : vector<2x128xf32>
    %39 = math.tanh %38 : vector<2x128xf32>
    %40 = arith.mulf %33, %39 : vector<2x128xf32>
    %c0_19 = arith.constant 0 : index
    %c0_20 = arith.constant 0 : index
    %41 = vector.load %arg10[%c0_19, %c0_20] : memref<2x128xf32, #tpu.memory_space<vmem>>, vector<2x128xf32>
    %42 = vector.extract_strided_slice %23 {offsets = [0, 0], sizes = [2, 384], strides = [1, 1]} : vector<2x512xf32> to vector<2x384xf32>
    %43 = arith.negf %42 : vector<2x384xf32>
    %44 = math.exp %43 : vector<2x384xf32>
    %cst_21 = arith.constant 1.000000e+00 : f32
    %45 = vector.broadcast %cst_21 : f32 to vector<2x384xf32>
    %46 = arith.addf %45, %44 : vector<2x384xf32>
    %47 = arith.divf %45, %46 : vector<2x384xf32>
    %48 = vector.extract_strided_slice %47 {offsets = [0, 0], sizes = [2, 128], strides = [1, 1]} : vector<2x384xf32> to vector<2x128xf32>
    %49 = vector.extract_strided_slice %47 {offsets = [0, 128], sizes = [2, 128], strides = [1, 1]} : vector<2x384xf32> to vector<2x128xf32>
    %50 = vector.extract_strided_slice %47 {offsets = [0, 256], sizes = [2, 128], strides = [1, 1]} : vector<2x384xf32> to vector<2x128xf32>
    %51 = vector.extract_strided_slice %23 {offsets = [0, 384], sizes = [2, 128], strides = [1, 1]} : vector<2x512xf32> to vector<2x128xf32>
    %52 = math.tanh %51 : vector<2x128xf32>
    %53 = arith.mulf %49, %41 : vector<2x128xf32>
    %54 = arith.mulf %48, %52 : vector<2x128xf32>
    %55 = arith.addf %53, %54 : vector<2x128xf32>
    %56 = math.tanh %55 : vector<2x128xf32>
    %57 = arith.mulf %50, %56 : vector<2x128xf32>
    %c0_22 = arith.constant 0 : index
    %c0_23 = arith.constant 0 : index
    %58 = vector.load %arg7[%c0_22, %c0_23] : memref<2x128xf32, #tpu.memory_space<vmem>>, vector<2x128xf32>
    tpu.vector_store %arg7[%c0_22, %c0_23], %40 {strides = array<i32>} : memref<2x128xf32, #tpu.memory_space<vmem>>, vector<2x128xf32>,
    %c0_24 = arith.constant 0 : index
    %c0_25 = arith.constant 0 : index
    %59 = vector.load %arg8[%c0_24, %c0_25] : memref<2x128xf32, #tpu.memory_space<vmem>>, vector<2x128xf32>
    tpu.vector_store %arg8[%c0_24, %c0_25], %38 {strides = array<i32>} : memref<2x128xf32, #tpu.memory_space<vmem>>, vector<2x128xf32>,
    %c0_26 = arith.constant 0 : index
    %c0_27 = arith.constant 0 : index
    %60 = vector.load %arg9[%c0_26, %c0_27] : memref<2x128xf32, #tpu.memory_space<vmem>>, vector<2x128xf32>
    tpu.vector_store %arg9[%c0_26, %c0_27], %57 {strides = array<i32>} : memref<2x128xf32, #tpu.memory_space<vmem>>, vector<2x128xf32>,
    %c0_28 = arith.constant 0 : index
    %c0_29 = arith.constant 0 : index
    %61 = vector.load %arg10[%c0_28, %c0_29] : memref<2x128xf32, #tpu.memory_space<vmem>>, vector<2x128xf32>
    tpu.vector_store %arg10[%c0_28, %c0_29], %55 {strides = array<i32>} : memref<2x128xf32, #tpu.memory_space<vmem>>, vector<2x128xf32>,
    %62 = vector.shape_cast %40 : vector<2x128xf32> to vector<1x2x128xf32>
    %63 = arith.truncf %62 : vector<1x2x128xf32> to vector<1x2x128xbf16>
    %64 = arith.index_cast %c0_i32_1 : i32 to index
    %c0_30 = arith.constant 0 : index
    %c0_31 = arith.constant 0 : index
    %65 = vector.load %arg5[%64, %c0_30, %c0_31] : memref<8x2x128xbf16, #tpu.memory_space<vmem>>, vector<1x2x128xbf16>
    tpu.vector_store %arg5[%64, %c0_30, %c0_31], %63 {strides = array<i32>} : memref<8x2x128xbf16, #tpu.memory_space<vmem>>, vector<1x2x128xbf16>,
    %66 = vector.shape_cast %57 : vector<2x128xf32> to vector<1x2x128xf32>
    %67 = arith.truncf %66 : vector<1x2x128xf32> to vector<1x2x128xbf16>
    %68 = arith.index_cast %3 : i32 to index
    %c0_32 = arith.constant 0 : index
    %c0_33 = arith.constant 0 : index
    %69 = vector.load %arg6[%68, %c0_32, %c0_33] : memref<8x2x128xbf16, #tpu.memory_space<vmem>>, vector<1x2x128xbf16>
    tpu.vector_store %arg6[%68, %c0_32, %c0_33], %67 {strides = array<i32>} : memref<8x2x128xbf16, #tpu.memory_space<vmem>>, vector<1x2x128xbf16>,
    %c1_i32 = arith.constant 1 : i32
    %c7_i32_34 = arith.constant 7 : i32
    %70 = arith.subi %c7_i32_34, %c1_i32 : i32
    %71 = arith.index_cast %c1_i32 : i32 to index
    %c0_35 = arith.constant 0 : index
    %c0_36 = arith.constant 0 : index
    %72 = vector.load %arg1[%71, %c0_35, %c0_36] : memref<8x2x512xbf16, #tpu.memory_space<vmem>>, vector<1x2x512xbf16>
    %73 = vector.shape_cast %72 : vector<1x2x512xbf16> to vector<2x512xbf16>
    %74 = arith.extf %73 : vector<2x512xbf16> to vector<2x512xf32>
    %c0_37 = arith.constant 0 : index
    %c0_38 = arith.constant 0 : index
    %75 = vector.load %arg7[%c0_37, %c0_38] : memref<2x128xf32, #tpu.memory_space<vmem>>, vector<2x128xf32>
    %76 = arith.truncf %75 : vector<2x128xf32> to vector<2x128xbf16>
    %c0_39 = arith.constant 0 : index
    %c0_40 = arith.constant 0 : index
    %c0_41 = arith.constant 0 : index
    %77 = vector.load %arg3[%c0_39, %c0_40, %c0_41] : memref<1x128x512xbf16, #tpu.memory_space<vmem>>, vector<1x128x512xbf16>
    %78 = vector.shape_cast %77 : vector<1x128x512xbf16> to vector<128x512xbf16>
    %cst_42 = arith.constant dense<0.000000e+00> : vector<2x512xf32>
    %79 = tpu.matmul %76, %78, %cst_42 {dimension_numbers = #tpu.dot_dimension_numbers<[1], [0], [0], [1], [0, 0, 1, 1], [], []>} : vector<2x128xbf16>, vector<128x512xbf16>, vector<2x512xf32> -> vector<2x512xf32>
    %80 = arith.addf %74, %79 : vector<2x512xf32>
    %81 = arith.index_cast %70 : i32 to index
    %c0_43 = arith.constant 0 : index
    %c0_44 = arith.constant 0 : index
    %82 = vector.load %arg2[%81, %c0_43, %c0_44] : memref<8x2x512xbf16, #tpu.memory_space<vmem>>, vector<1x2x512xbf16>
    %83 = vector.shape_cast %82 : vector<1x2x512xbf16> to vector<2x512xbf16>
    %84 = arith.extf %83 : vector<2x512xbf16> to vector<2x512xf32>
    %c0_45 = arith.constant 0 : index
    %c0_46 = arith.constant 0 : index
    %85 = vector.load %arg9[%c0_45, %c0_46] : memref<2x128xf32, #tpu.memory_space<vmem>>, vector<2x128xf32>
    %86 = arith.truncf %85 : vector<2x128xf32> to vector<2x128xbf16>
    %c0_47 = arith.constant 0 : index
    %c0_48 = arith.constant 0 : index
    %c0_49 = arith.constant 0 : index
    %87 = vector.load %arg4[%c0_47, %c0_48, %c0_49] : memref<1x128x512xbf16, #tpu.memory_space<vmem>>, vector<1x128x512xbf16>
    %88 = vector.shape_cast %87 : vector<1x128x512xbf16> to vector<128x512xbf16>
    %cst_50 = arith.constant dense<0.000000e+00> : vector<2x512xf32>
    %89 = tpu.matmul %86, %88, %cst_50 {dimension_numbers = #tpu.dot_dimension_numbers<[1], [0], [0], [1], [0, 0, 1, 1], [], []>} : vector<2x128xbf16>, vector<128x512xbf16>, vector<2x512xf32> -> vector<2x512xf32>
    %90 = arith.addf %84, %89 : vector<2x512xf32>
    %c0_51 = arith.constant 0 : index
    %c0_52 = arith.constant 0 : index
    %91 = vector.load %arg8[%c0_51, %c0_52] : memref<2x128xf32, #tpu.memory_space<vmem>>, vector<2x128xf32>
    %92 = vector.extract_strided_slice %80 {offsets = [0, 0], sizes = [2, 384], strides = [1, 1]} : vector<2x512xf32> to vector<2x384xf32>
    %93 = arith.negf %92 : vector<2x384xf32>
    %94 = math.exp %93 : vector<2x384xf32>
    %cst_53 = arith.constant 1.000000e+00 : f32
    %95 = vector.broadcast %cst_53 : f32 to vector<2x384xf32>
    %96 = arith.addf %95, %94 : vector<2x384xf32>
    %97 = arith.divf %95, %96 : vector<2x384xf32>
    %98 = vector.extract_strided_slice %97 {offsets = [0, 0], sizes = [2, 128], strides = [1, 1]} : vector<2x384xf32> to vector<2x128xf32>
    %99 = vector.extract_strided_slice %97 {offsets = [0, 128], sizes = [2, 128], strides = [1, 1]} : vector<2x384xf32> to vector<2x128xf32>
    %100 = vector.extract_strided_slice %97 {offsets = [0, 256], sizes = [2, 128], strides = [1, 1]} : vector<2x384xf32> to vector<2x128xf32>
    %101 = vector.extract_strided_slice %80 {offsets = [0, 384], sizes = [2, 128], strides = [1, 1]} : vector<2x512xf32> to vector<2x128xf32>
    %102 = math.tanh %101 : vector<2x128xf32>
    %103 = arith.mulf %99, %91 : vector<2x128xf32>
    %104 = arith.mulf %98, %102 : vector<2x128xf32>
    %105 = arith.addf %103, %104 : vector<2x128xf32>
    %106 = math.tanh %105 : vector<2x128xf32>
    %107 = arith.mulf %100, %106 : vector<2x128xf32>
    %c0_54 = arith.constant 0 : index
    %c0_55 = arith.constant 0 : index
    %108 = vector.load %arg10[%c0_54, %c0_55] : memref<2x128xf32, #tpu.memory_space<vmem>>, vector<2x128xf32>
    %109 = vector.extract_strided_slice %90 {offsets = [0, 0], sizes = [2, 384], strides = [1, 1]} : vector<2x512xf32> to vector<2x384xf32>
    %110 = arith.negf %109 : vector<2x384xf32>
    %111 = math.exp %110 : vector<2x384xf32>
    %cst_56 = arith.constant 1.000000e+00 : f32
    %112 = vector.broadcast %cst_56 : f32 to vector<2x384xf32>
    %113 = arith.addf %112, %111 : vector<2x384xf32>
    %114 = arith.divf %112, %113 : vector<2x384xf32>
    %115 = vector.extract_strided_slice %114 {offsets = [0, 0], sizes = [2, 128], strides = [1, 1]} : vector<2x384xf32> to vector<2x128xf32>
    %116 = vector.extract_strided_slice %114 {offsets = [0, 128], sizes = [2, 128], strides = [1, 1]} : vector<2x384xf32> to vector<2x128xf32>
    %117 = vector.extract_strided_slice %114 {offsets = [0, 256], sizes = [2, 128], strides = [1, 1]} : vector<2x384xf32> to vector<2x128xf32>
    %118 = vector.extract_strided_slice %90 {offsets = [0, 384], sizes = [2, 128], strides = [1, 1]} : vector<2x512xf32> to vector<2x128xf32>
    %119 = math.tanh %118 : vector<2x128xf32>
    %120 = arith.mulf %116, %108 : vector<2x128xf32>
    %121 = arith.mulf %115, %119 : vector<2x128xf32>
    %122 = arith.addf %120, %121 : vector<2x128xf32>
    %123 = math.tanh %122 : vector<2x128xf32>
    %124 = arith.mulf %117, %123 : vector<2x128xf32>
    %c0_57 = arith.constant 0 : index
    %c0_58 = arith.constant 0 : index
    %125 = vector.load %arg7[%c0_57, %c0_58] : memref<2x128xf32, #tpu.memory_space<vmem>>, vector<2x128xf32>
    tpu.vector_store %arg7[%c0_57, %c0_58], %107 {strides = array<i32>} : memref<2x128xf32, #tpu.memory_space<vmem>>, vector<2x128xf32>,
    %c0_59 = arith.constant 0 : index
    %c0_60 = arith.constant 0 : index
    %126 = vector.load %arg8[%c0_59, %c0_60] : memref<2x128xf32, #tpu.memory_space<vmem>>, vector<2x128xf32>
    tpu.vector_store %arg8[%c0_59, %c0_60], %105 {strides = array<i32>} : memref<2x128xf32, #tpu.memory_space<vmem>>, vector<2x128xf32>,
    %c0_61 = arith.constant 0 : index
    %c0_62 = arith.constant 0 : index
    %127 = vector.load %arg9[%c0_61, %c0_62] : memref<2x128xf32, #tpu.memory_space<vmem>>, vector<2x128xf32>
    tpu.vector_store %arg9[%c0_61, %c0_62], %124 {strides = array<i32>} : memref<2x128xf32, #tpu.memory_space<vmem>>, vector<2x128xf32>,
    %c0_63 = arith.constant 0 : index
    %c0_64 = arith.constant 0 : index
    %128 = vector.load %arg10[%c0_63, %c0_64] : memref<2x128xf32, #tpu.memory_space<vmem>>, vector<2x128xf32>
    tpu.vector_store %arg10[%c0_63, %c0_64], %122 {strides = array<i32>} : memref<2x128xf32, #tpu.memory_space<vmem>>, vector<2x128xf32>,
    %129 = vector.shape_cast %107 : vector<2x128xf32> to vector<1x2x128xf32>
    %130 = arith.truncf %129 : vector<1x2x128xf32> to vector<1x2x128xbf16>
    %131 = arith.index_cast %c1_i32 : i32 to index
    %c0_65 = arith.constant 0 : index
    %c0_66 = arith.constant 0 : index
    %132 = vector.load %arg5[%131, %c0_65, %c0_66] : memref<8x2x128xbf16, #tpu.memory_space<vmem>>, vector<1x2x128xbf16>
    tpu.vector_store %arg5[%131, %c0_65, %c0_66], %130 {strides = array<i32>} : memref<8x2x128xbf16, #tpu.memory_space<vmem>>, vector<1x2x128xbf16>,
    %133 = vector.shape_cast %124 : vector<2x128xf32> to vector<1x2x128xf32>
    %134 = arith.truncf %133 : vector<1x2x128xf32> to vector<1x2x128xbf16>
    %135 = arith.index_cast %70 : i32 to index
    %c0_67 = arith.constant 0 : index
    %c0_68 = arith.constant 0 : index
    %136 = vector.load %arg6[%135, %c0_67, %c0_68] : memref<8x2x128xbf16, #tpu.memory_space<vmem>>, vector<1x2x128xbf16>
    tpu.vector_store %arg6[%135, %c0_67, %c0_68], %134 {strides = array<i32>} : memref<8x2x128xbf16, #tpu.memory_space<vmem>>, vector<1x2x128xbf16>,
    %c2_i32 = arith.constant 2 : i32
    %c7_i32_69 = arith.constant 7 : i32
    %137 = arith.subi %c7_i32_69, %c2_i32 : i32
    %138 = arith.index_cast %c2_i32 : i32 to index
    %c0_70 = arith.constant 0 : index
    %c0_71 = arith.constant 0 : index
    %139 = vector.load %arg1[%138, %c0_70, %c0_71] : memref<8x2x512xbf16, #tpu.memory_space<vmem>>, vector<1x2x512xbf16>
    %140 = vector.shape_cast %139 : vector<1x2x512xbf16> to vector<2x512xbf16>
    %141 = arith.extf %140 : vector<2x512xbf16> to vector<2x512xf32>
    %c0_72 = arith.constant 0 : index
    %c0_73 = arith.constant 0 : index
    %142 = vector.load %arg7[%c0_72, %c0_73] : memref<2x128xf32, #tpu.memory_space<vmem>>, vector<2x128xf32>
    %143 = arith.truncf %142 : vector<2x128xf32> to vector<2x128xbf16>
    %c0_74 = arith.constant 0 : index
    %c0_75 = arith.constant 0 : index
    %c0_76 = arith.constant 0 : index
    %144 = vector.load %arg3[%c0_74, %c0_75, %c0_76] : memref<1x128x512xbf16, #tpu.memory_space<vmem>>, vector<1x128x512xbf16>
    %145 = vector.shape_cast %144 : vector<1x128x512xbf16> to vector<128x512xbf16>
    %cst_77 = arith.constant dense<0.000000e+00> : vector<2x512xf32>
    %146 = tpu.matmul %143, %145, %cst_77 {dimension_numbers = #tpu.dot_dimension_numbers<[1], [0], [0], [1], [0, 0, 1, 1], [], []>} : vector<2x128xbf16>, vector<128x512xbf16>, vector<2x512xf32> -> vector<2x512xf32>
    %147 = arith.addf %141, %146 : vector<2x512xf32>
    %148 = arith.index_cast %137 : i32 to index
    %c0_78 = arith.constant 0 : index
    %c0_79 = arith.constant 0 : index
    %149 = vector.load %arg2[%148, %c0_78, %c0_79] : memref<8x2x512xbf16, #tpu.memory_space<vmem>>, vector<1x2x512xbf16>
    %150 = vector.shape_cast %149 : vector<1x2x512xbf16> to vector<2x512xbf16>
    %151 = arith.extf %150 : vector<2x512xbf16> to vector<2x512xf32>
    %c0_80 = arith.constant 0 : index
    %c0_81 = arith.constant 0 : index
    %152 = vector.load %arg9[%c0_80, %c0_81] : memref<2x128xf32, #tpu.memory_space<vmem>>, vector<2x128xf32>
    %153 = arith.truncf %152 : vector<2x128xf32> to vector<2x128xbf16>
    %c0_82 = arith.constant 0 : index
    %c0_83 = arith.constant 0 : index
    %c0_84 = arith.constant 0 : index
    %154 = vector.load %arg4[%c0_82, %c0_83, %c0_84] : memref<1x128x512xbf16, #tpu.memory_space<vmem>>, vector<1x128x512xbf16>
    %155 = vector.shape_cast %154 : vector<1x128x512xbf16> to vector<128x512xbf16>
    %cst_85 = arith.constant dense<0.000000e+00> : vector<2x512xf32>
    %156 = tpu.matmul %153, %155, %cst_85 {dimension_numbers = #tpu.dot_dimension_numbers<[1], [0], [0], [1], [0, 0, 1, 1], [], []>} : vector<2x128xbf16>, vector<128x512xbf16>, vector<2x512xf32> -> vector<2x512xf32>
    %157 = arith.addf %151, %156 : vector<2x512xf32>
    %c0_86 = arith.constant 0 : index
    %c0_87 = arith.constant 0 : index
    %158 = vector.load %arg8[%c0_86, %c0_87] : memref<2x128xf32, #tpu.memory_space<vmem>>, vector<2x128xf32>
    %159 = vector.extract_strided_slice %147 {offsets = [0, 0], sizes = [2, 384], strides = [1, 1]} : vector<2x512xf32> to vector<2x384xf32>
    %160 = arith.negf %159 : vector<2x384xf32>
    %161 = math.exp %160 : vector<2x384xf32>
    %cst_88 = arith.constant 1.000000e+00 : f32
    %162 = vector.broadcast %cst_88 : f32 to vector<2x384xf32>
    %163 = arith.addf %162, %161 : vector<2x384xf32>
    %164 = arith.divf %162, %163 : vector<2x384xf32>
    %165 = vector.extract_strided_slice %164 {offsets = [0, 0], sizes = [2, 128], strides = [1, 1]} : vector<2x384xf32> to vector<2x128xf32>
    %166 = vector.extract_strided_slice %164 {offsets = [0, 128], sizes = [2, 128], strides = [1, 1]} : vector<2x384xf32> to vector<2x128xf32>
    %167 = vector.extract_strided_slice %164 {offsets = [0, 256], sizes = [2, 128], strides = [1, 1]} : vector<2x384xf32> to vector<2x128xf32>
    %168 = vector.extract_strided_slice %147 {offsets = [0, 384], sizes = [2, 128], strides = [1, 1]} : vector<2x512xf32> to vector<2x128xf32>
    %169 = math.tanh %168 : vector<2x128xf32>
    %170 = arith.mulf %166, %158 : vector<2x128xf32>
    %171 = arith.mulf %165, %169 : vector<2x128xf32>
    %172 = arith.addf %170, %171 : vector<2x128xf32>
    %173 = math.tanh %172 : vector<2x128xf32>
    %174 = arith.mulf %167, %173 : vector<2x128xf32>
    %c0_89 = arith.constant 0 : index
    %c0_90 = arith.constant 0 : index
    %175 = vector.load %arg10[%c0_89, %c0_90] : memref<2x128xf32, #tpu.memory_space<vmem>>, vector<2x128xf32>
    %176 = vector.extract_strided_slice %157 {offsets = [0, 0], sizes = [2, 384], strides = [1, 1]} : vector<2x512xf32> to vector<2x384xf32>
    %177 = arith.negf %176 : vector<2x384xf32>
    %178 = math.exp %177 : vector<2x384xf32>
    %cst_91 = arith.constant 1.000000e+00 : f32
    %179 = vector.broadcast %cst_91 : f32 to vector<2x384xf32>
    %180 = arith.addf %179, %178 : vector<2x384xf32>
    %181 = arith.divf %179, %180 : vector<2x384xf32>
    %182 = vector.extract_strided_slice %181 {offsets = [0, 0], sizes = [2, 128], strides = [1, 1]} : vector<2x384xf32> to vector<2x128xf32>
    %183 = vector.extract_strided_slice %181 {offsets = [0, 128], sizes = [2, 128], strides = [1, 1]} : vector<2x384xf32> to vector<2x128xf32>
    %184 = vector.extract_strided_slice %181 {offsets = [0, 256], sizes = [2, 128], strides = [1, 1]} : vector<2x384xf32> to vector<2x128xf32>
    %185 = vector.extract_strided_slice %157 {offsets = [0, 384], sizes = [2, 128], strides = [1, 1]} : vector<2x512xf32> to vector<2x128xf32>
    %186 = math.tanh %185 : vector<2x128xf32>
    %187 = arith.mulf %183, %175 : vector<2x128xf32>
    %188 = arith.mulf %182, %186 : vector<2x128xf32>
    %189 = arith.addf %187, %188 : vector<2x128xf32>
    %190 = math.tanh %189 : vector<2x128xf32>
    %191 = arith.mulf %184, %190 : vector<2x128xf32>
    %c0_92 = arith.constant 0 : index
    %c0_93 = arith.constant 0 : index
    %192 = vector.load %arg7[%c0_92, %c0_93] : memref<2x128xf32, #tpu.memory_space<vmem>>, vector<2x128xf32>
    tpu.vector_store %arg7[%c0_92, %c0_93], %174 {strides = array<i32>} : memref<2x128xf32, #tpu.memory_space<vmem>>, vector<2x128xf32>,
    %c0_94 = arith.constant 0 : index
    %c0_95 = arith.constant 0 : index
    %193 = vector.load %arg8[%c0_94, %c0_95] : memref<2x128xf32, #tpu.memory_space<vmem>>, vector<2x128xf32>
    tpu.vector_store %arg8[%c0_94, %c0_95], %172 {strides = array<i32>} : memref<2x128xf32, #tpu.memory_space<vmem>>, vector<2x128xf32>,
    %c0_96 = arith.constant 0 : index
    %c0_97 = arith.constant 0 : index
    %194 = vector.load %arg9[%c0_96, %c0_97] : memref<2x128xf32, #tpu.memory_space<vmem>>, vector<2x128xf32>
    tpu.vector_store %arg9[%c0_96, %c0_97], %191 {strides = array<i32>} : memref<2x128xf32, #tpu.memory_space<vmem>>, vector<2x128xf32>,
    %c0_98 = arith.constant 0 : index
    %c0_99 = arith.constant 0 : index
    %195 = vector.load %arg10[%c0_98, %c0_99] : memref<2x128xf32, #tpu.memory_space<vmem>>, vector<2x128xf32>
    tpu.vector_store %arg10[%c0_98, %c0_99], %189 {strides = array<i32>} : memref<2x128xf32, #tpu.memory_space<vmem>>, vector<2x128xf32>,
    %196 = vector.shape_cast %174 : vector<2x128xf32> to vector<1x2x128xf32>
    %197 = arith.truncf %196 : vector<1x2x128xf32> to vector<1x2x128xbf16>
    %198 = arith.index_cast %c2_i32 : i32 to index
    %c0_100 = arith.constant 0 : index
    %c0_101 = arith.constant 0 : index
    %199 = vector.load %arg5[%198, %c0_100, %c0_101] : memref<8x2x128xbf16, #tpu.memory_space<vmem>>, vector<1x2x128xbf16>
    tpu.vector_store %arg5[%198, %c0_100, %c0_101], %197 {strides = array<i32>} : memref<8x2x128xbf16, #tpu.memory_space<vmem>>, vector<1x2x128xbf16>,
    %200 = vector.shape_cast %191 : vector<2x128xf32> to vector<1x2x128xf32>
    %201 = arith.truncf %200 : vector<1x2x128xf32> to vector<1x2x128xbf16>
    %202 = arith.index_cast %137 : i32 to index
    %c0_102 = arith.constant 0 : index
    %c0_103 = arith.constant 0 : index
    %203 = vector.load %arg6[%202, %c0_102, %c0_103] : memref<8x2x128xbf16, #tpu.memory_space<vmem>>, vector<1x2x128xbf16>
    tpu.vector_store %arg6[%202, %c0_102, %c0_103], %201 {strides = array<i32>} : memref<8x2x128xbf16, #tpu.memory_space<vmem>>, vector<1x2x128xbf16>,
    %c3_i32 = arith.constant 3 : i32
    %c7_i32_104 = arith.constant 7 : i32
    %204 = arith.subi %c7_i32_104, %c3_i32 : i32
    %205 = arith.index_cast %c3_i32 : i32 to index
    %c0_105 = arith.constant 0 : index
    %c0_106 = arith.constant 0 : index
    %206 = vector.load %arg1[%205, %c0_105, %c0_106] : memref<8x2x512xbf16, #tpu.memory_space<vmem>>, vector<1x2x512xbf16>
    %207 = vector.shape_cast %206 : vector<1x2x512xbf16> to vector<2x512xbf16>
    %208 = arith.extf %207 : vector<2x512xbf16> to vector<2x512xf32>
    %c0_107 = arith.constant 0 : index
    %c0_108 = arith.constant 0 : index
    %209 = vector.load %arg7[%c0_107, %c0_108] : memref<2x128xf32, #tpu.memory_space<vmem>>, vector<2x128xf32>
    %210 = arith.truncf %209 : vector<2x128xf32> to vector<2x128xbf16>
    %c0_109 = arith.constant 0 : index
    %c0_110 = arith.constant 0 : index
    %c0_111 = arith.constant 0 : index
    %211 = vector.load %arg3[%c0_109, %c0_110, %c0_111] : memref<1x128x512xbf16, #tpu.memory_space<vmem>>, vector<1x128x512xbf16>
    %212 = vector.shape_cast %211 : vector<1x128x512xbf16> to vector<128x512xbf16>
    %cst_112 = arith.constant dense<0.000000e+00> : vector<2x512xf32>
    %213 = tpu.matmul %210, %212, %cst_112 {dimension_numbers = #tpu.dot_dimension_numbers<[1], [0], [0], [1], [0, 0, 1, 1], [], []>} : vector<2x128xbf16>, vector<128x512xbf16>, vector<2x512xf32> -> vector<2x512xf32>
    %214 = arith.addf %208, %213 : vector<2x512xf32>
    %215 = arith.index_cast %204 : i32 to index
    %c0_113 = arith.constant 0 : index
    %c0_114 = arith.constant 0 : index
    %216 = vector.load %arg2[%215, %c0_113, %c0_114] : memref<8x2x512xbf16, #tpu.memory_space<vmem>>, vector<1x2x512xbf16>
    %217 = vector.shape_cast %216 : vector<1x2x512xbf16> to vector<2x512xbf16>
    %218 = arith.extf %217 : vector<2x512xbf16> to vector<2x512xf32>
    %c0_115 = arith.constant 0 : index
    %c0_116 = arith.constant 0 : index
    %219 = vector.load %arg9[%c0_115, %c0_116] : memref<2x128xf32, #tpu.memory_space<vmem>>, vector<2x128xf32>
    %220 = arith.truncf %219 : vector<2x128xf32> to vector<2x128xbf16>
    %c0_117 = arith.constant 0 : index
    %c0_118 = arith.constant 0 : index
    %c0_119 = arith.constant 0 : index
    %221 = vector.load %arg4[%c0_117, %c0_118, %c0_119] : memref<1x128x512xbf16, #tpu.memory_space<vmem>>, vector<1x128x512xbf16>
    %222 = vector.shape_cast %221 : vector<1x128x512xbf16> to vector<128x512xbf16>
    %cst_120 = arith.constant dense<0.000000e+00> : vector<2x512xf32>
    %223 = tpu.matmul %220, %222, %cst_120 {dimension_numbers = #tpu.dot_dimension_numbers<[1], [0], [0], [1], [0, 0, 1, 1], [], []>} : vector<2x128xbf16>, vector<128x512xbf16>, vector<2x512xf32> -> vector<2x512xf32>
    %224 = arith.addf %218, %223 : vector<2x512xf32>
    %c0_121 = arith.constant 0 : index
    %c0_122 = arith.constant 0 : index
    %225 = vector.load %arg8[%c0_121, %c0_122] : memref<2x128xf32, #tpu.memory_space<vmem>>, vector<2x128xf32>
    %226 = vector.extract_strided_slice %214 {offsets = [0, 0], sizes = [2, 384], strides = [1, 1]} : vector<2x512xf32> to vector<2x384xf32>
    %227 = arith.negf %226 : vector<2x384xf32>
    %228 = math.exp %227 : vector<2x384xf32>
    %cst_123 = arith.constant 1.000000e+00 : f32
    %229 = vector.broadcast %cst_123 : f32 to vector<2x384xf32>
    %230 = arith.addf %229, %228 : vector<2x384xf32>
    %231 = arith.divf %229, %230 : vector<2x384xf32>
    %232 = vector.extract_strided_slice %231 {offsets = [0, 0], sizes = [2, 128], strides = [1, 1]} : vector<2x384xf32> to vector<2x128xf32>
    %233 = vector.extract_strided_slice %231 {offsets = [0, 128], sizes = [2, 128], strides = [1, 1]} : vector<2x384xf32> to vector<2x128xf32>
    %234 = vector.extract_strided_slice %231 {offsets = [0, 256], sizes = [2, 128], strides = [1, 1]} : vector<2x384xf32> to vector<2x128xf32>
    %235 = vector.extract_strided_slice %214 {offsets = [0, 384], sizes = [2, 128], strides = [1, 1]} : vector<2x512xf32> to vector<2x128xf32>
    %236 = math.tanh %235 : vector<2x128xf32>
    %237 = arith.mulf %233, %225 : vector<2x128xf32>
    %238 = arith.mulf %232, %236 : vector<2x128xf32>
    %239 = arith.addf %237, %238 : vector<2x128xf32>
    %240 = math.tanh %239 : vector<2x128xf32>
    %241 = arith.mulf %234, %240 : vector<2x128xf32>
    %c0_124 = arith.constant 0 : index
    %c0_125 = arith.constant 0 : index
    %242 = vector.load %arg10[%c0_124, %c0_125] : memref<2x128xf32, #tpu.memory_space<vmem>>, vector<2x128xf32>
    %243 = vector.extract_strided_slice %224 {offsets = [0, 0], sizes = [2, 384], strides = [1, 1]} : vector<2x512xf32> to vector<2x384xf32>
    %244 = arith.negf %243 : vector<2x384xf32>
    %245 = math.exp %244 : vector<2x384xf32>
    %cst_126 = arith.constant 1.000000e+00 : f32
    %246 = vector.broadcast %cst_126 : f32 to vector<2x384xf32>
    %247 = arith.addf %246, %245 : vector<2x384xf32>
    %248 = arith.divf %246, %247 : vector<2x384xf32>
    %249 = vector.extract_strided_slice %248 {offsets = [0, 0], sizes = [2, 128], strides = [1, 1]} : vector<2x384xf32> to vector<2x128xf32>
    %250 = vector.extract_strided_slice %248 {offsets = [0, 128], sizes = [2, 128], strides = [1, 1]} : vector<2x384xf32> to vector<2x128xf32>
    %251 = vector.extract_strided_slice %248 {offsets = [0, 256], sizes = [2, 128], strides = [1, 1]} : vector<2x384xf32> to vector<2x128xf32>
    %252 = vector.extract_strided_slice %224 {offsets = [0, 384], sizes = [2, 128], strides = [1, 1]} : vector<2x512xf32> to vector<2x128xf32>
    %253 = math.tanh %252 : vector<2x128xf32>
    %254 = arith.mulf %250, %242 : vector<2x128xf32>
    %255 = arith.mulf %249, %253 : vector<2x128xf32>
    %256 = arith.addf %254, %255 : vector<2x128xf32>
    %257 = math.tanh %256 : vector<2x128xf32>
    %258 = arith.mulf %251, %257 : vector<2x128xf32>
    %c0_127 = arith.constant 0 : index
    %c0_128 = arith.constant 0 : index
    %259 = vector.load %arg7[%c0_127, %c0_128] : memref<2x128xf32, #tpu.memory_space<vmem>>, vector<2x128xf32>
    tpu.vector_store %arg7[%c0_127, %c0_128], %241 {strides = array<i32>} : memref<2x128xf32, #tpu.memory_space<vmem>>, vector<2x128xf32>,
    %c0_129 = arith.constant 0 : index
    %c0_130 = arith.constant 0 : index
    %260 = vector.load %arg8[%c0_129, %c0_130] : memref<2x128xf32, #tpu.memory_space<vmem>>, vector<2x128xf32>
    tpu.vector_store %arg8[%c0_129, %c0_130], %239 {strides = array<i32>} : memref<2x128xf32, #tpu.memory_space<vmem>>, vector<2x128xf32>,
    %c0_131 = arith.constant 0 : index
    %c0_132 = arith.constant 0 : index
    %261 = vector.load %arg9[%c0_131, %c0_132] : memref<2x128xf32, #tpu.memory_space<vmem>>, vector<2x128xf32>
    tpu.vector_store %arg9[%c0_131, %c0_132], %258 {strides = array<i32>} : memref<2x128xf32, #tpu.memory_space<vmem>>, vector<2x128xf32>,
    %c0_133 = arith.constant 0 : index
    %c0_134 = arith.constant 0 : index
    %262 = vector.load %arg10[%c0_133, %c0_134] : memref<2x128xf32, #tpu.memory_space<vmem>>, vector<2x128xf32>
    tpu.vector_store %arg10[%c0_133, %c0_134], %256 {strides = array<i32>} : memref<2x128xf32, #tpu.memory_space<vmem>>, vector<2x128xf32>,
    %263 = vector.shape_cast %241 : vector<2x128xf32> to vector<1x2x128xf32>
    %264 = arith.truncf %263 : vector<1x2x128xf32> to vector<1x2x128xbf16>
    %265 = arith.index_cast %c3_i32 : i32 to index
    %c0_135 = arith.constant 0 : index
    %c0_136 = arith.constant 0 : index
    %266 = vector.load %arg5[%265, %c0_135, %c0_136] : memref<8x2x128xbf16, #tpu.memory_space<vmem>>, vector<1x2x128xbf16>
    tpu.vector_store %arg5[%265, %c0_135, %c0_136], %264 {strides = array<i32>} : memref<8x2x128xbf16, #tpu.memory_space<vmem>>, vector<1x2x128xbf16>,
    %267 = vector.shape_cast %258 : vector<2x128xf32> to vector<1x2x128xf32>
    %268 = arith.truncf %267 : vector<1x2x128xf32> to vector<1x2x128xbf16>
    %269 = arith.index_cast %204 : i32 to index
    %c0_137 = arith.constant 0 : index
    %c0_138 = arith.constant 0 : index
    %270 = vector.load %arg6[%269, %c0_137, %c0_138] : memref<8x2x128xbf16, #tpu.memory_space<vmem>>, vector<1x2x128xbf16>
    tpu.vector_store %arg6[%269, %c0_137, %c0_138], %268 {strides = array<i32>} : memref<8x2x128xbf16, #tpu.memory_space<vmem>>, vector<1x2x128xbf16>,
    %c4_i32 = arith.constant 4 : i32
    %c7_i32_139 = arith.constant 7 : i32
    %271 = arith.subi %c7_i32_139, %c4_i32 : i32
    %272 = arith.index_cast %c4_i32 : i32 to index
    %c0_140 = arith.constant 0 : index
    %c0_141 = arith.constant 0 : index
    %273 = vector.load %arg1[%272, %c0_140, %c0_141] : memref<8x2x512xbf16, #tpu.memory_space<vmem>>, vector<1x2x512xbf16>
    %274 = vector.shape_cast %273 : vector<1x2x512xbf16> to vector<2x512xbf16>
    %275 = arith.extf %274 : vector<2x512xbf16> to vector<2x512xf32>
    %c0_142 = arith.constant 0 : index
    %c0_143 = arith.constant 0 : index
    %276 = vector.load %arg7[%c0_142, %c0_143] : memref<2x128xf32, #tpu.memory_space<vmem>>, vector<2x128xf32>
    %277 = arith.truncf %276 : vector<2x128xf32> to vector<2x128xbf16>
    %c0_144 = arith.constant 0 : index
    %c0_145 = arith.constant 0 : index
    %c0_146 = arith.constant 0 : index
    %278 = vector.load %arg3[%c0_144, %c0_145, %c0_146] : memref<1x128x512xbf16, #tpu.memory_space<vmem>>, vector<1x128x512xbf16>
    %279 = vector.shape_cast %278 : vector<1x128x512xbf16> to vector<128x512xbf16>
    %cst_147 = arith.constant dense<0.000000e+00> : vector<2x512xf32>
    %280 = tpu.matmul %277, %279, %cst_147 {dimension_numbers = #tpu.dot_dimension_numbers<[1], [0], [0], [1], [0, 0, 1, 1], [], []>} : vector<2x128xbf16>, vector<128x512xbf16>, vector<2x512xf32> -> vector<2x512xf32>
    %281 = arith.addf %275, %280 : vector<2x512xf32>
    %282 = arith.index_cast %271 : i32 to index
    %c0_148 = arith.constant 0 : index
    %c0_149 = arith.constant 0 : index
    %283 = vector.load %arg2[%282, %c0_148, %c0_149] : memref<8x2x512xbf16, #tpu.memory_space<vmem>>, vector<1x2x512xbf16>
    %284 = vector.shape_cast %283 : vector<1x2x512xbf16> to vector<2x512xbf16>
    %285 = arith.extf %284 : vector<2x512xbf16> to vector<2x512xf32>
    %c0_150 = arith.constant 0 : index
    %c0_151 = arith.constant 0 : index
    %286 = vector.load %arg9[%c0_150, %c0_151] : memref<2x128xf32, #tpu.memory_space<vmem>>, vector<2x128xf32>
    %287 = arith.truncf %286 : vector<2x128xf32> to vector<2x128xbf16>
    %c0_152 = arith.constant 0 : index
    %c0_153 = arith.constant 0 : index
    %c0_154 = arith.constant 0 : index
    %288 = vector.load %arg4[%c0_152, %c0_153, %c0_154] : memref<1x128x512xbf16, #tpu.memory_space<vmem>>, vector<1x128x512xbf16>
    %289 = vector.shape_cast %288 : vector<1x128x512xbf16> to vector<128x512xbf16>
    %cst_155 = arith.constant dense<0.000000e+00> : vector<2x512xf32>
    %290 = tpu.matmul %287, %289, %cst_155 {dimension_numbers = #tpu.dot_dimension_numbers<[1], [0], [0], [1], [0, 0, 1, 1], [], []>} : vector<2x128xbf16>, vector<128x512xbf16>, vector<2x512xf32> -> vector<2x512xf32>
    %291 = arith.addf %285, %290 : vector<2x512xf32>
    %c0_156 = arith.constant 0 : index
    %c0_157 = arith.constant 0 : index
    %292 = vector.load %arg8[%c0_156, %c0_157] : memref<2x128xf32, #tpu.memory_space<vmem>>, vector<2x128xf32>
    %293 = vector.extract_strided_slice %281 {offsets = [0, 0], sizes = [2, 384], strides = [1, 1]} : vector<2x512xf32> to vector<2x384xf32>
    %294 = arith.negf %293 : vector<2x384xf32>
    %295 = math.exp %294 : vector<2x384xf32>
    %cst_158 = arith.constant 1.000000e+00 : f32
    %296 = vector.broadcast %cst_158 : f32 to vector<2x384xf32>
    %297 = arith.addf %296, %295 : vector<2x384xf32>
    %298 = arith.divf %296, %297 : vector<2x384xf32>
    %299 = vector.extract_strided_slice %298 {offsets = [0, 0], sizes = [2, 128], strides = [1, 1]} : vector<2x384xf32> to vector<2x128xf32>
    %300 = vector.extract_strided_slice %298 {offsets = [0, 128], sizes = [2, 128], strides = [1, 1]} : vector<2x384xf32> to vector<2x128xf32>
    %301 = vector.extract_strided_slice %298 {offsets = [0, 256], sizes = [2, 128], strides = [1, 1]} : vector<2x384xf32> to vector<2x128xf32>
    %302 = vector.extract_strided_slice %281 {offsets = [0, 384], sizes = [2, 128], strides = [1, 1]} : vector<2x512xf32> to vector<2x128xf32>
    %303 = math.tanh %302 : vector<2x128xf32>
    %304 = arith.mulf %300, %292 : vector<2x128xf32>
    %305 = arith.mulf %299, %303 : vector<2x128xf32>
    %306 = arith.addf %304, %305 : vector<2x128xf32>
    %307 = math.tanh %306 : vector<2x128xf32>
    %308 = arith.mulf %301, %307 : vector<2x128xf32>
    %c0_159 = arith.constant 0 : index
    %c0_160 = arith.constant 0 : index
    %309 = vector.load %arg10[%c0_159, %c0_160] : memref<2x128xf32, #tpu.memory_space<vmem>>, vector<2x128xf32>
    %310 = vector.extract_strided_slice %291 {offsets = [0, 0], sizes = [2, 384], strides = [1, 1]} : vector<2x512xf32> to vector<2x384xf32>
    %311 = arith.negf %310 : vector<2x384xf32>
    %312 = math.exp %311 : vector<2x384xf32>
    %cst_161 = arith.constant 1.000000e+00 : f32
    %313 = vector.broadcast %cst_161 : f32 to vector<2x384xf32>
    %314 = arith.addf %313, %312 : vector<2x384xf32>
    %315 = arith.divf %313, %314 : vector<2x384xf32>
    %316 = vector.extract_strided_slice %315 {offsets = [0, 0], sizes = [2, 128], strides = [1, 1]} : vector<2x384xf32> to vector<2x128xf32>
    %317 = vector.extract_strided_slice %315 {offsets = [0, 128], sizes = [2, 128], strides = [1, 1]} : vector<2x384xf32> to vector<2x128xf32>
    %318 = vector.extract_strided_slice %315 {offsets = [0, 256], sizes = [2, 128], strides = [1, 1]} : vector<2x384xf32> to vector<2x128xf32>
    %319 = vector.extract_strided_slice %291 {offsets = [0, 384], sizes = [2, 128], strides = [1, 1]} : vector<2x512xf32> to vector<2x128xf32>
    %320 = math.tanh %319 : vector<2x128xf32>
    %321 = arith.mulf %317, %309 : vector<2x128xf32>
    %322 = arith.mulf %316, %320 : vector<2x128xf32>
    %323 = arith.addf %321, %322 : vector<2x128xf32>
    %324 = math.tanh %323 : vector<2x128xf32>
    %325 = arith.mulf %318, %324 : vector<2x128xf32>
    %c0_162 = arith.constant 0 : index
    %c0_163 = arith.constant 0 : index
    %326 = vector.load %arg7[%c0_162, %c0_163] : memref<2x128xf32, #tpu.memory_space<vmem>>, vector<2x128xf32>
    tpu.vector_store %arg7[%c0_162, %c0_163], %308 {strides = array<i32>} : memref<2x128xf32, #tpu.memory_space<vmem>>, vector<2x128xf32>,
    %c0_164 = arith.constant 0 : index
    %c0_165 = arith.constant 0 : index
    %327 = vector.load %arg8[%c0_164, %c0_165] : memref<2x128xf32, #tpu.memory_space<vmem>>, vector<2x128xf32>
    tpu.vector_store %arg8[%c0_164, %c0_165], %306 {strides = array<i32>} : memref<2x128xf32, #tpu.memory_space<vmem>>, vector<2x128xf32>,
    %c0_166 = arith.constant 0 : index
    %c0_167 = arith.constant 0 : index
    %328 = vector.load %arg9[%c0_166, %c0_167] : memref<2x128xf32, #tpu.memory_space<vmem>>, vector<2x128xf32>
    tpu.vector_store %arg9[%c0_166, %c0_167], %325 {strides = array<i32>} : memref<2x128xf32, #tpu.memory_space<vmem>>, vector<2x128xf32>,
    %c0_168 = arith.constant 0 : index
    %c0_169 = arith.constant 0 : index
    %329 = vector.load %arg10[%c0_168, %c0_169] : memref<2x128xf32, #tpu.memory_space<vmem>>, vector<2x128xf32>
    tpu.vector_store %arg10[%c0_168, %c0_169], %323 {strides = array<i32>} : memref<2x128xf32, #tpu.memory_space<vmem>>, vector<2x128xf32>,
    %330 = vector.shape_cast %308 : vector<2x128xf32> to vector<1x2x128xf32>
    %331 = arith.truncf %330 : vector<1x2x128xf32> to vector<1x2x128xbf16>
    %332 = arith.index_cast %c4_i32 : i32 to index
    %c0_170 = arith.constant 0 : index
    %c0_171 = arith.constant 0 : index
    %333 = vector.load %arg5[%332, %c0_170, %c0_171] : memref<8x2x128xbf16, #tpu.memory_space<vmem>>, vector<1x2x128xbf16>
    tpu.vector_store %arg5[%332, %c0_170, %c0_171], %331 {strides = array<i32>} : memref<8x2x128xbf16, #tpu.memory_space<vmem>>, vector<1x2x128xbf16>,
    %334 = vector.shape_cast %325 : vector<2x128xf32> to vector<1x2x128xf32>
    %335 = arith.truncf %334 : vector<1x2x128xf32> to vector<1x2x128xbf16>
    %336 = arith.index_cast %271 : i32 to index
    %c0_172 = arith.constant 0 : index
    %c0_173 = arith.constant 0 : index
    %337 = vector.load %arg6[%336, %c0_172, %c0_173] : memref<8x2x128xbf16, #tpu.memory_space<vmem>>, vector<1x2x128xbf16>
    tpu.vector_store %arg6[%336, %c0_172, %c0_173], %335 {strides = array<i32>} : memref<8x2x128xbf16, #tpu.memory_space<vmem>>, vector<1x2x128xbf16>,
    %c5_i32 = arith.constant 5 : i32
    %c7_i32_174 = arith.constant 7 : i32
    %338 = arith.subi %c7_i32_174, %c5_i32 : i32
    %339 = arith.index_cast %c5_i32 : i32 to index
    %c0_175 = arith.constant 0 : index
    %c0_176 = arith.constant 0 : index
    %340 = vector.load %arg1[%339, %c0_175, %c0_176] : memref<8x2x512xbf16, #tpu.memory_space<vmem>>, vector<1x2x512xbf16>
    %341 = vector.shape_cast %340 : vector<1x2x512xbf16> to vector<2x512xbf16>
    %342 = arith.extf %341 : vector<2x512xbf16> to vector<2x512xf32>
    %c0_177 = arith.constant 0 : index
    %c0_178 = arith.constant 0 : index
    %343 = vector.load %arg7[%c0_177, %c0_178] : memref<2x128xf32, #tpu.memory_space<vmem>>, vector<2x128xf32>
    %344 = arith.truncf %343 : vector<2x128xf32> to vector<2x128xbf16>
    %c0_179 = arith.constant 0 : index
    %c0_180 = arith.constant 0 : index
    %c0_181 = arith.constant 0 : index
    %345 = vector.load %arg3[%c0_179, %c0_180, %c0_181] : memref<1x128x512xbf16, #tpu.memory_space<vmem>>, vector<1x128x512xbf16>
    %346 = vector.shape_cast %345 : vector<1x128x512xbf16> to vector<128x512xbf16>
    %cst_182 = arith.constant dense<0.000000e+00> : vector<2x512xf32>
    %347 = tpu.matmul %344, %346, %cst_182 {dimension_numbers = #tpu.dot_dimension_numbers<[1], [0], [0], [1], [0, 0, 1, 1], [], []>} : vector<2x128xbf16>, vector<128x512xbf16>, vector<2x512xf32> -> vector<2x512xf32>
    %348 = arith.addf %342, %347 : vector<2x512xf32>
    %349 = arith.index_cast %338 : i32 to index
    %c0_183 = arith.constant 0 : index
    %c0_184 = arith.constant 0 : index
    %350 = vector.load %arg2[%349, %c0_183, %c0_184] : memref<8x2x512xbf16, #tpu.memory_space<vmem>>, vector<1x2x512xbf16>
    %351 = vector.shape_cast %350 : vector<1x2x512xbf16> to vector<2x512xbf16>
    %352 = arith.extf %351 : vector<2x512xbf16> to vector<2x512xf32>
    %c0_185 = arith.constant 0 : index
    %c0_186 = arith.constant 0 : index
    %353 = vector.load %arg9[%c0_185, %c0_186] : memref<2x128xf32, #tpu.memory_space<vmem>>, vector<2x128xf32>
    %354 = arith.truncf %353 : vector<2x128xf32> to vector<2x128xbf16>
    %c0_187 = arith.constant 0 : index
    %c0_188 = arith.constant 0 : index
    %c0_189 = arith.constant 0 : index
    %355 = vector.load %arg4[%c0_187, %c0_188, %c0_189] : memref<1x128x512xbf16, #tpu.memory_space<vmem>>, vector<1x128x512xbf16>
    %356 = vector.shape_cast %355 : vector<1x128x512xbf16> to vector<128x512xbf16>
    %cst_190 = arith.constant dense<0.000000e+00> : vector<2x512xf32>
    %357 = tpu.matmul %354, %356, %cst_190 {dimension_numbers = #tpu.dot_dimension_numbers<[1], [0], [0], [1], [0, 0, 1, 1], [], []>} : vector<2x128xbf16>, vector<128x512xbf16>, vector<2x512xf32> -> vector<2x512xf32>
    %358 = arith.addf %352, %357 : vector<2x512xf32>
    %c0_191 = arith.constant 0 : index
    %c0_192 = arith.constant 0 : index
    %359 = vector.load %arg8[%c0_191, %c0_192] : memref<2x128xf32, #tpu.memory_space<vmem>>, vector<2x128xf32>
    %360 = vector.extract_strided_slice %348 {offsets = [0, 0], sizes = [2, 384], strides = [1, 1]} : vector<2x512xf32> to vector<2x384xf32>
    %361 = arith.negf %360 : vector<2x384xf32>
    %362 = math.exp %361 : vector<2x384xf32>
    %cst_193 = arith.constant 1.000000e+00 : f32
    %363 = vector.broadcast %cst_193 : f32 to vector<2x384xf32>
    %364 = arith.addf %363, %362 : vector<2x384xf32>
    %365 = arith.divf %363, %364 : vector<2x384xf32>
    %366 = vector.extract_strided_slice %365 {offsets = [0, 0], sizes = [2, 128], strides = [1, 1]} : vector<2x384xf32> to vector<2x128xf32>
    %367 = vector.extract_strided_slice %365 {offsets = [0, 128], sizes = [2, 128], strides = [1, 1]} : vector<2x384xf32> to vector<2x128xf32>
    %368 = vector.extract_strided_slice %365 {offsets = [0, 256], sizes = [2, 128], strides = [1, 1]} : vector<2x384xf32> to vector<2x128xf32>
    %369 = vector.extract_strided_slice %348 {offsets = [0, 384], sizes = [2, 128], strides = [1, 1]} : vector<2x512xf32> to vector<2x128xf32>
    %370 = math.tanh %369 : vector<2x128xf32>
    %371 = arith.mulf %367, %359 : vector<2x128xf32>
    %372 = arith.mulf %366, %370 : vector<2x128xf32>
    %373 = arith.addf %371, %372 : vector<2x128xf32>
    %374 = math.tanh %373 : vector<2x128xf32>
    %375 = arith.mulf %368, %374 : vector<2x128xf32>
    %c0_194 = arith.constant 0 : index
    %c0_195 = arith.constant 0 : index
    %376 = vector.load %arg10[%c0_194, %c0_195] : memref<2x128xf32, #tpu.memory_space<vmem>>, vector<2x128xf32>
    %377 = vector.extract_strided_slice %358 {offsets = [0, 0], sizes = [2, 384], strides = [1, 1]} : vector<2x512xf32> to vector<2x384xf32>
    %378 = arith.negf %377 : vector<2x384xf32>
    %379 = math.exp %378 : vector<2x384xf32>
    %cst_196 = arith.constant 1.000000e+00 : f32
    %380 = vector.broadcast %cst_196 : f32 to vector<2x384xf32>
    %381 = arith.addf %380, %379 : vector<2x384xf32>
    %382 = arith.divf %380, %381 : vector<2x384xf32>
    %383 = vector.extract_strided_slice %382 {offsets = [0, 0], sizes = [2, 128], strides = [1, 1]} : vector<2x384xf32> to vector<2x128xf32>
    %384 = vector.extract_strided_slice %382 {offsets = [0, 128], sizes = [2, 128], strides = [1, 1]} : vector<2x384xf32> to vector<2x128xf32>
    %385 = vector.extract_strided_slice %382 {offsets = [0, 256], sizes = [2, 128], strides = [1, 1]} : vector<2x384xf32> to vector<2x128xf32>
    %386 = vector.extract_strided_slice %358 {offsets = [0, 384], sizes = [2, 128], strides = [1, 1]} : vector<2x512xf32> to vector<2x128xf32>
    %387 = math.tanh %386 : vector<2x128xf32>
    %388 = arith.mulf %384, %376 : vector<2x128xf32>
    %389 = arith.mulf %383, %387 : vector<2x128xf32>
    %390 = arith.addf %388, %389 : vector<2x128xf32>
    %391 = math.tanh %390 : vector<2x128xf32>
    %392 = arith.mulf %385, %391 : vector<2x128xf32>
    %c0_197 = arith.constant 0 : index
    %c0_198 = arith.constant 0 : index
    %393 = vector.load %arg7[%c0_197, %c0_198] : memref<2x128xf32, #tpu.memory_space<vmem>>, vector<2x128xf32>
    tpu.vector_store %arg7[%c0_197, %c0_198], %375 {strides = array<i32>} : memref<2x128xf32, #tpu.memory_space<vmem>>, vector<2x128xf32>,
    %c0_199 = arith.constant 0 : index
    %c0_200 = arith.constant 0 : index
    %394 = vector.load %arg8[%c0_199, %c0_200] : memref<2x128xf32, #tpu.memory_space<vmem>>, vector<2x128xf32>
    tpu.vector_store %arg8[%c0_199, %c0_200], %373 {strides = array<i32>} : memref<2x128xf32, #tpu.memory_space<vmem>>, vector<2x128xf32>,
    %c0_201 = arith.constant 0 : index
    %c0_202 = arith.constant 0 : index
    %395 = vector.load %arg9[%c0_201, %c0_202] : memref<2x128xf32, #tpu.memory_space<vmem>>, vector<2x128xf32>
    tpu.vector_store %arg9[%c0_201, %c0_202], %392 {strides = array<i32>} : memref<2x128xf32, #tpu.memory_space<vmem>>, vector<2x128xf32>,
    %c0_203 = arith.constant 0 : index
    %c0_204 = arith.constant 0 : index
    %396 = vector.load %arg10[%c0_203, %c0_204] : memref<2x128xf32, #tpu.memory_space<vmem>>, vector<2x128xf32>
    tpu.vector_store %arg10[%c0_203, %c0_204], %390 {strides = array<i32>} : memref<2x128xf32, #tpu.memory_space<vmem>>, vector<2x128xf32>,
    %397 = vector.shape_cast %375 : vector<2x128xf32> to vector<1x2x128xf32>
    %398 = arith.truncf %397 : vector<1x2x128xf32> to vector<1x2x128xbf16>
    %399 = arith.index_cast %c5_i32 : i32 to index
    %c0_205 = arith.constant 0 : index
    %c0_206 = arith.constant 0 : index
    %400 = vector.load %arg5[%399, %c0_205, %c0_206] : memref<8x2x128xbf16, #tpu.memory_space<vmem>>, vector<1x2x128xbf16>
    tpu.vector_store %arg5[%399, %c0_205, %c0_206], %398 {strides = array<i32>} : memref<8x2x128xbf16, #tpu.memory_space<vmem>>, vector<1x2x128xbf16>,
    %401 = vector.shape_cast %392 : vector<2x128xf32> to vector<1x2x128xf32>
    %402 = arith.truncf %401 : vector<1x2x128xf32> to vector<1x2x128xbf16>
    %403 = arith.index_cast %338 : i32 to index
    %c0_207 = arith.constant 0 : index
    %c0_208 = arith.constant 0 : index
    %404 = vector.load %arg6[%403, %c0_207, %c0_208] : memref<8x2x128xbf16, #tpu.memory_space<vmem>>, vector<1x2x128xbf16>
    tpu.vector_store %arg6[%403, %c0_207, %c0_208], %402 {strides = array<i32>} : memref<8x2x128xbf16, #tpu.memory_space<vmem>>, vector<1x2x128xbf16>,
    %c6_i32 = arith.constant 6 : i32
    %c7_i32_209 = arith.constant 7 : i32
    %405 = arith.subi %c7_i32_209, %c6_i32 : i32
    %406 = arith.index_cast %c6_i32 : i32 to index
    %c0_210 = arith.constant 0 : index
    %c0_211 = arith.constant 0 : index
    %407 = vector.load %arg1[%406, %c0_210, %c0_211] : memref<8x2x512xbf16, #tpu.memory_space<vmem>>, vector<1x2x512xbf16>
    %408 = vector.shape_cast %407 : vector<1x2x512xbf16> to vector<2x512xbf16>
    %409 = arith.extf %408 : vector<2x512xbf16> to vector<2x512xf32>
    %c0_212 = arith.constant 0 : index
    %c0_213 = arith.constant 0 : index
    %410 = vector.load %arg7[%c0_212, %c0_213] : memref<2x128xf32, #tpu.memory_space<vmem>>, vector<2x128xf32>
    %411 = arith.truncf %410 : vector<2x128xf32> to vector<2x128xbf16>
    %c0_214 = arith.constant 0 : index
    %c0_215 = arith.constant 0 : index
    %c0_216 = arith.constant 0 : index
    %412 = vector.load %arg3[%c0_214, %c0_215, %c0_216] : memref<1x128x512xbf16, #tpu.memory_space<vmem>>, vector<1x128x512xbf16>
    %413 = vector.shape_cast %412 : vector<1x128x512xbf16> to vector<128x512xbf16>
    %cst_217 = arith.constant dense<0.000000e+00> : vector<2x512xf32>
    %414 = tpu.matmul %411, %413, %cst_217 {dimension_numbers = #tpu.dot_dimension_numbers<[1], [0], [0], [1], [0, 0, 1, 1], [], []>} : vector<2x128xbf16>, vector<128x512xbf16>, vector<2x512xf32> -> vector<2x512xf32>
    %415 = arith.addf %409, %414 : vector<2x512xf32>
    %416 = arith.index_cast %405 : i32 to index
    %c0_218 = arith.constant 0 : index
    %c0_219 = arith.constant 0 : index
    %417 = vector.load %arg2[%416, %c0_218, %c0_219] : memref<8x2x512xbf16, #tpu.memory_space<vmem>>, vector<1x2x512xbf16>
    %418 = vector.shape_cast %417 : vector<1x2x512xbf16> to vector<2x512xbf16>
    %419 = arith.extf %418 : vector<2x512xbf16> to vector<2x512xf32>
    %c0_220 = arith.constant 0 : index
    %c0_221 = arith.constant 0 : index
    %420 = vector.load %arg9[%c0_220, %c0_221] : memref<2x128xf32, #tpu.memory_space<vmem>>, vector<2x128xf32>
    %421 = arith.truncf %420 : vector<2x128xf32> to vector<2x128xbf16>
    %c0_222 = arith.constant 0 : index
    %c0_223 = arith.constant 0 : index
    %c0_224 = arith.constant 0 : index
    %422 = vector.load %arg4[%c0_222, %c0_223, %c0_224] : memref<1x128x512xbf16, #tpu.memory_space<vmem>>, vector<1x128x512xbf16>
    %423 = vector.shape_cast %422 : vector<1x128x512xbf16> to vector<128x512xbf16>
    %cst_225 = arith.constant dense<0.000000e+00> : vector<2x512xf32>
    %424 = tpu.matmul %421, %423, %cst_225 {dimension_numbers = #tpu.dot_dimension_numbers<[1], [0], [0], [1], [0, 0, 1, 1], [], []>} : vector<2x128xbf16>, vector<128x512xbf16>, vector<2x512xf32> -> vector<2x512xf32>
    %425 = arith.addf %419, %424 : vector<2x512xf32>
    %c0_226 = arith.constant 0 : index
    %c0_227 = arith.constant 0 : index
    %426 = vector.load %arg8[%c0_226, %c0_227] : memref<2x128xf32, #tpu.memory_space<vmem>>, vector<2x128xf32>
    %427 = vector.extract_strided_slice %415 {offsets = [0, 0], sizes = [2, 384], strides = [1, 1]} : vector<2x512xf32> to vector<2x384xf32>
    %428 = arith.negf %427 : vector<2x384xf32>
    %429 = math.exp %428 : vector<2x384xf32>
    %cst_228 = arith.constant 1.000000e+00 : f32
    %430 = vector.broadcast %cst_228 : f32 to vector<2x384xf32>
    %431 = arith.addf %430, %429 : vector<2x384xf32>
    %432 = arith.divf %430, %431 : vector<2x384xf32>
    %433 = vector.extract_strided_slice %432 {offsets = [0, 0], sizes = [2, 128], strides = [1, 1]} : vector<2x384xf32> to vector<2x128xf32>
    %434 = vector.extract_strided_slice %432 {offsets = [0, 128], sizes = [2, 128], strides = [1, 1]} : vector<2x384xf32> to vector<2x128xf32>
    %435 = vector.extract_strided_slice %432 {offsets = [0, 256], sizes = [2, 128], strides = [1, 1]} : vector<2x384xf32> to vector<2x128xf32>
    %436 = vector.extract_strided_slice %415 {offsets = [0, 384], sizes = [2, 128], strides = [1, 1]} : vector<2x512xf32> to vector<2x128xf32>
    %437 = math.tanh %436 : vector<2x128xf32>
    %438 = arith.mulf %434, %426 : vector<2x128xf32>
    %439 = arith.mulf %433, %437 : vector<2x128xf32>
    %440 = arith.addf %438, %439 : vector<2x128xf32>
    %441 = math.tanh %440 : vector<2x128xf32>
    %442 = arith.mulf %435, %441 : vector<2x128xf32>
    %c0_229 = arith.constant 0 : index
    %c0_230 = arith.constant 0 : index
    %443 = vector.load %arg10[%c0_229, %c0_230] : memref<2x128xf32, #tpu.memory_space<vmem>>, vector<2x128xf32>
    %444 = vector.extract_strided_slice %425 {offsets = [0, 0], sizes = [2, 384], strides = [1, 1]} : vector<2x512xf32> to vector<2x384xf32>
    %445 = arith.negf %444 : vector<2x384xf32>
    %446 = math.exp %445 : vector<2x384xf32>
    %cst_231 = arith.constant 1.000000e+00 : f32
    %447 = vector.broadcast %cst_231 : f32 to vector<2x384xf32>
    %448 = arith.addf %447, %446 : vector<2x384xf32>
    %449 = arith.divf %447, %448 : vector<2x384xf32>
    %450 = vector.extract_strided_slice %449 {offsets = [0, 0], sizes = [2, 128], strides = [1, 1]} : vector<2x384xf32> to vector<2x128xf32>
    %451 = vector.extract_strided_slice %449 {offsets = [0, 128], sizes = [2, 128], strides = [1, 1]} : vector<2x384xf32> to vector<2x128xf32>
    %452 = vector.extract_strided_slice %449 {offsets = [0, 256], sizes = [2, 128], strides = [1, 1]} : vector<2x384xf32> to vector<2x128xf32>
    %453 = vector.extract_strided_slice %425 {offsets = [0, 384], sizes = [2, 128], strides = [1, 1]} : vector<2x512xf32> to vector<2x128xf32>
    %454 = math.tanh %453 : vector<2x128xf32>
    %455 = arith.mulf %451, %443 : vector<2x128xf32>
    %456 = arith.mulf %450, %454 : vector<2x128xf32>
    %457 = arith.addf %455, %456 : vector<2x128xf32>
    %458 = math.tanh %457 : vector<2x128xf32>
    %459 = arith.mulf %452, %458 : vector<2x128xf32>
    %c0_232 = arith.constant 0 : index
    %c0_233 = arith.constant 0 : index
    %460 = vector.load %arg7[%c0_232, %c0_233] : memref<2x128xf32, #tpu.memory_space<vmem>>, vector<2x128xf32>
    tpu.vector_store %arg7[%c0_232, %c0_233], %442 {strides = array<i32>} : memref<2x128xf32, #tpu.memory_space<vmem>>, vector<2x128xf32>,
    %c0_234 = arith.constant 0 : index
    %c0_235 = arith.constant 0 : index
    %461 = vector.load %arg8[%c0_234, %c0_235] : memref<2x128xf32, #tpu.memory_space<vmem>>, vector<2x128xf32>
    tpu.vector_store %arg8[%c0_234, %c0_235], %440 {strides = array<i32>} : memref<2x128xf32, #tpu.memory_space<vmem>>, vector<2x128xf32>,
    %c0_236 = arith.constant 0 : index
    %c0_237 = arith.constant 0 : index
    %462 = vector.load %arg9[%c0_236, %c0_237] : memref<2x128xf32, #tpu.memory_space<vmem>>, vector<2x128xf32>
    tpu.vector_store %arg9[%c0_236, %c0_237], %459 {strides = array<i32>} : memref<2x128xf32, #tpu.memory_space<vmem>>, vector<2x128xf32>,
    %c0_238 = arith.constant 0 : index
    %c0_239 = arith.constant 0 : index
    %463 = vector.load %arg10[%c0_238, %c0_239] : memref<2x128xf32, #tpu.memory_space<vmem>>, vector<2x128xf32>
    tpu.vector_store %arg10[%c0_238, %c0_239], %457 {strides = array<i32>} : memref<2x128xf32, #tpu.memory_space<vmem>>, vector<2x128xf32>,
    %464 = vector.shape_cast %442 : vector<2x128xf32> to vector<1x2x128xf32>
    %465 = arith.truncf %464 : vector<1x2x128xf32> to vector<1x2x128xbf16>
    %466 = arith.index_cast %c6_i32 : i32 to index
    %c0_240 = arith.constant 0 : index
    %c0_241 = arith.constant 0 : index
    %467 = vector.load %arg5[%466, %c0_240, %c0_241] : memref<8x2x128xbf16, #tpu.memory_space<vmem>>, vector<1x2x128xbf16>
    tpu.vector_store %arg5[%466, %c0_240, %c0_241], %465 {strides = array<i32>} : memref<8x2x128xbf16, #tpu.memory_space<vmem>>, vector<1x2x128xbf16>,
    %468 = vector.shape_cast %459 : vector<2x128xf32> to vector<1x2x128xf32>
    %469 = arith.truncf %468 : vector<1x2x128xf32> to vector<1x2x128xbf16>
    %470 = arith.index_cast %405 : i32 to index
    %c0_242 = arith.constant 0 : index
    %c0_243 = arith.constant 0 : index
    %471 = vector.load %arg6[%470, %c0_242, %c0_243] : memref<8x2x128xbf16, #tpu.memory_space<vmem>>, vector<1x2x128xbf16>
    tpu.vector_store %arg6[%470, %c0_242, %c0_243], %469 {strides = array<i32>} : memref<8x2x128xbf16, #tpu.memory_space<vmem>>, vector<1x2x128xbf16>,
    %c7_i32_244 = arith.constant 7 : i32
    %c7_i32_245 = arith.constant 7 : i32
    %472 = arith.subi %c7_i32_245, %c7_i32_244 : i32
    %473 = arith.index_cast %c7_i32_244 : i32 to index
    %c0_246 = arith.constant 0 : index
    %c0_247 = arith.constant 0 : index
    %474 = vector.load %arg1[%473, %c0_246, %c0_247] : memref<8x2x512xbf16, #tpu.memory_space<vmem>>, vector<1x2x512xbf16>
    %475 = vector.shape_cast %474 : vector<1x2x512xbf16> to vector<2x512xbf16>
    %476 = arith.extf %475 : vector<2x512xbf16> to vector<2x512xf32>
    %c0_248 = arith.constant 0 : index
    %c0_249 = arith.constant 0 : index
    %477 = vector.load %arg7[%c0_248, %c0_249] : memref<2x128xf32, #tpu.memory_space<vmem>>, vector<2x128xf32>
    %478 = arith.truncf %477 : vector<2x128xf32> to vector<2x128xbf16>
    %c0_250 = arith.constant 0 : index
    %c0_251 = arith.constant 0 : index
    %c0_252 = arith.constant 0 : index
    %479 = vector.load %arg3[%c0_250, %c0_251, %c0_252] : memref<1x128x512xbf16, #tpu.memory_space<vmem>>, vector<1x128x512xbf16>
    %480 = vector.shape_cast %479 : vector<1x128x512xbf16> to vector<128x512xbf16>
    %cst_253 = arith.constant dense<0.000000e+00> : vector<2x512xf32>
    %481 = tpu.matmul %478, %480, %cst_253 {dimension_numbers = #tpu.dot_dimension_numbers<[1], [0], [0], [1], [0, 0, 1, 1], [], []>} : vector<2x128xbf16>, vector<128x512xbf16>, vector<2x512xf32> -> vector<2x512xf32>
    %482 = arith.addf %476, %481 : vector<2x512xf32>
    %483 = arith.index_cast %472 : i32 to index
    %c0_254 = arith.constant 0 : index
    %c0_255 = arith.constant 0 : index
    %484 = vector.load %arg2[%483, %c0_254, %c0_255] : memref<8x2x512xbf16, #tpu.memory_space<vmem>>, vector<1x2x512xbf16>
    %485 = vector.shape_cast %484 : vector<1x2x512xbf16> to vector<2x512xbf16>
    %486 = arith.extf %485 : vector<2x512xbf16> to vector<2x512xf32>
    %c0_256 = arith.constant 0 : index
    %c0_257 = arith.constant 0 : index
    %487 = vector.load %arg9[%c0_256, %c0_257] : memref<2x128xf32, #tpu.memory_space<vmem>>, vector<2x128xf32>
    %488 = arith.truncf %487 : vector<2x128xf32> to vector<2x128xbf16>
    %c0_258 = arith.constant 0 : index
    %c0_259 = arith.constant 0 : index
    %c0_260 = arith.constant 0 : index
    %489 = vector.load %arg4[%c0_258, %c0_259, %c0_260] : memref<1x128x512xbf16, #tpu.memory_space<vmem>>, vector<1x128x512xbf16>
    %490 = vector.shape_cast %489 : vector<1x128x512xbf16> to vector<128x512xbf16>
    %cst_261 = arith.constant dense<0.000000e+00> : vector<2x512xf32>
    %491 = tpu.matmul %488, %490, %cst_261 {dimension_numbers = #tpu.dot_dimension_numbers<[1], [0], [0], [1], [0, 0, 1, 1], [], []>} : vector<2x128xbf16>, vector<128x512xbf16>, vector<2x512xf32> -> vector<2x512xf32>
    %492 = arith.addf %486, %491 : vector<2x512xf32>
    %c0_262 = arith.constant 0 : index
    %c0_263 = arith.constant 0 : index
    %493 = vector.load %arg8[%c0_262, %c0_263] : memref<2x128xf32, #tpu.memory_space<vmem>>, vector<2x128xf32>
    %494 = vector.extract_strided_slice %482 {offsets = [0, 0], sizes = [2, 384], strides = [1, 1]} : vector<2x512xf32> to vector<2x384xf32>
    %495 = arith.negf %494 : vector<2x384xf32>
    %496 = math.exp %495 : vector<2x384xf32>
    %cst_264 = arith.constant 1.000000e+00 : f32
    %497 = vector.broadcast %cst_264 : f32 to vector<2x384xf32>
    %498 = arith.addf %497, %496 : vector<2x384xf32>
    %499 = arith.divf %497, %498 : vector<2x384xf32>
    %500 = vector.extract_strided_slice %499 {offsets = [0, 0], sizes = [2, 128], strides = [1, 1]} : vector<2x384xf32> to vector<2x128xf32>
    %501 = vector.extract_strided_slice %499 {offsets = [0, 128], sizes = [2, 128], strides = [1, 1]} : vector<2x384xf32> to vector<2x128xf32>
    %502 = vector.extract_strided_slice %499 {offsets = [0, 256], sizes = [2, 128], strides = [1, 1]} : vector<2x384xf32> to vector<2x128xf32>
    %503 = vector.extract_strided_slice %482 {offsets = [0, 384], sizes = [2, 128], strides = [1, 1]} : vector<2x512xf32> to vector<2x128xf32>
    %504 = math.tanh %503 : vector<2x128xf32>
    %505 = arith.mulf %501, %493 : vector<2x128xf32>
    %506 = arith.mulf %500, %504 : vector<2x128xf32>
    %507 = arith.addf %505, %506 : vector<2x128xf32>
    %508 = math.tanh %507 : vector<2x128xf32>
    %509 = arith.mulf %502, %508 : vector<2x128xf32>
    %c0_265 = arith.constant 0 : index
    %c0_266 = arith.constant 0 : index
    %510 = vector.load %arg10[%c0_265, %c0_266] : memref<2x128xf32, #tpu.memory_space<vmem>>, vector<2x128xf32>
    %511 = vector.extract_strided_slice %492 {offsets = [0, 0], sizes = [2, 384], strides = [1, 1]} : vector<2x512xf32> to vector<2x384xf32>
    %512 = arith.negf %511 : vector<2x384xf32>
    %513 = math.exp %512 : vector<2x384xf32>
    %cst_267 = arith.constant 1.000000e+00 : f32
    %514 = vector.broadcast %cst_267 : f32 to vector<2x384xf32>
    %515 = arith.addf %514, %513 : vector<2x384xf32>
    %516 = arith.divf %514, %515 : vector<2x384xf32>
    %517 = vector.extract_strided_slice %516 {offsets = [0, 0], sizes = [2, 128], strides = [1, 1]} : vector<2x384xf32> to vector<2x128xf32>
    %518 = vector.extract_strided_slice %516 {offsets = [0, 128], sizes = [2, 128], strides = [1, 1]} : vector<2x384xf32> to vector<2x128xf32>
    %519 = vector.extract_strided_slice %516 {offsets = [0, 256], sizes = [2, 128], strides = [1, 1]} : vector<2x384xf32> to vector<2x128xf32>
    %520 = vector.extract_strided_slice %492 {offsets = [0, 384], sizes = [2, 128], strides = [1, 1]} : vector<2x512xf32> to vector<2x128xf32>
    %521 = math.tanh %520 : vector<2x128xf32>
    %522 = arith.mulf %518, %510 : vector<2x128xf32>
    %523 = arith.mulf %517, %521 : vector<2x128xf32>
    %524 = arith.addf %522, %523 : vector<2x128xf32>
    %525 = math.tanh %524 : vector<2x128xf32>
    %526 = arith.mulf %519, %525 : vector<2x128xf32>
    %c0_268 = arith.constant 0 : index
    %c0_269 = arith.constant 0 : index
    %527 = vector.load %arg7[%c0_268, %c0_269] : memref<2x128xf32, #tpu.memory_space<vmem>>, vector<2x128xf32>
    tpu.vector_store %arg7[%c0_268, %c0_269], %509 {strides = array<i32>} : memref<2x128xf32, #tpu.memory_space<vmem>>, vector<2x128xf32>,
    %c0_270 = arith.constant 0 : index
    %c0_271 = arith.constant 0 : index
    %528 = vector.load %arg8[%c0_270, %c0_271] : memref<2x128xf32, #tpu.memory_space<vmem>>, vector<2x128xf32>
    tpu.vector_store %arg8[%c0_270, %c0_271], %507 {strides = array<i32>} : memref<2x128xf32, #tpu.memory_space<vmem>>, vector<2x128xf32>,
    %c0_272 = arith.constant 0 : index
    %c0_273 = arith.constant 0 : index
    %529 = vector.load %arg9[%c0_272, %c0_273] : memref<2x128xf32, #tpu.memory_space<vmem>>, vector<2x128xf32>
    tpu.vector_store %arg9[%c0_272, %c0_273], %526 {strides = array<i32>} : memref<2x128xf32, #tpu.memory_space<vmem>>, vector<2x128xf32>,
    %c0_274 = arith.constant 0 : index
    %c0_275 = arith.constant 0 : index
    %530 = vector.load %arg10[%c0_274, %c0_275] : memref<2x128xf32, #tpu.memory_space<vmem>>, vector<2x128xf32>
    tpu.vector_store %arg10[%c0_274, %c0_275], %524 {strides = array<i32>} : memref<2x128xf32, #tpu.memory_space<vmem>>, vector<2x128xf32>,
    %531 = vector.shape_cast %509 : vector<2x128xf32> to vector<1x2x128xf32>
    %532 = arith.truncf %531 : vector<1x2x128xf32> to vector<1x2x128xbf16>
    %533 = arith.index_cast %c7_i32_244 : i32 to index
    %c0_276 = arith.constant 0 : index
    %c0_277 = arith.constant 0 : index
    %534 = vector.load %arg5[%533, %c0_276, %c0_277] : memref<8x2x128xbf16, #tpu.memory_space<vmem>>, vector<1x2x128xbf16>
    tpu.vector_store %arg5[%533, %c0_276, %c0_277], %532 {strides = array<i32>} : memref<8x2x128xbf16, #tpu.memory_space<vmem>>, vector<1x2x128xbf16>,
    %535 = vector.shape_cast %526 : vector<2x128xf32> to vector<1x2x128xf32>
    %536 = arith.truncf %535 : vector<1x2x128xf32> to vector<1x2x128xbf16>
    %537 = arith.index_cast %472 : i32 to index
    %c0_278 = arith.constant 0 : index
    %c0_279 = arith.constant 0 : index
    %538 = vector.load %arg6[%537, %c0_278, %c0_279] : memref<8x2x128xbf16, #tpu.memory_space<vmem>>, vector<1x2x128xbf16>
    tpu.vector_store %arg6[%537, %c0_278, %c0_279], %536 {strides = array<i32>} : memref<8x2x128xbf16, #tpu.memory_space<vmem>>, vector<1x2x128xbf16>,
    %c8_i32 = arith.constant 8 : i32
    return
  }
  func.func @transform_0(%arg0: i32) -> (i32, i32, i32) {
    %c0_i32 = arith.constant 0 : i32
    %c0_i32_0 = arith.constant 0 : i32
    %c0_i32_1 = arith.constant 0 : i32
    return %arg0, %c0_i32, %c0_i32_0 : i32, i32, i32
  }
  func.func @transform_1(%arg0: i32) -> (i32, i32, i32) {
    %c0_i32 = arith.constant 0 : i32
    %0 = arith.subi %c0_i32, %arg0 : i32
    %c0_i32_0 = arith.constant 0 : i32
    %c1_i32 = arith.constant 1 : i32
    %c0_i32_1 = arith.constant 0 : i32
    return %0, %c0_i32_0, %c1_i32 : i32, i32, i32
  }
  func.func @transform_2(%arg0: i32) -> (i32, i32, i32) {
    %c0_i32 = arith.constant 0 : i32
    %c0_i32_0 = arith.constant 0 : i32
    %c0_i32_1 = arith.constant 0 : i32
    %c0_i32_2 = arith.constant 0 : i32
    return %c0_i32, %c0_i32_0, %c0_i32_1 : i32, i32, i32
  }
  func.func @transform_3(%arg0: i32) -> (i32, i32, i32) {
    %c1_i32 = arith.constant 1 : i32
    %c0_i32 = arith.constant 0 : i32
    %c0_i32_0 = arith.constant 0 : i32
    %c0_i32_1 = arith.constant 0 : i32
    return %c1_i32, %c0_i32, %c0_i32_0 : i32, i32, i32
  }
  func.func @transform_4(%arg0: i32) -> (i32, i32, i32) {
    %c0_i32 = arith.constant 0 : i32
    %c0_i32_0 = arith.constant 0 : i32
    %c0_i32_1 = arith.constant 0 : i32
    return %arg0, %c0_i32, %c0_i32_0 : i32, i32, i32
  }
  func.func @transform_5(%arg0: i32) -> (i32, i32, i32) {
    %c0_i32 = arith.constant 0 : i32
    %0 = arith.subi %c0_i32, %arg0 : i32
    %c0_i32_0 = arith.constant 0 : i32
    %c0_i32_1 = arith.constant 0 : i32
    %c0_i32_2 = arith.constant 0 : i32
    return %0, %c0_i32_0, %c0_i32_1 : i32, i32, i32
  }
}

module attributes {stable_mosaic.version = 11 : i64} {
  func.func @_dual_matmul_bias_kernel(%arg0: i32, %arg1: memref<16x128xbf16, #tpu.memory_space<vmem>>, %arg2: memref<16x128xbf16, #tpu.memory_space<vmem>>, %arg3: memref<128x1024xbf16, #tpu.memory_space<vmem>>, %arg4: memref<128x1024xbf16, #tpu.memory_space<vmem>>, %arg5: memref<1x1024xf32, #tpu.memory_space<vmem>>, %arg6: memref<16x1024xbf16, #tpu.memory_space<vmem>>) attributes {dimension_semantics = [#tpu.dimension_semantics<parallel>], iteration_bounds = array<i64: 1>, scalar_prefetch = 0 : i64, scratch_operands = 0 : i64, tpu.core_type = #tpu.core_type<tc>, window_params = [{transform_indices = @transform_0, window_bounds = array<i64: 16, 128>}, {transform_indices = @transform_1, window_bounds = array<i64: 16, 128>}, {pipeline_mode = #tpu.pipeline_mode<synchronous>, transform_indices = @transform_2, window_bounds = array<i64: 128, 1024>}, {pipeline_mode = #tpu.pipeline_mode<synchronous>, transform_indices = @transform_3, window_bounds = array<i64: 128, 1024>}, {pipeline_mode = #tpu.pipeline_mode<synchronous>, transform_indices = @transform_4, window_bounds = array<i64: 1, 1024>}, {transform_indices = @transform_5, window_bounds = array<i64: 16, 1024>}]} {
    %c0 = arith.constant 0 : index
    %c0_0 = arith.constant 0 : index
    %0 = vector.load %arg1[%c0, %c0_0] : memref<16x128xbf16, #tpu.memory_space<vmem>>, vector<16x128xbf16>
    %c0_1 = arith.constant 0 : index
    %c0_2 = arith.constant 0 : index
    %1 = vector.load %arg3[%c0_1, %c0_2] : memref<128x1024xbf16, #tpu.memory_space<vmem>>, vector<128x1024xbf16>
    %cst = arith.constant dense<0.000000e+00> : vector<16x1024xf32>
    %2 = tpu.matmul %0, %1, %cst {dimension_numbers = #tpu.dot_dimension_numbers<[1], [0], [0], [1], [0, 0, 1, 1], [], []>} : vector<16x128xbf16>, vector<128x1024xbf16>, vector<16x1024xf32> -> vector<16x1024xf32>
    %c0_3 = arith.constant 0 : index
    %c0_4 = arith.constant 0 : index
    %3 = vector.load %arg2[%c0_3, %c0_4] : memref<16x128xbf16, #tpu.memory_space<vmem>>, vector<16x128xbf16>
    %c0_5 = arith.constant 0 : index
    %c0_6 = arith.constant 0 : index
    %4 = vector.load %arg4[%c0_5, %c0_6] : memref<128x1024xbf16, #tpu.memory_space<vmem>>, vector<128x1024xbf16>
    %cst_7 = arith.constant dense<0.000000e+00> : vector<16x1024xf32>
    %5 = tpu.matmul %3, %4, %cst_7 {dimension_numbers = #tpu.dot_dimension_numbers<[1], [0], [0], [1], [0, 0, 1, 1], [], []>} : vector<16x128xbf16>, vector<128x1024xbf16>, vector<16x1024xf32> -> vector<16x1024xf32>
    %6 = arith.addf %2, %5 : vector<16x1024xf32>
    %c0_8 = arith.constant 0 : index
    %c0_9 = arith.constant 0 : index
    %7 = vector.load %arg5[%c0_8, %c0_9] : memref<1x1024xf32, #tpu.memory_space<vmem>>, vector<1x1024xf32>
    %8 = vector.broadcast %7 : vector<1x1024xf32> to vector<16x1024xf32>
    %9 = arith.addf %6, %8 : vector<16x1024xf32>
    %10 = arith.truncf %9 : vector<16x1024xf32> to vector<16x1024xbf16>
    %c0_10 = arith.constant 0 : index
    %c0_11 = arith.constant 0 : index
    %11 = vector.load %arg6[%c0_10, %c0_11] : memref<16x1024xbf16, #tpu.memory_space<vmem>>, vector<16x1024xbf16>
    tpu.vector_store %arg6[%c0_10, %c0_11], %10 {strides = array<i32>} : memref<16x1024xbf16, #tpu.memory_space<vmem>>, vector<16x1024xbf16>,
    return
  }
  func.func @transform_0(%arg0: i32) -> (i32, i32) {
    %c0_i32 = arith.constant 0 : i32
    %c0_i32_0 = arith.constant 0 : i32
    return %arg0, %c0_i32 : i32, i32
  }
  func.func @transform_1(%arg0: i32) -> (i32, i32) {
    %c0_i32 = arith.constant 0 : i32
    %c0_i32_0 = arith.constant 0 : i32
    return %arg0, %c0_i32 : i32, i32
  }
  func.func @transform_2(%arg0: i32) -> (i32, i32) {
    %c0_i32 = arith.constant 0 : i32
    %c0_i32_0 = arith.constant 0 : i32
    %c0_i32_1 = arith.constant 0 : i32
    return %c0_i32, %c0_i32_0 : i32, i32
  }
  func.func @transform_3(%arg0: i32) -> (i32, i32) {
    %c0_i32 = arith.constant 0 : i32
    %c0_i32_0 = arith.constant 0 : i32
    %c0_i32_1 = arith.constant 0 : i32
    return %c0_i32, %c0_i32_0 : i32, i32
  }
  func.func @transform_4(%arg0: i32) -> (i32, i32) {
    %c0_i32 = arith.constant 0 : i32
    %c0_i32_0 = arith.constant 0 : i32
    %c0_i32_1 = arith.constant 0 : i32
    return %c0_i32, %c0_i32_0 : i32, i32
  }
  func.func @transform_5(%arg0: i32) -> (i32, i32) {
    %c0_i32 = arith.constant 0 : i32
    %c0_i32_0 = arith.constant 0 : i32
    return %arg0, %c0_i32 : i32, i32
  }
}

module attributes {stable_mosaic.version = 11 : i64} {
  func.func @_dual_matmul_bias_kernel(%arg0: i32, %arg1: memref<16x128xbf16, #tpu.memory_space<vmem>>, %arg2: memref<16x128xbf16, #tpu.memory_space<vmem>>, %arg3: memref<128x128xbf16, #tpu.memory_space<vmem>>, %arg4: memref<128x128xbf16, #tpu.memory_space<vmem>>, %arg5: memref<1x128xf32, #tpu.memory_space<vmem>>, %arg6: memref<16x128xf32, #tpu.memory_space<vmem>>) attributes {dimension_semantics = [#tpu.dimension_semantics<parallel>], iteration_bounds = array<i64: 1>, scalar_prefetch = 0 : i64, scratch_operands = 0 : i64, tpu.core_type = #tpu.core_type<tc>, window_params = [{transform_indices = @transform_0, window_bounds = array<i64: 16, 128>}, {transform_indices = @transform_1, window_bounds = array<i64: 16, 128>}, {pipeline_mode = #tpu.pipeline_mode<synchronous>, transform_indices = @transform_2, window_bounds = array<i64: 128, 128>}, {pipeline_mode = #tpu.pipeline_mode<synchronous>, transform_indices = @transform_3, window_bounds = array<i64: 128, 128>}, {pipeline_mode = #tpu.pipeline_mode<synchronous>, transform_indices = @transform_4, window_bounds = array<i64: 1, 128>}, {transform_indices = @transform_5, window_bounds = array<i64: 16, 128>}]} {
    %c0 = arith.constant 0 : index
    %c0_0 = arith.constant 0 : index
    %0 = vector.load %arg1[%c0, %c0_0] : memref<16x128xbf16, #tpu.memory_space<vmem>>, vector<16x128xbf16>
    %c0_1 = arith.constant 0 : index
    %c0_2 = arith.constant 0 : index
    %1 = vector.load %arg3[%c0_1, %c0_2] : memref<128x128xbf16, #tpu.memory_space<vmem>>, vector<128x128xbf16>
    %cst = arith.constant dense<0.000000e+00> : vector<16x128xf32>
    %2 = tpu.matmul %0, %1, %cst {dimension_numbers = #tpu.dot_dimension_numbers<[1], [0], [0], [1], [0, 0, 1, 1], [], []>} : vector<16x128xbf16>, vector<128x128xbf16>, vector<16x128xf32> -> vector<16x128xf32>
    %c0_3 = arith.constant 0 : index
    %c0_4 = arith.constant 0 : index
    %3 = vector.load %arg2[%c0_3, %c0_4] : memref<16x128xbf16, #tpu.memory_space<vmem>>, vector<16x128xbf16>
    %c0_5 = arith.constant 0 : index
    %c0_6 = arith.constant 0 : index
    %4 = vector.load %arg4[%c0_5, %c0_6] : memref<128x128xbf16, #tpu.memory_space<vmem>>, vector<128x128xbf16>
    %cst_7 = arith.constant dense<0.000000e+00> : vector<16x128xf32>
    %5 = tpu.matmul %3, %4, %cst_7 {dimension_numbers = #tpu.dot_dimension_numbers<[1], [0], [0], [1], [0, 0, 1, 1], [], []>} : vector<16x128xbf16>, vector<128x128xbf16>, vector<16x128xf32> -> vector<16x128xf32>
    %6 = arith.addf %2, %5 : vector<16x128xf32>
    %c0_8 = arith.constant 0 : index
    %c0_9 = arith.constant 0 : index
    %7 = vector.load %arg5[%c0_8, %c0_9] : memref<1x128xf32, #tpu.memory_space<vmem>>, vector<1x128xf32>
    %8 = vector.broadcast %7 : vector<1x128xf32> to vector<16x128xf32>
    %9 = arith.addf %6, %8 : vector<16x128xf32>
    %cst_10 = arith.constant dense<0xFF800000> : vector<16xf32>
    %10 = vector.multi_reduction <maximumf>, %9, %cst_10 [1] : vector<16x128xf32> to vector<16xf32>
    %11 = vector.shape_cast %10 : vector<16xf32> to vector<16x1xf32>
    %12 = vector.broadcast %11 : vector<16x1xf32> to vector<16x128xf32>
    %13 = arith.subf %9, %12 : vector<16x128xf32>
    %14 = math.exp %13 : vector<16x128xf32>
    %cst_11 = arith.constant dense<0.000000e+00> : vector<16xf32>
    %15 = vector.multi_reduction <add>, %14, %cst_11 [1] : vector<16x128xf32> to vector<16xf32>
    %16 = vector.shape_cast %15 : vector<16xf32> to vector<16x1xf32>
    %17 = math.log %16 : vector<16x1xf32>
    %18 = vector.broadcast %11 : vector<16x1xf32> to vector<16x128xf32>
    %19 = arith.subf %9, %18 : vector<16x128xf32>
    %20 = vector.broadcast %17 : vector<16x1xf32> to vector<16x128xf32>
    %21 = arith.subf %19, %20 : vector<16x128xf32>
    %c0_12 = arith.constant 0 : index
    %c0_13 = arith.constant 0 : index
    %22 = vector.load %arg6[%c0_12, %c0_13] : memref<16x128xf32, #tpu.memory_space<vmem>>, vector<16x128xf32>
    tpu.vector_store %arg6[%c0_12, %c0_13], %21 {strides = array<i32>} : memref<16x128xf32, #tpu.memory_space<vmem>>, vector<16x128xf32>,
    return
  }
  func.func @transform_0(%arg0: i32) -> (i32, i32) {
    %c0_i32 = arith.constant 0 : i32
    %c0_i32_0 = arith.constant 0 : i32
    return %arg0, %c0_i32 : i32, i32
  }
  func.func @transform_1(%arg0: i32) -> (i32, i32) {
    %c0_i32 = arith.constant 0 : i32
    %c0_i32_0 = arith.constant 0 : i32
    return %arg0, %c0_i32 : i32, i32
  }
  func.func @transform_2(%arg0: i32) -> (i32, i32) {
    %c0_i32 = arith.constant 0 : i32
    %c0_i32_0 = arith.constant 0 : i32
    %c0_i32_1 = arith.constant 0 : i32
    return %c0_i32, %c0_i32_0 : i32, i32
  }
  func.func @transform_3(%arg0: i32) -> (i32, i32) {
    %c0_i32 = arith.constant 0 : i32
    %c0_i32_0 = arith.constant 0 : i32
    %c0_i32_1 = arith.constant 0 : i32
    return %c0_i32, %c0_i32_0 : i32, i32
  }
  func.func @transform_4(%arg0: i32) -> (i32, i32) {
    %c0_i32 = arith.constant 0 : i32
    %c0_i32_0 = arith.constant 0 : i32
    %c0_i32_1 = arith.constant 0 : i32
    return %c0_i32, %c0_i32_0 : i32, i32
  }
  func.func @transform_5(%arg0: i32) -> (i32, i32) {
    %c0_i32 = arith.constant 0 : i32
    %c0_i32_0 = arith.constant 0 : i32
    return %arg0, %c0_i32 : i32, i32
  }
}

</mosaic_0001>

<bundles_post_ra>
// kernel: forward.9
= control target key start
LH: loop header
LB: loop body
LE: loop exit
PB: predicated region body
PF: predicated region fallthrough
CT: control target
= control target key end

     0   :  { %s870_s12 = smov 0   ;;  %s1004_s0 = inlined_call_operand.vmem [shape: bf16[2,32,8,128], index: 0, kind: input, shape index: {}]   ;;  %s1005_s1 = inlined_call_operand.vmem [shape: bf16[128,32], index: 1, kind: input, shape index: {}]   ;;  %s1006_s2 = inlined_call_operand.vmem [shape: f32[1,32], index: 2, kind: input, shape index: {}]   ;;  %s1007_s3 = inlined_call_operand.vmem [shape: bf16[2,16,8,32], index: 3, kind: output, shape index: {}]  }
   0x1 LB: > { %s684_s13 = sadd.s32 4294967295, %s848_s12   ;;  %p688_p0 = scmp.ge.s32.totalorder %s848_s12, 1  ;;  %s848_s12 = sphi %s870_s12, %s13_s12  }
   0x2   : > { %p137_p1 = scmp.lt.s32.totalorder %s848_s12, 3 }
   0x4   : > { %p138_p2 = pnand %p688_p0, %p137_p1 }
   0x5   : > { %v818_v0 = vld [vmem:[%s1005_s1] sm:$0xff] (!%p138_p2)   ;;  %p161_p3 = scmp.lt.s32.totalorder (!%p138_p2), %s684_s13, 1  ;;  %v819_v1 = vld [vmem:[%s1005_s1 + $0x8] sm:$0xff] (!%p138_p2)   ;;  %v820_v2 = vld [vmem:[%s1005_s1 + $0x10] sm:$0xff] (!%p138_p2)   ;;  %vm612_vm0 = vcmask (!%p138_p2), 257024  }
   0x6   : > { %141 = sbr.rel (%p138_p2) target bundleno = 291 (0x123), region = 32  ;;  %746 = vmatprep.subr.bf16.mxu0 (!%p138_p2), %v818_v0  ;;  %794 = vmatprep.subr.bf16.mxu1 (!%p138_p2), %v818_v0  ;;  %v821_v3 = vld [vmem:[%s1005_s1 + $0x18] sm:$0xff] (!%p138_p2)   ;;  %v822_v6 = vld [vmem:[%s1005_s1 + $0x20] sm:$0xff] (!%p138_p2)   ;;  %v823_v7 = vld [vmem:[%s1005_s1 + $0x28] sm:$0xff] (!%p138_p2)  }
   0x7   : > { %747 = vmatpush3.bf16.msra.mxu0 (!%p138_p2), %v818_v0  ;;  %802 = vmatpush3.bf16.msra.mxu1 (!%p138_p2), %v818_v0  ;;  %v824_v8 = vld [vmem:[%s1005_s1 + $0x30] sm:$0xff] (!%p138_p2)   ;;  %v825_v9 = vld [vmem:[%s1005_s1 + $0x38] sm:$0xff] (!%p138_p2)   ;;  %v929_v24 = vld [vmem:[%s1006_s2] ss:$0 sm:$0xff] (!%p138_p2) }
   0x8   : > { %748 = vmatprep.subr.bf16.mxu0 (!%p138_p2), %v819_v1  ;;  %795 = vmatprep.subr.bf16.mxu1 (!%p138_p2), %v819_v1 }
   0xb   : > { %749 = vmatpush3.bf16.msra.mxu0 (!%p138_p2), %v819_v1  ;;  %803 = vmatpush3.bf16.msra.mxu1 (!%p138_p2), %v819_v1 }
   0xc   : > { %750 = vmatprep.subr.bf16.mxu0 (!%p138_p2), %v820_v2  ;;  %796 = vmatprep.subr.bf16.mxu1 (!%p138_p2), %v820_v2 }
   0xd   : > { %s1009_s13 = smov (!%p161_p3, %s684_s13), 1 }
   0xe   : > { %s720_s20 = sshll.u32 %s1009_s13, 7  ;;  %s721_s9 = sshll.u32 %s1009_s13, 6 }
   0xf   : > { %s893_s23 = scalar_lea.vmem %s1004_s0, %s720_s20  ;;  %751 = vmatpush3.bf16.msra.mxu0 %v820_v2  ;;  %804 = vmatpush3.bf16.msra.mxu1 %v820_v2  ;;  %s945_s14 = scalar_lea.vmem %s1007_s3, %s721_s9 }
  0x10   : > { %v826_v4 = vld [vmem:[%s893_s23] sm:$0xff]   ;;  %752 = vmatprep.subr.bf16.mxu0 %v821_v3  ;;  %797 = vmatprep.subr.bf16.mxu1 %v821_v3  ;;  %v828_v10 = vld [vmem:[%s893_s23 + $0x8] sm:$0xff]   ;;  %v830_v12 = vld [vmem:[%s893_s23 + $0x10] sm:$0xff]  }
  0x11   : > { %v827_v5 = vld [vmem:[%s893_s23 + $0x40] sm:$0xff]   ;;  %762 = vmatprep.mubr.bf16.mxu0 %v826_v4  ;;  %v829_v11 = vld [vmem:[%s893_s23 + $0x48] sm:$0xff]   ;;  %v831_v13 = vld [vmem:[%s893_s23 + $0x50] sm:$0xff]  }
  0x12   : > { %778 = vmatprep.mubr.bf16.mxu1 %v827_v5  ;;  %v832_v14 = vld [vmem:[%s893_s23 + $0x18] sm:$0xff]   ;;  %v834_v16 = vld [vmem:[%s893_s23 + $0x20] sm:$0xff]   ;;  %v836_v18 = vld [vmem:[%s893_s23 + $0x28] sm:$0xff]  }
  0x13   : > { %753 = vmatpush3.bf16.msra.mxu0 %v821_v3  ;;  %805 = vmatpush3.bf16.msra.mxu1 %v821_v3  ;;  %v833_v15 = vld [vmem:[%s893_s23 + $0x58] sm:$0xff]   ;;  %v835_v17 = vld [vmem:[%s893_s23 + $0x60] sm:$0xff]   ;;  %v837_v19 = vld [vmem:[%s893_s23 + $0x68] sm:$0xff]  }
  0x14   : > { %754 = vmatprep.subr.bf16.mxu0 %v822_v6  ;;  %798 = vmatprep.subr.bf16.mxu1 %v822_v6  ;;  %v838_v20 = vld [vmem:[%s893_s23 + $0x30] sm:$0xff]   ;;  %v840_v22 = vld [vmem:[%s893_s23 + $0x38] sm:$0xff]  }
  0x15   : > { %v839_v21 = vld [vmem:[%s893_s23 + $0x70] sm:$0xff]   ;;  %v841_v23 = vld [vmem:[%s893_s23 + $0x78] sm:$0xff]  }
  0x17   : > { %755 = vmatpush3.bf16.msra.mxu0 %v822_v6  ;;  %806 = vmatpush3.bf16.msra.mxu1 %v822_v6 }
  0x18   : > { %756 = vmatprep.subr.bf16.mxu0 %v823_v7  ;;  %799 = vmatprep.subr.bf16.mxu1 %v823_v7 }
  0x1b   : > { %757 = vmatpush3.bf16.msra.mxu0 %v823_v7  ;;  %807 = vmatpush3.bf16.msra.mxu1 %v823_v7 }
  0x1c   : > { %758 = vmatprep.subr.bf16.mxu0 %v824_v8  ;;  %800 = vmatprep.subr.bf16.mxu1 %v824_v8 }
  0x1f   : > { %759 = vmatpush3.bf16.msra.mxu0 %v824_v8  ;;  %808 = vmatpush3.bf16.msra.mxu1 %v824_v8 }
  0x20   : > { %760 = vmatprep.subr.bf16.mxu0 %v825_v9  ;;  %801 = vmatprep.subr.bf16.mxu1 %v825_v9 }
  0x23   : > { %761 = vmatpush3.bf16.msra.mxu0 %v825_v9  ;;  %809 = vmatpush3.bf16.msra.mxu1 %v825_v9 }
  0x26   : > { %763 = vmatmul.mubr.bf16.vlgmr.msra.gmra.mrb[0].mxu0 %v828_v10  ;;  %779 = vmatmul.mubr.bf16.vlgmr.msra.gmra.mrb[0].mxu1 %v829_v11 }
  0x27   : > { %766 = vmatprep.mubr.bf16.mxu0 %v830_v12  ;;  %782 = vmatprep.mubr.bf16.mxu1 %v831_v13 }
  0x2e   : > { %767 = vmatmul.mubr.bf16.gmra.mrb[4].mxu0 %v832_v14  ;;  %783 = vmatmul.mubr.bf16.gmra.mrb[4].mxu1 %v833_v15 }
  0x2f   : > { %770 = vmatprep.mubr.bf16.mxu0 %v834_v16  ;;  %786 = vmatprep.mubr.bf16.mxu1 %v835_v17 }
  0x36   : > { %771 = vmatmul.mubr.bf16.gmra.mrb[8].mxu0 %v836_v18  ;;  %787 = vmatmul.mubr.bf16.gmra.mrb[8].mxu1 %v837_v19 }
  0x37   : > { %774 = vmatprep.mubr.bf16.mxu0 %v838_v20  ;;  %790 = vmatprep.mubr.bf16.mxu1 %v839_v21 }
  0x3e   : > { %775 = vmatmul.mubr.bf16.gmra.mrb[12].mxu0 %v840_v22  ;;  %791 = vmatmul.mubr.bf16.gmra.mrb[12].mxu1 %v841_v23 }
  0xf9   : > { %v764_v25 = vpop.f32.mrb[0].mxu0  ;;  %v780_v26 = vpop.f32.mrb[0].mxu1 }
  0xfa   : > { %v414_v27 = vadd.f32 %v764_v25, %v929_v24  ;;  %v478_v28 = vadd.f32 %v780_v26, %v929_v24  ;;  %v405_v29 = vpop.f32.mrb[1].mxu0  ;;  %v469_v30 = vpop.f32.mrb[1].mxu1 }
  0xfb   : > { %v406_v31 = vadd.f32 %v929_v24, %v405_v29  ;;  %v470_v32 = vadd.f32 %v929_v24, %v469_v30  ;;  %v765_v33 = vpop.f32.mrb[2].mxu0  ;;  %v781_v34 = vpop.f32.mrb[2].mxu1 }
  0xfc   : > { %v417_v35 = vadd.f32 %v765_v33, %v929_v24  ;;  %v481_v36 = vadd.f32 %v781_v34, %v929_v24  ;;  %v408_v37 = vpop.f32.mrb[3].mxu0  ;;  %v472_v38 = vpop.f32.mrb[3].mxu1  ;;  %v534_v41 = vmax.f32 %v414_v27, 0.0  ;;  %v550_v42 = vmax.f32 %v478_v28, 0.0 }
  0xfd   : > { %v409_v39 = vadd.f32 %v929_v24, %v408_v37  ;;  %v473_v40 = vadd.f32 %v929_v24, %v472_v38  ;;  %v532_v45 = vmax.f32 %v406_v31, 0.0  ;;  %v548_v46 = vmax.f32 %v470_v32, 0.0 }
  0xfe   : > { %v535_v43 = vmax.f32 %v417_v35, 0.0  ;;  %v551_v44 = vmax.f32 %v481_v36, 0.0 }
  0xff   : > { %v533_v47 = vmax.f32 %v409_v39, 0.0  ;;  %v549_v48 = vmax.f32 %v473_v40, 0.0 }
 0x100   : > { %v565_v49 = vadd.f32 %v535_v43, %v534_v41  ;;  %v573_v50 = vadd.f32 %v551_v44, %v550_v42 }
 0x101   : > { %v564_v51 = vadd.f32 %v533_v47, %v532_v45  ;;  %v572_v52 = vadd.f32 %v549_v48, %v548_v46  ;;  %v768_v53 = vpop.f32.mrb[4].mxu0  ;;  %v784_v54 = vpop.f32.mrb[4].mxu1 }
 0x102   : > { %v581_v55 = vmul.f32 0.5, %v565_v49  ;;  %v589_v56 = vmul.f32 0.5, %v573_v50  ;;  %v430_v57 = vadd.f32 %v768_v53, %v929_v24  ;;  %v494_v58 = vadd.f32 %v784_v54, %v929_v24  ;;  %v421_v59 = vpop.f32.mrb[5].mxu0  ;;  %v485_v60 = vpop.f32.mrb[5].mxu1 }
 0x103   : > { %v580_v61 = vmul.f32 0.5, %v564_v51  ;;  %v588_v62 = vmul.f32 0.5, %v572_v52  ;;  %v422_v63 = vadd.f32 %v929_v24, %v421_v59  ;;  %v486_v0 = vadd.f32 %v929_v24, %v485_v60  ;;  %v769_v1 = vpop.f32.mrb[6].mxu0  ;;  %v785_v2 = vpop.f32.mrb[6].mxu1 }
 0x104   : > { %v597_v3 = vpack.c.bf16 %v581_v55, %v581_v55  ;;  %v605_v4 = vpack.c.bf16 %v589_v56, %v589_v56  ;;  %v424_v5 = vpop.f32.mrb[7].mxu0  ;;  %v488_v6 = vpop.f32.mrb[7].mxu1  ;;  %v433_v9 = vadd.f32 %v769_v1, %v929_v24  ;;  %v497_v10 = vadd.f32 %v785_v2, %v929_v24 }
 0x105   : > { %v596_v7 = vpack.c.bf16 %v580_v61, %v580_v61  ;;  %v604_v8 = vpack.c.bf16 %v588_v62, %v588_v62  ;;  %v425_v11 = vadd.f32 %v929_v24, %v424_v5  ;;  %v489_v12 = vadd.f32 %v929_v24, %v488_v6 }
 0x106   : > { %614 = vst.msk [vmem:[%s945_s14 + $0x4] sm:$0xf] %vm612_vm0, %v597_v3  ;;  %622 = vst.msk [vmem:[%s945_s14 + $0x24] sm:$0xf] %vm612_vm0, %v605_v4  ;;  %v538_v13 = vmax.f32 %v430_v57, 0.0  ;;  %v554_v14 = vmax.f32 %v494_v58, 0.0 }
 0x107   : > { %613 = vst.msk [vmem:[%s945_s14] sm:$0xf] %vm612_vm0, %v596_v7  ;;  %621 = vst.msk [vmem:[%s945_s14 + $0x20] sm:$0xf] %vm612_vm0, %v604_v8  ;;  %v536_v15 = vmax.f32 %v422_v63, 0.0  ;;  %v552_v16 = vmax.f32 %v486_v0, 0.0 }
 0x108   : > { %v539_v17 = vmax.f32 %v433_v9, 0.0  ;;  %v555_v18 = vmax.f32 %v497_v10, 0.0  ;;  %v537_v19 = vmax.f32 %v425_v11, 0.0  ;;  %v553_v20 = vmax.f32 %v489_v12, 0.0 }
 0x109   : > { %v772_v21 = vpop.f32.mrb[8].mxu0  ;;  %v788_v22 = vpop.f32.mrb[8].mxu1 }
 0x10a   : > { %v567_v23 = vadd.f32 %v539_v17, %v538_v13  ;;  %v575_v25 = vadd.f32 %v555_v18, %v554_v14  ;;  %v566_v26 = vadd.f32 %v537_v19, %v536_v15  ;;  %v574_v27 = vadd.f32 %v553_v20, %v552_v16  ;;  %v437_v28 = vpop.f32.mrb[9].mxu0  ;;  %v501_v29 = vpop.f32.mrb[9].mxu1 }
 0x10b   : > { %v446_v30 = vadd.f32 %v772_v21, %v929_v24  ;;  %v510_v31 = vadd.f32 %v788_v22, %v929_v24  ;;  %v438_v32 = vadd.f32 %v929_v24, %v437_v28  ;;  %v502_v33 = vadd.f32 %v929_v24, %v501_v29  ;;  %v773_v34 = vpop.f32.mrb[10].mxu0  ;;  %v789_v35 = vpop.f32.mrb[10].mxu1 }
 0x10c   : > { %v583_v36 = vmul.f32 0.5, %v567_v23  ;;  %v591_v37 = vmul.f32 0.5, %v575_v25  ;;  %v582_v38 = vmul.f32 0.5, %v566_v26  ;;  %v590_v39 = vmul.f32 0.5, %v574_v27  ;;  %v440_v40 = vpop.f32.mrb[11].mxu0  ;;  %v504_v41 = vpop.f32.mrb[11].mxu1 }
 0x10d   : > { %v449_v46 = vadd.f32 %v773_v34, %v929_v24  ;;  %v513_v47 = vadd.f32 %v789_v35, %v929_v24  ;;  %v441_v48 = vadd.f32 %v929_v24, %v440_v40  ;;  %v505_v49 = vadd.f32 %v929_v24, %v504_v41 }
 0x10e   : > { %v599_v42 = vpack.c.bf16 %v583_v36, %v583_v36  ;;  %v607_v43 = vpack.c.bf16 %v591_v37, %v591_v37  ;;  %v598_v44 = vpack.c.bf16 %v582_v38, %v582_v38  ;;  %v606_v45 = vpack.c.bf16 %v590_v39, %v590_v39 }
 0x10f   : > { %v542_v50 = vmax.f32 %v446_v30, 0.0  ;;  %v558_v51 = vmax.f32 %v510_v31, 0.0  ;;  %v540_v52 = vmax.f32 %v438_v32, 0.0  ;;  %v556_v53 = vmax.f32 %v502_v33, 0.0 }
 0x110   : > { %616 = vst.msk [vmem:[%s945_s14 + $0xc] sm:$0xf] %vm612_vm0, %v599_v42  ;;  %624 = vst.msk [vmem:[%s945_s14 + $0x2c] sm:$0xf] %vm612_vm0, %v607_v43  ;;  %v543_v54 = vmax.f32 %v449_v46, 0.0  ;;  %v559_v55 = vmax.f32 %v513_v47, 0.0 }
 0x111   : > { %615 = vst.msk [vmem:[%s945_s14 + $0x8] sm:$0xf] %vm612_vm0, %v598_v44  ;;  %623 = vst.msk [vmem:[%s945_s14 + $0x28] sm:$0xf] %vm612_vm0, %v606_v45  ;;  %v541_v56 = vmax.f32 %v441_v48, 0.0  ;;  %v557_v57 = vmax.f32 %v505_v49, 0.0 }
 0x112   : > { %v776_v58 = vpop.f32.mrb[12].mxu0  ;;  %v792_v59 = vpop.f32.mrb[12].mxu1  ;;  %v569_v0 = vadd.f32 %v543_v54, %v542_v50  ;;  %v577_v1 = vadd.f32 %v559_v55, %v558_v51 }
 0x113   : > { %v462_v60 = vadd.f32 %v776_v58, %v929_v24  ;;  %v526_v61 = vadd.f32 %v792_v59, %v929_v24  ;;  %v453_v62 = vpop.f32.mrb[13].mxu0  ;;  %v517_v63 = vpop.f32.mrb[13].mxu1  ;;  %v568_v2 = vadd.f32 %v541_v56, %v540_v52  ;;  %v576_v3 = vadd.f32 %v557_v57, %v556_v53 }
 0x114   : > { %v777_v4 = vpop.f32.mrb[14].mxu0  ;;  %v793_v5 = vpop.f32.mrb[14].mxu1  ;;  %v454_v6 = vadd.f32 %v929_v24, %v453_v62  ;;  %v518_v7 = vadd.f32 %v929_v24, %v517_v63  ;;  %v585_v10 = vmul.f32 0.5, %v569_v0  ;;  %v593_v11 = vmul.f32 0.5, %v577_v1 }
 0x115   : > { %v456_v8 = vpop.f32.mrb[15].mxu0  ;;  %v520_v9 = vpop.f32.mrb[15].mxu1  ;;  %v584_v12 = vmul.f32 0.5, %v568_v2  ;;  %v592_v13 = vmul.f32 0.5, %v576_v3  ;;  %v546_v14 = vmax.f32 %v462_v60, 0.0  ;;  %v562_v15 = vmax.f32 %v526_v61, 0.0 }
 0x116   : > { %v465_v16 = vadd.f32 %v777_v4, %v929_v24  ;;  %v529_v17 = vadd.f32 %v793_v5, %v929_v24  ;;  %v601_v18 = vpack.c.bf16 %v585_v10, %v585_v10  ;;  %v609_v19 = vpack.c.bf16 %v593_v11, %v593_v11 }
 0x117   : > { %v600_v20 = vpack.c.bf16 %v584_v12, %v584_v12  ;;  %v608_v21 = vpack.c.bf16 %v592_v13, %v592_v13  ;;  %v457_v25 = vadd.f32 %v929_v24, %v456_v8  ;;  %v521_v26 = vadd.f32 %v929_v24, %v520_v9 }
 0x118   : > { %v547_v22 = vmax.f32 %v465_v16, 0.0  ;;  %v563_v23 = vmax.f32 %v529_v17, 0.0  ;;  %618 = vst.msk [vmem:[%s945_s14 + $0x14] sm:$0xf] %vm612_vm0, %v601_v18  ;;  %626 = vst.msk [vmem:[%s945_s14 + $0x34] sm:$0xf] %vm612_vm0, %v609_v19 }
 0x119   : > { %617 = vst.msk [vmem:[%s945_s14 + $0x10] sm:$0xf] %vm612_vm0, %v600_v20  ;;  %625 = vst.msk [vmem:[%s945_s14 + $0x30] sm:$0xf] %vm612_vm0, %v608_v21  ;;  %v544_v27 = vmax.f32 %v454_v6, 0.0  ;;  %v560_v28 = vmax.f32 %v518_v7, 0.0 }
 0x11a   : > { %v571_v29 = vadd.f32 %v547_v22, %v546_v14  ;;  %v579_v30 = vadd.f32 %v563_v23, %v562_v15  ;;  %v545_v31 = vmax.f32 %v457_v25, 0.0  ;;  %v561_v32 = vmax.f32 %v521_v26, 0.0 }
 0x11c   : > { %v587_v33 = vmul.f32 0.5, %v571_v29  ;;  %v595_v24 = vmul.f32 0.5, %v579_v30  ;;  %v570_v34 = vadd.f32 %v545_v31, %v544_v27  ;;  %v578_v35 = vadd.f32 %v561_v32, %v560_v28 }
 0x11e   : > { %v603_v36 = vpack.c.bf16 %v587_v33, %v587_v33  ;;  %v611_v37 = vpack.c.bf16 %v595_v24, %v595_v24  ;;  %v586_v38 = vmul.f32 0.5, %v570_v34  ;;  %v594_v39 = vmul.f32 0.5, %v578_v35 }
 0x120   : > { %620 = vst.msk [vmem:[%s945_s14 + $0x1c] sm:$0xf] %vm612_vm0, %v603_v36  ;;  %628 = vst.msk [vmem:[%s945_s14 + $0x3c] sm:$0xf] %vm612_vm0, %v611_v37  ;;  %v602_v40 = vpack.c.bf16 %v586_v38, %v586_v38  ;;  %v610_v41 = vpack.c.bf16 %v594_v39, %v594_v39 }
 0x122   : > { %619 = vst.msk [vmem:[%s945_s14 + $0x18] sm:$0xf] %vm612_vm0, %v602_v40  ;;  %627 = vst.msk [vmem:[%s945_s14 + $0x38] sm:$0xf] %vm612_vm0, %v610_v41 }
 0x123 PF: > { %s13_s12 = sadd.s32 1, %s848_s12  }
 0x124   : > { %p10_p4 = scmp.ge.s32.totalorder %s13_s12, 4  }
 0x126   :  { %12 = sbr.rel (!%p10_p4) target bundleno = 1 (0x1), region = 62 }

// kernel: forward.11
= control target key start
LH: loop header
LB: loop body
LE: loop exit
PB: predicated region body
PF: predicated region fallthrough
CT: control target
= control target key end

     0   :  { %s2604_s12 = smov 0   ;;  %s3128_s0 = inlined_call_operand.vmem [shape: bf16[2,10,10,64], index: 0, kind: input, shape index: {}]   ;;  %s3129_s1 = inlined_call_operand.vmem [shape: bf16[576,128], index: 1, kind: input, shape index: {}]   ;;  %s3130_s2 = inlined_call_operand.vmem [shape: f32[1,128], index: 2, kind: input, shape index: {}]   ;;  %s3131_s3 = inlined_call_operand.vmem [shape: bf16[2,4,8,128], index: 3, kind: output, shape index: {}]  }
   0x1 LB: > { %s2012_s13 = sadd.s32 4294967295, %s2582_s12   ;;  %p2016_p0 = scmp.ge.s32.totalorder %s2582_s12, 1  ;;  %s2582_s12 = sphi %s2604_s12, %s13_s12  }
   0x2   : > { %p137_p1 = scmp.lt.s32.totalorder %s2582_s12, 3 }
   0x4   : > { %p138_p2 = pnand %p2016_p0, %p137_p1 }
   0x5   : > { %v2528_v0 = vld [vmem:[%s3129_s1 + $0x20] sm:$0xff] (!%p138_p2)   ;;  %p161_p3 = scmp.lt.s32.totalorder (!%p138_p2), %s2012_s13, 1  ;;  %v2530_v2 = vld [vmem:[%s3129_s1 + $0x28] sm:$0xff] (!%p138_p2)   ;;  %v2532_v4 = vld [vmem:[%s3129_s1 + $0x30] sm:$0xff] (!%p138_p2)   ;;  %vm196_vm0 = vsmask.f32 (!%p138_p2), 3328 }
   0x6   : > { %141 = sbr.rel (%p138_p2) target bundleno = 347 (0x15b), region = 32  ;;  %v2529_v1 = vld [vmem:[%s3129_s1 + $0x80] sm:$0xff] (!%p138_p2)   ;;  %2303 = vmatprep.subr.bf16.mxu1 (!%p138_p2), %v2528_v0  ;;  %v2531_v3 = vld [vmem:[%s3129_s1 + $0x88] sm:$0xff] (!%p138_p2)   ;;  %v2533_v5 = vld [vmem:[%s3129_s1 + $0x90] sm:$0xff] (!%p138_p2)   ;;  %vm197_vm1 = vsmask.f32 (!%p138_p2), 7440 }
   0x7   : > { %2367 = vmatprep.subr.bf16.mxu0 (!%p138_p2), %v2529_v1  ;;  %2304 = vmatpush3.bf16.msra.mxu1 (!%p138_p2), %v2528_v0  ;;  %v2534_v6 = vld [vmem:[%s3129_s1 + $0x38] sm:$0xff] (!%p138_p2)   ;;  %v2665_v22 = vld [vmem:[%s3129_s1] sm:$0xff] (!%p138_p2)   ;;  %vm2682_vm2 = vmor (!%p138_p2), %vm196_vm0, %vm197_vm1  ;;  %vm355_vm3 = vcmask (!%p138_p2), 523264   ;;  %vm578_vm4 = vcmask (!%p138_p2), 1042432   ;;  %vm579_vm5 = vcmask (!%p138_p2), 1046532  }
   0x8   : > { %2368 = vmatpush3.bf16.msra.mxu0 (!%p138_p2), %v2529_v1  ;;  %2305 = vmatprep.subr.bf16.mxu1 (!%p138_p2), %v2530_v2  ;;  %v2535_v10 = vld [vmem:[%s3129_s1 + $0x98] sm:$0xff] (!%p138_p2)   ;;  %v2670_v23 = vld [vmem:[%s3129_s1 + $0xa0] sm:$0xff] (!%p138_p2)   ;;  %vm2843_vm6 = vmor (!%p138_p2), %vm578_vm4, %vm579_vm5 }
   0x9   : > { %2369 = vmatprep.subr.bf16.mxu0 (!%p138_p2), %v2531_v3 }
   0xb   : > { %2306 = vmatpush3.bf16.msra.mxu1 (!%p138_p2), %v2530_v2 }
   0xc   : > { %2370 = vmatpush3.bf16.msra.mxu0 (!%p138_p2), %v2531_v3  ;;  %2307 = vmatprep.subr.bf16.mxu1 (!%p138_p2), %v2532_v4 }
   0xd   : > { %s3137_s13 = smov (!%p161_p3, %s2012_s13), 1  ;;  %2371 = vmatprep.subr.bf16.mxu0 %v2533_v5 }
   0xe   : > { %s2519_s24 = smul.u32 80, %s3137_s13  ;;  %s2219_s18 = sshll.u32 %s3137_s13, 4 }
   0xf   : > { %2308 = vmatpush3.bf16.msra.mxu1 %v2532_v4  ;;  %s170_s21 = scalar_lea.vmem %s3131_s3, %s2219_s18 }
  0x10   : > { %s2636_s29 = scalar_lea.vmem %s3128_s0, %s2519_s24  ;;  %2372 = vmatpush3.bf16.msra.mxu0 %v2533_v5  ;;  %2309 = vmatprep.subr.bf16.mxu1 %v2534_v6 }
  0x11   : > { %v2642_v7 = vld [vmem:[%s2636_s29] sm:$0xf]  ;;  %v2645_v8 = vld [vmem:[%s2636_s29 + $0x8] sm:$0xf]  ;;  %v2648_v9 = vld [vmem:[%s2636_s29 + $0x4] sm:$0x1]  ;;  %2373 = vmatprep.subr.bf16.mxu0 %v2535_v10 }
  0x12   : > { %v2654_v11 = vld [vmem:[%s2636_s29 + $0xc] sm:$0x1]  ;;  %v200_v12 = vshrl.u32 %v2642_v7, 16  ;;  %v203_v13 = vshll.u32 %v2642_v7, 16  ;;  %v209_v14 = vshll.u32 %v2648_v9, 16  ;;  %v214_v15 = vshrl.u32 %v2645_v8, 16 }
  0x13   : > { %v217_v16 = vshll.u32 %v2645_v8, 16  ;;  %v223_v17 = vshll.u32 %v2654_v11, 16  ;;  %v2084_v26 = vld [vmem:[%s2636_s29 + $0x8] sm:$0xf]  ;;  %v2674_v27 = vld [vmem:[%s2636_s29 + $0xc] sm:$0x1]  ;;  %2310 = vmatpush3.bf16.msra.mxu1 %v2534_v6 }
  0x14   : > { %v202_v18 = vrot.slane %v200_v12, 4  ;;  %v205_v19 = vrot.slane %v203_v13, 5  ;;  %v211_v20 = vrot.slane %v209_v14, 5  ;;  %v216_v21 = vrot.slane %v214_v15, 4  ;;  %v2086_v29 = vld [vmem:[%s2636_s29 + $0x10] sm:$0xf]  ;;  %2374 = vmatpush3.bf16.msra.mxu0 %v2535_v10  ;;  %2319 = vmatprep.subr.bf16.mxu1 %v2665_v22 }
  0x15   : > { %v219_v24 = vrot.slane %v217_v16, 5  ;;  %v225_v25 = vrot.slane %v223_v17, 5  ;;  %v2678_v30 = vld [vmem:[%s2636_s29 + $0x14] sm:$0x1]  ;;  %v905_v31 = vshrl.u32 %v2084_v26, 16  ;;  %v908_v32 = vshll.u32 %v2084_v26, 16  ;;  %2383 = vmatprep.subr.bf16.mxu0 %v2670_v23 }
  0x16   : > { %v206_v28 = vor.u32 %v205_v19, %v202_v18  ;;  %v914_v35 = vshll.u32 %v2674_v27, 16  ;;  %v919_v36 = vshrl.u32 %v2086_v29, 16  ;;  %v922_v37 = vshll.u32 %v2086_v29, 16  ;;  %v2691_v45 = vld [vmem:[%s2636_s29 + $0x10] sm:$0xf] }
  0x17   : > { %v220_v34 = vor.u32 %v219_v24, %v216_v21  ;;  %v907_v39 = vrot.slane %v905_v31, 4  ;;  %v910_v40 = vrot.slane %v908_v32, 5  ;;  %v928_v41 = vshll.u32 %v2678_v30, 16  ;;  %v2696_v49 = vld [vmem:[%s2636_s29 + $0x18] sm:$0xf] }
  0x18   : > { %v207_v38 = vrot.slane %v206_v28, 4  ;;  %v921_v43 = vrot.slane %v919_v36, 4  ;;  %v924_v44 = vrot.slane %v922_v37, 5  ;;  %v916_v48 = vrot.slane %v914_v35, 5  ;;  %v2699_v50 = vld [vmem:[%s2636_s29 + $0x14] sm:$0x1] }
  0x19   : > { %v221_v42 = vrot.slane %v220_v34, 4  ;;  %v911_v47 = vor.u32 %v910_v40, %v907_v39  ;;  %v930_v53 = vrot.slane %v928_v41, 5  ;;  %v2704_v54 = vld [vmem:[%s2636_s29 + $0x1c] sm:$0x1]  ;;  %v228_v55 = vshrl.u32 %v2691_v45, 16  ;;  %v2538_v39 = vld [vmem:[%s3129_s1 + $0x8] sm:$0xff]  }
  0x1a   : > { %v212_v46 = vsel %vm2682_vm2, %v207_v38, %v211_v20  ;;  %v925_v52 = vor.u32 %v924_v44, %v921_v43  ;;  %v231_v58 = vshll.u32 %v2691_v45, 16  ;;  %v237_v59 = vshll.u32 %v2699_v50, 16  ;;  %v2088_v0 = vld [vmem:[%s2636_s29 + $0x18] sm:$0xf]  ;;  %v2717_v4 = vld [vmem:[%s2636_s29 + $0x1c] sm:$0x1] }
  0x1b   : > { %v226_v51 = vsel %vm2682_vm2, %v221_v42, %v225_v25  ;;  %v912_v57 = vrot.slane %v911_v47, 4  ;;  %v230_v61 = vrot.slane %v228_v55, 4  ;;  %v242_v62 = vshrl.u32 %v2696_v49, 16  ;;  %v2090_v5 = vld [vmem:[%s2636_s29 + $0x20] sm:$0xf] }
  0x1c   : > { %v2020_v56 = vcombine.low %v212_v46, %v226_v51  ;;  %v926_v60 = vrot.slane %v925_v52, 4  ;;  %v245_v63 = vshll.u32 %v2696_v49, 16  ;;  %v233_v2 = vrot.slane %v231_v58, 5  ;;  %v2723_v13 = vld [vmem:[%s2636_s29 + $0x24] sm:$0x1] }
  0x1d   : > { %v917_v1 = vsel %vm2682_vm2, %v912_v57, %v916_v48  ;;  %v251_v3 = vshll.u32 %v2704_v54, 16  ;;  %v244_v10 = vrot.slane %v242_v62, 4  ;;  %v239_v16 = vrot.slane %v237_v59, 5  ;;  %v2730_v35 = vld [vmem:[%s2636_s29 + $0x20] sm:$0xf] }
  0x1e   : > { %2311 = vmatprep.mubr.msk.bf16.mxu1 %vm355_vm3, %v2020_v56  ;;  %v931_v6 = vsel %vm2682_vm2, %v926_v60, %v930_v53  ;;  %v247_v12 = vrot.slane %v245_v63, 5  ;;  %v234_v15 = vor.u32 %v233_v2, %v230_v61  ;;  %v933_v19 = vshrl.u32 %v2088_v0, 16  ;;  %v2738_v40 = vld [vmem:[%s2636_s29 + $0x28] sm:$0xf]  ;;  %v2741_v41 = vld [vmem:[%s2636_s29 + $0x24] sm:$0x1] }
  0x1f   : > { %v2100_v14 = vcombine.low %v917_v1, %v931_v6  ;;  %v253_v17 = vrot.slane %v251_v3, 5  ;;  %v936_v20 = vshll.u32 %v2088_v0, 16  ;;  %v942_v21 = vshll.u32 %v2717_v4, 16  ;;  %v2746_v47 = vld [vmem:[%s2636_s29 + $0x2c] sm:$0x1] }
  0x20   : > { %v248_v18 = vor.u32 %v247_v12, %v244_v10  ;;  %v235_v24 = vrot.slane %v234_v15, 4  ;;  %v947_v25 = vshrl.u32 %v2090_v5, 16  ;;  %v950_v26 = vshll.u32 %v2090_v5, 16  ;;  %v2092_v55 = vld [vmem:[%s2636_s29 + $0x28] sm:$0xf]  ;;  %v2540_v10 = vld [vmem:[%s3129_s1 + $0x10] sm:$0xff]  }
  0x21   : > { %2375 = vmatprep.mubr.msk.bf16.mxu0 %vm355_vm3, %v2100_v14  ;;  %v956_v28 = vshll.u32 %v2723_v13, 16  ;;  %v1171_v29 = vrot.slane %v2674_v27, 5  ;;  %v935_v32 = vrot.slane %v933_v19, 4  ;;  %v938_v34 = vrot.slane %v936_v20, 5  ;;  %v2755_v60 = vld [vmem:[%s2636_s29 + $0x2c] sm:$0x1] }
  0x22   : > { %v249_v31 = vrot.slane %v248_v18, 4  ;;  %v240_v36 = vsel %vm2682_vm2, %v235_v24, %v239_v16  ;;  %v949_v37 = vrot.slane %v947_v25, 4  ;;  %v952_v38 = vrot.slane %v950_v26, 5  ;;  %v2094_v1 = vld [vmem:[%s2636_s29 + $0x30] sm:$0xf]  ;;  %v2539_v18 = vld [vmem:[%s3129_s1 + $0xa8] sm:$0xff]  }
  0x23   : > { %v939_v43 = vor.u32 %v938_v34, %v935_v32  ;;  %v944_v44 = vrot.slane %v942_v21, 5  ;;  %v958_v46 = vrot.slane %v956_v28, 5  ;;  %v256_v52 = vshrl.u32 %v2730_v35, 16  ;;  %v2767_v12 = vld [vmem:[%s2636_s29 + $0x34] sm:$0x1] }
  0x24   : > { %v254_v42 = vsel %vm2682_vm2, %v249_v31, %v253_v17  ;;  %v953_v51 = vor.u32 %v952_v38, %v949_v37  ;;  %v259_v53 = vshll.u32 %v2730_v35, 16  ;;  %v265_v57 = vshll.u32 %v2741_v41, 16  ;;  %v2776_v24 = vld [vmem:[%s2636_s29 + $0x30] sm:$0xf] }
  0x25   : > { %v2021_v48 = vcombine.low %v240_v36, %v254_v42  ;;  %v940_v56 = vrot.slane %v939_v43, 4  ;;  %v270_v58 = vshrl.u32 %v2738_v40, 16  ;;  %v273_v59 = vshll.u32 %v2738_v40, 16  ;;  %v2541_v38 = vld [vmem:[%s3129_s1 + $0xb0] sm:$0xff]  }
  0x26   : > { %v954_v61 = vrot.slane %v953_v51, 4  ;;  %v258_v62 = vrot.slane %v256_v52, 4  ;;  %v261_v63 = vrot.slane %v259_v53, 5  ;;  %v279_v0 = vshll.u32 %v2746_v47, 16  ;;  %v2784_v42 = vld [vmem:[%s2636_s29 + $0x34] sm:$0x1] }
  0x27   : > { %2312 = vmatmul.mubr.msk.bf16.vlgmr.msra.gmra.mrb[0].mxu1 %vm355_vm3, %v2021_v48  ;;  %v945_v2 = vsel %vm2682_vm2, %v940_v56, %v944_v44  ;;  %v267_v3 = vrot.slane %v265_v57, 5  ;;  %v272_v5 = vrot.slane %v270_v58, 4  ;;  %v275_v6 = vrot.slane %v273_v59, 5  ;;  %v2542_v51 = vld [vmem:[%s3129_s1 + $0x18] sm:$0xff]  }
  0x28   : > { %2320 = vmatpush3.bf16.msra.mxu1 %v2665_v22  ;;  %v959_v14 = vsel %vm2682_vm2, %v954_v61, %v958_v46  ;;  %v262_v15 = vor.u32 %v261_v63, %v258_v62  ;;  %v281_v16 = vrot.slane %v279_v0, 5  ;;  %v961_v22 = vshrl.u32 %v2092_v55, 16  ;;  %v2790_v46 = vld [vmem:[%s2636_s29 + $0x38] sm:$0xf]  ;;  %v2805_v63 = vld [vmem:[%s2636_s29 + $0x3c] sm:$0x1] }
  0x29   : > { %2321 = vmatprep.subr.bf16.mxu1 %v2538_v39  ;;  %v2101_v17 = vcombine.low %v945_v2, %v959_v14  ;;  %v276_v19 = vor.u32 %v275_v6, %v272_v5  ;;  %v964_v20 = vshll.u32 %v2092_v55, 16  ;;  %v970_v21 = vshll.u32 %v2755_v60, 16  ;;  %v2799_v55 = vld [vmem:[%s2636_s29 + $0x3c] sm:$0x1]  ;;  %v2096_v57 = vld [vmem:[%s2636_s29 + $0x38] sm:$0xf] }
  0x2a   : > { %v263_v25 = vrot.slane %v262_v15, 4  ;;  %v963_v26 = vrot.slane %v961_v22, 4  ;;  %v975_v28 = vshrl.u32 %v2094_v1, 16  ;;  %v978_v31 = vshll.u32 %v2094_v1, 16  ;;  %v2810_v0 = vld [vmem:[%s3129_s1 + $0x40] sm:$0xff]   ;;  %v2543_v15 = vld [vmem:[%s3129_s1 + $0xb8] sm:$0xff]  }
  0x2b   : > { %2376 = vmatmul.mubr.msk.bf16.vlgmr.msra.gmra.mrb[0].mxu0 %vm355_vm3, %v2101_v17  ;;  %v277_v32 = vrot.slane %v276_v19, 4  ;;  %v966_v34 = vrot.slane %v964_v20, 5  ;;  %v972_v36 = vrot.slane %v970_v21, 5  ;;  %v984_v37 = vshll.u32 %v2767_v12, 16  ;;  %v2098_v6 = vld [vmem:[%s2636_s29 + $0x40] sm:$0xf] }
  0x2c   : > { %2322 = vmatpush3.bf16.msra.mxu1 %v2538_v39  ;;  %2384 = vmatpush3.bf16.msra.mxu0 %v2670_v23  ;;  %v268_v39 = vsel %vm2682_vm2, %v263_v25, %v267_v3  ;;  %v977_v43 = vrot.slane %v975_v28, 4  ;;  %v980_v44 = vrot.slane %v978_v31, 5  ;;  %v284_v48 = vshrl.u32 %v2776_v24, 16  ;;  %v2816_v14 = vld [vmem:[%s2636_s29 + $0x44] sm:$0x1] }
  0x2d   : > { %2323 = vmatprep.subr.bf16.mxu1 %v2540_v10  ;;  %2385 = vmatprep.subr.bf16.mxu0 %v2539_v18  ;;  %v282_v52 = vsel %vm2682_vm2, %v277_v32, %v281_v16  ;;  %v967_v23 = vor.u32 %v966_v34, %v963_v26  ;;  %v986_v53 = vrot.slane %v984_v37, 5  ;;  %v287_v56 = vshll.u32 %v2776_v24, 16 }
  0x2e   : > { %v2022_v58 = vcombine.low %v268_v39, %v282_v52  ;;  %v981_v59 = vor.u32 %v980_v44, %v977_v43  ;;  %v286_v61 = vrot.slane %v284_v48, 4  ;;  %v293_v62 = vshll.u32 %v2784_v42, 16  ;;  %v2112_v43 = vld [vmem:[%s2636_s29 + $0x8] sm:$0xe] }
  0x2f   : > { %v968_v1 = vrot.slane %v967_v23, 4  ;;  %v289_v2 = vrot.slane %v287_v56, 5  ;;  %v298_v3 = vshrl.u32 %v2790_v46, 16  ;;  %v301_v5 = vshll.u32 %v2790_v46, 16 }
  0x30   : > { %2324 = vmatpush3.bf16.msra.mxu1 %v2540_v10  ;;  %2386 = vmatpush3.bf16.msra.mxu0 %v2539_v18  ;;  %v982_v16 = vrot.slane %v981_v59, 4  ;;  %v295_v22 = vrot.slane %v293_v62, 5  ;;  %v307_v17 = vshll.u32 %v2799_v55, 16  ;;  %v989_v19 = vshrl.u32 %v2096_v57, 16 }
  0x31   : > { %2315 = vmatprep.mubr.msk.bf16.mxu1 %vm355_vm3, %v2022_v58  ;;  %v973_v20 = vsel %vm2682_vm2, %v968_v1, %v972_v36  ;;  %2387 = vmatprep.subr.bf16.mxu0 %v2541_v38  ;;  %v290_v10 = vor.u32 %v289_v2, %v286_v61  ;;  %v300_v21 = vrot.slane %v298_v3, 4  ;;  %v303_v25 = vrot.slane %v301_v5, 5  ;;  %v2113_v36 = vld [vmem:[%s2636_s29 + $0x10] sm:$0xe]  ;;  %v2839_v58 = vld [vmem:[%s3129_s1 + $0xc0] sm:$0xff]  }
  0x32   : > { %2325 = vmatprep.subr.bf16.mxu1 %v2542_v51  ;;  %v987_v18 = vsel %vm2682_vm2, %v982_v16, %v986_v53  ;;  %v309_v26 = vrot.slane %v307_v17, 5  ;;  %v991_v28 = vrot.slane %v989_v19, 4  ;;  %v992_v31 = vshll.u32 %v2096_v57, 16  ;;  %v2114_v1 = vld [vmem:[%s2636_s29 + $0x18] sm:$0xe] }
  0x33   : > { %v2102_v32 = vcombine.low %v973_v20, %v987_v18  ;;  %v291_v34 = vrot.slane %v290_v10, 4  ;;  %v304_v37 = vor.u32 %v303_v25, %v300_v21  ;;  %v998_v39 = vshll.u32 %v2805_v63, 16  ;;  %v2117_v25 = vld [vmem:[%s2636_s29 + $0x30] sm:$0xe] }
  0x34   : > { %2326 = vmatpush3.bf16.msra.mxu1 %v2542_v51  ;;  %v994_v44 = vrot.slane %v992_v31, 5  ;;  %v1003_v48 = vshrl.u32 %v2098_v6, 16  ;;  %v1006_v52 = vshll.u32 %v2098_v6, 16  ;;  %v1012_v23 = vshll.u32 %v2816_v14, 16  ;;  %2388 = vmatpush3.bf16.msra.mxu0 %v2541_v38  ;;  %v2115_v6 = vld [vmem:[%s2636_s29 + $0x20] sm:$0xe] }
  0x35   : > { %2335 = vmatprep.subr.bf16.mxu1 %v2810_v0  ;;  %v1175_v53 = vrot.slane %v2678_v30, 5  ;;  %2379 = vmatprep.mubr.msk.bf16.mxu0 %vm355_vm3, %v2102_v32  ;;  %v296_v56 = vsel %vm2682_vm2, %v291_v34, %v295_v22  ;;  %v305_v51 = vrot.slane %v304_v37, 4  ;;  %v2120_v57 = vrot.slane %v2112_v43, 9  ;;  %v2118_v43 = vld [vmem:[%s2636_s29 + $0x38] sm:$0xe] }
  0x36   : > { %2389 = vmatprep.subr.bf16.mxu0 %v2543_v15  ;;  %v995_v59 = vor.u32 %v994_v44, %v991_v28  ;;  %v1000_v38 = vrot.slane %v998_v39, 5  ;;  %v1005_v61 = vrot.slane %v1003_v48, 4  ;;  %v1008_v62 = vrot.slane %v1006_v52, 5  ;;  %v554_v48 = vld [vmem:[%s2636_s29] sm:$0xe] }
  0x37   : > { %v310_v2 = vsel %vm2682_vm2, %v305_v51, %v309_v26  ;;  %v2032_v3 = vcombine.low %v2642_v7, %v2645_v8  ;;  %v2121_v5 = vrot.slane %v2113_v36, 9  ;;  %v1014_v19 = vrot.slane %v1012_v23, 5  ;;  %v2119_v36 = vld [vmem:[%s2636_s29 + $0x40] sm:$0xe]  ;;  %v555_v52 = vld [vmem:[%s2636_s29 + $0x8] sm:$0xe] }
  0x38   : > { %v2023_v16 = vcombine.low %v296_v56, %v310_v2  ;;  %v996_v22 = vrot.slane %v995_v59, 4  ;;  %v1009_v17 = vor.u32 %v1008_v62, %v1005_v61  ;;  %2390 = vmatpush3.bf16.msra.mxu0 %v2543_v15  ;;  %v583_v20 = vrot.slane %v2648_v9, 5  ;;  %v2551_v56 = vld [vmem:[%s3129_s1 + $0x50] sm:$0xff]  }
  0x39   : > { %v1179_v10 = vrot.slane %v2717_v4, 5  ;;  %v1172_v21 = vsel %vm2843_vm6, %v2120_v57, %v1171_v29  ;;  %v1176_v7 = vsel %vm2843_vm6, %v2121_v5, %v1175_v53  ;;  %2399 = vmatprep.subr.bf16.mxu0 %v2839_v58  ;;  %v1183_v8 = vrot.slane %v2723_v13, 5  ;;  %v2116_v4 = vld [vmem:[%s2636_s29 + $0x28] sm:$0xe] }
  0x3a   : > { %2316 = vmatmul.mubr.msk.bf16.gmra.mrb[4].mxu1 %vm355_vm3, %v2023_v16  ;;  %v1001_v15 = vsel %vm2682_vm2, %v996_v22, %v1000_v38  ;;  %v1010_v9 = vrot.slane %v1009_v17, 4  ;;  %v2122_v27 = vrot.slane %v2114_v1, 9  ;;  %v2123_v29 = vrot.slane %v2115_v6, 9  ;;  %v556_v38 = vld [vmem:[%s2636_s29 + $0x10] sm:$0xe] }
  0x3b   : > { %2327 = vmatprep.mubr.msk.bf16.mxu1 %vm355_vm3, %v2032_v3  ;;  %v587_v18 = vrot.slane %v2654_v11, 5  ;;  %v2128_v26 = vcombine.low %v1172_v21, %v1176_v7  ;;  %v1187_v28 = vrot.slane %v2755_v60, 5  ;;  %v2124_v32 = vrot.slane %v2116_v4, 9  ;;  %v2548_v11 = vld [vmem:[%s3129_s1 + $0x48] sm:$0xff]   ;;  %v557_v1 = vld [vmem:[%s2636_s29 + $0x18] sm:$0xe] }
  0x3c   : > { %v1015_v13 = vsel %vm2682_vm2, %v1010_v9, %v1014_v19  ;;  %v2125_v34 = vrot.slane %v2117_v25, 9  ;;  %v1191_v37 = vrot.slane %v2767_v12, 5  ;;  %v2033_v39 = vcombine.low %v2691_v45, %v2696_v49  ;;  %v2554_v3 = vld [vmem:[%s3129_s1 + $0x58] sm:$0xff]   ;;  %v558_v17 = vld [vmem:[%s2636_s29 + $0x20] sm:$0xe] }
  0x3d   : > { %v2103_v31 = vcombine.low %v1001_v15, %v1015_v13  ;;  %v1180_v44 = vsel %vm2843_vm6, %v2122_v27, %v1179_v10  ;;  %v1184_v60 = vsel %vm2843_vm6, %v2123_v29, %v1183_v8  ;;  %v2034_v12 = vcombine.low %v2730_v35, %v2738_v40  ;;  %v559_v19 = vld [vmem:[%s2636_s29 + $0x28] sm:$0xe]  ;;  %v2555_v10 = vld [vmem:[%s3129_s1 + $0xd8] sm:$0xff]   ;;  %v2556_v21 = vld [vmem:[%s3129_s1 + $0x60] sm:$0xff]  }
  0x3e   : > { %v2044_v45 = vrot.slane %v554_v48, 9  ;;  %v2045_v49 = vrot.slane %v555_v52, 9  ;;  %v591_v23 = vrot.slane %v2699_v50, 5  ;;  %v2129_v53 = vcombine.low %v1180_v44, %v1184_v60  ;;  %v560_v15 = vld [vmem:[%s2636_s29 + $0x30] sm:$0xe]  ;;  %v2561_v52 = vld [vmem:[%s3129_s1 + $0xe8] sm:$0xff]  }
  0x3f   : > { %2380 = vmatmul.mubr.msk.bf16.gmra.mrb[4].mxu0 %vm355_vm3, %v2103_v31  ;;  %v1188_v35 = vsel %vm2843_vm6, %v2124_v32, %v1187_v28  ;;  %v1192_v40 = vsel %vm2843_vm6, %v2125_v34, %v1191_v37  ;;  %v2126_v51 = vrot.slane %v2118_v43, 9  ;;  %v1195_v50 = vrot.slane %v2805_v63, 5  ;;  %v2549_v63 = vld [vmem:[%s3129_s1 + $0xc8] sm:$0xff]   ;;  %v561_v27 = vld [vmem:[%s2636_s29 + $0x38] sm:$0xe] }
  0x40   : > { %2391 = vmatprep.mubr.msk.bf16.mxu0 %vm355_vm3, %v2128_v26  ;;  %v2127_v57 = vrot.slane %v2119_v36, 9  ;;  %v1199_v59 = vrot.slane %v2816_v14, 5  ;;  %v584_v61 = vsel %vm2843_vm6, %v2044_v45, %v583_v20  ;;  %v588_v62 = vsel %vm2843_vm6, %v2045_v49, %v587_v18  ;;  %v2552_v20 = vld [vmem:[%s3129_s1 + $0xd0] sm:$0xff]   ;;  %v2558_v26 = vld [vmem:[%s3129_s1 + $0xe0] sm:$0xff]  }
  0x41   : > { %v2130_v2 = vcombine.low %v1188_v35, %v1192_v40  ;;  %v2035_v14 = vcombine.low %v2776_v24, %v2790_v46  ;;  %v599_v5 = vrot.slane %v2741_v41, 5  ;;  %v603_v6 = vrot.slane %v2746_v47, 5  ;;  %v2557_v29 = vld [vmem:[%s2636_s29 + $0x10] ss:$8 sps:$4 sm:$0xff]   ;;  %v2963_v37 = vld [vmem:[%s2636_s29 + $0x14] sm:$0x1] }
  0x42   : > { %2328 = vmatmul.mubr.msk.bf16.vlgmr.msra.gmra.mrb[0].mxu1 %vm355_vm3, %v2033_v39  ;;  %v2046_v16 = vrot.slane %v556_v38, 9  ;;  %v2047_v22 = vrot.slane %v557_v1, 9  ;;  %v1196_v24 = vsel %vm2843_vm6, %v2126_v51, %v1195_v50  ;;  %v1200_v41 = vsel %vm2843_vm6, %v2127_v57, %v1199_v59  ;;  %v2160_v34 = vld [vmem:[%s2636_s29 + $0x10] sm:$0xf]  ;;  %v2162_v39 = vld [vmem:[%s2636_s29 + $0x18] sm:$0xf] }
  0x43   : > { %2336 = vmatpush3.bf16.msra.mxu1 %v2810_v0  ;;  %2331 = vmatprep.mubr.msk.bf16.mxu1 %vm355_vm3, %v2034_v12  ;;  %v595_v0 = vrot.slane %v2704_v54, 5  ;;  %v2052_v54 = vcombine.low %v584_v61, %v588_v62  ;;  %v2048_v46 = vrot.slane %v558_v17, 9  ;;  %v2049_v47 = vrot.slane %v559_v19, 9  ;;  %v2562_v45 = vld [vmem:[%s3129_s1 + $0x70] sm:$0xff]   ;;  %v2164_v61 = vld [vmem:[%s2636_s29 + $0x20] sm:$0xf] }
  0x44   : > { %2337 = vmatprep.subr.bf16.mxu1 %v2548_v11  ;;  %v592_v7 = vsel %vm2843_vm6, %v2046_v16, %v591_v23  ;;  %v607_v18 = vrot.slane %v2784_v42, 5  ;;  %v611_v13 = vrot.slane %v2799_v55, 5  ;;  %v2050_v31 = vrot.slane %v560_v15, 9  ;;  %v2560_v42 = vld [vmem:[%s3129_s1 + $0x68] sm:$0xff]   ;;  %v2563_v35 = vld [vmem:[%s2636_s29 + $0x30] ss:$8 sps:$4 sm:$0xff]  }
  0x45   : > { %v596_v8 = vsel %vm2843_vm6, %v2047_v22, %v595_v0  ;;  %v600_v9 = vsel %vm2843_vm6, %v2048_v46, %v599_v5  ;;  %v604_v4 = vsel %vm2843_vm6, %v2049_v47, %v603_v6  ;;  %v2051_v32 = vrot.slane %v561_v27, 9  ;;  %v2559_v55 = vld [vmem:[%s2636_s29 + $0x20] ss:$8 sps:$4 sm:$0xff]   ;;  %v2566_v1 = vld [vmem:[%s3129_s1 + $0x78] sm:$0xff]   ;;  %v2168_v27 = vld [vmem:[%s2636_s29 + $0x30] sm:$0xf] }
  0x46   : > { %v2053_v25 = vcombine.low %v592_v7, %v596_v8  ;;  %v2054_v28 = vcombine.low %v600_v9, %v604_v4  ;;  %v1493_v43 = vshrl.u32 %v2160_v34, 16  ;;  %v1496_v36 = vshll.u32 %v2160_v34, 16  ;;  %v2568_v50 = vld [vmem:[%s2636_s29 + $0x8] ss:$8 sps:$4 sm:$0xff]   ;;  %v2567_v7 = vld [vmem:[%s3129_s1 + $0xf8] sm:$0xff]   ;;  %v3018_v8 = vld [vmem:[%s3129_s1 + $0x100] sm:$0xff]  }
  0x47   : > { %2392 = vmatmul.mubr.msk.bf16.vlgmr.msra.gmra.mrb[0].mxu0 %vm355_vm3, %v2129_v53  ;;  %2338 = vmatpush3.bf16.msra.mxu1 %v2548_v11  ;;  %v2969_v11 = vld [vmem:[%s2636_s29 + $0x1c] sm:$0x1]  ;;  %v1502_v44 = vshll.u32 %v2963_v37, 16  ;;  %v1507_v60 = vshrl.u32 %v2162_v39, 16  ;;  %v1510_v12 = vshll.u32 %v2162_v39, 16  ;;  %v608_v49 = vsel %vm2843_vm6, %v2050_v31, %v607_v18 }
  0x48   : > { %2400 = vmatpush3.bf16.msra.mxu0 %v2839_v58  ;;  %2339 = vmatprep.subr.bf16.mxu1 %v2551_v56  ;;  %v2131_v58 = vcombine.low %v1196_v24, %v1200_v41  ;;  %v1516_v48 = vshll.u32 %v2969_v11, 16  ;;  %v612_v23 = vsel %vm2843_vm6, %v2051_v32, %v611_v13  ;;  %v1495_v53 = vrot.slane %v1493_v43, 4  ;;  %v2564_v24 = vld [vmem:[%s3129_s1 + $0xf0] sm:$0xff]   ;;  %v2570_v18 = vld [vmem:[%s2636_s29 + $0x18] ss:$8 sps:$4 sm:$0xff]  }
  0x49   : > { %2401 = vmatprep.subr.bf16.mxu0 %v2549_v63  ;;  %2395 = vmatprep.mubr.msk.bf16.mxu0 %vm355_vm3, %v2130_v2  ;;  %v1509_v40 = vrot.slane %v1507_v60, 4  ;;  %v1512_v51 = vrot.slane %v1510_v12, 5  ;;  %v1504_v59 = vrot.slane %v1502_v44, 5  ;;  %v2055_v62 = vcombine.low %v608_v49, %v612_v23  ;;  %v2166_v2 = vld [vmem:[%s2636_s29 + $0x28] sm:$0xf] }
  0x4a   : > { %2332 = vmatmul.mubr.msk.bf16.gmra.mrb[4].mxu1 %vm355_vm3, %v2035_v14  ;;  %v1518_v38 = vrot.slane %v1516_v48, 5  ;;  %v2996_v14 = vld [vmem:[%s2636_s29 + $0x2c] sm:$0x1]  ;;  %v1521_v5 = vshrl.u32 %v2164_v61, 16  ;;  %v1524_v6 = vshll.u32 %v2164_v61, 16  ;;  %v1535_v22 = vshrl.u32 %v2166_v2, 16 }
  0x4b   : > { %2340 = vmatpush3.bf16.msra.mxu1 %v2551_v56  ;;  %2343 = vmatprep.mubr.msk.bf16.mxu1 %vm355_vm3, %v2052_v54  ;;  %v1498_v56 = vrot.slane %v1496_v36, 5  ;;  %v1513_v0 = vor.u32 %v1512_v51, %v1509_v40  ;;  %v1538_v17 = vshll.u32 %v2166_v2, 16  ;;  %v1544_v19 = vshll.u32 %v2996_v14, 16  ;;  %v2572_v34 = vld [vmem:[%s2636_s29 + $0x28] ss:$8 sps:$4 sm:$0xff]  }
  0x4c   : > { %2402 = vmatpush3.bf16.msra.mxu0 %v2549_v63  ;;  %2341 = vmatprep.subr.bf16.mxu1 %v2554_v3  ;;  %v2992_v63 = vld [vmem:[%s2636_s29 + $0x24] sm:$0x1]  ;;  %v1523_v46 = vrot.slane %v1521_v5, 4  ;;  %v1526_v47 = vrot.slane %v1524_v6, 5  ;;  %v1549_v31 = vshrl.u32 %v2168_v27, 16  ;;  %v1552_v32 = vshll.u32 %v2168_v27, 16 }
  0x4d   : > { %2403 = vmatprep.subr.bf16.mxu0 %v2552_v20  ;;  %v1499_v57 = vor.u32 %v1498_v56, %v1495_v53  ;;  %v1530_v54 = vshll.u32 %v2992_v63, 16  ;;  %v1514_v16 = vrot.slane %v1513_v0, 4  ;;  %v1546_v4 = vrot.slane %v1544_v19, 5  ;;  %v3041_v53 = vld [vmem:[%s3129_s1 + $0x108] sm:$0xff]  }
  0x4e   : > { %v1527_v15 = vor.u32 %v1526_v47, %v1523_v46  ;;  %v1551_v44 = vrot.slane %v1549_v31, 4  ;;  %v1554_v60 = vrot.slane %v1552_v32, 5  ;;  %v1759_v40 = vrot.slane %v2963_v37, 5  ;;  %v2193_v31 = vld [vmem:[%s2636_s29 + $0x38] sm:$0xe] }
  0x4f   : > { %2396 = vmatmul.mubr.msk.bf16.gmra.mrb[4].mxu0 %vm355_vm3, %v2131_v58  ;;  %2342 = vmatpush3.bf16.msra.mxu1 %v2554_v3  ;;  %v1500_v3 = vrot.slane %v1499_v57, 4  ;;  %v1519_v58 = vsel %vm2682_vm2, %v1514_v16, %v1518_v38  ;;  %v1532_v9 = vrot.slane %v1530_v54, 5  ;;  %v2172_v57 = vld [vmem:[%s2636_s29 + $0x40] sm:$0xf]  ;;  %v2174_v38 = vld [vmem:[%s2636_s29 + $0x48] sm:$0xf] }
  0x50   : > { %2404 = vmatpush3.bf16.msra.mxu0 %v2552_v20  ;;  %2351 = vmatprep.subr.bf16.mxu1 %v2556_v21  ;;  %v2565_v20 = vld [vmem:[%s2636_s29 + $0x40] ss:$8 sps:$4 sm:$0xff]   ;;  %v1555_v56 = vor.u32 %v1554_v60, %v1551_v44  ;;  %v1580_v0 = vshll.u32 %v2172_v57, 16  ;;  %v1594_v5 = vshll.u32 %v2174_v38, 16 }
  0x51   : > { %2405 = vmatprep.subr.bf16.mxu0 %v2555_v10  ;;  %2407 = vmatprep.mubr.msk.bf16.mxu0 %vm355_vm3, %v2557_v29  ;;  %v1505_v41 = vsel %vm2682_vm2, %v1500_v3, %v1504_v59  ;;  %v3022_v29 = vld [vmem:[%s2636_s29 + $0x34] sm:$0x1]  ;;  %v3047_v59 = vld [vmem:[%s2636_s29 + $0x44] sm:$0x1]  ;;  %v1591_v3 = vshrl.u32 %v2174_v38, 16 }
  0x52   : > { %2344 = vmatmul.mubr.msk.bf16.vlgmr.msra.gmra.mrb[0].mxu1 %vm355_vm3, %v2053_v25  ;;  %v2176_v25 = vcombine.low %v1505_v41, %v1519_v58  ;;  %v1556_v61 = vrot.slane %v1555_v56, 4  ;;  %v1586_v2 = vshll.u32 %v3047_v59, 16  ;;  %v2574_v16 = vld [vmem:[%s2636_s29 + $0x38] ss:$8 sps:$4 sm:$0xff]   ;;  %v2573_v41 = vld [vmem:[%s3129_s1 + $0x110] sm:$0xff]   ;;  %v1596_v47 = vrot.slane %v1594_v5, 5 }
  0x53   : > { %2352 = vmatpush3.bf16.msra.mxu1 %v2556_v21  ;;  %2347 = vmatprep.mubr.msk.bf16.mxu1 %vm355_vm3, %v2054_v28  ;;  %v1540_v21 = vrot.slane %v1538_v17, 5  ;;  %v3027_v28 = vld [vmem:[%s2636_s29 + $0x3c] sm:$0x1]  ;;  %v1582_v17 = vrot.slane %v1580_v0, 5  ;;  %v1593_v46 = vrot.slane %v1591_v3, 4 }
  0x54   : > { %2406 = vmatpush3.bf16.msra.mxu0 %v2555_v10  ;;  %2353 = vmatprep.subr.bf16.mxu1 %v2560_v42  ;;  %v1537_v10 = vrot.slane %v1535_v22, 4  ;;  %v1572_v12 = vshll.u32 %v3027_v28, 16  ;;  %v1588_v19 = vrot.slane %v1586_v2, 5  ;;  %v2188_v58 = vld [vmem:[%s2636_s29 + $0x10] sm:$0xe] }
  0x55   : > { %2415 = vmatprep.subr.bf16.mxu0 %v2558_v26  ;;  %v1597_v27 = vor.u32 %v1596_v47, %v1593_v46  ;;  %v2191_v44 = vld [vmem:[%s2636_s29 + $0x28] sm:$0xe]  ;;  %v2194_v60 = vld [vmem:[%s2636_s29 + $0x40] sm:$0xe] }
  0x56   : > { %v1541_v13 = vor.u32 %v1540_v21, %v1537_v10  ;;  %v2199_v56 = vrot.slane %v2191_v44, 9 }
  0x57   : > { %2408 = vmatmul.mubr.msk.bf16.vlgmr.msra.gmra.mrb[0].mxu0 %vm355_vm3, %v2559_v55  ;;  %2354 = vmatpush3.bf16.msra.mxu1 %v2560_v42  ;;  %v1528_v42 = vrot.slane %v1527_v15, 4  ;;  %v1558_v55 = vshll.u32 %v3022_v29, 16 }
  0x58   : > { %2416 = vmatpush3.bf16.msra.mxu0 %v2558_v26  ;;  %2355 = vmatprep.subr.bf16.mxu1 %v2562_v45  ;;  %v2170_v26 = vld [vmem:[%s2636_s29 + $0x38] sm:$0xf]  ;;  %v1542_v36 = vrot.slane %v1541_v13, 4 }
  0x59   : > { %2417 = vmatprep.subr.bf16.mxu0 %v2561_v52  ;;  %2411 = vmatprep.mubr.msk.bf16.mxu0 %vm355_vm3, %v2563_v35  ;;  %v1563_v39 = vshrl.u32 %v2170_v26, 16  ;;  %v1566_v43 = vshll.u32 %v2170_v26, 16  ;;  %v1533_v48 = vsel %vm2682_vm2, %v1528_v42, %v1532_v9  ;;  %v1574_v35 = vrot.slane %v1572_v12, 5  ;;  %v2189_v9 = vld [vmem:[%s2636_s29 + $0x18] sm:$0xe] }
  0x5a   : > { %2348 = vmatmul.mubr.msk.bf16.gmra.mrb[4].mxu1 %vm355_vm3, %v2055_v62  ;;  %v1547_v23 = vsel %vm2682_vm2, %v1542_v36, %v1546_v4  ;;  %v3052_v62 = vld [vmem:[%s2636_s29 + $0x4c] sm:$0x1]  ;;  %v2192_v4 = vld [vmem:[%s2636_s29 + $0x30] sm:$0xe]  ;;  %v2197_v13 = vrot.slane %v2189_v9, 9  ;;  %v1763_v26 = vrot.slane %v2969_v11, 5 }
  0x5b   : > { %2356 = vmatpush3.bf16.msra.mxu1 %v2562_v45  ;;  %2359 = vmatprep.mubr.msk.bf16.mxu1 %vm355_vm3, %v2568_v50  ;;  %v1565_v45 = vrot.slane %v1563_v39, 4  ;;  %v1568_v49 = vrot.slane %v1566_v43, 5  ;;  %v2177_v51 = vcombine.low %v1533_v48, %v1547_v23  ;;  %v1600_v6 = vshll.u32 %v3052_v62, 16  ;;  %v2190_v39 = vld [vmem:[%s2636_s29 + $0x20] sm:$0xe] }
  0x5c   : > { %2418 = vmatpush3.bf16.msra.mxu0 %v2561_v52  ;;  %2357 = vmatprep.subr.bf16.mxu1 %v2566_v1  ;;  %v1560_v52 = vrot.slane %v1558_v55, 5  ;;  %v1787_v15 = vrot.slane %v3052_v62, 5  ;;  %v2200_v42 = vrot.slane %v2192_v4, 9  ;;  %v2201_v55 = vrot.slane %v2193_v31, 9 }
  0x5d   : > { %2419 = vmatprep.subr.bf16.mxu0 %v2564_v24  ;;  %v1569_v50 = vor.u32 %v1568_v49, %v1565_v45  ;;  %v1598_v43 = vrot.slane %v1597_v27, 4  ;;  %v1764_v36 = vsel %vm2843_vm6, %v2197_v13, %v1763_v26  ;;  %v2195_v45 = vld [vmem:[%s2636_s29 + $0x48] sm:$0xe]  ;;  %v1767_v23 = vrot.slane %v2992_v63, 5 }
  0x5e   : > { %v1561_v54 = vsel %vm2682_vm2, %v1556_v61, %v1560_v52  ;;  %v2198_v52 = vrot.slane %v2190_v39, 9 }
  0x5f   : > { %2412 = vmatmul.mubr.msk.bf16.gmra.mrb[4].mxu0 %vm355_vm3, %v2565_v20  ;;  %2358 = vmatpush3.bf16.msra.mxu1 %v2566_v1  ;;  %v1577_v1 = vshrl.u32 %v2172_v57, 16  ;;  %v1570_v37 = vrot.slane %v1569_v50, 4  ;;  %v1602_v20 = vrot.slane %v1600_v6, 5  ;;  %v2202_v50 = vrot.slane %v2194_v60, 9 }
  0x60   : > { %2420 = vmatpush3.bf16.msra.mxu0 %v2564_v24  ;;  %2423 = vmatprep.mubr.msk.bf16.mxu0 %vm355_vm3, %v2176_v25  ;;  %v2575_v25 = vld [vmem:[%s3129_s1 + $0x118] sm:$0xff]   ;;  %v2203_v57 = vrot.slane %v2195_v45, 9 }
  0x61   : > { %2421 = vmatprep.subr.bf16.mxu0 %v2567_v7  ;;  %2447 = vmatprep.subr.bf16.mxu1 %v3018_v8  ;;  %v1579_v22 = vrot.slane %v1577_v1, 4  ;;  %v1575_v24 = vsel %vm2682_vm2, %v1570_v37, %v1574_v35  ;;  %v1603_v49 = vsel %vm2682_vm2, %v1598_v43, %v1602_v20 }
  0x62   : > { %2360 = vmatmul.mubr.msk.bf16.vlgmr.msra.gmra.mrb[0].mxu1 %vm355_vm3, %v2570_v18  ;;  %v2178_v10 = vcombine.low %v1561_v54, %v1575_v24  ;;  %v2196_v18 = vrot.slane %v2188_v58, 9  ;;  %v1788_v63 = vsel %vm2843_vm6, %v2203_v57, %v1787_v15  ;;  %v2216_v24 = vld [vmem:[%s3130_s2] ss:$0 sm:$0xff] }
  0x63   : > { %2451 = vmatpush3.bf16.msra.mxu1 %v3018_v8  ;;  %2363 = vmatprep.mubr.msk.bf16.mxu1 %vm355_vm3, %v2572_v34  ;;  %v1583_v21 = vor.u32 %v1582_v17, %v1579_v22  ;;  %v1775_v34 = vrot.slane %v3022_v29, 5 }
  0x64   : > { %2422 = vmatpush3.bf16.msra.mxu0 %v2567_v7  ;;  %2448 = vmatprep.subr.bf16.mxu1 %v3041_v53  ;;  %v1783_v7 = vrot.slane %v3047_v59, 5  ;;  %v1760_v11 = vsel %vm2843_vm6, %v2196_v18, %v1759_v40 }
  0x65   : > { %2431 = vmatprep.subr.bf16.mxu0 %v3018_v8  ;;  %v1584_v32 = vrot.slane %v1583_v21, 4  ;;  %v2204_v12 = vcombine.low %v1760_v11, %v1764_v36  ;;  %v1776_v48 = vsel %vm2843_vm6, %v2200_v42, %v1775_v34 }
  0x66   : > { %v1784_v33 = vsel %vm2843_vm6, %v2202_v50, %v1783_v7 }
  0x67   : > { %2424 = vmatmul.mubr.msk.bf16.vlgmr.msra.gmra.mrb[0].mxu0 %vm355_vm3, %v2177_v51  ;;  %2452 = vmatpush3.bf16.msra.mxu1 %v3041_v53  ;;  %v1589_v29 = vsel %vm2682_vm2, %v1584_v32, %v1588_v19  ;;  %v1771_v51 = vrot.slane %v2996_v14, 5  ;;  %v1768_v14 = vsel %vm2843_vm6, %v2198_v52, %v1767_v23  ;;  %v2207_v59 = vcombine.low %v1784_v33, %v1788_v63 }
  0x68   : > { %2432 = vmatpush3.bf16.msra.mxu0 %v3018_v8  ;;  %2427 = vmatprep.mubr.msk.bf16.mxu0 %vm355_vm3, %v2178_v10  ;;  %v1779_v8 = vrot.slane %v3027_v28, 5  ;;  %v2179_v35 = vcombine.low %v1589_v29, %v1603_v49 }
  0x69   : > { %2433 = vmatprep.subr.bf16.mxu0 %v3041_v53  ;;  %2449 = vmatprep.subr.bf16.mxu1 %v2573_v41 }
  0x6a   : > { %2364 = vmatmul.mubr.msk.bf16.gmra.mrb[4].mxu1 %vm355_vm3, %v2574_v16  ;;  %v1780_v28 = vsel %vm2843_vm6, %v2201_v55, %v1779_v8 }
  0x6b   : > { %2453 = vmatpush3.bf16.msra.mxu1 %v2573_v41  ;;  %v2206_v40 = vcombine.low %v1776_v48, %v1780_v28 }
  0x6c   : > { %2434 = vmatpush3.bf16.msra.mxu0 %v3041_v53  ;;  %2450 = vmatprep.subr.bf16.mxu1 %v2575_v25  ;;  %v1772_v53 = vsel %vm2843_vm6, %v2199_v56, %v1771_v51 }
  0x6d   : > { %2435 = vmatprep.subr.bf16.mxu0 %v2573_v41  ;;  %2443 = vmatprep.mubr.msk.bf16.mxu1 %vm355_vm3, %v2206_v40  ;;  %v2205_v38 = vcombine.low %v1768_v14, %v1772_v53 }
  0x6f   : > { %2428 = vmatmul.mubr.msk.bf16.gmra.mrb[4].mxu0 %vm355_vm3, %v2179_v35  ;;  %2454 = vmatpush3.bf16.msra.mxu1 %v2575_v25 }
  0x70   : > { %2436 = vmatpush3.bf16.msra.mxu0 %v2573_v41  ;;  %2439 = vmatprep.mubr.msk.bf16.mxu0 %vm355_vm3, %v2204_v12 }
  0x71   : > { %2437 = vmatprep.subr.bf16.mxu0 %v2575_v25 }
  0x72   : > { %2444 = vmatmul.mubr.msk.bf16.vlgmr.msra.gmra.mrb[8].mxu1 %vm355_vm3, %v2207_v59 }
  0x74   : > { %2438 = vmatpush3.bf16.msra.mxu0 %v2575_v25 }
  0x77   : > { %2440 = vmatmul.mubr.msk.bf16.vlgmr.msra.gmra.mrb[0].mxu0 %vm355_vm3, %v2205_v38 }
 0x135   : > { %v2361_v61 = vpop.f32.mrb[0].mxu1 }
 0x136   : > { %v849_v62 = vpop.f32.mrb[1].mxu1 }
 0x137   : > { %v2362_v1 = vpop.f32.mrb[2].mxu1 }
 0x138   : > { %v852_v0 = vpop.f32.mrb[3].mxu1 }
 0x13d   : > { %v2365_v2 = vpop.f32.mrb[4].mxu1 }
 0x13e   : > { %v865_v37 = vpop.f32.mrb[5].mxu1 }
 0x13f   : > { %v2366_v3 = vpop.f32.mrb[6].mxu1 }
 0x140   : > { %v868_v5 = vpop.f32.mrb[7].mxu1 }
 0x142   : > { %v2429_v6 = vpop.f32.mrb[4].mxu0 }
 0x143   : > { %v2459_v54 = vadd.f32 %v2429_v6, %v2365_v2  ;;  %v1710_v30 = vpop.f32.mrb[5].mxu0 }
 0x144   : > { %v2461_v16 = vadd.f32 %v1710_v30, %v865_v37  ;;  %v2430_v22 = vpop.f32.mrb[6].mxu0 }
 0x145   : > { %v2463_v17 = vadd.f32 %v2430_v22, %v2366_v3  ;;  %v1713_v19 = vpop.f32.mrb[7].mxu0  ;;  %v2445_v41 = vpop.f32.mrb[8].mxu1 }
 0x146   : > { %v2465_v46 = vadd.f32 %v1713_v19, %v868_v5  ;;  %v2460_v47 = vadd.f32 %v2459_v54, %v2445_v41  ;;  %v1895_v20 = vpop.f32.mrb[9].mxu1 }
 0x147   : > { %v2462_v58 = vadd.f32 %v2461_v16, %v1895_v20  ;;  %v2446_v10 = vpop.f32.mrb[10].mxu1 }
 0x148   : > { %v1931_v21 = vadd.f32 %v2460_v47, %v2216_v24  ;;  %v2464_v7 = vadd.f32 %v2463_v17, %v2446_v10  ;;  %v1898_v15 = vpop.f32.mrb[11].mxu1 }
 0x149   : > { %v1929_v9 = vadd.f32 %v2462_v58, %v2216_v24  ;;  %v2466_v4 = vadd.f32 %v2465_v46, %v1898_v15 }
 0x14a   : > { %v2441_v27 = vpop.f32.mrb[0].mxu0  ;;  %v1932_v25 = vadd.f32 %v2464_v7, %v2216_v24  ;;  %v1939_v31 = vmax.f32 %v1931_v21, 0.0 }
 0x14b   : > { %v2455_v18 = vadd.f32 %v2441_v27, %v2361_v61  ;;  %v1879_v13 = vpop.f32.mrb[1].mxu0  ;;  %v1930_v26 = vadd.f32 %v2466_v4, %v2216_v24  ;;  %v1937_v39 = vmax.f32 %v1929_v9, 0.0 }
 0x14c   : > { %v2456_v32 = vadd.f32 %v1879_v13, %v849_v62  ;;  %v2442_v42 = vpop.f32.mrb[2].mxu0  ;;  %v1940_v34 = vmax.f32 %v1932_v25, 0.0 }
 0x14d   : > { %v1927_v55 = vadd.f32 %v2455_v18, %v2216_v24  ;;  %v2457_v43 = vadd.f32 %v2442_v42, %v2362_v1  ;;  %v1882_v11 = vpop.f32.mrb[3].mxu0  ;;  %v1938_v36 = vmax.f32 %v1930_v26, 0.0 }
 0x14e   : > { %v1925_v8 = vadd.f32 %v2456_v32, %v2216_v24  ;;  %v1944_v44 = vadd.f32 %v1940_v34, %v1939_v31  ;;  %v2458_v60 = vadd.f32 %v1882_v11, %v852_v0 }
 0x14f   : > { %v1928_v29 = vadd.f32 %v2457_v43, %v2216_v24  ;;  %v1943_v12 = vadd.f32 %v1938_v36, %v1937_v39  ;;  %v1935_v45 = vmax.f32 %v1927_v55, 0.0 }
 0x150   : > { %v1948_v48 = vmul.f32 0.5, %v1944_v44  ;;  %v1926_v52 = vadd.f32 %v2458_v60, %v2216_v24  ;;  %v1933_v23 = vmax.f32 %v1925_v8, 0.0 }
 0x151   : > { %v1936_v49 = vmax.f32 %v1928_v29, 0.0  ;;  %v1947_v28 = vmul.f32 0.5, %v1943_v12 }
 0x152   : > { %v1934_v56 = vmax.f32 %v1926_v52, 0.0 }
 0x153   : > { %v1942_v35 = vadd.f32 %v1936_v49, %v1935_v45  ;;  %v2228_v40 = vpack.c.bf16 %v1948_v48, %v1947_v28 }
 0x154   : > { %v1941_v51 = vadd.f32 %v1934_v56, %v1933_v23 }
 0x155   : > { %v1946_v50 = vmul.f32 0.5, %v1942_v35  ;;  %2230 = vst [vmem:[%s170_s21 + $0x8] sm:$0xff] %v2228_v40  }
 0x156   : > { %v1945_v57 = vmul.f32 0.5, %v1941_v51 }
 0x158   : > { %v2223_v33 = vpack.c.bf16 %v1946_v50, %v1945_v57 }
 0x15a   : > { %2224 = vst [vmem:[%s170_s21] sm:$0xff] %v2223_v33  }
 0x15b PF: > { %s13_s12 = sadd.s32 1, %s2582_s12  }
 0x15c   : > { %p10_p4 = scmp.ge.s32.totalorder %s13_s12, 4  }
 0x15e   :  { %12 = sbr.rel (!%p10_p4) target bundleno = 1 (0x1), region = 64 }

// kernel: forward.10
= control target key start
LH: loop header
LB: loop body
LE: loop exit
PB: predicated region body
PF: predicated region fallthrough
CT: control target
= control target key end

     0   :  { %s3892_s12 = smov 0   ;;  %s4867_s0 = inlined_call_operand.vmem [shape: bf16[2,18,10,32], index: 0, kind: input, shape index: {}]   ;;  %s4868_s1 = inlined_call_operand.vmem [shape: bf16[288,64], index: 1, kind: input, shape index: {}]   ;;  %s4869_s2 = inlined_call_operand.vmem [shape: f32[1,64], index: 2, kind: input, shape index: {}]   ;;  %s4870_s3 = inlined_call_operand.vmem [shape: bf16[2,8,8,64], index: 3, kind: output, shape index: {}]  }
   0x1 LB: > { %s3053_s13 = sadd.s32 4294967295, %s3870_s12   ;;  %p3057_p0 = scmp.ge.s32.totalorder %s3870_s12, 1  ;;  %s3870_s12 = sphi %s3892_s12, %s13_s12  }
   0x2   : > { %p137_p1 = scmp.lt.s32.totalorder %s3870_s12, 3 }
   0x4   : > { %p138_p2 = pnand %p3057_p0, %p137_p1 }
   0x5   : > { %v3814_v0 = vld [vmem:[%s4868_s1 + $0x10] sm:$0xff] (!%p138_p2)   ;;  %p161_p3 = scmp.lt.s32.totalorder (!%p138_p2), %s3053_s13, 1  ;;  %v3815_v1 = vld [vmem:[%s4868_s1 + $0x40] sm:$0xff] (!%p138_p2)   ;;  %v3816_v2 = vld [vmem:[%s4868_s1 + $0x18] sm:$0xff] (!%p138_p2)   ;;  %vm208_vm0 = vsmask.f32 (!%p138_p2), 3328 }
   0x6   : > { %141 = sbr.rel (%p138_p2) target bundleno = 428 (0x1ac), region = 32  ;;  %3493 = vmatprep.subr.bf16.mxu1 (!%p138_p2), %v3814_v0  ;;  %3573 = vmatprep.subr.bf16.mxu0 (!%p138_p2), %v3815_v1  ;;  %v3817_v3 = vld [vmem:[%s4868_s1 + $0x48] sm:$0xff] (!%p138_p2)   ;;  %v3918_v4 = vld [vmem:[%s4868_s1] sm:$0xff] (!%p138_p2)   ;;  %v3928_v5 = vld [vmem:[%s4868_s1 + $0x50] sm:$0xff] (!%p138_p2)   ;;  %vm209_vm1 = vsmask.f32 (!%p138_p2), 7440 }
   0x7   : > { %3494 = vmatpush3.bf16.msra.mxu1 (!%p138_p2), %v3814_v0  ;;  %3574 = vmatpush3.bf16.msra.mxu0 (!%p138_p2), %v3815_v1  ;;  %vm3963_vm2 = vmor (!%p138_p2), %vm208_vm0, %vm209_vm1  ;;  %vm475_vm3 = vcmask (!%p138_p2), 261120   ;;  %vm818_vm4 = vcmask (!%p138_p2), 1042432   ;;  %vm819_vm5 = vcmask (!%p138_p2), 1046532   ;;  %vm2989_vm7 = vcmask (!%p138_p2), 519168  }
   0x8   : > { %3495 = vmatprep.subr.bf16.mxu1 (!%p138_p2), %v3816_v2  ;;  %3575 = vmatprep.subr.bf16.mxu0 (!%p138_p2), %v3817_v3  ;;  %vm4135_vm6 = vmor (!%p138_p2), %vm818_vm4, %vm819_vm5 }
   0xb   : > { %3496 = vmatpush3.bf16.msra.mxu1 (!%p138_p2), %v3816_v2  ;;  %3576 = vmatpush3.bf16.msra.mxu0 (!%p138_p2), %v3817_v3 }
   0xc   : > { %3513 = vmatprep.subr.bf16.mxu1 (!%p138_p2), %v3918_v4  ;;  %3593 = vmatprep.subr.bf16.mxu0 (!%p138_p2), %v3928_v5 }
   0xd   : > { %s4880_s13 = smov (!%p161_p3, %s3053_s13), 1 }
   0xe   : > { %s3805_s22 = smul.u32 144, %s4880_s13  ;;  %s3402_s8 = sshll.u32 %s4880_s13, 5 }
   0xf   : > { %s4835_s11 = scalar_lea.vmem %s4870_s3, %s3402_s8 }
  0x10   : > { %s3923_s27 = scalar_lea.vmem %s4867_s0, %s3805_s22 }
  0x11   : > { %v3931_v6 = vld [vmem:[%s3923_s27] sm:$0xf]  ;;  %v3934_v7 = vld [vmem:[%s3923_s27 + $0x8] sm:$0xf]  ;;  %v3937_v8 = vld [vmem:[%s3923_s27 + $0x4] sm:$0x1] }
  0x12   : > { %v3940_v9 = vld [vmem:[%s3923_s27 + $0xc] sm:$0x1]  ;;  %v212_v10 = vshrl.u32 %v3931_v6, 16  ;;  %v215_v11 = vshll.u32 %v3931_v6, 16  ;;  %v221_v12 = vshll.u32 %v3937_v8, 16  ;;  %v226_v13 = vshrl.u32 %v3934_v7, 16 }
  0x13   : > { %v229_v14 = vshll.u32 %v3934_v7, 16  ;;  %v235_v15 = vshll.u32 %v3940_v9, 16  ;;  %v3165_v16 = vld [vmem:[%s3923_s27 + $0x8] sm:$0xf]  ;;  %v3952_v21 = vld [vmem:[%s3923_s27 + $0xc] sm:$0x1] }
  0x14   : > { %v214_v17 = vrot.slane %v212_v10, 4  ;;  %v217_v18 = vrot.slane %v215_v11, 5  ;;  %v223_v19 = vrot.slane %v221_v12, 5  ;;  %v228_v20 = vrot.slane %v226_v13, 4  ;;  %v3167_v24 = vld [vmem:[%s3923_s27 + $0x10] sm:$0xf] }
  0x15   : > { %v231_v22 = vrot.slane %v229_v14, 5  ;;  %v237_v23 = vrot.slane %v235_v15, 5  ;;  %v3956_v25 = vld [vmem:[%s3923_s27 + $0x14] sm:$0x1]  ;;  %v1305_v28 = vshrl.u32 %v3165_v16, 16  ;;  %v1308_v29 = vshll.u32 %v3165_v16, 16 }
  0x16   : > { %v218_v27 = vor.u32 %v217_v18, %v214_v17  ;;  %v1314_v30 = vshll.u32 %v3952_v21, 16  ;;  %v1319_v33 = vshrl.u32 %v3167_v24, 16  ;;  %v1322_v34 = vshll.u32 %v3167_v24, 16  ;;  %v3969_v36 = vld [vmem:[%s3923_s27 + $0x10] sm:$0xf] }
  0x17   : > { %v232_v32 = vor.u32 %v231_v22, %v228_v20  ;;  %v1328_v35 = vshll.u32 %v3956_v25, 16  ;;  %v1307_v38 = vrot.slane %v1305_v28, 4  ;;  %v1310_v39 = vrot.slane %v1308_v29, 5  ;;  %v3972_v40 = vld [vmem:[%s3923_s27 + $0x18] sm:$0xf] }
  0x18   : > { %v219_v37 = vrot.slane %v218_v27, 4  ;;  %v1321_v42 = vrot.slane %v1319_v33, 4  ;;  %v1324_v43 = vrot.slane %v1322_v34, 5  ;;  %v3975_v44 = vld [vmem:[%s3923_s27 + $0x14] sm:$0x1]  ;;  %v1316_v47 = vrot.slane %v1314_v30, 5 }
  0x19   : > { %v233_v41 = vrot.slane %v232_v32, 4  ;;  %v1311_v46 = vor.u32 %v1310_v39, %v1307_v38  ;;  %v1330_v48 = vrot.slane %v1328_v35, 5  ;;  %v3982_v51 = vld [vmem:[%s3923_s27 + $0x1c] sm:$0x1]  ;;  %v240_v52 = vshrl.u32 %v3969_v36, 16 }
  0x1a   : > { %v224_v45 = vsel %vm3963_vm2, %v219_v37, %v223_v19  ;;  %v1325_v50 = vor.u32 %v1324_v43, %v1321_v42  ;;  %v243_v53 = vshll.u32 %v3969_v36, 16  ;;  %v249_v56 = vshll.u32 %v3975_v44, 16  ;;  %v3169_v62 = vld [vmem:[%s3923_s27 + $0x18] sm:$0xf]  ;;  %v3996_v3 = vld [vmem:[%s3923_s27 + $0x1c] sm:$0x1] }
  0x1b   : > { %v238_v49 = vsel %vm3963_vm2, %v233_v41, %v237_v23  ;;  %v1312_v55 = vrot.slane %v1311_v46, 4  ;;  %v254_v57 = vshrl.u32 %v3972_v40, 16  ;;  %v242_v59 = vrot.slane %v240_v52, 4  ;;  %v3171_v14 = vld [vmem:[%s3923_s27 + $0x20] sm:$0xf] }
  0x1c   : > { %v3061_v54 = vcombine.low %v224_v45, %v238_v49  ;;  %v1326_v58 = vrot.slane %v1325_v50, 4  ;;  %v245_v60 = vrot.slane %v243_v53, 5  ;;  %v257_v61 = vshll.u32 %v3972_v40, 16  ;;  %v4002_v15 = vld [vmem:[%s3923_s27 + $0x24] sm:$0x1] }
  0x1d   : > { %v1317_v63 = vsel %vm3963_vm2, %v1312_v55, %v1316_v47  ;;  %v1755_v0 = vrot.slane %v3952_v21, 5  ;;  %v256_v1 = vrot.slane %v254_v57, 4  ;;  %v263_v2 = vshll.u32 %v3982_v51, 16  ;;  %v4007_v27 = vld [vmem:[%s3923_s27 + $0x20] sm:$0xf]  ;;  %v3821_v57 = vld [vmem:[%s4868_s1 + $0x8] sm:$0xff]  }
  0x1e   : > { %3497 = vmatprep.mubr.msk.bf16.mxu1 %vm475_vm3, %v3061_v54  ;;  %v1331_v10 = vsel %vm3963_vm2, %v1326_v58, %v1330_v48  ;;  %v246_v11 = vor.u32 %v245_v60, %v242_v59  ;;  %v251_v12 = vrot.slane %v249_v56, 5  ;;  %v259_v13 = vrot.slane %v257_v61, 5  ;;  %v4012_v33 = vld [vmem:[%s3923_s27 + $0x28] sm:$0xf]  ;;  %v4015_v34 = vld [vmem:[%s3923_s27 + $0x24] sm:$0x1] }
  0x1f   : > { %v3197_v16 = vcombine.low %v1317_v63, %v1331_v10  ;;  %v1759_v17 = vrot.slane %v3956_v25, 5  ;;  %v265_v18 = vrot.slane %v263_v2, 5  ;;  %v1333_v19 = vshrl.u32 %v3169_v62, 16  ;;  %v4024_v49 = vld [vmem:[%s3923_s27 + $0x2c] sm:$0x1] }
  0x20   : > { %v247_v20 = vrot.slane %v246_v11, 4  ;;  %v260_v22 = vor.u32 %v259_v13, %v256_v1  ;;  %v1336_v23 = vshll.u32 %v3169_v62, 16  ;;  %v1342_v24 = vshll.u32 %v3996_v3, 16  ;;  %v3173_v56 = vld [vmem:[%s3923_s27 + $0x28] sm:$0xf] }
  0x21   : > { %3577 = vmatprep.mubr.msk.bf16.mxu0 %vm475_vm3, %v3197_v16  ;;  %v1335_v28 = vrot.slane %v1333_v19, 4  ;;  %v1347_v29 = vshrl.u32 %v3171_v14, 16  ;;  %v1350_v30 = vshll.u32 %v3171_v14, 16  ;;  %v1356_v32 = vshll.u32 %v4002_v15, 16  ;;  %v4038_v10 = vld [vmem:[%s3923_s27 + $0x2c] sm:$0x1] }
  0x22   : > { %v252_v35 = vsel %vm3963_vm2, %v247_v20, %v251_v12  ;;  %v261_v37 = vrot.slane %v260_v22, 4  ;;  %v1338_v38 = vrot.slane %v1336_v23, 5  ;;  %v1344_v39 = vrot.slane %v1342_v24, 5  ;;  %v3175_v14 = vld [vmem:[%s3923_s27 + $0x30] sm:$0xf] }
  0x23   : > { %v1349_v41 = vrot.slane %v1347_v29, 4  ;;  %v1352_v42 = vrot.slane %v1350_v30, 5  ;;  %v1358_v43 = vrot.slane %v1356_v32, 5  ;;  %v1763_v45 = vrot.slane %v3996_v3, 5  ;;  %v4055_v24 = vld [vmem:[%s3923_s27 + $0x30] sm:$0xf] }
  0x24   : > { %v266_v46 = vsel %vm3963_vm2, %v261_v37, %v265_v18  ;;  %v1339_v47 = vor.u32 %v1338_v38, %v1335_v28  ;;  %v1767_v48 = vrot.slane %v4002_v15, 5  ;;  %v268_v50 = vshrl.u32 %v4007_v27, 16  ;;  %v4047_v18 = vld [vmem:[%s4868_s1 + $0x20] sm:$0xff]  }
  0x25   : > { %v3062_v52 = vcombine.low %v252_v35, %v266_v46  ;;  %v1353_v53 = vor.u32 %v1352_v42, %v1349_v41  ;;  %v271_v54 = vshll.u32 %v4007_v27, 16  ;;  %v277_v55 = vshll.u32 %v4015_v34, 16  ;;  %v3820_v35 = vld [vmem:[%s4868_s1 + $0x58] sm:$0xff]  }
  0x26   : > { %v1340_v58 = vrot.slane %v1339_v47, 4  ;;  %v270_v59 = vrot.slane %v268_v50, 4  ;;  %v282_v60 = vshrl.u32 %v4012_v33, 16  ;;  %v285_v61 = vshll.u32 %v4012_v33, 16  ;;  %v4062_v42 = vld [vmem:[%s3923_s27 + $0x38] sm:$0xf] }
  0x27   : > { %3498 = vmatmul.mubr.msk.bf16.vlgmr.msra.gmra.mrb[0].mxu1 %vm475_vm3, %v3062_v52  ;;  %v1354_v62 = vrot.slane %v1353_v53, 4  ;;  %v273_v63 = vrot.slane %v271_v54, 5  ;;  %v279_v1 = vrot.slane %v277_v55, 5  ;;  %v291_v2 = vshll.u32 %v4024_v49, 16 }
  0x28   : > { %3514 = vmatpush3.bf16.msra.mxu1 %v3918_v4  ;;  %v1345_v11 = vsel %vm3963_vm2, %v1340_v58, %v1344_v39  ;;  %v284_v12 = vrot.slane %v282_v60, 4  ;;  %v287_v13 = vrot.slane %v285_v61, 5  ;;  %v1361_v16 = vshrl.u32 %v3173_v56, 16  ;;  %v4052_v4 = vld [vmem:[%s3923_s27 + $0x34] sm:$0x1] }
  0x29   : > { %v1359_v19 = vsel %vm3963_vm2, %v1354_v62, %v1358_v43  ;;  %v274_v20 = vor.u32 %v273_v63, %v270_v59  ;;  %v293_v22 = vrot.slane %v291_v2, 5  ;;  %v1364_v23 = vshll.u32 %v3173_v56, 16  ;;  %3515 = vmatprep.subr.bf16.mxu1 %v3821_v57  ;;  %v4065_v43 = vld [vmem:[%s3923_s27 + $0x34] sm:$0x1]  ;;  %v4074_v58 = vld [vmem:[%s3923_s27 + $0x3c] sm:$0x1] }
  0x2a   : > { %v3198_v28 = vcombine.low %v1345_v11, %v1359_v19  ;;  %v288_v29 = vor.u32 %v287_v13, %v284_v12  ;;  %v1363_v30 = vrot.slane %v1361_v16, 4  ;;  %v1370_v32 = vshll.u32 %v4038_v10, 16  ;;  %v4084_v62 = vld [vmem:[%s4868_s1 + $0x60] sm:$0xff]   ;;  %v4091_v19 = vld [vmem:[%s3923_s27 + $0x3c] sm:$0x1] }
  0x2b   : > { %v275_v37 = vrot.slane %v274_v20, 4  ;;  %v1366_v38 = vrot.slane %v1364_v23, 5  ;;  %v1375_v39 = vshrl.u32 %v3175_v14, 16  ;;  %v1378_v41 = vshll.u32 %v3175_v14, 16 }
  0x2c   : > { %3578 = vmatmul.mubr.msk.bf16.vlgmr.msra.gmra.mrb[0].mxu0 %vm475_vm3, %v3198_v28  ;;  %v289_v46 = vrot.slane %v288_v29, 4  ;;  %v1372_v47 = vrot.slane %v1370_v32, 5  ;;  %v1384_v50 = vshll.u32 %v4052_v4, 16  ;;  %v296_v52 = vshrl.u32 %v4055_v24, 16  ;;  %3516 = vmatpush3.bf16.msra.mxu1 %v3821_v57  ;;  %v3179_v28 = vld [vmem:[%s3923_s27 + $0x40] sm:$0xf] }
  0x2d   : > { %3594 = vmatpush3.bf16.msra.mxu0 %v3928_v5  ;;  %v280_v53 = vsel %vm3963_vm2, %v275_v37, %v279_v1  ;;  %v1367_v54 = vor.u32 %v1366_v38, %v1363_v30  ;;  %v1377_v55 = vrot.slane %v1375_v39, 4  ;;  %v1380_v56 = vrot.slane %v1378_v41, 5  ;;  %3533 = vmatprep.subr.bf16.mxu1 %v4047_v18  ;;  %v3177_v5 = vld [vmem:[%s3923_s27 + $0x38] sm:$0xf]  ;;  %v4098_v39 = vld [vmem:[%s3923_s27 + $0x44] sm:$0x1] }
  0x2e   : > { %v294_v59 = vsel %vm3963_vm2, %v289_v46, %v293_v22  ;;  %v1386_v60 = vrot.slane %v1384_v50, 5  ;;  %3595 = vmatprep.subr.bf16.mxu0 %v3820_v35  ;;  %v298_v61 = vrot.slane %v296_v52, 4  ;;  %v299_v57 = vshll.u32 %v4055_v24, 16  ;;  %v4105_v52 = vld [vmem:[%s3923_s27 + $0x40] sm:$0xf] }
  0x2f   : > { %v3063_v63 = vcombine.low %v280_v53, %v294_v59  ;;  %v1368_v1 = vrot.slane %v1367_v54, 4  ;;  %v1381_v2 = vor.u32 %v1380_v56, %v1377_v55  ;;  %v305_v11 = vshll.u32 %v4065_v43, 16  ;;  %v4108_v56 = vld [vmem:[%s3923_s27 + $0x48] sm:$0xf] }
  0x30   : > { %v301_v12 = vrot.slane %v299_v57, 5  ;;  %v310_v13 = vshrl.u32 %v4062_v42, 16  ;;  %v313_v14 = vshll.u32 %v4062_v42, 16  ;;  %v319_v16 = vshll.u32 %v4074_v58, 16 }
  0x31   : > { %3501 = vmatprep.mubr.msk.bf16.mxu1 %vm475_vm3, %v3063_v63  ;;  %v1373_v20 = vsel %vm3963_vm2, %v1368_v1, %v1372_v47  ;;  %v1382_v22 = vrot.slane %v1381_v2, 4  ;;  %v307_v23 = vrot.slane %v305_v11, 5  ;;  %v1389_v29 = vshrl.u32 %v3177_v5, 16  ;;  %3596 = vmatpush3.bf16.msra.mxu0 %v3820_v35 }
  0x32   : > { %v302_v30 = vor.u32 %v301_v12, %v298_v61  ;;  %v312_v32 = vrot.slane %v310_v13, 4  ;;  %v315_v37 = vrot.slane %v313_v14, 5  ;;  %v321_v38 = vrot.slane %v319_v16, 5  ;;  %3613 = vmatprep.subr.bf16.mxu0 %v4084_v62  ;;  %v4119_v16 = vld [vmem:[%s3923_s27 + $0x4c] sm:$0x1] }
  0x33   : > { %v1387_v41 = vsel %vm3963_vm2, %v1382_v22, %v1386_v60  ;;  %v1391_v46 = vrot.slane %v1389_v29, 4  ;;  %v1392_v47 = vshll.u32 %v3177_v5, 16  ;;  %v1398_v50 = vshll.u32 %v4091_v19, 16  ;;  %v4112_v60 = vld [vmem:[%s3923_s27 + $0x44] sm:$0x1] }
  0x34   : > { %v3199_v35 = vcombine.low %v1373_v20, %v1387_v41  ;;  %v303_v53 = vrot.slane %v302_v30, 4  ;;  %v316_v54 = vor.u32 %v315_v37, %v312_v32  ;;  %v1403_v55 = vshrl.u32 %v3179_v28, 16  ;;  %v3215_v30 = vld [vmem:[%s3923_s27 + $0x8] sm:$0xe] }
  0x35   : > { %v1394_v59 = vrot.slane %v1392_v47, 5  ;;  %v1400_v61 = vrot.slane %v1398_v50, 5  ;;  %v1406_v57 = vshll.u32 %v3179_v28, 16  ;;  %v1412_v63 = vshll.u32 %v4098_v39, 16  ;;  %v3216_v47 = vld [vmem:[%s3923_s27 + $0x10] sm:$0xe] }
  0x36   : > { %3581 = vmatprep.mubr.msk.bf16.mxu0 %vm475_vm3, %v3199_v35  ;;  %v308_v5 = vsel %vm3963_vm2, %v303_v53, %v307_v23  ;;  %v317_v1 = vrot.slane %v316_v54, 4  ;;  %v1405_v2 = vrot.slane %v1403_v55, 4  ;;  %v324_v11 = vshrl.u32 %v4105_v52, 16  ;;  %v4129_v50 = vld [vmem:[%s3923_s27 + $0x50] sm:$0xf] }
  0x37   : > { %v1395_v12 = vor.u32 %v1394_v59, %v1391_v46  ;;  %v1408_v13 = vrot.slane %v1406_v57, 5  ;;  %v1414_v14 = vrot.slane %v1412_v63, 5  ;;  %v327_v20 = vshll.u32 %v4105_v52, 16 }
  0x38   : > { %v322_v22 = vsel %vm3963_vm2, %v317_v1, %v321_v38  ;;  %v326_v28 = vrot.slane %v324_v11, 4  ;;  %v333_v29 = vshll.u32 %v4112_v60, 16  ;;  %v338_v23 = vshrl.u32 %v4108_v56, 16  ;;  %v4143_v1 = vld [vmem:[%s3923_s27 + $0x58] sm:$0xf] }
  0x39   : > { %v3064_v32 = vcombine.low %v308_v5, %v322_v22  ;;  %v1396_v37 = vrot.slane %v1395_v12, 4  ;;  %v1409_v41 = vor.u32 %v1408_v13, %v1405_v2  ;;  %v329_v46 = vrot.slane %v327_v20, 5  ;;  %v4146_v2 = vld [vmem:[%s3923_s27 + $0x54] sm:$0x1]  ;;  %v4149_v20 = vld [vmem:[%s3923_s27 + $0x5c] sm:$0x1] }
  0x3a   : > { %v335_v35 = vrot.slane %v333_v29, 5  ;;  %v340_v53 = vrot.slane %v338_v23, 4  ;;  %v341_v38 = vshll.u32 %v4108_v56, 16  ;;  %v347_v54 = vshll.u32 %v4119_v16, 16 }
  0x3b   : > { %3502 = vmatmul.mubr.msk.bf16.gmra.mrb[4].mxu1 %vm475_vm3, %v3064_v32  ;;  %v1401_v59 = vsel %vm3963_vm2, %v1396_v37, %v1400_v61  ;;  %v1410_v57 = vrot.slane %v1409_v41, 4  ;;  %v330_v63 = vor.u32 %v329_v46, %v326_v28  ;;  %v3231_v5 = vrot.slane %v3215_v30, 9  ;;  %v3217_v30 = vld [vmem:[%s3923_s27 + $0x18] sm:$0xe]  ;;  %v3218_v32 = vld [vmem:[%s3923_s27 + $0x20] sm:$0xe] }
  0x3c   : > { %v343_v11 = vrot.slane %v341_v38, 5  ;;  %v349_v12 = vrot.slane %v347_v54, 5  ;;  %v3232_v13 = vrot.slane %v3216_v47, 9  ;;  %v352_v22 = vshrl.u32 %v4129_v50, 16  ;;  %v4169_v54 = vld [vmem:[%s3923_s27 + $0x60] sm:$0xf] }
  0x3d   : > { %v1415_v29 = vsel %vm3963_vm2, %v1410_v57, %v1414_v14  ;;  %v331_v61 = vrot.slane %v330_v63, 4  ;;  %v1756_v28 = vsel %vm4135_vm6, %v3231_v5, %v1755_v0  ;;  %v355_v23 = vshll.u32 %v4129_v50, 16  ;;  %v4176_v57 = vld [vmem:[%s3923_s27 + $0x68] sm:$0xf] }
  0x3e   : > { %v3200_v37 = vcombine.low %v1401_v59, %v1415_v29  ;;  %v344_v41 = vor.u32 %v343_v11, %v340_v53  ;;  %v1760_v46 = vsel %vm4135_vm6, %v3232_v13, %v1759_v17  ;;  %v354_v47 = vrot.slane %v352_v22, 4  ;;  %v4180_v13 = vld [vmem:[%s3923_s27 + $0x64] sm:$0x1] }
  0x3f   : > { %v336_v14 = vsel %vm3963_vm2, %v331_v61, %v335_v35  ;;  %v3247_v21 = vcombine.low %v1756_v28, %v1760_v46  ;;  %v357_v38 = vrot.slane %v355_v23, 5  ;;  %v361_v0 = vshll.u32 %v4146_v2, 16 }
  0x40   : > { %3582 = vmatmul.mubr.msk.bf16.gmra.mrb[4].mxu0 %vm475_vm3, %v3200_v37  ;;  %v345_v59 = vrot.slane %v344_v41, 4  ;;  %v366_v53 = vshrl.u32 %v4143_v1, 16  ;;  %v369_v25 = vshll.u32 %v4143_v1, 16  ;;  %v375_v17 = vshll.u32 %v4149_v20, 16 }
  0x41   : > { %3597 = vmatprep.mubr.msk.bf16.mxu0 %vm475_vm3, %v3247_v21  ;;  %v358_v35 = vor.u32 %v357_v38, %v354_v47  ;;  %v363_v63 = vrot.slane %v361_v0, 5  ;;  %v3233_v5 = vrot.slane %v3217_v30, 9  ;;  %v3234_v11 = vrot.slane %v3218_v32, 9  ;;  %v4193_v32 = vld [vmem:[%s3923_s27 + $0x6c] sm:$0x1] }
  0x42   : > { %v350_v22 = vsel %vm3963_vm2, %v345_v59, %v349_v12  ;;  %v368_v29 = vrot.slane %v366_v53, 4  ;;  %v371_v61 = vrot.slane %v369_v25, 5  ;;  %v377_v28 = vrot.slane %v375_v17, 5  ;;  %v3219_v21 = vld [vmem:[%s3923_s27 + $0x28] sm:$0xe] }
  0x43   : > { %v3065_v23 = vcombine.low %v336_v14, %v350_v22  ;;  %v359_v37 = vrot.slane %v358_v35, 4  ;;  %v1764_v41 = vsel %vm4135_vm6, %v3233_v5, %v1763_v45  ;;  %v1768_v30 = vsel %vm4135_vm6, %v3234_v11, %v1767_v48  ;;  %v3825_v38 = vld [vmem:[%s4868_s1 + $0x68] sm:$0xff]   ;;  %v3220_v17 = vld [vmem:[%s3923_s27 + $0x30] sm:$0xe] }
  0x44   : > { %v372_v46 = vor.u32 %v371_v61, %v368_v29  ;;  %v3248_v12 = vcombine.low %v1764_v41, %v1768_v30  ;;  %v380_v47 = vshrl.u32 %v4169_v54, 16  ;;  %v383_v14 = vshll.u32 %v4169_v54, 16  ;;  %v4210_v22 = vld [vmem:[%s3923_s27 + $0x70] sm:$0xf]  ;;  %v4217_v41 = vld [vmem:[%s3923_s27 + $0x78] sm:$0xf] }
  0x45   : > { %3505 = vmatprep.mubr.msk.bf16.mxu1 %vm475_vm3, %v3065_v23  ;;  %v364_v3 = vsel %vm3963_vm2, %v359_v37, %v363_v63  ;;  %v389_v15 = vshll.u32 %v4180_v13, 16  ;;  %v394_v45 = vshrl.u32 %v4176_v57, 16  ;;  %v397_v48 = vshll.u32 %v4176_v57, 16  ;;  %v4220_v30 = vld [vmem:[%s3923_s27 + $0x74] sm:$0x1] }
  0x46   : > { %v373_v0 = vrot.slane %v372_v46, 4  ;;  %v382_v59 = vrot.slane %v380_v47, 4  ;;  %v385_v53 = vrot.slane %v383_v14, 5  ;;  %v403_v25 = vshll.u32 %v4193_v32, 16 }
  0x47   : > { %v391_v35 = vrot.slane %v389_v15, 5  ;;  %v396_v63 = vrot.slane %v394_v45, 4  ;;  %v399_v5 = vrot.slane %v397_v48, 5  ;;  %v3235_v11 = vrot.slane %v3219_v21, 9 }
  0x48   : > { %v378_v29 = vsel %vm3963_vm2, %v373_v0, %v377_v28  ;;  %3598 = vmatmul.mubr.msk.bf16.vlgmr.msra.gmra.mrb[0].mxu0 %vm475_vm3, %v3248_v12  ;;  %v386_v61 = vor.u32 %v385_v53, %v382_v59  ;;  %v405_v23 = vrot.slane %v403_v25, 5  ;;  %v1771_v37 = vrot.slane %v4038_v10, 5  ;;  %v4225_v28 = vld [vmem:[%s3923_s27 + $0x7c] sm:$0x1]  ;;  %v3221_v12 = vld [vmem:[%s3923_s27 + $0x38] sm:$0xe] }
  0x49   : > { %v3066_v46 = vcombine.low %v364_v3, %v378_v29  ;;  %3614 = vmatpush3.bf16.msra.mxu0 %v4084_v62  ;;  %v400_v47 = vor.u32 %v399_v5, %v396_v63  ;;  %v3236_v14 = vrot.slane %v3220_v17, 9  ;;  %v1775_v21 = vrot.slane %v4052_v4, 5  ;;  %v3222_v3 = vld [vmem:[%s3923_s27 + $0x40] sm:$0xe]  ;;  %v4236_v62 = vld [vmem:[%s4868_s1 + $0x70] sm:$0xff]  }
  0x4a   : > { %v387_v15 = vrot.slane %v386_v61, 4  ;;  %v1772_v10 = vsel %vm4135_vm6, %v3235_v11, %v1771_v37  ;;  %v408_v45 = vshrl.u32 %v4210_v22, 16  ;;  %v411_v48 = vshll.u32 %v4210_v22, 16  ;;  %3615 = vmatprep.subr.bf16.mxu0 %v3825_v38  ;;  %v3182_v25 = vld [vmem:[%s3923_s27 + $0x4c] sm:$0x1] }
  0x4b   : > { %3506 = vmatmul.mubr.msk.bf16.gmra.mrb[8].mxu1 %vm475_vm3, %v3066_v46  ;;  %v401_v4 = vrot.slane %v400_v47, 4  ;;  %v1776_v0 = vsel %vm4135_vm6, %v3236_v14, %v1775_v21  ;;  %v417_v59 = vshll.u32 %v4220_v30, 16  ;;  %v422_v53 = vshrl.u32 %v4217_v41, 16  ;;  %v3223_v17 = vld [vmem:[%s3923_s27 + $0x48] sm:$0xe] }
  0x4c   : > { %v392_v63 = vsel %vm3963_vm2, %v387_v15, %v391_v35  ;;  %v3249_v5 = vcombine.low %v1772_v10, %v1776_v0  ;;  %v410_v11 = vrot.slane %v408_v45, 4  ;;  %v413_v29 = vrot.slane %v411_v48, 5  ;;  %v3184_v14 = vld [vmem:[%s3923_s27 + $0x54] sm:$0x1]  ;;  %v3224_v10 = vld [vmem:[%s3923_s27 + $0x50] sm:$0xe] }
  0x4d   : > { %v406_v61 = vsel %vm3963_vm2, %v401_v4, %v405_v23  ;;  %v419_v37 = vrot.slane %v417_v59, 5  ;;  %v424_v46 = vrot.slane %v422_v53, 4  ;;  %v425_v47 = vshll.u32 %v4217_v41, 16  ;;  %3616 = vmatpush3.bf16.msra.mxu0 %v3825_v38  ;;  %v4258_v0 = vld [vmem:[%s3923_s27 + $0x5c] sm:$0x1] }
  0x4e   : > { %v3067_v21 = vcombine.low %v392_v63, %v406_v61  ;;  %3601 = vmatprep.mubr.msk.bf16.mxu0 %vm475_vm3, %v3249_v5  ;;  %v414_v26 = vor.u32 %v413_v29, %v410_v11  ;;  %v431_v35 = vshll.u32 %v4225_v28, 16  ;;  %v3237_v15 = vrot.slane %v3221_v12, 9  ;;  %3633 = vmatprep.subr.bf16.mxu0 %v4236_v62  ;;  %v3225_v38 = vld [vmem:[%s3923_s27 + $0x58] sm:$0xe]  ;;  %v3226_v59 = vld [vmem:[%s3923_s27 + $0x60] sm:$0xe] }
  0x4f   : > { %v427_v23 = vrot.slane %v425_v47, 5  ;;  %v1779_v45 = vrot.slane %v4091_v19, 5  ;;  %v3238_v48 = vrot.slane %v3222_v3, 9  ;;  %v1783_v4 = vrot.slane %v4098_v39, 5  ;;  %v4268_v29 = vld [vmem:[%s3923_s27 + $0x64] sm:$0x1] }
  0x50   : > { %3509 = vmatprep.mubr.msk.bf16.mxu1 %vm475_vm3, %v3067_v21  ;;  %v415_v12 = vrot.slane %v414_v26, 4  ;;  %v433_v53 = vrot.slane %v431_v35, 5  ;;  %v3239_v63 = vrot.slane %v3223_v17, 9  ;;  %v1787_v5 = vrot.slane %v3182_v25, 5  ;;  %v3190_v17 = vld [vmem:[%s3923_s27 + $0x6c] sm:$0x1] }
  0x51   : > { %v428_v11 = vor.u32 %v427_v23, %v424_v46  ;;  %v1780_v19 = vsel %vm4135_vm6, %v3237_v15, %v1779_v45  ;;  %v1784_v39 = vsel %vm4135_vm6, %v3238_v48, %v1783_v4  ;;  %v3240_v3 = vrot.slane %v3224_v10, 9  ;;  %v3192_v25 = vld [vmem:[%s3923_s27 + $0x74] sm:$0x1]  ;;  %v3227_v46 = vld [vmem:[%s3923_s27 + $0x68] sm:$0xe] }
  0x52   : > { %v3250_v61 = vcombine.low %v1780_v19, %v1784_v39  ;;  %v1788_v47 = vsel %vm4135_vm6, %v3239_v63, %v1787_v5  ;;  %v1791_v26 = vrot.slane %v3184_v14, 5  ;;  %v420_v21 = vsel %vm3963_vm2, %v415_v12, %v419_v37  ;;  %v3228_v10 = vld [vmem:[%s3923_s27 + $0x70] sm:$0xe]  ;;  %v3194_v4 = vld [vmem:[%s3923_s27 + $0x7c] sm:$0x1] }
  0x53   : > { %v429_v35 = vrot.slane %v428_v11, 4  ;;  %v3080_v15 = vcombine.low %v3969_v36, %v3972_v40  ;;  %v3241_v23 = vrot.slane %v3225_v38, 9  ;;  %v1795_v45 = vrot.slane %v4258_v0, 5  ;;  %v3196_v63 = vld [vmem:[%s3923_s27 + $0x84] sm:$0x1] }
  0x54   : > { %3602 = vmatmul.mubr.msk.bf16.gmra.mrb[4].mxu0 %vm475_vm3, %v3250_v61  ;;  %v1792_v14 = vsel %vm4135_vm6, %v3240_v3, %v1791_v26  ;;  %v3242_v48 = vrot.slane %v3226_v59, 9  ;;  %v3229_v36 = vld [vmem:[%s3923_s27 + $0x78] sm:$0xe]  ;;  %v823_v40 = vrot.slane %v3937_v8, 5  ;;  %v1799_v19 = vrot.slane %v4268_v29, 5 }
  0x55   : > { %v434_v37 = vsel %vm3963_vm2, %v429_v35, %v433_v53  ;;  %v3251_v12 = vcombine.low %v1788_v47, %v1792_v14  ;;  %v1796_v11 = vsel %vm4135_vm6, %v3241_v23, %v1795_v45  ;;  %v3230_v38 = vld [vmem:[%s3923_s27 + $0x80] sm:$0xe]  ;;  %v3243_v59 = vrot.slane %v3227_v46, 9  ;;  %v771_v53 = vld [vmem:[%s3923_s27 + $0x8] sm:$0xe] }
  0x56   : > { %v3068_v5 = vcombine.low %v420_v21, %v434_v37  ;;  %v770_v39 = vld [vmem:[%s3923_s27] sm:$0xe]  ;;  %v1803_v3 = vrot.slane %v3190_v17, 5  ;;  %v3244_v61 = vrot.slane %v3228_v10, 9  ;;  %v1807_v26 = vrot.slane %v3192_v25, 5 }
  0x57   : > { %3605 = vmatprep.mubr.msk.bf16.mxu0 %vm475_vm3, %v3251_v12  ;;  %v1800_v8 = vsel %vm4135_vm6, %v3242_v48, %v1799_v19  ;;  %v3245_v47 = vrot.slane %v3229_v36, 9  ;;  %v1811_v21 = vrot.slane %v3194_v4, 5  ;;  %v4875_v35 = vcombine.low %v3931_v6, %v3934_v7  ;;  %v772_v7 = vld [vmem:[%s3923_s27 + $0x10] sm:$0xe] }
  0x58   : > { %3510 = vmatmul.mubr.msk.bf16.gmra.mrb[12].mxu1 %vm475_vm3, %v3068_v5  ;;  %v3252_v14 = vcombine.low %v1796_v11, %v1800_v8  ;;  %v1804_v17 = vsel %vm4135_vm6, %v3243_v59, %v1803_v3  ;;  %v1808_v25 = vsel %vm4135_vm6, %v3244_v61, %v1807_v26  ;;  %v3246_v46 = vrot.slane %v3230_v38, 9  ;;  %v774_v38 = vld [vmem:[%s3923_s27 + $0x20] sm:$0xe]  ;;  %v3831_v8 = vld [vmem:[%s3923_s27 + $0x10] ss:$8 sps:$4 sm:$0xff]  }
  0x59   : > { %3517 = vmatprep.mubr.msk.bf16.mxu1 %vm475_vm3, %v4875_v35  ;;  %v827_v10 = vrot.slane %v3940_v9, 5  ;;  %v831_v23 = vrot.slane %v3975_v44, 5  ;;  %v3253_v45 = vcombine.low %v1804_v17, %v1808_v25  ;;  %v1815_v48 = vrot.slane %v3196_v63, 5  ;;  %v773_v9 = vld [vmem:[%s3923_s27 + $0x18] sm:$0xe]  ;;  %v4366_v17 = vld [vmem:[%s4868_s1 + $0x30] sm:$0xff]  }
  0x5a   : > { %v835_v4 = vrot.slane %v3982_v51, 5  ;;  %v3097_v6 = vrot.slane %v770_v39, 9  ;;  %v3081_v37 = vcombine.low %v4007_v27, %v4012_v33  ;;  %v1812_v12 = vsel %vm4135_vm6, %v3245_v47, %v1811_v21  ;;  %v3830_v51 = vld [vmem:[%s4868_s1 + $0x28] sm:$0xff]  }
  0x5b   : > { %v3098_v36 = vrot.slane %v771_v53, 9  ;;  %v3099_v5 = vrot.slane %v772_v7, 9  ;;  %v1816_v44 = vsel %vm4135_vm6, %v3246_v46, %v1815_v48  ;;  %v3100_v27 = vrot.slane %v773_v9, 9  ;;  %v775_v39 = vld [vmem:[%s3923_s27 + $0x28] sm:$0xe] }
  0x5c   : > { %3606 = vmatmul.mubr.msk.bf16.gmra.mrb[8].mxu0 %vm475_vm3, %v3252_v14  ;;  %v4326_v63 = vsel %vm4135_vm6, %v3097_v6, %v823_v40  ;;  %v839_v33 = vrot.slane %v4015_v34, 5  ;;  %v843_v59 = vrot.slane %v4024_v49, 5  ;;  %v847_v40 = vrot.slane %v4065_v43, 5  ;;  %v776_v49 = vld [vmem:[%s3923_s27 + $0x30] sm:$0xe] }
  0x5d   : > { %3609 = vmatprep.mubr.msk.bf16.mxu0 %vm475_vm3, %v3253_v45  ;;  %v4331_v11 = vsel %vm4135_vm6, %v3098_v36, %v827_v10  ;;  %v4335_v19 = vsel %vm4135_vm6, %v3099_v5, %v831_v23  ;;  %v4345_v34 = vsel %vm4135_vm6, %v3100_v27, %v835_v4  ;;  %v3101_v61 = vrot.slane %v774_v38, 9  ;;  %v777_v43 = vld [vmem:[%s3923_s27 + $0x38] sm:$0xe]  ;;  %v778_v46 = vld [vmem:[%s3923_s27 + $0x40] sm:$0xe] }
  0x5e   : > { %v3113_v3 = vcombine.low %v4326_v63, %v4331_v11  ;;  %v3102_v26 = vrot.slane %v775_v39, 9  ;;  %v3254_v53 = vcombine.low %v1812_v12, %v1816_v44  ;;  %v3114_v47 = vcombine.low %v4335_v19, %v4345_v34  ;;  %v779_v45 = vld [vmem:[%s3923_s27 + $0x48] sm:$0xe]  ;;  %v3299_v7 = vld [vmem:[%s3923_s27 + $0x10] sm:$0xf] }
  0x5f   : > { %v4357_v21 = vsel %vm4135_vm6, %v3101_v61, %v839_v33  ;;  %v3103_v35 = vrot.slane %v776_v49, 9  ;;  %v3104_v14 = vrot.slane %v777_v43, 9  ;;  %v851_v25 = vrot.slane %v4074_v58, 5  ;;  %v3834_v36 = vld [vmem:[%s3923_s27 + $0x20] ss:$8 sps:$4 sm:$0xff]   ;;  %v3841_v49 = vld [vmem:[%s4868_s1 + $0x78] sm:$0xff]  }
  0x60   : > { %3518 = vmatmul.mubr.msk.bf16.vlgmr.msra.gmra.mrb[0].mxu1 %vm475_vm3, %v3080_v15  ;;  %v4361_v15 = vsel %vm4135_vm6, %v3102_v26, %v843_v59  ;;  %v855_v10 = vrot.slane %v4112_v60, 5  ;;  %v3105_v48 = vrot.slane %v778_v46, 9  ;;  %v859_v4 = vrot.slane %v4119_v16, 5  ;;  %v3836_v44 = vld [vmem:[%s3923_s27 + $0x30] ss:$8 sps:$4 sm:$0xff]  }
  0x61   : > { %3534 = vmatpush3.bf16.msra.mxu1 %v4047_v18  ;;  %3521 = vmatprep.mubr.msk.bf16.mxu1 %vm475_vm3, %v3081_v37  ;;  %v3115_v18 = vcombine.low %v4357_v21, %v4361_v15  ;;  %v4375_v23 = vsel %vm4135_vm6, %v3103_v35, %v847_v40  ;;  %v3082_v6 = vcombine.low %v4055_v24, %v4062_v42  ;;  %v3106_v60 = vrot.slane %v779_v45, 9  ;;  %v3301_v42 = vld [vmem:[%s3923_s27 + $0x18] sm:$0xf]  ;;  %v4411_v27 = vld [vmem:[%s3923_s27 + $0x1c] sm:$0x1] }
  0x62   : > { %3535 = vmatprep.subr.bf16.mxu1 %v3830_v51  ;;  %v4384_v58 = vsel %vm4135_vm6, %v3104_v14, %v851_v25  ;;  %v3083_v37 = vcombine.low %v4105_v52, %v4108_v56  ;;  %v4394_v24 = vsel %vm4135_vm6, %v3105_v48, %v855_v10  ;;  %v863_v12 = vrot.slane %v4146_v2, 5  ;;  %v4405_v56 = vld [vmem:[%s3923_s27 + $0x14] sm:$0x1]  ;;  %v780_v59 = vld [vmem:[%s3923_s27 + $0x50] sm:$0xe] }
  0x63   : > { %v3116_v16 = vcombine.low %v4375_v23, %v4384_v58  ;;  %v4402_v52 = vsel %vm4135_vm6, %v3106_v60, %v859_v4  ;;  %v2237_v9 = vshrl.u32 %v3299_v7, 16  ;;  %v2240_v5 = vshll.u32 %v3299_v7, 16  ;;  %v3303_v35 = vld [vmem:[%s3923_s27 + $0x20] sm:$0xf]  ;;  %v3305_v10 = vld [vmem:[%s3923_s27 + $0x28] sm:$0xf] }
  0x64   : > { %3610 = vmatmul.mubr.msk.bf16.gmra.mrb[12].mxu0 %vm475_vm3, %v3254_v53  ;;  %v2251_v2 = vshrl.u32 %v3301_v42, 16  ;;  %v2254_v33 = vshll.u32 %v3301_v42, 16  ;;  %v867_v40 = vrot.slane %v4149_v20, 5  ;;  %v781_v53 = vld [vmem:[%s3923_s27 + $0x58] sm:$0xe]  ;;  %v2246_v25 = vshll.u32 %v4405_v56, 16 }
  0x65   : > { %3617 = vmatprep.mubr.msk.bf16.mxu0 %vm475_vm3, %v3831_v8  ;;  %3536 = vmatpush3.bf16.msra.mxu1 %v3830_v51  ;;  %v3117_v51 = vcombine.low %v4394_v24, %v4402_v52  ;;  %v2239_v38 = vrot.slane %v2237_v9, 4  ;;  %v2242_v39 = vrot.slane %v2240_v5, 5  ;;  %v3107_v8 = vrot.slane %v780_v59, 9  ;;  %v782_v60 = vld [vmem:[%s3923_s27 + $0x60] sm:$0xe] }
  0x66   : > { %3553 = vmatprep.subr.bf16.mxu1 %v4366_v17  ;;  %v2253_v61 = vrot.slane %v2251_v2, 4  ;;  %v2256_v26 = vrot.slane %v2254_v33, 5  ;;  %v3108_v43 = vrot.slane %v781_v53, 9  ;;  %v2260_v46 = vshll.u32 %v4411_v27, 16  ;;  %v783_v42 = vld [vmem:[%s3923_s27 + $0x68] sm:$0xe] }
  0x67   : > { %v2243_v14 = vor.u32 %v2242_v39, %v2239_v38  ;;  %v4426_v20 = vsel %vm4135_vm6, %v3107_v8, %v863_v12  ;;  %v3084_v45 = vcombine.low %v4129_v50, %v4143_v1  ;;  %v2265_v4 = vshrl.u32 %v3303_v35, 16  ;;  %v4444_v1 = vld [vmem:[%s4868_s1 + $0x80] sm:$0xff]   ;;  %v3307_v9 = vld [vmem:[%s3923_s27 + $0x30] sm:$0xf]  ;;  %v4467_v53 = vld [vmem:[%s3923_s27 + $0x2c] sm:$0x1] }
  0x68   : > { %3522 = vmatmul.mubr.msk.bf16.gmra.mrb[4].mxu1 %vm475_vm3, %v3082_v6  ;;  %v4434_v48 = vsel %vm4135_vm6, %v3108_v43, %v867_v40  ;;  %v2268_v6 = vshll.u32 %v3303_v35, 16  ;;  %v3085_v7 = vcombine.low %v4169_v54, %v4176_v57  ;;  %v2257_v50 = vor.u32 %v2256_v26, %v2253_v61  ;;  %v3840_v5 = vld [vmem:[%s3923_s27 + $0x50] ss:$8 sps:$4 sm:$0xff]   ;;  %v3329_v52 = vld [vmem:[%s3923_s27 + $0x88] sm:$0xf] }
  0x69   : > { %3525 = vmatprep.mubr.msk.bf16.mxu1 %vm475_vm3, %v3083_v37  ;;  %v871_v12 = vrot.slane %v4180_v13, 5  ;;  %v2279_v54 = vshrl.u32 %v3305_v10, 16  ;;  %v2282_v57 = vshll.u32 %v3305_v10, 16  ;;  %v4458_v2 = vrot.slane %v2246_v25, 5  ;;  %v3309_v61 = vld [vmem:[%s3923_s27 + $0x38] sm:$0xf] }
  0x6a   : > { %v4460_v33 = vrot.slane %v2260_v46, 5  ;;  %v3109_v38 = vrot.slane %v782_v60, 9  ;;  %v2267_v13 = vrot.slane %v2265_v4, 4  ;;  %v2270_v39 = vrot.slane %v2268_v6, 5  ;;  %v784_v46 = vld [vmem:[%s3923_s27 + $0x70] sm:$0xe] }
  0x6b   : > { %v3110_v59 = vrot.slane %v783_v42, 9  ;;  %v875_v40 = vrot.slane %v4193_v32, 5  ;;  %v2258_v26 = vrot.slane %v2257_v50, 4  ;;  %v2293_v35 = vshrl.u32 %v3307_v9, 16  ;;  %v785_v6 = vld [vmem:[%s3923_s27 + $0x78] sm:$0xe] }
  0x6c   : > { %3618 = vmatmul.mubr.msk.bf16.vlgmr.msra.gmra.mrb[0].mxu0 %vm475_vm3, %v3834_v36  ;;  %v3838_v36 = vld [vmem:[%s3923_s27 + $0x40] ss:$8 sps:$4 sm:$0xff]   ;;  %v4472_v43 = vsel %vm4135_vm6, %v3109_v38, %v871_v12  ;;  %v2281_v32 = vrot.slane %v2279_v54, 4  ;;  %v3086_v10 = vcombine.low %v4210_v22, %v4217_v41  ;;  %v2307_v4 = vshrl.u32 %v3309_v61, 16  ;;  %v4492_v42 = vld [vmem:[%s3923_s27 + $0x34] sm:$0x1] }
  0x6d   : > { %3634 = vmatpush3.bf16.msra.mxu0 %v4236_v62  ;;  %3621 = vmatprep.mubr.msk.bf16.mxu0 %vm475_vm3, %v3836_v44  ;;  %v4452_v62 = vld [vmem:[%s3923_s27 + $0x24] sm:$0x1]  ;;  %v4456_v44 = vrot.slane %v2243_v14, 4  ;;  %v2284_v14 = vrot.slane %v2282_v57, 5  ;;  %v4477_v25 = vsel %vm4135_vm6, %v3110_v59, %v875_v40  ;;  %v2288_v50 = vshll.u32 %v4467_v53, 16 }
  0x6e   : > { %3635 = vmatprep.subr.bf16.mxu0 %v3841_v49  ;;  %v2274_v8 = vshll.u32 %v4452_v62, 16  ;;  %v2310_v22 = vshll.u32 %v3309_v61, 16  ;;  %v3311_v41 = vld [vmem:[%s3923_s27 + $0x40] sm:$0xf]  ;;  %v2295_v54 = vrot.slane %v2293_v35, 4  ;;  %v879_v57 = vrot.slane %v4220_v30, 5 }
  0x6f   : > { %v2249_v60 = vsel %vm3963_vm2, %v4456_v44, %v4458_v2  ;;  %v2263_v44 = vsel %vm3963_vm2, %v2258_v26, %v4460_v33  ;;  %v2285_v2 = vor.u32 %v2284_v14, %v2281_v32  ;;  %v3843_v59 = vld [vmem:[%s3923_s27 + $0x70] ss:$8 sps:$4 sm:$0xff]   ;;  %v2309_v40 = vrot.slane %v2307_v4, 4  ;;  %v4516_v26 = vld [vmem:[%s3923_s27 + $0x3c] sm:$0x1] }
  0x70   : > { %3526 = vmatmul.mubr.msk.bf16.gmra.mrb[8].mxu1 %vm475_vm3, %v3084_v45  ;;  %v4496_v12 = vrot.slane %v2274_v8, 5  ;;  %v883_v30 = vrot.slane %v4225_v28, 5  ;;  %v4513_v33 = vrot.slane %v2288_v50, 5  ;;  %v2302_v35 = vshll.u32 %v4492_v42, 16  ;;  %v4548_v45 = vld [vmem:[%s3923_s27 + $0x54] sm:$0x1] }
  0x71   : > { %3529 = vmatprep.mubr.msk.bf16.mxu1 %vm475_vm3, %v3085_v7  ;;  %3636 = vmatpush3.bf16.msra.mxu0 %v3841_v49  ;;  %v2296_v49 = vshll.u32 %v3307_v9, 16  ;;  %v2271_v7 = vor.u32 %v2270_v39, %v2267_v13  ;;  %v3842_v9 = vld [vmem:[%s3923_s27 + $0x60] ss:$8 sps:$4 sm:$0xff]   ;;  %v3112_v13 = vrot.slane %v785_v6, 9  ;;  %v2321_v32 = vshrl.u32 %v3311_v41, 16 }
  0x72   : > { %3653 = vmatprep.subr.bf16.mxu0 %v4444_v1  ;;  %v3313_v39 = vld [vmem:[%s3923_s27 + $0x48] sm:$0xf]  ;;  %v2324_v14 = vshll.u32 %v3311_v41, 16  ;;  %v2286_v50 = vrot.slane %v2285_v2, 4  ;;  %v2316_v11 = vshll.u32 %v4516_v26, 16  ;;  %v2358_v15 = vshll.u32 %v4548_v45, 16 }
  0x73   : > { %v2298_v38 = vrot.slane %v2296_v49, 5  ;;  %v4511_v8 = vrot.slane %v2271_v7, 4  ;;  %v4525_v28 = vsel %vm4135_vm6, %v3112_v13, %v883_v30  ;;  %v2335_v49 = vshrl.u32 %v3313_v39, 16  ;;  %v4531_v7 = vld [vmem:[%s3923_s27 + $0x44] sm:$0x1] }
  0x74   : > { %3622 = vmatmul.mubr.msk.bf16.gmra.mrb[4].mxu0 %vm475_vm3, %v3838_v36  ;;  %v3111_v36 = vrot.slane %v784_v46, 9  ;;  %v2338_v46 = vshll.u32 %v3313_v39, 16  ;;  %v4537_v41 = vld [vmem:[%s3923_s27 + $0x4c] sm:$0x1]  ;;  %v2323_v2 = vrot.slane %v2321_v32, 4  ;;  %v2318_v6 = vrot.slane %v2316_v11, 5 }
  0x75   : > { %3625 = vmatprep.mubr.msk.bf16.mxu0 %vm475_vm3, %v3840_v5  ;;  %v2312_v5 = vrot.slane %v2310_v22, 5  ;;  %v2299_v4 = vor.u32 %v2298_v38, %v2295_v54  ;;  %v3331_v22 = vcombine.low %v2249_v60, %v2263_v44  ;;  %v3845_v54 = vld [vmem:[%s4868_s1 + $0x38] sm:$0xff]   ;;  %v2326_v38 = vrot.slane %v2324_v14, 5  ;;  %v3319_v30 = vld [vmem:[%s3923_s27 + $0x60] sm:$0xf] }
  0x76   : > { %v4507_v61 = vsel %vm4135_vm6, %v3111_v36, %v879_v57  ;;  %v2337_v13 = vrot.slane %v2335_v49, 4  ;;  %v2340_v39 = vrot.slane %v2338_v46, 5  ;;  %v2304_v60 = vrot.slane %v2302_v35, 5  ;;  %v4562_v14 = vld [vmem:[%s3923_s27 + $0x5c] sm:$0x1] }
  0x77   : > { %v2313_v63 = vor.u32 %v2312_v5, %v2309_v40  ;;  %v3844_v40 = vld [vmem:[%s3923_s27 + $0x80] ss:$8 sps:$4 sm:$0xff]   ;;  %v2330_v44 = vshll.u32 %v4531_v7, 16  ;;  %v2277_v35 = vsel %vm3963_vm2, %v4511_v8, %v4496_v12  ;;  %v2291_v32 = vsel %vm3963_vm2, %v2286_v50, %v4513_v33  ;;  %v3323_v11 = vld [vmem:[%s3923_s27 + $0x70] sm:$0xf] }
  0x78   : > { %3530 = vmatmul.mubr.msk.bf16.gmra.mrb[12].mxu1 %vm475_vm3, %v3086_v10  ;;  %v3315_v10 = vld [vmem:[%s3923_s27 + $0x50] sm:$0xf]  ;;  %v2327_v19 = vor.u32 %v2326_v38, %v2323_v2  ;;  %v2341_v34 = vor.u32 %v2340_v39, %v2337_v13  ;;  %v2380_v12 = vshll.u32 %v3319_v30, 16  ;;  %v4583_v2 = vld [vmem:[%s3923_s27 + $0x64] sm:$0x1] }
  0x79   : > { %3537 = vmatprep.mubr.msk.bf16.mxu1 %vm475_vm3, %v3113_v3  ;;  %v3317_v3 = vld [vmem:[%s3923_s27 + $0x58] sm:$0xf]  ;;  %v2349_v36 = vshrl.u32 %v3315_v10, 16  ;;  %v2352_v57 = vshll.u32 %v3315_v10, 16  ;;  %v2314_v10 = vrot.slane %v2313_v63, 4  ;;  %v4572_v33 = vrot.slane %v2330_v44, 5 }
  0x7a   : > { %v2363_v5 = vshrl.u32 %v3317_v3, 16  ;;  %v2366_v37 = vshll.u32 %v3317_v3, 16  ;;  %v3332_v3 = vcombine.low %v2277_v35, %v2291_v32  ;;  %v3325_v38 = vld [vmem:[%s3923_s27 + $0x78] sm:$0xf]  ;;  %v2342_v13 = vrot.slane %v2341_v34, 4 }
  0x7b   : > { %v2351_v49 = vrot.slane %v2349_v36, 4  ;;  %v2354_v46 = vrot.slane %v2352_v57, 5  ;;  %v2372_v57 = vshll.u32 %v4562_v14, 16  ;;  %v4588_v39 = vld [vmem:[%s3923_s27 + $0x6c] sm:$0x1]  ;;  %v2419_v32 = vshrl.u32 %v3325_v38, 16 }
  0x7c   : > { %3626 = vmatmul.mubr.msk.bf16.gmra.mrb[8].mxu0 %vm475_vm3, %v3842_v9  ;;  %v2300_v9 = vrot.slane %v2299_v4, 4  ;;  %v3321_v4 = vld [vmem:[%s3923_s27 + $0x68] sm:$0xf]  ;;  %v2365_v50 = vrot.slane %v2363_v5, 4  ;;  %v2368_v63 = vrot.slane %v2366_v37, 5  ;;  %v2386_v23 = vshll.u32 %v4583_v2, 16 }
  0x7d   : > { %3629 = vmatprep.mubr.msk.bf16.mxu0 %vm475_vm3, %v3843_v59  ;;  %v2344_v59 = vshll.u32 %v4537_v41, 16  ;;  %v2355_v36 = vor.u32 %v2354_v46, %v2351_v49  ;;  %v2394_v37 = vshll.u32 %v3321_v4, 16  ;;  %v2374_v46 = vrot.slane %v2372_v57, 5  ;;  %v3327_v34 = vld [vmem:[%s3923_s27 + $0x80] sm:$0xf] }
  0x7e   : > { %v2305_v8 = vsel %vm3963_vm2, %v2300_v9, %v2304_v60  ;;  %v2382_v60 = vrot.slane %v2380_v12, 5  ;;  %v2369_v5 = vor.u32 %v2368_v63, %v2365_v50  ;;  %v2400_v58 = vshll.u32 %v4588_v39, 16 }
  0x7f   : > { %v4576_v21 = vrot.slane %v2344_v59, 5  ;;  %v2396_v35 = vrot.slane %v2394_v37, 5  ;;  %v2356_v49 = vrot.slane %v2355_v36, 4  ;;  %v2422_v12 = vshll.u32 %v3325_v38, 16 }
  0x80   : > { %3538 = vmatmul.mubr.msk.bf16.vlgmr.msra.gmra.mrb[0].mxu1 %vm475_vm3, %v3114_v47  ;;  %v2377_v47 = vshrl.u32 %v3319_v30, 16  ;;  %v4597_v30 = vld [vmem:[%s3923_s27 + $0x74] sm:$0x1]  ;;  %v2370_v50 = vrot.slane %v2369_v5, 4  ;;  %v2447_v37 = vshrl.u32 %v3329_v52, 16  ;;  %v2388_v38 = vrot.slane %v2386_v23, 5 }
  0x81   : > { %3554 = vmatpush3.bf16.msra.mxu1 %v4366_v17  ;;  %3541 = vmatprep.mubr.msk.bf16.mxu1 %vm475_vm3, %v3115_v18  ;;  %v2319_v17 = vsel %vm3963_vm2, %v2314_v10, %v2318_v6  ;;  %v2391_v18 = vshrl.u32 %v3321_v4, 16  ;;  %v2328_v6 = vrot.slane %v2327_v19, 4  ;;  %v2360_v10 = vrot.slane %v2358_v15, 5 }
  0x82   : > { %3555 = vmatprep.subr.bf16.mxu1 %v3845_v54  ;;  %v2379_v9 = vrot.slane %v2377_v47, 4  ;;  %v3333_v44 = vcombine.low %v2305_v8, %v2319_v17  ;;  %v3848_v47 = vld [vmem:[%s4868_s1 + $0x88] sm:$0xff]   ;;  %v4617_v17 = vld [vmem:[%s3923_s27 + $0x7c] sm:$0x1]  ;;  %v2414_v24 = vshll.u32 %v4597_v30, 16  ;;  %v2424_v15 = vrot.slane %v2422_v12, 5 }
  0x83   : > { %v2393_v59 = vrot.slane %v2391_v18, 4  ;;  %v2333_v8 = vsel %vm3963_vm2, %v2328_v6, %v4572_v33  ;;  %v2433_v18 = vshrl.u32 %v3327_v34, 16  ;;  %v2347_v36 = vsel %vm3963_vm2, %v2342_v13, %v4576_v21  ;;  %v4633_v21 = vld [vmem:[%s3923_s27 + $0x84] sm:$0x1] }
  0x84   : > { %3630 = vmatmul.mubr.msk.bf16.gmra.mrb[12].mxu0 %vm475_vm3, %v3844_v40  ;;  %v4593_v40 = vld [vmem:[%s4868_s1 + $0x40] sm:$0xff]   ;;  %v2383_v63 = vor.u32 %v2382_v60, %v2379_v9  ;;  %v2361_v33 = vsel %vm3963_vm2, %v2356_v49, %v2360_v10  ;;  %v2402_v6 = vrot.slane %v2400_v58, 5  ;;  %v2428_v60 = vshll.u32 %v4617_v17, 16  ;;  %v4640_v49 = vld [vmem:[%s3923_s27 + $0x8c] sm:$0x1] }
  0x85   : > { %3637 = vmatprep.mubr.msk.bf16.mxu0 %vm475_vm3, %v3331_v22  ;;  %3556 = vmatpush3.bf16.msra.mxu1 %v3845_v54  ;;  %v2405_v22 = vshrl.u32 %v3323_v11, 16  ;;  %v2408_v54 = vshll.u32 %v3323_v11, 16  ;;  %v2436_v11 = vshll.u32 %v3327_v34, 16  ;;  %v2435_v13 = vrot.slane %v2433_v18, 4 }
  0x86   : > { %3673 = vmatprep.subr.bf16.mxu1 %v4593_v40  ;;  %v2449_v10 = vrot.slane %v2447_v37, 4  ;;  %v2430_v23 = vrot.slane %v2428_v60, 5  ;;  %v2442_v58 = vshll.u32 %v4633_v21, 16  ;;  %v1454_v12 = vshll.u32 %v4258_v0, 16  ;;  %v3352_v37 = vld [vmem:[%s3923_s27 + $0x28] sm:$0xe] }
  0x87   : > { %v2407_v4 = vrot.slane %v2405_v22, 4  ;;  %v2410_v19 = vrot.slane %v2408_v54, 5  ;;  %v2438_v5 = vrot.slane %v2436_v11, 5  ;;  %v2450_v22 = vshll.u32 %v3329_v52, 16 }
  0x88   : > { %3542 = vmatmul.mubr.msk.bf16.gmra.mrb[4].mxu1 %vm475_vm3, %v3116_v16  ;;  %v2421_v16 = vrot.slane %v2419_v32, 4  ;;  %v2384_v54 = vrot.slane %v2383_v63, 4  ;;  %v2687_v52 = vrot.slane %v4405_v56, 5  ;;  %v2444_v11 = vrot.slane %v2442_v58, 5  ;;  %v3850_v58 = vld [vmem:[%s3923_s27 + $0x28] ss:$8 sps:$4 sm:$0xff]  }
  0x89   : > { %3545 = vmatprep.mubr.msk.bf16.mxu1 %vm475_vm3, %v3117_v51  ;;  %v2397_v51 = vor.u32 %v2396_v35, %v2393_v59  ;;  %v2411_v57 = vor.u32 %v2410_v19, %v2407_v4  ;;  %v4876_v59 = vcombine.low %v4426_v20, %v4434_v48  ;;  %v3334_v35 = vcombine.low %v2333_v8, %v2347_v36  ;;  %v3349_v20 = vld [vmem:[%s3923_s27 + $0x10] sm:$0xe]  ;;  %v3351_v36 = vld [vmem:[%s3923_s27 + $0x20] sm:$0xe] }
  0x8a   : > { %v2425_v9 = vor.u32 %v2424_v15, %v2421_v16  ;;  %v4877_v4 = vcombine.low %v4472_v43, %v4477_v25  ;;  %v2439_v48 = vor.u32 %v2438_v5, %v2435_v13  ;;  %v3350_v16 = vld [vmem:[%s3923_s27 + $0x18] sm:$0xe]  ;;  %v3847_v43 = vld [vmem:[%s3923_s27 + $0x8] ss:$8 sps:$4 sm:$0xff]   ;;  %v2389_v25 = vsel %vm3963_vm2, %v2384_v54, %v2388_v38 }
  0x8b   : > { %v2412_v32 = vrot.slane %v2411_v57, 4  ;;  %v2691_v15 = vrot.slane %v4411_v27, 5  ;;  %v3353_v38 = vld [vmem:[%s3923_s27 + $0x30] sm:$0xe]  ;;  %v4878_v60 = vcombine.low %v4507_v61, %v4525_v28  ;;  %v2695_v61 = vrot.slane %v4452_v62, 5 }
  0x8c   : > { %3638 = vmatmul.mubr.msk.bf16.vlgmr.msra.gmra.mrb[0].mxu0 %vm475_vm3, %v3332_v3  ;;  %v2375_v3 = vsel %vm3963_vm2, %v2370_v50, %v2374_v46  ;;  %v2452_v46 = vrot.slane %v2450_v22, 5  ;;  %v2426_v34 = vrot.slane %v2425_v9, 4  ;;  %v2456_v50 = vshll.u32 %v4640_v49, 16  ;;  %v3181_v28 = vld [vmem:[%s3923_s27 + $0x48] sm:$0xf] }
  0x8d   : > { %3654 = vmatpush3.bf16.msra.mxu0 %v4444_v1  ;;  %3641 = vmatprep.mubr.msk.bf16.mxu0 %vm475_vm3, %v3333_v44  ;;  %v2398_v1 = vrot.slane %v2397_v51, 4  ;;  %v2416_v44 = vrot.slane %v2414_v24, 5  ;;  %v3335_v19 = vcombine.low %v2361_v33, %v2375_v3  ;;  %v3365_v24 = vrot.slane %v3349_v20, 9  ;;  %v3354_v3 = vld [vmem:[%s3923_s27 + $0x38] sm:$0xe] }
  0x8e   : > { %3655 = vmatprep.subr.bf16.mxu0 %v3848_v47  ;;  %v2453_v8 = vor.u32 %v2452_v46, %v2449_v10  ;;  %v2431_v0 = vsel %vm3963_vm2, %v2426_v34, %v2430_v23  ;;  %v3366_v51 = vrot.slane %v3350_v16, 9  ;;  %v2440_v18 = vrot.slane %v2439_v48, 4  ;;  %v3183_v10 = vld [vmem:[%s3923_s27 + $0x50] sm:$0xf]  ;;  %v3185_v62 = vld [vmem:[%s3923_s27 + $0x58] sm:$0xf] }
  0x8f   : > { %v2417_v63 = vsel %vm3963_vm2, %v2412_v32, %v2416_v44  ;;  %v2458_v57 = vrot.slane %v2456_v50, 5  ;;  %v1468_v9 = vshll.u32 %v4268_v29, 16  ;;  %v4678_v13 = vsel %vm4135_vm6, %v3365_v24, %v2687_v52  ;;  %v3187_v23 = vld [vmem:[%s3923_s27 + $0x60] sm:$0xf]  ;;  %v3356_v24 = vld [vmem:[%s3923_s27 + $0x48] sm:$0xe] }
  0x90   : > { %3546 = vmatmul.mubr.msk.bf16.gmra.mrb[8].mxu1 %vm475_vm3, %v4876_v59  ;;  %v2454_v33 = vrot.slane %v2453_v8, 4  ;;  %v3337_v27 = vcombine.low %v2417_v63, %v2431_v0  ;;  %v4682_v5 = vsel %vm4135_vm6, %v3366_v51, %v2691_v15  ;;  %v3367_v29 = vrot.slane %v3351_v36, 9 }
  0x91   : > { %3549 = vmatprep.mubr.msk.bf16.mxu1 %vm475_vm3, %v4877_v4  ;;  %3656 = vmatpush3.bf16.msra.mxu0 %v3848_v47  ;;  %v2403_v47 = vsel %vm3963_vm2, %v2398_v1, %v2402_v6  ;;  %v4667_v6 = vrot.slane %v1454_v12, 5  ;;  %v2445_v22 = vsel %vm3963_vm2, %v2440_v18, %v2444_v11  ;;  %v3368_v54 = vrot.slane %v3352_v37, 9  ;;  %v3849_v4 = vld [vmem:[%s3923_s27 + $0x18] ss:$8 sps:$4 sm:$0xff]  }
  0x92   : > { %v3336_v56 = vcombine.low %v2389_v25, %v2403_v47  ;;  %v2699_v1 = vrot.slane %v4467_v53, 5  ;;  %v3369_v44 = vrot.slane %v3353_v38, 9  ;;  %v2459_v59 = vsel %vm3963_vm2, %v2454_v33, %v2458_v57  ;;  %v3355_v25 = vld [vmem:[%s3923_s27 + $0x40] sm:$0xe]  ;;  %v3857_v38 = vld [vmem:[%s4868_s1 + $0x48] sm:$0xff]  }
  0x93   : > { %v3370_v32 = vrot.slane %v3354_v3, 9  ;;  %v2707_v46 = vrot.slane %v4516_v26, 5  ;;  %v1420_v34 = vshll.u32 %v3181_v28, 16  ;;  %v3381_v53 = vcombine.low %v4678_v13, %v4682_v5  ;;  %v3851_v37 = vld [vmem:[%s3923_s27 + $0x38] ss:$8 sps:$4 sm:$0xff]  }
  0x94   : > { %3642 = vmatmul.mubr.msk.bf16.gmra.mrb[4].mxu0 %vm475_vm3, %v3334_v35  ;;  %v2703_v35 = vrot.slane %v4492_v42, 5  ;;  %v4704_v42 = vsel %vm4135_vm6, %v3367_v29, %v2695_v61  ;;  %v1431_v26 = vshrl.u32 %v3183_v10, 16  ;;  %v1434_v20 = vshll.u32 %v3183_v10, 16  ;;  %v3358_v5 = vld [vmem:[%s3923_s27 + $0x58] sm:$0xe] }
  0x95   : > { %3645 = vmatprep.mubr.msk.bf16.mxu0 %vm475_vm3, %v3335_v19  ;;  %v1417_v19 = vshrl.u32 %v3181_v28, 16  ;;  %v3338_v48 = vcombine.low %v2445_v22, %v2459_v59  ;;  %v4708_v16 = vsel %vm4135_vm6, %v3368_v54, %v2699_v1  ;;  %v1445_v12 = vshrl.u32 %v3185_v62, 16  ;;  %v3858_v22 = vld [vmem:[%s3923_s27 + $0x4c] sm:$0x1]  ;;  %v3852_v10 = vld [vmem:[%s3923_s27 + $0x48] ss:$8 sps:$4 sm:$0xff]  }
  0x96   : > { %v1448_v8 = vshll.u32 %v3185_v62, 16  ;;  %v4712_v50 = vsel %vm4135_vm6, %v3369_v44, %v2703_v35  ;;  %v1459_v47 = vshrl.u32 %v3187_v23, 16  ;;  %v1462_v63 = vshll.u32 %v3187_v23, 16  ;;  %v3189_v44 = vld [vmem:[%s3923_s27 + $0x68] sm:$0xf] }
  0x97   : > { %v1419_v0 = vrot.slane %v1417_v19, 4  ;;  %v1422_v52 = vrot.slane %v1420_v34, 5  ;;  %v1447_v51 = vrot.slane %v1445_v12, 4  ;;  %v1433_v18 = vrot.slane %v1431_v26, 4  ;;  %v3859_v35 = vld [vmem:[%s3923_s27 + $0x54] sm:$0x1] }
  0x98   : > { %3550 = vmatmul.mubr.msk.bf16.gmra.mrb[12].mxu1 %vm475_vm3, %v4878_v60  ;;  %v1450_v15 = vrot.slane %v1448_v8, 5  ;;  %v1436_v11 = vrot.slane %v1434_v20, 5  ;;  %v1461_v36 = vrot.slane %v1459_v47, 4  ;;  %v1464_v33 = vrot.slane %v1462_v63, 5  ;;  %v3191_v34 = vld [vmem:[%s3923_s27 + $0x70] sm:$0xf] }
  0x99   : > { %3557 = vmatprep.mubr.msk.bf16.mxu1 %vm475_vm3, %v3847_v43  ;;  %v4716_v43 = vsel %vm4135_vm6, %v3370_v32, %v2707_v46  ;;  %v1470_v57 = vrot.slane %v1468_v9, 5  ;;  %v3382_v60 = vcombine.low %v4704_v42, %v4708_v16  ;;  %v3371_v3 = vrot.slane %v3355_v25, 9  ;;  %v3360_v25 = vld [vmem:[%s3923_s27 + $0x68] sm:$0xe] }
  0x9a   : > { %v2711_v9 = vrot.slane %v4531_v7, 5  ;;  %v3372_v13 = vrot.slane %v3356_v24, 9  ;;  %v1465_v29 = vor.u32 %v1464_v33, %v1461_v36  ;;  %v2715_v61 = vrot.slane %v4537_v41, 5  ;;  %v3853_v24 = vld [vmem:[%s3923_s27 + $0x58] ss:$8 sps:$4 sm:$0xff]  }
  0x9b   : > { %v1423_v28 = vor.u32 %v1422_v52, %v1419_v0  ;;  %v1426_v54 = vshll.u32 %v3858_v22, 16  ;;  %v1437_v59 = vor.u32 %v1436_v11, %v1433_v18  ;;  %v1440_v7 = vshll.u32 %v3859_v35, 16  ;;  %v3854_v0 = vld [vmem:[%s3923_s27 + $0x68] ss:$8 sps:$4 sm:$0xff]  }
  0x9c   : > { %3646 = vmatmul.mubr.msk.bf16.gmra.mrb[8].mxu0 %vm475_vm3, %v3336_v56  ;;  %v3357_v56 = vld [vmem:[%s3923_s27 + $0x50] sm:$0xe]  ;;  %v1466_v46 = vrot.slane %v1465_v29, 4  ;;  %v2719_v62 = vrot.slane %v4548_v45, 5  ;;  %v2723_v41 = vrot.slane %v4562_v14, 5  ;;  %v2712_v23 = vsel %vm4135_vm6, %v3371_v3, %v2711_v9 }
  0x9d   : > { %3649 = vmatprep.mubr.msk.bf16.mxu0 %vm475_vm3, %v3337_v27  ;;  %v1451_v27 = vor.u32 %v1450_v15, %v1447_v51  ;;  %v3373_v32 = vrot.slane %v3357_v56, 9  ;;  %v1476_v42 = vshll.u32 %v3189_v44, 16  ;;  %v2716_v45 = vsel %vm4135_vm6, %v3372_v13, %v2715_v61  ;;  %v3361_v15 = vld [vmem:[%s3923_s27 + $0x70] sm:$0xe]  ;;  %v3195_v3 = vld [vmem:[%s3923_s27 + $0x80] sm:$0xf] }
  0x9e   : > { %v1424_v14 = vrot.slane %v1423_v28, 4  ;;  %v1438_v20 = vrot.slane %v1437_v59, 4  ;;  %v1487_v16 = vshrl.u32 %v3191_v34, 16  ;;  %v1490_v12 = vshll.u32 %v3191_v34, 16  ;;  %v3860_v13 = vld [vmem:[%s3923_s27 + $0x6c] sm:$0x1] }
  0x9f   : > { %v1452_v1 = vrot.slane %v1451_v27, 4  ;;  %v2720_v8 = vsel %vm4135_vm6, %v3373_v32, %v2719_v62  ;;  %v1478_v63 = vrot.slane %v1476_v42, 5  ;;  %v3384_v52 = vcombine.low %v2712_v23, %v2716_v45  ;;  %v3855_v32 = vld [vmem:[%s3923_s27 + $0x78] ss:$8 sps:$4 sm:$0xff]   ;;  %v3364_v42 = vld [vmem:[%s3923_s27 + $0x88] sm:$0xe] }
  0xa0   : > { %3558 = vmatmul.mubr.msk.bf16.vlgmr.msra.gmra.mrb[0].mxu1 %vm475_vm3, %v3849_v4  ;;  %v3374_v4 = vrot.slane %v3358_v5, 9  ;;  %v1489_v36 = vrot.slane %v1487_v16, 4  ;;  %v1492_v33 = vrot.slane %v1490_v12, 5  ;;  %v3376_v56 = vrot.slane %v3360_v25, 9  ;;  %v3863_v12 = vld [vmem:[%s3923_s27 + $0x84] sm:$0x1] }
  0xa1   : > { %3675 = vmatpush3.bf16.msra.mxu1 %v4593_v40  ;;  %3561 = vmatprep.mubr.msk.bf16.mxu1 %vm475_vm3, %v3850_v58  ;;  %v3383_v40 = vcombine.low %v4712_v50, %v4716_v43  ;;  %v1457_v19 = vsel %vm3963_vm2, %v1452_v1, %v4667_v6  ;;  %v1471_v58 = vsel %vm3963_vm2, %v1466_v46, %v1470_v57  ;;  %v1428_v6 = vrot.slane %v1426_v54, 5  ;;  %v3359_v43 = vld [vmem:[%s3923_s27 + $0x60] sm:$0xe]  ;;  %v3362_v57 = vld [vmem:[%s3923_s27 + $0x78] sm:$0xe] }
  0xa2   : > { %3674 = vmatprep.subr.bf16.mxu1 %v3857_v38  ;;  %v4754_v26 = vcombine.low %v1457_v19, %v1471_v58  ;;  %v2724_v50 = vsel %vm4135_vm6, %v3374_v4, %v2723_v41  ;;  %v2731_v27 = vrot.slane %v4588_v39, 5  ;;  %v1482_v5 = vshll.u32 %v3860_v13, 16  ;;  %v3861_v1 = vld [vmem:[%s3923_s27 + $0x74] sm:$0x1]  ;;  %v4824_v13 = vld [vmem:[%s4869_s2] ss:$0 sm:$0xff] }
  0xa3   : > { %v1429_v51 = vsel %vm3963_vm2, %v1424_v14, %v1428_v6  ;;  %v3385_v11 = vcombine.low %v2720_v8, %v2724_v50  ;;  %v2735_v29 = vrot.slane %v4597_v30, 5  ;;  %v3378_v61 = vrot.slane %v3362_v57, 9 }
  0xa4   : > { %3650 = vmatmul.mubr.msk.bf16.gmra.mrb[12].mxu0 %vm475_vm3, %v3338_v48  ;;  %v1442_v48 = vrot.slane %v1440_v7, 5  ;;  %v2739_v28 = vrot.slane %v4617_v17, 5  ;;  %v1496_v39 = vshll.u32 %v3861_v1, 16  ;;  %v2732_v35 = vsel %vm4135_vm6, %v3376_v56, %v2731_v27 }
  0xa5   : > { %3657 = vmatprep.mubr.msk.bf16.mxu0 %vm475_vm3, %v3381_v53  ;;  %3676 = vmatpush3.bf16.msra.mxu1 %v3857_v38  ;;  %v1473_v53 = vshrl.u32 %v3189_v44, 16  ;;  %v3375_v38 = vrot.slane %v3359_v43, 9  ;;  %v1515_v44 = vshrl.u32 %v3195_v3, 16  ;;  %v1484_v17 = vrot.slane %v1482_v5, 5 }
  0xa6   : > { %v1443_v18 = vsel %vm3963_vm2, %v1438_v20, %v1442_v48  ;;  %v2740_v62 = vsel %vm4135_vm6, %v3378_v61, %v2739_v28  ;;  %v1498_v34 = vrot.slane %v1496_v39, 5  ;;  %v3862_v20 = vld [vmem:[%s3923_s27 + $0x7c] sm:$0x1]  ;;  %v1524_v8 = vshll.u32 %v3863_v12, 16 }
  0xa7   : > { %v1475_v47 = vrot.slane %v1473_v53, 4  ;;  %v3201_v59 = vcombine.low %v1429_v51, %v1443_v18  ;;  %v1517_v23 = vrot.slane %v1515_v44, 4  ;;  %v3363_v53 = vld [vmem:[%s3923_s27 + $0x80] sm:$0xe]  ;;  %v1510_v48 = vshll.u32 %v3862_v20, 16 }
  0xa8   : > { %3562 = vmatmul.mubr.msk.bf16.gmra.mrb[4].mxu1 %vm475_vm3, %v3851_v37  ;;  %v3193_v37 = vld [vmem:[%s3923_s27 + $0x78] sm:$0xf]  ;;  %v3379_v50 = vrot.slane %v3363_v53, 9  ;;  %v2743_v43 = vrot.slane %v4633_v21, 5  ;;  %v1526_v18 = vrot.slane %v1524_v8, 5 }
  0xa9   : > { %3565 = vmatprep.mubr.msk.bf16.mxu1 %vm475_vm3, %v3852_v10  ;;  %v1479_v9 = vor.u32 %v1478_v63, %v1475_v47  ;;  %v1501_v22 = vshrl.u32 %v3193_v37, 16  ;;  %v1504_v54 = vshll.u32 %v3193_v37, 16  ;;  %v1518_v10 = vshll.u32 %v3195_v3, 16 }
  0xaa   : > { %v3380_v63 = vrot.slane %v3364_v42, 9  ;;  %v1512_v51 = vrot.slane %v1510_v48, 5  ;;  %v2744_v21 = vsel %vm4135_vm6, %v3379_v50, %v2743_v43 }
  0xab   : > { %v1480_v7 = vrot.slane %v1479_v9, 4  ;;  %v1503_v4 = vrot.slane %v1501_v22, 4  ;;  %v1506_v41 = vrot.slane %v1504_v54, 5  ;;  %v1520_v58 = vrot.slane %v1518_v10, 5 }
  0xac   : > { %3658 = vmatmul.mubr.msk.bf16.vlgmr.msra.gmra.mrb[0].mxu0 %vm475_vm3, %v3382_v60  ;;  %v2727_v60 = vrot.slane %v4583_v2, 5  ;;  %v1493_v2 = vor.u32 %v1492_v33, %v1489_v36 }
  0xad   : > { %3661 = vmatprep.mubr.msk.bf16.mxu0 %vm475_vm3, %v3383_v40  ;;  %v3377_v40 = vrot.slane %v3361_v15, 9  ;;  %v1485_v14 = vsel %vm3963_vm2, %v1480_v7, %v1484_v17  ;;  %v1507_v16 = vor.u32 %v1506_v41, %v1503_v4  ;;  %v1521_v47 = vor.u32 %v1520_v58, %v1517_v23 }
  0xae   : > { %v2728_v30 = vsel %vm4135_vm6, %v3375_v38, %v2727_v60  ;;  %v1494_v19 = vrot.slane %v1493_v2, 4 }
  0xaf   : > { %v2736_v46 = vsel %vm4135_vm6, %v3377_v40, %v2735_v29  ;;  %v3386_v45 = vcombine.low %v2728_v30, %v2732_v35  ;;  %v1522_v15 = vrot.slane %v1521_v47, 4 }
  0xb0   : > { %3566 = vmatmul.mubr.msk.bf16.gmra.mrb[8].mxu1 %vm475_vm3, %v3853_v24  ;;  %v3387_v6 = vcombine.low %v2736_v46, %v2740_v62  ;;  %v1499_v25 = vsel %vm3963_vm2, %v1494_v19, %v1498_v34  ;;  %v2747_v24 = vrot.slane %v4640_v49, 5 }
  0xb1   : > { %3569 = vmatprep.mubr.msk.bf16.mxu1 %vm475_vm3, %v3854_v0  ;;  %v3203_v0 = vcombine.low %v1485_v14, %v1499_v25  ;;  %v1527_v33 = vsel %vm3963_vm2, %v1522_v15, %v1526_v18 }
  0xb4   : > { %3662 = vmatmul.mubr.msk.bf16.gmra.mrb[4].mxu0 %vm475_vm3, %v3384_v52  ;;  %v1508_v52 = vrot.slane %v1507_v16, 4 }
  0xb5   : > { %3665 = vmatprep.mubr.msk.bf16.mxu0 %vm475_vm3, %v3385_v11  ;;  %v2748_v11 = vsel %vm4135_vm6, %v3380_v63, %v2747_v24 }
  0xb6   : > { %v3388_v36 = vcombine.low %v2744_v21, %v2748_v11  ;;  %v1513_v49 = vsel %vm3963_vm2, %v1508_v52, %v1512_v51 }
  0xb7   : > { %v3204_v57 = vcombine.low %v1513_v49, %v1527_v33 }
  0xb8   : > { %3570 = vmatmul.mubr.msk.bf16.gmra.mrb[12].mxu1 %vm475_vm3, %v3855_v32 }
  0xb9   : > { %3585 = vmatprep.mubr.msk.bf16.mxu1 %vm475_vm3, %v3201_v59 }
  0xbc   : > { %3666 = vmatmul.mubr.msk.bf16.gmra.mrb[8].mxu0 %vm475_vm3, %v3386_v45 }
  0xbd   : > { %3669 = vmatprep.mubr.msk.bf16.mxu0 %vm475_vm3, %v3387_v6 }
  0xc0   : > { %3586 = vmatmul.mubr.msk.bf16.vlgmr.msra.gmra.mrb[8].mxu1 %vm475_vm3, %v4754_v26 }
  0xc1   : > { %3589 = vmatprep.mubr.msk.bf16.mxu1 %vm475_vm3, %v3203_v0 }
  0xc4   : > { %3670 = vmatmul.mubr.msk.bf16.gmra.mrb[12].mxu0 %vm475_vm3, %v3388_v36 }
  0xc8   : > { %3590 = vmatmul.mubr.msk.bf16.gmra.mrb[12].mxu1 %vm475_vm3, %v3204_v57 }
 0x173   : > { %v3559_v37 = vpop.f32.mrb[0].mxu1 }
 0x174   : > { %v1193_v55 = vpop.f32.mrb[1].mxu1 }
 0x175   : > { %v3560_v38 = vpop.f32.mrb[2].mxu1 }
 0x176   : > { %v1196_v60 = vpop.f32.mrb[3].mxu1 }
 0x17b   : > { %v3563_v56 = vpop.f32.mrb[4].mxu1 }
 0x17c   : > { %v1209_v26 = vpop.f32.mrb[5].mxu1 }
 0x17d   : > { %v3564_v27 = vpop.f32.mrb[6].mxu1 }
 0x17e   : > { %v1212_v3 = vpop.f32.mrb[7].mxu1 }
 0x17f   : > { %v3659_v9 = vpop.f32.mrb[0].mxu0 }
 0x180   : > { %v3677_v31 = vadd.f32 %v3659_v9, %v3559_v37  ;;  %v2847_v5 = vpop.f32.mrb[1].mxu0 }
 0x181   : > { %v3678_v40 = vadd.f32 %v2847_v5, %v1193_v55  ;;  %v3660_v29 = vpop.f32.mrb[2].mxu0 }
 0x182   : > { %v2935_v61 = vadd.f32 %v3677_v31, %v4824_v13  ;;  %v3679_v28 = vadd.f32 %v3660_v29, %v3560_v38  ;;  %v2850_v22 = vpop.f32.mrb[3].mxu0 }
 0x183   : > { %v2933_v54 = vadd.f32 %v3678_v40, %v4824_v13  ;;  %v3680_v2 = vadd.f32 %v2850_v22, %v1196_v60 }
 0x184   : > { %v2936_v1 = vadd.f32 %v3679_v28, %v4824_v13  ;;  %v2951_v44 = vmax.f32 %v2935_v61, 0.0 }
 0x185   : > { %v2934_v39 = vadd.f32 %v3680_v2, %v4824_v13  ;;  %v2949_v59 = vmax.f32 %v2933_v54, 0.0 }
 0x186   : > { %v2952_v10 = vmax.f32 %v2936_v1, 0.0 }
 0x187   : > { %v2950_v30 = vmax.f32 %v2934_v39, 0.0  ;;  %v3663_v35 = vpop.f32.mrb[4].mxu0 }
 0x188   : > { %v2966_v7 = vadd.f32 %v2952_v10, %v2951_v44  ;;  %v3681_v17 = vadd.f32 %v3663_v35, %v3563_v56  ;;  %v2863_v32 = vpop.f32.mrb[5].mxu0 }
 0x189   : > { %v2965_v46 = vadd.f32 %v2950_v30, %v2949_v59  ;;  %v3682_v62 = vadd.f32 %v2863_v32, %v1209_v26  ;;  %v3664_v4 = vpop.f32.mrb[6].mxu0 }
 0x18a   : > { %v2974_v41 = vmul.f32 0.5, %v2966_v7  ;;  %v2939_v19 = vadd.f32 %v3681_v17, %v4824_v13  ;;  %v3683_v34 = vadd.f32 %v3664_v4, %v3564_v27  ;;  %v2866_v23 = vpop.f32.mrb[7].mxu0 }
 0x18b   : > { %v2973_v58 = vmul.f32 0.5, %v2965_v46  ;;  %v2937_v53 = vadd.f32 %v3682_v62, %v4824_v13  ;;  %v3684_v42 = vadd.f32 %v2866_v23, %v1212_v3 }
 0x18c   : > { %v2982_v45 = vpack.c.bf16 %v2974_v41, %v2974_v41  ;;  %v2940_v14 = vadd.f32 %v3683_v34, %v4824_v13  ;;  %v2955_v48 = vmax.f32 %v2939_v19, 0.0 }
 0x18d   : > { %v2981_v6 = vpack.c.bf16 %v2973_v58, %v2973_v58  ;;  %v2938_v20 = vadd.f32 %v3684_v42, %v4824_v13  ;;  %v2953_v12 = vmax.f32 %v2937_v53, 0.0 }
 0x18e   : > { %2991 = vst.msk [vmem:[%s4835_s11 + $0x4] sm:$0xf] %vm2989_vm7, %v2982_v45  ;;  %v2956_v16 = vmax.f32 %v2940_v14, 0.0 }
 0x18f   : > { %2990 = vst.msk [vmem:[%s4835_s11] sm:$0xf] %vm2989_vm7, %v2981_v6  ;;  %v2954_v8 = vmax.f32 %v2938_v20, 0.0  ;;  %v3667_v50 = vpop.f32.mrb[8].mxu0 }
 0x190   : > { %v2968_v43 = vadd.f32 %v2956_v16, %v2955_v48  ;;  %v2879_v25 = vpop.f32.mrb[9].mxu0 }
 0x191   : > { %v2967_v47 = vadd.f32 %v2954_v8, %v2953_v12  ;;  %v3668_v63 = vpop.f32.mrb[10].mxu0 }
 0x192   : > { %v2976_v24 = vmul.f32 0.5, %v2968_v43  ;;  %v2882_v0 = vpop.f32.mrb[11].mxu0 }
 0x193   : > { %v2975_v52 = vmul.f32 0.5, %v2967_v47  ;;  %v3587_v51 = vpop.f32.mrb[8].mxu1 }
 0x194   : > { %v2984_v15 = vpack.c.bf16 %v2976_v24, %v2976_v24  ;;  %v3685_v18 = vadd.f32 %v3667_v50, %v3587_v51  ;;  %v1658_v21 = vpop.f32.mrb[9].mxu1 }
 0x195   : > { %v2983_v11 = vpack.c.bf16 %v2975_v52, %v2975_v52  ;;  %v3686_v36 = vadd.f32 %v2879_v25, %v1658_v21  ;;  %v3588_v49 = vpop.f32.mrb[10].mxu1 }
 0x196   : > { %2993 = vst.msk [vmem:[%s4835_s11 + $0xc] sm:$0xf] %vm2989_vm7, %v2984_v15  ;;  %v2943_v33 = vadd.f32 %v3685_v18, %v4824_v13  ;;  %v3687_v57 = vadd.f32 %v3668_v63, %v3588_v49  ;;  %v1661_v37 = vpop.f32.mrb[11].mxu1 }
 0x197   : > { %2992 = vst.msk [vmem:[%s4835_s11 + $0x8] sm:$0xf] %vm2989_vm7, %v2983_v11  ;;  %v2941_v55 = vadd.f32 %v3686_v36, %v4824_v13  ;;  %v3688_v38 = vadd.f32 %v2882_v0, %v1661_v37  ;;  %v3671_v60 = vpop.f32.mrb[12].mxu0 }
 0x198   : > { %v2944_v56 = vadd.f32 %v3687_v57, %v4824_v13  ;;  %v2895_v26 = vpop.f32.mrb[13].mxu0  ;;  %v2959_v9 = vmax.f32 %v2943_v33, 0.0 }
 0x199   : > { %v2942_v27 = vadd.f32 %v3688_v38, %v4824_v13  ;;  %v3672_v3 = vpop.f32.mrb[14].mxu0  ;;  %v2957_v40 = vmax.f32 %v2941_v55, 0.0 }
 0x19a   : > { %v2960_v31 = vmax.f32 %v2944_v56, 0.0  ;;  %v2898_v5 = vpop.f32.mrb[15].mxu0 }
 0x19b   : > { %v2958_v29 = vmax.f32 %v2942_v27, 0.0  ;;  %v3591_v61 = vpop.f32.mrb[12].mxu1 }
 0x19c   : > { %v2970_v28 = vadd.f32 %v2960_v31, %v2959_v9  ;;  %v3689_v22 = vadd.f32 %v3671_v60, %v3591_v61  ;;  %v1674_v54 = vpop.f32.mrb[13].mxu1 }
 0x19d   : > { %v2969_v2 = vadd.f32 %v2958_v29, %v2957_v40  ;;  %v3690_v1 = vadd.f32 %v2895_v26, %v1674_v54  ;;  %v3592_v39 = vpop.f32.mrb[14].mxu1 }
 0x19e   : > { %v2978_v44 = vmul.f32 0.5, %v2970_v28  ;;  %v2947_v10 = vadd.f32 %v3689_v22, %v4824_v13  ;;  %v3691_v59 = vadd.f32 %v3672_v3, %v3592_v39  ;;  %v1677_v30 = vpop.f32.mrb[15].mxu1 }
 0x19f   : > { %v2977_v35 = vmul.f32 0.5, %v2969_v2  ;;  %v2945_v7 = vadd.f32 %v3690_v1, %v4824_v13  ;;  %v3692_v17 = vadd.f32 %v2898_v5, %v1677_v30 }
 0x1a0   : > { %v2986_v32 = vpack.c.bf16 %v2978_v44, %v2978_v44  ;;  %v2948_v46 = vadd.f32 %v3691_v59, %v4824_v13  ;;  %v2963_v41 = vmax.f32 %v2947_v10, 0.0 }
 0x1a1   : > { %v2985_v62 = vpack.c.bf16 %v2977_v35, %v2977_v35  ;;  %v2946_v4 = vadd.f32 %v3692_v17, %v4824_v13  ;;  %v2961_v34 = vmax.f32 %v2945_v7, 0.0 }
 0x1a2   : > { %2995 = vst.msk [vmem:[%s4835_s11 + $0x14] sm:$0xf] %vm2989_vm7, %v2986_v32  ;;  %v2964_v19 = vmax.f32 %v2948_v46, 0.0 }
 0x1a3   : > { %2994 = vst.msk [vmem:[%s4835_s11 + $0x10] sm:$0xf] %vm2989_vm7, %v2985_v62  ;;  %v2962_v23 = vmax.f32 %v2946_v4, 0.0 }
 0x1a4   : > { %v2972_v58 = vadd.f32 %v2964_v19, %v2963_v41 }
 0x1a5   : > { %v2971_v53 = vadd.f32 %v2962_v23, %v2961_v34 }
 0x1a6   : > { %v2980_v42 = vmul.f32 0.5, %v2972_v58 }
 0x1a7   : > { %v2979_v45 = vmul.f32 0.5, %v2971_v53 }
 0x1a8   : > { %v2988_v14 = vpack.c.bf16 %v2980_v42, %v2980_v42 }
 0x1a9   : > { %v2987_v6 = vpack.c.bf16 %v2979_v45, %v2979_v45 }
 0x1aa   : > { %2997 = vst.msk [vmem:[%s4835_s11 + $0x1c] sm:$0xf] %vm2989_vm7, %v2988_v14 }
 0x1ab   : > { %2996 = vst.msk [vmem:[%s4835_s11 + $0x18] sm:$0xf] %vm2989_vm7, %v2987_v6 }
 0x1ac PF: > { %s13_s12 = sadd.s32 1, %s3870_s12  }
 0x1ad   : > { %p10_p4 = scmp.ge.s32.totalorder %s13_s12, 4  }
 0x1af   :  { %12 = sbr.rel (!%p10_p4) target bundleno = 1 (0x1), region = 64 }

// kernel: forward.12
= control target key start
LH: loop header
LB: loop body
LE: loop exit
PB: predicated region body
PF: predicated region fallthrough
CT: control target
= control target key end

     0   :  { %s2239_s12 = smov 0   ;;  %s2660_s0 = inlined_call_operand.vmem [shape: bf16[2,6,10,128], index: 0, kind: input, shape index: {}]   ;;  %s2661_s1 = inlined_call_operand.vmem [shape: bf16[1152,128], index: 1, kind: input, shape index: {}]   ;;  %s2662_s2 = inlined_call_operand.vmem [shape: f32[1,128], index: 2, kind: input, shape index: {}]   ;;  %s2663_s3 = inlined_call_operand.vmem [shape: bf16[2,2,8,128], index: 3, kind: output, shape index: {}]  }
   0x1 LB: > { %s1671_s13 = sadd.s32 4294967295, %s2217_s12   ;;  %p1675_p0 = scmp.ge.s32.totalorder %s2217_s12, 1  ;;  %s2217_s12 = sphi %s2239_s12, %s13_s12  }
   0x2   : > { %p137_p1 = scmp.lt.s32.totalorder %s2217_s12, 3 }
   0x4   : > { %p138_p2 = pnand %p1675_p0, %p137_p1 }
   0x5   : > { %v2133_v0 = vld [vmem:[%s2661_s1 + $0x40] sm:$0xff] (!%p138_p2)   ;;  %p161_p3 = scmp.lt.s32.totalorder (!%p138_p2), %s1671_s13, 1  ;;  %v2135_v2 = vld [vmem:[%s2661_s1 + $0x48] sm:$0xff] (!%p138_p2)   ;;  %v2137_v4 = vld [vmem:[%s2661_s1 + $0x50] sm:$0xff] (!%p138_p2)   ;;  %vm196_vm0 = vsmask.f32 (!%p138_p2), 3328 }
   0x6   : > { %141 = sbr.rel (%p138_p2) target bundleno = 400 (0x190), region = 32  ;;  %v2134_v1 = vld [vmem:[%s2661_s1 + $0x100] sm:$0xff] (!%p138_p2)   ;;  %1912 = vmatprep.subr.bf16.mxu1 (!%p138_p2), %v2133_v0  ;;  %v2136_v3 = vld [vmem:[%s2661_s1 + $0x108] sm:$0xff] (!%p138_p2)   ;;  %v2138_v5 = vld [vmem:[%s2661_s1 + $0x110] sm:$0xff] (!%p138_p2)   ;;  %vm197_vm1 = vsmask.f32 (!%p138_p2), 7440 }
   0x7   : > { %1992 = vmatprep.subr.bf16.mxu0 (!%p138_p2), %v2134_v1  ;;  %1913 = vmatpush3.bf16.msra.mxu1 (!%p138_p2), %v2133_v0  ;;  %v2139_v6 = vld [vmem:[%s2661_s1 + $0x58] sm:$0xff] (!%p138_p2)   ;;  %v2141_v8 = vld [vmem:[%s2661_s1 + $0x60] sm:$0xff] (!%p138_p2)   ;;  %v2143_v10 = vld [vmem:[%s2661_s1 + $0x68] sm:$0xff] (!%p138_p2)   ;;  %vm497_vm3 = vcmask (!%p138_p2), 1042432   ;;  %vm498_vm4 = vcmask (!%p138_p2), 1046532  }
   0x8   : > { %1993 = vmatpush3.bf16.msra.mxu0 (!%p138_p2), %v2134_v1  ;;  %1914 = vmatprep.subr.bf16.mxu1 (!%p138_p2), %v2135_v2  ;;  %v2140_v7 = vld [vmem:[%s2661_s1 + $0x118] sm:$0xff] (!%p138_p2)   ;;  %v2142_v9 = vld [vmem:[%s2661_s1 + $0x120] sm:$0xff] (!%p138_p2)   ;;  %v2144_v14 = vld [vmem:[%s2661_s1 + $0x128] sm:$0xff] (!%p138_p2)  }
   0x9   : > { %1994 = vmatprep.subr.bf16.mxu0 (!%p138_p2), %v2136_v3  ;;  %v2145_v22 = vld [vmem:[%s2661_s1 + $0x70] sm:$0xff] (!%p138_p2)   ;;  %v2147_v37 = vld [vmem:[%s2661_s1 + $0x78] sm:$0xff] (!%p138_p2)   ;;  %vm2328_vm2 = vmor (!%p138_p2), %vm196_vm0, %vm197_vm1 }
   0xa   : > { %v2146_v23 = vld [vmem:[%s2661_s1 + $0x130] sm:$0xff] (!%p138_p2)   ;;  %v2148_v47 = vld [vmem:[%s2661_s1 + $0x138] sm:$0xff] (!%p138_p2)   ;;  %v2149_v63 = vld [vmem:[%s2661_s1] sm:$0xff] (!%p138_p2)  }
   0xb   : > { %1915 = vmatpush3.bf16.msra.mxu1 (!%p138_p2), %v2135_v2  ;;  %v2360_v1 = vld [vmem:[%s2661_s1 + $0x140] sm:$0xff] (!%p138_p2)   ;;  %vm2401_vm5 = vmor (!%p138_p2), %vm497_vm3, %vm498_vm4  ;;  %v2204_v38 = vld [vmem:[%s2661_s1 + $0x208] sm:$0xff] (!%p138_p2)  }
   0xc   : > { %1995 = vmatpush3.bf16.msra.mxu0 (!%p138_p2), %v2136_v3  ;;  %1916 = vmatprep.subr.bf16.mxu1 (!%p138_p2), %v2137_v4 }
   0xd   : > { %s2669_s13 = smov (!%p161_p3, %s1671_s13), 1  ;;  %1996 = vmatprep.subr.bf16.mxu0 %v2138_v5 }
   0xe   : > { %s2124_s30 = smul.u32 48, %s2669_s13  ;;  %s1816_s18 = sshll.u32 %s2669_s13, 3 }
   0xf   : > { %1917 = vmatpush3.bf16.msra.mxu1 %v2137_v4  ;;  %s170_s21 = scalar_lea.vmem %s2663_s3, %s1816_s18 }
  0x10   : > { %1997 = vmatpush3.bf16.msra.mxu0 %v2138_v5  ;;  %1918 = vmatprep.subr.bf16.mxu1 %v2139_v6  ;;  %s2283_s10 = scalar_lea.vmem %s2660_s0, %s2124_s30 }
  0x11   : > { %1998 = vmatprep.subr.bf16.mxu0 %v2140_v7  ;;  %v2289_v11 = vld [vmem:[%s2283_s10] sm:$0xf]  ;;  %v2292_v12 = vld [vmem:[%s2283_s10 + $0x8] sm:$0xf]  ;;  %v2295_v13 = vld [vmem:[%s2283_s10 + $0x4] sm:$0x1] }
  0x12   : > { %v2301_v15 = vld [vmem:[%s2283_s10 + $0xc] sm:$0x1]  ;;  %v200_v16 = vshrl.u32 %v2289_v11, 16  ;;  %v203_v17 = vshll.u32 %v2289_v11, 16  ;;  %v209_v18 = vshll.u32 %v2295_v13, 16  ;;  %v214_v19 = vshrl.u32 %v2292_v12, 16 }
  0x13   : > { %1919 = vmatpush3.bf16.msra.mxu1 %v2139_v6  ;;  %v217_v20 = vshll.u32 %v2292_v12, 16  ;;  %v223_v21 = vshll.u32 %v2301_v15, 16  ;;  %v1727_v30 = vld [vmem:[%s2283_s10 + $0x8] sm:$0xf]  ;;  %v2317_v31 = vld [vmem:[%s2283_s10 + $0xc] sm:$0x1] }
  0x14   : > { %1999 = vmatpush3.bf16.msra.mxu0 %v2140_v7  ;;  %1920 = vmatprep.subr.bf16.mxu1 %v2141_v8  ;;  %v202_v24 = vrot.slane %v200_v16, 4  ;;  %v205_v25 = vrot.slane %v203_v17, 5  ;;  %v211_v26 = vrot.slane %v209_v18, 5  ;;  %v216_v27 = vrot.slane %v214_v19, 4  ;;  %v1729_v33 = vld [vmem:[%s2283_s10 + $0x10] sm:$0xf] }
  0x15   : > { %2000 = vmatprep.subr.bf16.mxu0 %v2142_v9  ;;  %v219_v28 = vrot.slane %v217_v20, 5  ;;  %v225_v29 = vrot.slane %v223_v21, 5  ;;  %v2321_v34 = vld [vmem:[%s2283_s10 + $0x14] sm:$0x1]  ;;  %v784_v35 = vshrl.u32 %v1727_v30, 16  ;;  %v787_v36 = vshll.u32 %v1727_v30, 16 }
  0x16   : > { %v206_v32 = vor.u32 %v205_v25, %v202_v24  ;;  %v793_v40 = vshll.u32 %v2317_v31, 16  ;;  %v798_v41 = vshrl.u32 %v1729_v33, 16  ;;  %v801_v42 = vshll.u32 %v1729_v33, 16  ;;  %v2338_v51 = vld [vmem:[%s2283_s10 + $0x10] sm:$0xf] }
  0x17   : > { %1921 = vmatpush3.bf16.msra.mxu1 %v2141_v8  ;;  %v220_v39 = vor.u32 %v219_v28, %v216_v27  ;;  %v786_v44 = vrot.slane %v784_v35, 4  ;;  %v789_v45 = vrot.slane %v787_v36, 5  ;;  %v807_v46 = vshll.u32 %v2321_v34, 16  ;;  %v2343_v55 = vld [vmem:[%s2283_s10 + $0x18] sm:$0xf] }
  0x18   : > { %2001 = vmatpush3.bf16.msra.mxu0 %v2142_v9  ;;  %1922 = vmatprep.subr.bf16.mxu1 %v2143_v10  ;;  %v207_v43 = vrot.slane %v206_v32, 4  ;;  %v800_v49 = vrot.slane %v798_v41, 4  ;;  %v803_v50 = vrot.slane %v801_v42, 5  ;;  %v795_v54 = vrot.slane %v793_v40, 5  ;;  %v2346_v56 = vld [vmem:[%s2283_s10 + $0x14] sm:$0x1] }
  0x19   : > { %2002 = vmatprep.subr.bf16.mxu0 %v2144_v14  ;;  %v221_v48 = vrot.slane %v220_v39, 4  ;;  %v790_v53 = vor.u32 %v789_v45, %v786_v44  ;;  %v809_v59 = vrot.slane %v807_v46, 5  ;;  %v2351_v60 = vld [vmem:[%s2283_s10 + $0x1c] sm:$0x1]  ;;  %v228_v61 = vshrl.u32 %v2338_v51, 16 }
  0x1a   : > { %v212_v52 = vsel %vm2328_vm2, %v207_v43, %v211_v26  ;;  %v804_v58 = vor.u32 %v803_v50, %v800_v49  ;;  %v231_v2 = vshll.u32 %v2338_v51, 16  ;;  %v237_v3 = vshll.u32 %v2346_v56, 16  ;;  %v1731_v8 = vld [vmem:[%s2283_s10 + $0x18] sm:$0xf]  ;;  %v2371_v16 = vld [vmem:[%s2283_s10 + $0x1c] sm:$0x1] }
  0x1b   : > { %1923 = vmatpush3.bf16.msra.mxu1 %v2143_v10  ;;  %v226_v57 = vsel %vm2328_vm2, %v221_v48, %v225_v29  ;;  %v791_v0 = vrot.slane %v790_v53, 4  ;;  %v230_v5 = vrot.slane %v228_v61, 4  ;;  %v242_v6 = vshrl.u32 %v2343_v55, 16  ;;  %v1733_v17 = vld [vmem:[%s2283_s10 + $0x20] sm:$0xf]  ;;  %v2151_v43 = vld [vmem:[%s2661_s1 + $0x8] sm:$0xff]  }
  0x1c   : > { %2003 = vmatpush3.bf16.msra.mxu0 %v2144_v14  ;;  %1924 = vmatprep.subr.bf16.mxu1 %v2145_v22  ;;  %v1679_v62 = vcombine.low %v212_v52, %v226_v57  ;;  %v805_v4 = vrot.slane %v804_v58, 4  ;;  %v245_v7 = vshll.u32 %v2343_v55, 16  ;;  %v233_v10 = vrot.slane %v231_v2, 5  ;;  %v2377_v21 = vld [vmem:[%s2283_s10 + $0x24] sm:$0x1]  ;;  %v2152_v58 = vld [vmem:[%s2661_s1 + $0x148] sm:$0xff]  }
  0x1d   : > { %2004 = vmatprep.subr.bf16.mxu0 %v2146_v23  ;;  %v796_v9 = vsel %vm2328_vm2, %v791_v0, %v795_v54  ;;  %v251_v14 = vshll.u32 %v2351_v60, 16  ;;  %v244_v19 = vrot.slane %v242_v6, 4  ;;  %v239_v24 = vrot.slane %v237_v3, 5  ;;  %v2154_v0 = vld [vmem:[%s2661_s1 + $0x150] sm:$0xff]   ;;  %v1745_v2 = vld [vmem:[%s2283_s10 + $0x8] sm:$0xe] }
  0x1e   : > { %1928 = vmatprep.mubr.bf16.mxu1 %v1679_v62  ;;  %v810_v18 = vsel %vm2328_vm2, %v805_v4, %v809_v59  ;;  %v247_v20 = vrot.slane %v245_v7, 5  ;;  %v812_v27 = vshrl.u32 %v1731_v8, 16  ;;  %v815_v28 = vshll.u32 %v1731_v8, 16  ;;  %v2155_v62 = vld [vmem:[%s2661_s1 + $0x18] sm:$0xff]   ;;  %v1746_v3 = vld [vmem:[%s2283_s10 + $0x10] sm:$0xe] }
  0x1f   : > { %1925 = vmatpush3.bf16.msra.mxu1 %v2145_v22  ;;  %v1735_v22 = vcombine.low %v796_v9, %v810_v18  ;;  %v253_v25 = vrot.slane %v251_v14, 5  ;;  %v821_v29 = vshll.u32 %v2371_v16, 16  ;;  %v826_v32 = vshrl.u32 %v1733_v17, 16  ;;  %v2159_v8 = vld [vmem:[%s2661_s1 + $0x28] sm:$0xff]   ;;  %v2158_v9 = vld [vmem:[%s2661_s1 + $0x160] sm:$0xff]  }
  0x20   : > { %2005 = vmatpush3.bf16.msra.mxu0 %v2146_v23  ;;  %1926 = vmatprep.subr.bf16.mxu1 %v2147_v37  ;;  %v234_v23 = vor.u32 %v233_v10, %v230_v5  ;;  %v248_v26 = vor.u32 %v247_v20, %v244_v19  ;;  %v829_v33 = vshll.u32 %v1733_v17, 16  ;;  %v835_v35 = vshll.u32 %v2377_v21, 16  ;;  %v2161_v10 = vld [vmem:[%s2661_s1 + $0x30] sm:$0xff]   ;;  %v2160_v17 = vld [vmem:[%s2661_s1 + $0x168] sm:$0xff]  }
  0x21   : > { %2006 = vmatprep.subr.bf16.mxu0 %v2148_v47  ;;  %2008 = vmatprep.mubr.bf16.mxu0 %v1735_v22  ;;  %v817_v39 = vrot.slane %v815_v28, 5  ;;  %v828_v41 = vrot.slane %v826_v32, 4  ;;  %v1689_v44 = vcombine.low %v2289_v11, %v2292_v12  ;;  %v2153_v12 = vld [vmem:[%s2661_s1 + $0x10] sm:$0xff]   ;;  %v978_v61 = vrot.slane %v2317_v31, 5  ;;  %v2157_v31 = vld [vmem:[%s2661_s1 + $0x20] sm:$0xff]  }
  0x22   : > { %v235_v30 = vrot.slane %v234_v23, 4  ;;  %v249_v36 = vrot.slane %v248_v26, 4  ;;  %v831_v42 = vrot.slane %v829_v33, 5  ;;  %v837_v48 = vrot.slane %v835_v35, 5  ;;  %v2162_v22 = vld [vmem:[%s2661_s1 + $0x170] sm:$0xff]  }
  0x23   : > { %1927 = vmatpush3.bf16.msra.mxu1 %v2147_v37  ;;  %v814_v37 = vrot.slane %v812_v27, 4  ;;  %v1749_v4 = vrot.slane %v1745_v2, 9  ;;  %v1750_v5 = vrot.slane %v1746_v3, 9  ;;  %v502_v14 = vrot.slane %v2295_v13, 5  ;;  %v2163_v13 = vld [vmem:[%s2661_s1 + $0x38] sm:$0xff]   ;;  %v2179_v2 = vld [vmem:[%s2661_s1 + $0xb0] sm:$0xff]  }
  0x24   : > { %2007 = vmatpush3.bf16.msra.mxu0 %v2148_v47  ;;  %1932 = vmatprep.subr.bf16.mxu1 %v2149_v63  ;;  %v240_v40 = vsel %vm2328_vm2, %v235_v30, %v239_v24  ;;  %v254_v45 = vsel %vm2328_vm2, %v249_v36, %v253_v25  ;;  %v823_v47 = vrot.slane %v821_v29, 5  ;;  %v832_v50 = vor.u32 %v831_v42, %v828_v41  ;;  %v1747_v23 = vld [vmem:[%s2283_s10 + $0x18] sm:$0xe]  ;;  %v1748_v24 = vld [vmem:[%s2283_s10 + $0x20] sm:$0xe]  ;;  %v2178_v3 = vld [vmem:[%s2661_s1 + $0x1a8] sm:$0xff]  }
  0x25   : > { %2012 = vmatprep.subr.bf16.mxu0 %v2360_v1  ;;  %v818_v46 = vor.u32 %v817_v39, %v814_v37  ;;  %v1680_v49 = vcombine.low %v240_v40, %v254_v45  ;;  %v506_v18 = vrot.slane %v2301_v15, 5  ;;  %v510_v19 = vrot.slane %v2346_v56, 5  ;;  %v2166_v56 = vld [vmem:[%s2661_s1 + $0x80] sm:$0xff]   ;;  %v486_v26 = vld [vmem:[%s2283_s10 + $0x8] sm:$0xe] }
  0x26   : > { %v833_v53 = vrot.slane %v832_v50, 4  ;;  %v986_v20 = vrot.slane %v2371_v16, 5  ;;  %v990_v15 = vrot.slane %v2377_v21, 5  ;;  %v485_v16 = vld [vmem:[%s2283_s10] sm:$0xe]  ;;  %v1751_v25 = vrot.slane %v1747_v23, 9 }
  0x27   : > { %v819_v52 = vrot.slane %v818_v46, 4  ;;  %1929 = vmatmul.mubr.bf16.vlgmr.msra.gmra.mrb[0].mxu1 %v1680_v49  ;;  %v1699_v27 = vrot.slane %v485_v16, 9  ;;  %v1752_v28 = vrot.slane %v1748_v24, 9  ;;  %v1700_v29 = vrot.slane %v486_v26, 9  ;;  %v2164_v21 = vld [vmem:[%s2661_s1 + $0x178] sm:$0xff]  }
  0x28   : > { %1933 = vmatpush3.bf16.msra.mxu1 %v2149_v63  ;;  %1948 = vmatprep.mubr.bf16.mxu1 %v1689_v44  ;;  %v838_v11 = vsel %vm2328_vm2, %v833_v53, %v837_v48  ;;  %v982_v63 = vrot.slane %v2321_v34, 5  ;;  %v2156_v34 = vld [vmem:[%s2661_s1 + $0x158] sm:$0xff]   ;;  %v514_v30 = vrot.slane %v2351_v60, 5  ;;  %v1690_v33 = vcombine.low %v2338_v51, %v2343_v55  ;;  %v487_v36 = vld [vmem:[%s2283_s10 + $0x10] sm:$0xe]  ;;  %v2169_v51 = vld [vmem:[%s2661_s1 + $0x88] sm:$0xff]  }
  0x29   : > { %v824_v54 = vsel %vm2328_vm2, %v819_v52, %v823_v47  ;;  %1934 = vmatprep.subr.bf16.mxu1 %v2151_v43  ;;  %v503_v32 = vsel %vm2401_vm5, %v1699_v27, %v502_v14  ;;  %v507_v35 = vsel %vm2401_vm5, %v1700_v29, %v506_v18  ;;  %v488_v37 = vld [vmem:[%s2283_s10 + $0x18] sm:$0xe]  ;;  %v1701_v40 = vrot.slane %v487_v36, 9  ;;  %v2167_v55 = vld [vmem:[%s2661_s1 + $0x180] sm:$0xff]   ;;  %v2170_v47 = vld [vmem:[%s2661_s1 + $0x188] sm:$0xff]  }
  0x2a   : > { %v1736_v57 = vcombine.low %v824_v54, %v838_v11  ;;  %v983_v6 = vsel %vm2401_vm5, %v1750_v5, %v982_v63  ;;  %v1703_v39 = vcombine.low %v503_v32, %v507_v35  ;;  %v1702_v60 = vrot.slane %v488_v37, 9  ;;  %v2171_v48 = vld [vmem:[%s2661_s1 + $0x90] sm:$0xff]   ;;  %v2173_v50 = vld [vmem:[%s2661_s1 + $0x98] sm:$0xff]   ;;  %v2175_v53 = vld [vmem:[%s2661_s1 + $0xa0] sm:$0xff]  }
  0x2b   : > { %v987_v41 = vsel %vm2401_vm5, %v1751_v25, %v986_v20  ;;  %v991_v42 = vsel %vm2401_vm5, %v1752_v28, %v990_v15  ;;  %v2184_v49 = vld [vmem:[%s2283_s10 + $0x10] ss:$8 sps:$4 sm:$0xff]   ;;  %v2177_v11 = vld [vmem:[%s2661_s1 + $0xa8] sm:$0xff]   ;;  %v2525_v5 = vld [vmem:[%s2283_s10 + $0x1c] sm:$0x1] }
  0x2c   : > { %2009 = vmatmul.mubr.bf16.vlgmr.msra.gmra.mrb[0].mxu0 %v1736_v57  ;;  %1935 = vmatpush3.bf16.msra.mxu1 %v2151_v43  ;;  %v2480_v43 = vsel %vm2401_vm5, %v1701_v40, %v510_v19  ;;  %v2484_v44 = vsel %vm2401_vm5, %v1702_v60, %v514_v30  ;;  %v1754_v46 = vcombine.low %v987_v41, %v991_v42  ;;  %v2172_v52 = vld [vmem:[%s2661_s1 + $0x190] sm:$0xff]   ;;  %v2174_v54 = vld [vmem:[%s2661_s1 + $0x198] sm:$0xff]   ;;  %v2176_v57 = vld [vmem:[%s2661_s1 + $0x1a0] sm:$0xff]  }
  0x2d   : > { %2013 = vmatpush3.bf16.msra.mxu0 %v2360_v1  ;;  %1936 = vmatprep.subr.bf16.mxu1 %v2153_v12  ;;  %v979_v1 = vsel %vm2401_vm5, %v1749_v4, %v978_v61  ;;  %v1704_v45 = vcombine.low %v2480_v43, %v2484_v44  ;;  %v2522_v4 = vld [vmem:[%s2283_s10 + $0x14] sm:$0x1]  ;;  %v2183_v18 = vld [vmem:[%s2661_s1 + $0xc0] sm:$0xff]   ;;  %v2182_v19 = vld [vmem:[%s2661_s1 + $0x1b8] sm:$0xff]  }
  0x2e   : > { %2014 = vmatprep.subr.bf16.mxu0 %v2152_v58  ;;  %v1753_v7 = vcombine.low %v979_v1, %v983_v6  ;;  %v2201_v24 = vld [vmem:[%s2283_s10 + $0x8] ss:$8 sps:$4 sm:$0xff]   ;;  %v2191_v30 = vld [vmem:[%s2661_s1 + $0xd8] sm:$0xff]   ;;  %v2193_v32 = vld [vmem:[%s2661_s1 + $0xe0] sm:$0xff]  }
  0x2f   : > { %v2187_v15 = vld [vmem:[%s2661_s1 + $0xc8] sm:$0xff]   ;;  %v2189_v27 = vld [vmem:[%s2661_s1 + $0xd0] sm:$0xff]   ;;  %v1781_v35 = vld [vmem:[%s2283_s10 + $0x20] sm:$0xf] }
  0x30   : > { %1937 = vmatpush3.bf16.msra.mxu1 %v2153_v12  ;;  %2028 = vmatprep.mubr.bf16.mxu0 %v1753_v7  ;;  %v1777_v12 = vld [vmem:[%s2283_s10 + $0x10] sm:$0xf]  ;;  %v2181_v7 = vld [vmem:[%s2661_s1 + $0xb8] sm:$0xff]   ;;  %v2186_v26 = vld [vmem:[%s2283_s10 + $0x20] ss:$8 sps:$4 sm:$0xff]   ;;  %v1291_v40 = vshll.u32 %v1781_v35, 16 }
  0x31   : > { %2015 = vmatpush3.bf16.msra.mxu0 %v2152_v58  ;;  %1938 = vmatprep.subr.bf16.mxu1 %v2155_v62  ;;  %v1779_v58 = vld [vmem:[%s2283_s10 + $0x18] sm:$0xf]  ;;  %v1260_v61 = vshrl.u32 %v1777_v12, 16  ;;  %v2188_v28 = vld [vmem:[%s2661_s1 + $0x1c8] sm:$0xff]   ;;  %v2194_v42 = vld [vmem:[%s2661_s1 + $0x1e0] sm:$0xff]  }
  0x32   : > { %2016 = vmatprep.subr.bf16.mxu0 %v2154_v0  ;;  %v1274_v63 = vshrl.u32 %v1779_v58, 16  ;;  %v1783_v36 = vld [vmem:[%s2283_s10 + $0x28] sm:$0xf]  ;;  %v1293_v43 = vrot.slane %v1291_v40, 5 }
  0x33   : > { %v2195_v37 = vld [vmem:[%s2661_s1 + $0xe8] sm:$0xff]   ;;  %v1302_v60 = vshrl.u32 %v1783_v36, 16  ;;  %v1305_v41 = vshll.u32 %v1783_v36, 16 }
  0x34   : > { %1939 = vmatpush3.bf16.msra.mxu1 %v2155_v62  ;;  %v1263_v62 = vshll.u32 %v1777_v12, 16  ;;  %v1276_v1 = vrot.slane %v1274_v63, 4  ;;  %v1795_v12 = vld [vmem:[%s2283_s10 + $0x10] sm:$0xe] }
  0x35   : > { %2017 = vmatpush3.bf16.msra.mxu0 %v2154_v0  ;;  %1940 = vmatprep.subr.bf16.mxu1 %v2157_v31  ;;  %v1277_v0 = vshll.u32 %v1779_v58, 16  ;;  %v1304_v44 = vrot.slane %v1302_v60, 4 }
  0x36   : > { %2018 = vmatprep.subr.bf16.mxu0 %v2156_v34 }
  0x37   : > { %v1279_v6 = vrot.slane %v1277_v0, 5  ;;  %v2200_v0 = vld [vmem:[%s2661_s1 + $0x1f8] sm:$0xff]  }
  0x38   : > { %1941 = vmatpush3.bf16.msra.mxu1 %v2157_v31  ;;  %v1262_v31 = vrot.slane %v1260_v61, 4 }
  0x39   : > { %2019 = vmatpush3.bf16.msra.mxu0 %v2156_v34  ;;  %1942 = vmatprep.subr.bf16.mxu1 %v2159_v8  ;;  %v1265_v34 = vrot.slane %v1263_v62, 5 }
  0x3a   : > { %2020 = vmatprep.subr.bf16.mxu0 %v2158_v9 }
  0x3b   : > { %v1266_v14 = vor.u32 %v1265_v34, %v1262_v31  ;;  %v1458_v34 = vrot.slane %v2525_v5, 5 }
  0x3c   : > { %1943 = vmatpush3.bf16.msra.mxu1 %v2159_v8  ;;  %v2180_v8 = vld [vmem:[%s2661_s1 + $0x1b0] sm:$0xff]  }
  0x3d   : > { %2021 = vmatpush3.bf16.msra.mxu0 %v2158_v9  ;;  %1944 = vmatprep.subr.bf16.mxu1 %v2161_v10  ;;  %v1269_v9 = vshll.u32 %v2522_v4, 16  ;;  %v1267_v20 = vrot.slane %v1266_v14, 4  ;;  %v2205_v14 = vld [vmem:[%s2661_s1 + $0x210] sm:$0xff]  }
  0x3e   : > { %2022 = vmatprep.subr.bf16.mxu0 %v2160_v17 }
  0x40   : > { %1945 = vmatpush3.bf16.msra.mxu1 %v2161_v10  ;;  %v1283_v10 = vshll.u32 %v2525_v5, 16 }
  0x41   : > { %2023 = vmatpush3.bf16.msra.mxu0 %v2160_v17  ;;  %1946 = vmatprep.subr.bf16.mxu1 %v2163_v13  ;;  %v1280_v17 = vor.u32 %v1279_v6, %v1276_v1  ;;  %v2202_v1 = vld [vmem:[%s2283_s10 + $0x18] ss:$8 sps:$4 sm:$0xff]  }
  0x42   : > { %2024 = vmatprep.subr.bf16.mxu0 %v2162_v22  ;;  %v1285_v23 = vrot.slane %v1283_v10, 5 }
  0x44   : > { %1947 = vmatpush3.bf16.msra.mxu1 %v2163_v13  ;;  %v1281_v13 = vrot.slane %v1280_v17, 4  ;;  %v2206_v17 = vld [vmem:[%s2661_s1 + $0x218] sm:$0xff]  }
  0x45   : > { %2025 = vmatpush3.bf16.msra.mxu0 %v2162_v22  ;;  %1952 = vmatprep.subr.bf16.mxu1 %v2166_v56  ;;  %v1271_v22 = vrot.slane %v1269_v9, 5 }
  0x46   : > { %2026 = vmatprep.subr.bf16.mxu0 %v2164_v21  ;;  %v1286_v25 = vsel %vm2328_vm2, %v1281_v13, %v1285_v23  ;;  %v1798_v13 = vld [vmem:[%s2283_s10 + $0x28] sm:$0xe] }
  0x47   : > { %1949 = vmatmul.mubr.bf16.vlgmr.msra.gmra.mrb[0].mxu1 %v1690_v33  ;;  %v1272_v16 = vsel %vm2328_vm2, %v1267_v20, %v1271_v22  ;;  %v2192_v33 = vld [vmem:[%s2661_s1 + $0x1d8] sm:$0xff]   ;;  %v2209_v20 = vld [vmem:[%s2661_s1 + $0x230] sm:$0xff]   ;;  %v1797_v22 = vld [vmem:[%s2283_s10 + $0x20] sm:$0xe] }
  0x48   : > { %1953 = vmatpush3.bf16.msra.mxu1 %v2166_v56  ;;  %1968 = vmatprep.mubr.bf16.mxu1 %v1703_v39  ;;  %v2185_v56 = vld [vmem:[%s2661_s1 + $0x1c0] sm:$0xff]   ;;  %v1785_v29 = vcombine.low %v1272_v16, %v1286_v25  ;;  %v1288_v39 = vshrl.u32 %v1781_v35, 16  ;;  %v1801_v23 = vrot.slane %v1797_v22, 9  ;;  %v2210_v16 = vld [vmem:[%s2661_s1 + $0x238] sm:$0xff]  }
  0x49   : > { %2027 = vmatpush3.bf16.msra.mxu0 %v2164_v21  ;;  %1954 = vmatprep.subr.bf16.mxu1 %v2169_v51  ;;  %v2190_v21 = vld [vmem:[%s2661_s1 + $0x1d0] sm:$0xff]  }
  0x4a   : > { %2032 = vmatprep.subr.bf16.mxu0 %v2167_v55 }
  0x4c   : > { %2029 = vmatmul.mubr.bf16.vlgmr.msra.gmra.mrb[0].mxu0 %v1754_v46  ;;  %1955 = vmatpush3.bf16.msra.mxu1 %v2169_v51  ;;  %v2197_v51 = vld [vmem:[%s2661_s1 + $0xf0] sm:$0xff]   ;;  %v2196_v46 = vld [vmem:[%s2661_s1 + $0x1e8] sm:$0xff]  }
  0x4d   : > { %2033 = vmatpush3.bf16.msra.mxu0 %v2167_v55  ;;  %1956 = vmatprep.subr.bf16.mxu1 %v2171_v48  ;;  %v1290_v55 = vrot.slane %v1288_v39, 4 }
  0x4e   : > { %2034 = vmatprep.subr.bf16.mxu0 %v2170_v47  ;;  %2048 = vmatprep.mubr.bf16.mxu0 %v2184_v49  ;;  %v2199_v49 = vld [vmem:[%s2661_s1 + $0xf8] sm:$0xff]  }
  0x50   : > { %1957 = vmatpush3.bf16.msra.mxu1 %v2171_v48  ;;  %v2592_v48 = vld [vmem:[%s2283_s10 + $0x2c] sm:$0x1] }
  0x51   : > { %2035 = vmatpush3.bf16.msra.mxu0 %v2170_v47  ;;  %1958 = vmatprep.subr.bf16.mxu1 %v2173_v50  ;;  %v2589_v47 = vld [vmem:[%s2283_s10 + $0x24] sm:$0x1] }
  0x52   : > { %2036 = vmatprep.subr.bf16.mxu0 %v2172_v52 }
  0x54   : > { %1959 = vmatpush3.bf16.msra.mxu1 %v2173_v50  ;;  %v1294_v50 = vor.u32 %v1293_v43, %v1290_v55 }
  0x55   : > { %2037 = vmatpush3.bf16.msra.mxu0 %v2172_v52  ;;  %1960 = vmatprep.subr.bf16.mxu1 %v2175_v53  ;;  %v1297_v52 = vshll.u32 %v2589_v47, 16 }
  0x56   : > { %2038 = vmatprep.subr.bf16.mxu0 %v2174_v54  ;;  %v1295_v58 = vrot.slane %v1294_v50, 4 }
  0x57   : > { %v1299_v61 = vrot.slane %v1297_v52, 5 }
  0x58   : > { %1961 = vmatpush3.bf16.msra.mxu1 %v2175_v53 }
  0x59   : > { %2039 = vmatpush3.bf16.msra.mxu0 %v2174_v54  ;;  %1962 = vmatprep.subr.bf16.mxu1 %v2177_v11  ;;  %v1311_v54 = vshll.u32 %v2592_v48, 16  ;;  %v1300_v6 = vsel %vm2328_vm2, %v1295_v58, %v1299_v61 }
  0x5a   : > { %2040 = vmatprep.subr.bf16.mxu0 %v2176_v57 }
  0x5b   : > { %v1313_v63 = vrot.slane %v1311_v54, 5 }
  0x5c   : > { %1963 = vmatpush3.bf16.msra.mxu1 %v2177_v11  ;;  %v2198_v11 = vld [vmem:[%s2661_s1 + $0x1f0] sm:$0xff]  }
  0x5d   : > { %2041 = vmatpush3.bf16.msra.mxu0 %v2176_v57  ;;  %1964 = vmatprep.subr.bf16.mxu1 %v2179_v2  ;;  %v1796_v57 = vld [vmem:[%s2283_s10 + $0x18] sm:$0xe] }
  0x5e   : > { %2042 = vmatprep.subr.bf16.mxu0 %v2178_v3  ;;  %v1800_v31 = vrot.slane %v1796_v57, 9 }
  0x60   : > { %1965 = vmatpush3.bf16.msra.mxu1 %v2179_v2  ;;  %v1799_v2 = vrot.slane %v1795_v12, 9  ;;  %v1459_v5 = vsel %vm2401_vm5, %v1800_v31, %v1458_v34 }
  0x61   : > { %2043 = vmatpush3.bf16.msra.mxu0 %v2178_v3  ;;  %1966 = vmatprep.subr.bf16.mxu1 %v2181_v7  ;;  %v1454_v3 = vrot.slane %v2522_v4, 5 }
  0x62   : > { %2044 = vmatprep.subr.bf16.mxu0 %v2180_v8 }
  0x63   : > { %v1455_v4 = vsel %vm2401_vm5, %v1799_v2, %v1454_v3 }
  0x64   : > { %1967 = vmatpush3.bf16.msra.mxu1 %v2181_v7  ;;  %v1803_v10 = vcombine.low %v1455_v4, %v1459_v5 }
  0x65   : > { %2045 = vmatpush3.bf16.msra.mxu0 %v2180_v8  ;;  %1972 = vmatprep.subr.bf16.mxu1 %v2183_v18  ;;  %v2203_v8 = vld [vmem:[%s2661_s1 + $0x200] sm:$0xff]  }
  0x66   : > { %2046 = vmatprep.subr.bf16.mxu0 %v2182_v19 }
  0x67   : > { %1969 = vmatmul.mubr.bf16.vlgmr.msra.gmra.mrb[0].mxu1 %v1704_v45  ;;  %v1307_v45 = vrot.slane %v1305_v41, 5 }
  0x68   : > { %1973 = vmatpush3.bf16.msra.mxu1 %v2183_v18  ;;  %1988 = vmatprep.mubr.bf16.mxu1 %v2201_v24  ;;  %v2207_v18 = vld [vmem:[%s2661_s1 + $0x220] sm:$0xff]   ;;  %v1462_v24 = vrot.slane %v2589_v47, 5 }
  0x69   : > { %2047 = vmatpush3.bf16.msra.mxu0 %v2182_v19  ;;  %1974 = vmatprep.subr.bf16.mxu1 %v2187_v15  ;;  %v1308_v53 = vor.u32 %v1307_v45, %v1304_v44  ;;  %v2208_v19 = vld [vmem:[%s2661_s1 + $0x228] sm:$0xff]  }
  0x6a   : > { %2052 = vmatprep.subr.bf16.mxu0 %v2185_v56  ;;  %v1463_v25 = vsel %vm2401_vm5, %v1801_v23, %v1462_v24 }
  0x6b   : > { %v1309_v62 = vrot.slane %v1308_v53, 4 }
  0x6c   : > { %2049 = vmatmul.mubr.bf16.vlgmr.msra.gmra.mrb[0].mxu0 %v2186_v26  ;;  %1975 = vmatpush3.bf16.msra.mxu1 %v2187_v15  ;;  %v1802_v15 = vrot.slane %v1798_v13, 9 }
  0x6d   : > { %2053 = vmatpush3.bf16.msra.mxu0 %v2185_v56  ;;  %1976 = vmatprep.subr.bf16.mxu1 %v2189_v27  ;;  %v1314_v7 = vsel %vm2328_vm2, %v1309_v62, %v1313_v63  ;;  %v1466_v56 = vrot.slane %v2592_v48, 5 }
  0x6e   : > { %2054 = vmatprep.subr.bf16.mxu0 %v2188_v28  ;;  %2068 = vmatprep.mubr.bf16.mxu0 %v1785_v29  ;;  %v1786_v9 = vcombine.low %v1300_v6, %v1314_v7 }
  0x6f   : > { %v1467_v26 = vsel %vm2401_vm5, %v1802_v15, %v1466_v56 }
  0x70   : > { %1977 = vmatpush3.bf16.msra.mxu1 %v2189_v27  ;;  %v1804_v27 = vcombine.low %v1463_v25, %v1467_v26 }
  0x71   : > { %2055 = vmatpush3.bf16.msra.mxu0 %v2188_v28  ;;  %1978 = vmatprep.subr.bf16.mxu1 %v2191_v30 }
  0x72   : > { %2056 = vmatprep.subr.bf16.mxu0 %v2190_v21 }
  0x74   : > { %1979 = vmatpush3.bf16.msra.mxu1 %v2191_v30 }
  0x75   : > { %2057 = vmatpush3.bf16.msra.mxu0 %v2190_v21  ;;  %1980 = vmatprep.subr.bf16.mxu1 %v2193_v32 }
  0x76   : > { %2058 = vmatprep.subr.bf16.mxu0 %v2192_v33 }
  0x78   : > { %1981 = vmatpush3.bf16.msra.mxu1 %v2193_v32 }
  0x79   : > { %2059 = vmatpush3.bf16.msra.mxu0 %v2192_v33  ;;  %1982 = vmatprep.subr.bf16.mxu1 %v2195_v37  ;;  %v1813_v33 = vld [vmem:[%s2662_s2] ss:$0 sm:$0xff] }
  0x7a   : > { %2060 = vmatprep.subr.bf16.mxu0 %v2194_v42 }
  0x7c   : > { %1983 = vmatpush3.bf16.msra.mxu1 %v2195_v37 }
  0x7d   : > { %2061 = vmatpush3.bf16.msra.mxu0 %v2194_v42  ;;  %1984 = vmatprep.subr.bf16.mxu1 %v2197_v51 }
  0x7e   : > { %2062 = vmatprep.subr.bf16.mxu0 %v2196_v46 }
  0x80   : > { %1985 = vmatpush3.bf16.msra.mxu1 %v2197_v51 }
  0x81   : > { %2063 = vmatpush3.bf16.msra.mxu0 %v2196_v46  ;;  %1986 = vmatprep.subr.bf16.mxu1 %v2199_v49 }
  0x82   : > { %2064 = vmatprep.subr.bf16.mxu0 %v2198_v11 }
  0x84   : > { %1987 = vmatpush3.bf16.msra.mxu1 %v2199_v49 }
  0x85   : > { %2065 = vmatpush3.bf16.msra.mxu0 %v2198_v11 }
  0x86   : > { %2066 = vmatprep.subr.bf16.mxu0 %v2200_v0 }
  0x87   : > { %1989 = vmatmul.mubr.bf16.vlgmr.msra.gmra.mrb[0].mxu1 %v2202_v1 }
  0x89   : > { %2067 = vmatpush3.bf16.msra.mxu0 %v2200_v0 }
  0x8a   : > { %2072 = vmatprep.subr.bf16.mxu0 %v2203_v8 }
  0x8c   : > { %2069 = vmatmul.mubr.bf16.vlgmr.msra.gmra.mrb[0].mxu0 %v1786_v9 }
  0x8d   : > { %2073 = vmatpush3.bf16.msra.mxu0 %v2203_v8  ;;  %2088 = vmatprep.mubr.bf16.mxu0 %v1803_v10 }
  0x8e   : > { %2074 = vmatprep.subr.bf16.mxu0 %v2204_v38 }
  0x91   : > { %2075 = vmatpush3.bf16.msra.mxu0 %v2204_v38 }
  0x92   : > { %2076 = vmatprep.subr.bf16.mxu0 %v2205_v14 }
  0x95   : > { %2077 = vmatpush3.bf16.msra.mxu0 %v2205_v14 }
  0x96   : > { %2078 = vmatprep.subr.bf16.mxu0 %v2206_v17 }
  0x99   : > { %2079 = vmatpush3.bf16.msra.mxu0 %v2206_v17 }
  0x9a   : > { %2080 = vmatprep.subr.bf16.mxu0 %v2207_v18 }
  0x9d   : > { %2081 = vmatpush3.bf16.msra.mxu0 %v2207_v18 }
  0x9e   : > { %2082 = vmatprep.subr.bf16.mxu0 %v2208_v19 }
  0xa1   : > { %2083 = vmatpush3.bf16.msra.mxu0 %v2208_v19 }
  0xa2   : > { %2084 = vmatprep.subr.bf16.mxu0 %v2209_v20 }
  0xa5   : > { %2085 = vmatpush3.bf16.msra.mxu0 %v2209_v20 }
  0xa6   : > { %2086 = vmatprep.subr.bf16.mxu0 %v2210_v16 }
  0xa9   : > { %2087 = vmatpush3.bf16.msra.mxu0 %v2210_v16 }
  0xac   : > { %2089 = vmatmul.mubr.bf16.vlgmr.msra.gmra.mrb[0].mxu0 %v1804_v27 }
 0x15a   : > { %v1990_v28 = vpop.f32.mrb[0].mxu1 }
 0x15b   : > { %v756_v29 = vpop.f32.mrb[1].mxu1 }
 0x15c   : > { %v1991_v30 = vpop.f32.mrb[2].mxu1 }
 0x15d   : > { %v759_v21 = vpop.f32.mrb[3].mxu1 }
 0x17f   : > { %v2090_v32 = vpop.f32.mrb[0].mxu0 }
 0x180   : > { %v2092_v35 = vadd.f32 %v2090_v32, %v1990_v28  ;;  %v1574_v36 = vpop.f32.mrb[1].mxu0 }
 0x181   : > { %v2093_v37 = vadd.f32 %v1574_v36, %v756_v29  ;;  %v2091_v39 = vpop.f32.mrb[2].mxu0 }
 0x182   : > { %v1602_v59 = vadd.f32 %v2092_v35, %v1813_v33  ;;  %v2094_v40 = vadd.f32 %v2091_v39, %v1991_v30  ;;  %v1577_v60 = vpop.f32.mrb[3].mxu0 }
 0x183   : > { %v1600_v41 = vadd.f32 %v2093_v37, %v1813_v33  ;;  %v2095_v42 = vadd.f32 %v1577_v60, %v759_v21 }
 0x184   : > { %v1603_v51 = vadd.f32 %v2094_v40, %v1813_v33  ;;  %v1606_v43 = vmax.f32 %v1602_v59, 0.0 }
 0x185   : > { %v1601_v55 = vadd.f32 %v2095_v42, %v1813_v33  ;;  %v1604_v45 = vmax.f32 %v1600_v41, 0.0 }
 0x186   : > { %v1607_v44 = vmax.f32 %v1603_v51, 0.0 }
 0x187   : > { %v1605_v46 = vmax.f32 %v1601_v55, 0.0 }
 0x188   : > { %v1609_v47 = vadd.f32 %v1607_v44, %v1606_v43 }
 0x189   : > { %v1608_v48 = vadd.f32 %v1605_v46, %v1604_v45 }
 0x18a   : > { %v1611_v49 = vmul.f32 0.5, %v1609_v47 }
 0x18b   : > { %v1610_v50 = vmul.f32 0.5, %v1608_v48 }
 0x18d   : > { %v1820_v52 = vpack.c.bf16 %v1611_v49, %v1610_v50 }
 0x18f   : > { %1821 = vst [vmem:[%s170_s21] sm:$0xff] %v1820_v52  }
 0x190 PF: > { %s13_s12 = sadd.s32 1, %s2217_s12  }
 0x191   : > { %p10_p4 = scmp.ge.s32.totalorder %s13_s12, 4  }
 0x193   :  { %12 = sbr.rel (!%p10_p4) target bundleno = 1 (0x1), region = 64 }

// kernel: forward.13
= control target key start
LH: loop header
LB: loop body
LE: loop exit
PB: predicated region body
PF: predicated region fallthrough
CT: control target
= control target key end

     0   :  { %s1666_s1 = inlined_call_operand.vmem [shape: bf16[256,1024], index: 1, kind: input, shape index: {}]   ;;  %s1667_s0 = inlined_call_operand.vmem [shape: bf16[16,256], index: 0, kind: input, shape index: {}]   ;;  %s1668_s2 = inlined_call_operand.vmem [shape: f32[1,1024], index: 2, kind: input, shape index: {}]   ;;  %s1669_s3 = inlined_call_operand.vmem [shape: bf16[16,1024], index: 3, kind: output, shape index: {}]  }
   0x1   :  { %v16_v0 = vld [vmem:[%s1666_s1] sm:$0xff]  ;;  %v17_v2 = vld [vmem:[%s1666_s1 + $0x8] sm:$0xff] }
   0x2   :  { %v20_v1 = vld [vmem:[%s1666_s1 + $0x20] sm:$0xff]  ;;  %v21_v4 = vld [vmem:[%s1666_s1 + $0x28] sm:$0xff] }
   0x3   :  { %v1071_v3 = vcombine.high %v16_v0, %v20_v1  ;;  %v1070_v5 = vcombine.low %v16_v0, %v20_v1  ;;  %v24_v6 = vld [vmem:[%s1666_s1 + $0x40] sm:$0xff]  ;;  %v1073_v8 = vcombine.high %v17_v2, %v21_v4  ;;  %v1072_v9 = vcombine.low %v17_v2, %v21_v4  ;;  %v25_v11 = vld [vmem:[%s1666_s1 + $0x48] sm:$0xff] }
   0x4   :  { %v28_v7 = vld [vmem:[%s1666_s1 + $0x60] sm:$0xff]  ;;  %v29_v12 = vld [vmem:[%s1666_s1 + $0x68] sm:$0xff] }
   0x5   :  { %v1079_v10 = vcombine.high %v24_v6, %v28_v7  ;;  %v32_v13 = vld [vmem:[%s1666_s1 + $0x80] sm:$0xff]  ;;  %836 = vmatprep.subr.bf16.mxu0 %v1071_v3  ;;  %v1081_v14 = vcombine.high %v25_v11, %v29_v12  ;;  %v33_v16 = vld [vmem:[%s1666_s1 + $0x88] sm:$0xff]  ;;  %879 = vmatprep.subr.bf16.mxu1 %v1073_v8  ;;  %v1078_v18 = vcombine.low %v24_v6, %v28_v7 }
   0x6   :  { %v36_v15 = vld [vmem:[%s1666_s1 + $0xa0] sm:$0xff]  ;;  %v37_v17 = vld [vmem:[%s1666_s1 + $0xa8] sm:$0xff]  ;;  %837 = vmatpush1.bf16.msra.mxu0 %v1070_v5  ;;  %880 = vmatpush1.bf16.msra.mxu1 %v1072_v9  ;;  %v1080_v19 = vcombine.low %v25_v11, %v29_v12 }
   0x7   :  { %838 = vmatprep.subr.bf16.mxu0 %v1079_v10  ;;  %v1087_v20 = vcombine.high %v32_v13, %v36_v15  ;;  %881 = vmatprep.subr.bf16.mxu1 %v1081_v14  ;;  %v1089_v21 = vcombine.high %v33_v16, %v37_v17  ;;  %v40_v22 = vld [vmem:[%s1666_s1 + $0xc0] sm:$0xff]  ;;  %v41_v24 = vld [vmem:[%s1666_s1 + $0xc8] sm:$0xff]  ;;  %v1086_v26 = vcombine.low %v32_v13, %v36_v15 }
   0x8   :  { %v44_v23 = vld [vmem:[%s1666_s1 + $0xe0] sm:$0xff]  ;;  %v45_v25 = vld [vmem:[%s1666_s1 + $0xe8] sm:$0xff]  ;;  %v1088_v27 = vcombine.low %v33_v16, %v37_v17 }
   0x9   :  { %v1095_v28 = vcombine.high %v40_v22, %v44_v23  ;;  %v1097_v29 = vcombine.high %v41_v24, %v45_v25  ;;  %v48_v30 = vld [vmem:[%s1666_s1 + $0x100] sm:$0xff]  ;;  %v49_v32 = vld [vmem:[%s1666_s1 + $0x108] sm:$0xff]  ;;  %v1094_v34 = vcombine.low %v40_v22, %v44_v23  ;;  %v1096_v35 = vcombine.low %v41_v24, %v45_v25 }
   0xa   :  { %839 = vmatpush1.bf16.msra.mxu0 %v1078_v18  ;;  %882 = vmatpush1.bf16.msra.mxu1 %v1080_v19  ;;  %v52_v31 = vld [vmem:[%s1666_s1 + $0x120] sm:$0xff]  ;;  %v53_v33 = vld [vmem:[%s1666_s1 + $0x128] sm:$0xff] }
   0xb   :  { %840 = vmatprep.subr.bf16.mxu0 %v1087_v20  ;;  %883 = vmatprep.subr.bf16.mxu1 %v1089_v21  ;;  %v1103_v36 = vcombine.high %v48_v30, %v52_v31  ;;  %v1105_v37 = vcombine.high %v49_v32, %v53_v33  ;;  %v56_v38 = vld [vmem:[%s1666_s1 + $0x140] sm:$0xff]  ;;  %v57_v40 = vld [vmem:[%s1666_s1 + $0x148] sm:$0xff]  ;;  %v1102_v42 = vcombine.low %v48_v30, %v52_v31 }
   0xc   :  { %v60_v39 = vld [vmem:[%s1666_s1 + $0x160] sm:$0xff]  ;;  %v61_v41 = vld [vmem:[%s1666_s1 + $0x168] sm:$0xff]  ;;  %v1104_v43 = vcombine.low %v49_v32, %v53_v33 }
   0xd   :  { %v1111_v44 = vcombine.high %v56_v38, %v60_v39  ;;  %v1113_v45 = vcombine.high %v57_v40, %v61_v41  ;;  %v64_v46 = vld [vmem:[%s1666_s1 + $0x180] sm:$0xff]  ;;  %v65_v48 = vld [vmem:[%s1666_s1 + $0x188] sm:$0xff]  ;;  %v1110_v50 = vcombine.low %v56_v38, %v60_v39  ;;  %v1112_v51 = vcombine.low %v57_v40, %v61_v41 }
   0xe   :  { %841 = vmatpush1.bf16.msra.mxu0 %v1086_v26  ;;  %884 = vmatpush1.bf16.msra.mxu1 %v1088_v27  ;;  %v68_v47 = vld [vmem:[%s1666_s1 + $0x1a0] sm:$0xff]  ;;  %v69_v49 = vld [vmem:[%s1666_s1 + $0x1a8] sm:$0xff] }
   0xf   :  { %842 = vmatprep.subr.bf16.mxu0 %v1095_v28  ;;  %885 = vmatprep.subr.bf16.mxu1 %v1097_v29  ;;  %v1119_v52 = vcombine.high %v64_v46, %v68_v47  ;;  %v1121_v53 = vcombine.high %v65_v48, %v69_v49  ;;  %v72_v54 = vld [vmem:[%s1666_s1 + $0x1c0] sm:$0xff]  ;;  %v73_v57 = vld [vmem:[%s1666_s1 + $0x1c8] sm:$0xff]  ;;  %v1118_v59 = vcombine.low %v64_v46, %v68_v47 }
  0x10   :  { %v76_v55 = vld [vmem:[%s1666_s1 + $0x1e0] sm:$0xff]  ;;  %v77_v58 = vld [vmem:[%s1666_s1 + $0x1e8] sm:$0xff]  ;;  %v1120_v60 = vcombine.low %v65_v48, %v69_v49 }
  0x11   :  { %v1330_v56 = vld [vmem:[%s1667_s0 + $0x4] ss:$8 sps:$4 sm:$0xff]   ;;  %v1127_v61 = vcombine.high %v72_v54, %v76_v55  ;;  %v1129_v62 = vcombine.high %v73_v57, %v77_v58  ;;  %v1126_v3 = vcombine.low %v72_v54, %v76_v55  ;;  %v1128_v4 = vcombine.low %v73_v57, %v77_v58 }
  0x12   :  { %843 = vmatpush1.bf16.msra.mxu0 %v1094_v34  ;;  %886 = vmatpush1.bf16.msra.mxu1 %v1096_v35  ;;  %v80_v63 = vld [vmem:[%s1666_s1 + $0x200] sm:$0xff]  ;;  %v81_v1 = vld [vmem:[%s1666_s1 + $0x208] sm:$0xff] }
  0x13   :  { %844 = vmatprep.subr.bf16.mxu0 %v1103_v36  ;;  %887 = vmatprep.subr.bf16.mxu1 %v1105_v37  ;;  %v84_v0 = vld [vmem:[%s1666_s1 + $0x220] sm:$0xff]  ;;  %v85_v2 = vld [vmem:[%s1666_s1 + $0x228] sm:$0xff] }
  0x14   :  { %868 = vmatprep.mubr.bf16.mxu0 %v1330_v56  ;;  %911 = vmatprep.mubr.bf16.mxu1 %v1330_v56  ;;  %v1135_v5 = vcombine.high %v80_v63, %v84_v0  ;;  %v1137_v6 = vcombine.high %v81_v1, %v85_v2  ;;  %v88_v7 = vld [vmem:[%s1666_s1 + $0x240] sm:$0xff]  ;;  %v89_v9 = vld [vmem:[%s1666_s1 + $0x248] sm:$0xff]  ;;  %v1134_v11 = vcombine.low %v80_v63, %v84_v0  ;;  %v18_v0 = vld [vmem:[%s1666_s1 + $0x10] sm:$0xff] }
  0x15   :  { %v92_v8 = vld [vmem:[%s1666_s1 + $0x260] sm:$0xff]  ;;  %v93_v10 = vld [vmem:[%s1666_s1 + $0x268] sm:$0xff]  ;;  %v1136_v12 = vcombine.low %v81_v1, %v85_v2  ;;  %v22_v1 = vld [vmem:[%s1666_s1 + $0x30] sm:$0xff] }
  0x16   :  { %845 = vmatpush1.bf16.msra.mxu0 %v1102_v42  ;;  %888 = vmatpush1.bf16.msra.mxu1 %v1104_v43  ;;  %v1143_v13 = vcombine.high %v88_v7, %v92_v8  ;;  %v1145_v14 = vcombine.high %v89_v9, %v93_v10  ;;  %v96_v15 = vld [vmem:[%s1666_s1 + $0x280] sm:$0xff]  ;;  %v97_v17 = vld [vmem:[%s1666_s1 + $0x288] sm:$0xff]  ;;  %v1142_v19 = vcombine.low %v88_v7, %v92_v8  ;;  %v19_v2 = vld [vmem:[%s1666_s1 + $0x18] sm:$0xff] }
  0x17   :  { %846 = vmatprep.subr.bf16.mxu0 %v1111_v44  ;;  %889 = vmatprep.subr.bf16.mxu1 %v1113_v45  ;;  %v100_v16 = vld [vmem:[%s1666_s1 + $0x2a0] sm:$0xff]  ;;  %v101_v18 = vld [vmem:[%s1666_s1 + $0x2a8] sm:$0xff]  ;;  %v1144_v20 = vcombine.low %v89_v9, %v93_v10  ;;  %v26_v8 = vld [vmem:[%s1666_s1 + $0x50] sm:$0xff] }
  0x18   :  { %v1151_v21 = vcombine.high %v96_v15, %v100_v16  ;;  %v1153_v22 = vcombine.high %v97_v17, %v101_v18  ;;  %v104_v23 = vld [vmem:[%s1666_s1 + $0x2c0] sm:$0xff]  ;;  %v105_v25 = vld [vmem:[%s1666_s1 + $0x2c8] sm:$0xff]  ;;  %v1150_v27 = vcombine.low %v96_v15, %v100_v16  ;;  %v1152_v28 = vcombine.low %v97_v17, %v101_v18  ;;  %v30_v9 = vld [vmem:[%s1666_s1 + $0x70] sm:$0xff] }
  0x19   :  { %v108_v24 = vld [vmem:[%s1666_s1 + $0x2e0] sm:$0xff]  ;;  %v109_v26 = vld [vmem:[%s1666_s1 + $0x2e8] sm:$0xff]  ;;  %v1083_v15 = vcombine.high %v26_v8, %v30_v9  ;;  %v34_v17 = vld [vmem:[%s1666_s1 + $0x90] sm:$0xff] }
  0x1a   :  { %847 = vmatpush1.bf16.msra.mxu0 %v1110_v50  ;;  %890 = vmatpush1.bf16.msra.mxu1 %v1112_v51  ;;  %v1159_v29 = vcombine.high %v104_v23, %v108_v24  ;;  %v1161_v30 = vcombine.high %v105_v25, %v109_v26  ;;  %v112_v31 = vld [vmem:[%s1666_s1 + $0x300] sm:$0xff]  ;;  %v113_v33 = vld [vmem:[%s1666_s1 + $0x308] sm:$0xff]  ;;  %v1158_v35 = vcombine.low %v104_v23, %v108_v24  ;;  %v38_v18 = vld [vmem:[%s1666_s1 + $0xb0] sm:$0xff] }
  0x1b   :  { %848 = vmatprep.subr.bf16.mxu0 %v1119_v52  ;;  %891 = vmatprep.subr.bf16.mxu1 %v1121_v53  ;;  %v116_v32 = vld [vmem:[%s1666_s1 + $0x320] sm:$0xff]  ;;  %v117_v34 = vld [vmem:[%s1666_s1 + $0x328] sm:$0xff]  ;;  %v1160_v36 = vcombine.low %v105_v25, %v109_v26  ;;  %v1091_v23 = vcombine.high %v34_v17, %v38_v18  ;;  %v42_v25 = vld [vmem:[%s1666_s1 + $0xd0] sm:$0xff] }
  0x1c   :  { %v1167_v37 = vcombine.high %v112_v31, %v116_v32  ;;  %v1169_v38 = vcombine.high %v113_v33, %v117_v34  ;;  %v120_v39 = vld [vmem:[%s1666_s1 + $0x340] sm:$0xff]  ;;  %v121_v41 = vld [vmem:[%s1666_s1 + $0x348] sm:$0xff]  ;;  %v1166_v43 = vcombine.low %v112_v31, %v116_v32  ;;  %v1168_v44 = vcombine.low %v113_v33, %v117_v34  ;;  %v46_v26 = vld [vmem:[%s1666_s1 + $0xf0] sm:$0xff] }
  0x1d   :  { %v124_v40 = vld [vmem:[%s1666_s1 + $0x360] sm:$0xff]  ;;  %v125_v42 = vld [vmem:[%s1666_s1 + $0x368] sm:$0xff]  ;;  %v1099_v31 = vcombine.high %v42_v25, %v46_v26  ;;  %v50_v33 = vld [vmem:[%s1666_s1 + $0x110] sm:$0xff] }
  0x1e   :  { %849 = vmatpush1.bf16.msra.mxu0 %v1118_v59  ;;  %892 = vmatpush1.bf16.msra.mxu1 %v1120_v60  ;;  %v1175_v45 = vcombine.high %v120_v39, %v124_v40  ;;  %v1177_v46 = vcombine.high %v121_v41, %v125_v42  ;;  %v128_v47 = vld [vmem:[%s1666_s1 + $0x380] sm:$0xff]  ;;  %v129_v49 = vld [vmem:[%s1666_s1 + $0x388] sm:$0xff]  ;;  %v1174_v51 = vcombine.low %v120_v39, %v124_v40  ;;  %v54_v34 = vld [vmem:[%s1666_s1 + $0x130] sm:$0xff] }
  0x1f   :  { %850 = vmatprep.subr.bf16.mxu0 %v1127_v61  ;;  %893 = vmatprep.subr.bf16.mxu1 %v1129_v62  ;;  %v132_v48 = vld [vmem:[%s1666_s1 + $0x3a0] sm:$0xff]  ;;  %v133_v50 = vld [vmem:[%s1666_s1 + $0x3a8] sm:$0xff]  ;;  %v1176_v52 = vcombine.low %v121_v41, %v125_v42  ;;  %v58_v40 = vld [vmem:[%s1666_s1 + $0x150] sm:$0xff] }
  0x20   :  { %v1183_v53 = vcombine.high %v128_v47, %v132_v48  ;;  %v1185_v54 = vcombine.high %v129_v49, %v133_v50  ;;  %v136_v55 = vld [vmem:[%s1666_s1 + $0x3c0] sm:$0xff]  ;;  %v137_v58 = vld [vmem:[%s1666_s1 + $0x3c8] sm:$0xff]  ;;  %v1182_v60 = vcombine.low %v128_v47, %v132_v48  ;;  %v1184_v61 = vcombine.low %v129_v49, %v133_v50  ;;  %v62_v41 = vld [vmem:[%s1666_s1 + $0x170] sm:$0xff] }
  0x21   :  { %v140_v57 = vld [vmem:[%s1666_s1 + $0x3e0] sm:$0xff]  ;;  %v141_v59 = vld [vmem:[%s1666_s1 + $0x3e8] sm:$0xff]  ;;  %v59_v42 = vld [vmem:[%s1666_s1 + $0x158] sm:$0xff] }
  0x22   :  { %851 = vmatpush1.bf16.msra.mxu0 %v1126_v3  ;;  %894 = vmatpush1.bf16.msra.mxu1 %v1128_v4  ;;  %v1191_v62 = vcombine.high %v136_v55, %v140_v57  ;;  %v1193_v63 = vcombine.high %v137_v58, %v141_v59  ;;  %v23_v3 = vld [vmem:[%s1666_s1 + $0x38] sm:$0xff]  ;;  %v1190_v4 = vcombine.low %v136_v55, %v140_v57  ;;  %v1457_v10 = vld [vmem:[%s1667_s0] ss:$8 sps:$4 sm:$0xff]   ;;  %v66_v48 = vld [vmem:[%s1666_s1 + $0x190] sm:$0xff] }
  0x23   :  { %852 = vmatprep.subr.bf16.mxu0 %v1135_v5  ;;  %895 = vmatprep.subr.bf16.mxu1 %v1137_v6  ;;  %v1192_v5 = vcombine.low %v137_v58, %v141_v59  ;;  %v1075_v6 = vcombine.high %v18_v0, %v22_v1  ;;  %v1077_v7 = vcombine.high %v19_v2, %v23_v3  ;;  %v70_v49 = vld [vmem:[%s1666_s1 + $0x1b0] sm:$0xff]  ;;  %v67_v50 = vld [vmem:[%s1666_s1 + $0x198] sm:$0xff] }
  0x24   :  { %v74_v57 = vld [vmem:[%s1666_s1 + $0x1d0] sm:$0xff]  ;;  %v75_v59 = vld [vmem:[%s1666_s1 + $0x1d8] sm:$0xff] }
  0x25   :  { %v78_v58 = vld [vmem:[%s1666_s1 + $0x1f0] sm:$0xff] }
  0x26   :  { %853 = vmatpush1.bf16.msra.mxu0 %v1134_v11  ;;  %896 = vmatpush1.bf16.msra.mxu1 %v1136_v12  ;;  %v27_v11 = vld [vmem:[%s1666_s1 + $0x58] sm:$0xff] }
  0x27   :  { %854 = vmatprep.subr.bf16.mxu0 %v1143_v13  ;;  %897 = vmatprep.subr.bf16.mxu1 %v1145_v14  ;;  %v31_v12 = vld [vmem:[%s1666_s1 + $0x78] sm:$0xff]  ;;  %v1074_v13 = vcombine.low %v18_v0, %v22_v1  ;;  %v1076_v14 = vcombine.low %v19_v2, %v23_v3  ;;  %v82_v1 = vld [vmem:[%s1666_s1 + $0x210] sm:$0xff] }
  0x28   :  { %v1085_v16 = vcombine.high %v27_v11, %v31_v12  ;;  %v86_v2 = vld [vmem:[%s1666_s1 + $0x230] sm:$0xff]  ;;  %v83_v3 = vld [vmem:[%s1666_s1 + $0x218] sm:$0xff] }
  0x2a   :  { %855 = vmatpush1.bf16.msra.mxu0 %v1142_v19  ;;  %898 = vmatpush1.bf16.msra.mxu1 %v1144_v20  ;;  %v35_v19 = vld [vmem:[%s1666_s1 + $0x98] sm:$0xff] }
  0x2b   :  { %856 = vmatprep.subr.bf16.mxu0 %v1151_v21  ;;  %899 = vmatprep.subr.bf16.mxu1 %v1153_v22  ;;  %v39_v20 = vld [vmem:[%s1666_s1 + $0xb8] sm:$0xff]  ;;  %v1082_v21 = vcombine.low %v26_v8, %v30_v9  ;;  %v1084_v22 = vcombine.low %v27_v11, %v31_v12  ;;  %v90_v9 = vld [vmem:[%s1666_s1 + $0x250] sm:$0xff] }
  0x2c   :  { %v1093_v24 = vcombine.high %v35_v19, %v39_v20  ;;  %v94_v11 = vld [vmem:[%s1666_s1 + $0x270] sm:$0xff]  ;;  %v91_v12 = vld [vmem:[%s1666_s1 + $0x258] sm:$0xff] }
  0x2e   :  { %857 = vmatpush1.bf16.msra.mxu0 %v1150_v27  ;;  %900 = vmatpush1.bf16.msra.mxu1 %v1152_v28  ;;  %v43_v27 = vld [vmem:[%s1666_s1 + $0xd8] sm:$0xff] }
  0x2f   :  { %858 = vmatprep.subr.bf16.mxu0 %v1159_v29  ;;  %901 = vmatprep.subr.bf16.mxu1 %v1161_v30  ;;  %v47_v28 = vld [vmem:[%s1666_s1 + $0xf8] sm:$0xff]  ;;  %v1090_v29 = vcombine.low %v34_v17, %v38_v18  ;;  %v1092_v30 = vcombine.low %v35_v19, %v39_v20  ;;  %v98_v18 = vld [vmem:[%s1666_s1 + $0x290] sm:$0xff] }
  0x30   :  { %v1101_v32 = vcombine.high %v43_v27, %v47_v28  ;;  %v102_v19 = vld [vmem:[%s1666_s1 + $0x2b0] sm:$0xff]  ;;  %v99_v20 = vld [vmem:[%s1666_s1 + $0x298] sm:$0xff] }
  0x32   :  { %859 = vmatpush1.bf16.msra.mxu0 %v1158_v35  ;;  %902 = vmatpush1.bf16.msra.mxu1 %v1160_v36  ;;  %v55_v35 = vld [vmem:[%s1666_s1 + $0x138] sm:$0xff]  ;;  %v1098_v36 = vcombine.low %v42_v25, %v46_v26  ;;  %v106_v26 = vld [vmem:[%s1666_s1 + $0x2d0] sm:$0xff] }
  0x33   :  { %860 = vmatprep.subr.bf16.mxu0 %v1167_v37  ;;  %903 = vmatprep.subr.bf16.mxu1 %v1169_v38  ;;  %v1100_v37 = vcombine.low %v43_v27, %v47_v28  ;;  %v1107_v38 = vcombine.high %v50_v33, %v54_v34  ;;  %v110_v27 = vld [vmem:[%s1666_s1 + $0x2f0] sm:$0xff]  ;;  %v107_v28 = vld [vmem:[%s1666_s1 + $0x2d8] sm:$0xff] }
  0x36   :  { %861 = vmatpush1.bf16.msra.mxu0 %v1166_v43  ;;  %904 = vmatpush1.bf16.msra.mxu1 %v1168_v44  ;;  %v63_v43 = vld [vmem:[%s1666_s1 + $0x178] sm:$0xff]  ;;  %v1106_v44 = vcombine.low %v50_v33, %v54_v34  ;;  %v114_v34 = vld [vmem:[%s1666_s1 + $0x310] sm:$0xff] }
  0x37   :  { %862 = vmatprep.subr.bf16.mxu0 %v1175_v45  ;;  %905 = vmatprep.subr.bf16.mxu1 %v1177_v46  ;;  %v1115_v46 = vcombine.high %v58_v40, %v62_v41  ;;  %v1117_v47 = vcombine.high %v59_v42, %v63_v43 }
  0x3a   :  { %863 = vmatpush1.bf16.msra.mxu0 %v1174_v51  ;;  %906 = vmatpush1.bf16.msra.mxu1 %v1176_v52  ;;  %v71_v51 = vld [vmem:[%s1666_s1 + $0x1b8] sm:$0xff]  ;;  %v1114_v52 = vcombine.low %v58_v40, %v62_v41  ;;  %v122_v41 = vld [vmem:[%s1666_s1 + $0x350] sm:$0xff] }
  0x3b   :  { %864 = vmatprep.subr.bf16.mxu0 %v1183_v53  ;;  %907 = vmatprep.subr.bf16.mxu1 %v1185_v54  ;;  %v1116_v53 = vcombine.low %v59_v42, %v63_v43  ;;  %v1123_v54 = vcombine.high %v66_v48, %v70_v49  ;;  %v1125_v55 = vcombine.high %v67_v50, %v71_v51  ;;  %v126_v42 = vld [vmem:[%s1666_s1 + $0x370] sm:$0xff]  ;;  %v123_v43 = vld [vmem:[%s1666_s1 + $0x358] sm:$0xff] }
  0x3e   :  { %865 = vmatpush1.bf16.msra.mxu0 %v1182_v60  ;;  %908 = vmatpush1.bf16.msra.mxu1 %v1184_v61  ;;  %v79_v60 = vld [vmem:[%s1666_s1 + $0x1f8] sm:$0xff]  ;;  %v1122_v61 = vcombine.low %v66_v48, %v70_v49  ;;  %v130_v49 = vld [vmem:[%s1666_s1 + $0x390] sm:$0xff] }
  0x3f   :  { %866 = vmatprep.subr.bf16.mxu0 %v1191_v62  ;;  %909 = vmatprep.subr.bf16.mxu1 %v1193_v63  ;;  %v1124_v62 = vcombine.low %v67_v50, %v71_v51  ;;  %v1131_v63 = vcombine.high %v74_v57, %v78_v58  ;;  %v1133_v0 = vcombine.high %v75_v59, %v79_v60  ;;  %v134_v50 = vld [vmem:[%s1666_s1 + $0x3b0] sm:$0xff]  ;;  %v131_v51 = vld [vmem:[%s1666_s1 + $0x398] sm:$0xff] }
  0x42   :  { %867 = vmatpush1.bf16.msra.mxu0 %v1190_v4  ;;  %910 = vmatpush1.bf16.msra.mxu1 %v1192_v5  ;;  %v87_v4 = vld [vmem:[%s1666_s1 + $0x238] sm:$0xff]  ;;  %v1130_v5 = vcombine.low %v74_v57, %v78_v58  ;;  %v138_v58 = vld [vmem:[%s1666_s1 + $0x3d0] sm:$0xff] }
  0x43   :  { %922 = vmatprep.subr.bf16.mxu0 %v1075_v6  ;;  %965 = vmatprep.subr.bf16.mxu1 %v1077_v7  ;;  %v1132_v6 = vcombine.low %v75_v59, %v79_v60  ;;  %v1139_v7 = vcombine.high %v82_v1, %v86_v2  ;;  %v1141_v8 = vcombine.high %v83_v3, %v87_v4  ;;  %v142_v59 = vld [vmem:[%s1666_s1 + $0x3f0] sm:$0xff]  ;;  %v139_v60 = vld [vmem:[%s1666_s1 + $0x3d8] sm:$0xff] }
  0x45   :  { %869 = vmatmul.mubr.bf16.vlgmr.msra.gmra.mrb[0].mxu0 %v1457_v10  ;;  %912 = vmatmul.mubr.bf16.vlgmr.msra.gmra.mrb[0].mxu1 %v1457_v10 }
  0x46   :  { %923 = vmatpush1.bf16.msra.mxu0 %v1074_v13  ;;  %966 = vmatpush1.bf16.msra.mxu1 %v1076_v14  ;;  %v95_v13 = vld [vmem:[%s1666_s1 + $0x278] sm:$0xff]  ;;  %v1138_v14 = vcombine.low %v82_v1, %v86_v2  ;;  %v1194_v2 = vcombine.low %v138_v58, %v142_v59 }
  0x47   :  { %924 = vmatprep.subr.bf16.mxu0 %v1083_v15  ;;  %967 = vmatprep.subr.bf16.mxu1 %v1085_v16  ;;  %v1140_v15 = vcombine.low %v83_v3, %v87_v4  ;;  %v1147_v16 = vcombine.high %v90_v9, %v94_v11  ;;  %v1149_v17 = vcombine.high %v91_v12, %v95_v13  ;;  %v146_v4 = vlaneseq }
  0x48   :  { %954 = vmatprep.mubr.bf16.mxu0 %v1330_v56  ;;  %997 = vmatprep.mubr.bf16.mxu1 %v1330_v56  ;;  %v51_v56 = vld [vmem:[%s1666_s1 + $0x118] sm:$0xff] }
  0x49   :  { %v1109_v39 = vcombine.high %v51_v56, %v55_v35  ;;  %v1108_v45 = vcombine.low %v51_v56, %v55_v35  ;;  %v118_v56 = vld [vmem:[%s1666_s1 + $0x330] sm:$0xff]  ;;  %v115_v35 = vld [vmem:[%s1666_s1 + $0x318] sm:$0xff] }
  0x4a   :  { %925 = vmatpush1.bf16.msra.mxu0 %v1082_v21  ;;  %968 = vmatpush1.bf16.msra.mxu1 %v1084_v22  ;;  %v103_v21 = vld [vmem:[%s1666_s1 + $0x2b8] sm:$0xff]  ;;  %v1146_v22 = vcombine.low %v90_v9, %v94_v11 }
  0x4b   :  { %926 = vmatprep.subr.bf16.mxu0 %v1091_v23  ;;  %969 = vmatprep.subr.bf16.mxu1 %v1093_v24  ;;  %v1148_v23 = vcombine.low %v91_v12, %v95_v13  ;;  %v1155_v24 = vcombine.high %v98_v18, %v102_v19  ;;  %v1157_v25 = vcombine.high %v99_v20, %v103_v21 }
  0x4e   :  { %927 = vmatpush1.bf16.msra.mxu0 %v1090_v29  ;;  %970 = vmatpush1.bf16.msra.mxu1 %v1092_v30  ;;  %v111_v29 = vld [vmem:[%s1666_s1 + $0x2f8] sm:$0xff]  ;;  %v1154_v30 = vcombine.low %v98_v18, %v102_v19 }
  0x4f   :  { %928 = vmatprep.subr.bf16.mxu0 %v1099_v31  ;;  %971 = vmatprep.subr.bf16.mxu1 %v1101_v32  ;;  %v1156_v31 = vcombine.low %v99_v20, %v103_v21  ;;  %v1163_v32 = vcombine.high %v106_v26, %v110_v27  ;;  %v1165_v33 = vcombine.high %v107_v28, %v111_v29 }
  0x52   :  { %929 = vmatpush1.bf16.msra.mxu0 %v1098_v36  ;;  %972 = vmatpush1.bf16.msra.mxu1 %v1100_v37  ;;  %v119_v36 = vld [vmem:[%s1666_s1 + $0x338] sm:$0xff]  ;;  %v1162_v37 = vcombine.low %v106_v26, %v110_v27 }
  0x53   :  { %930 = vmatprep.subr.bf16.mxu0 %v1107_v38  ;;  %973 = vmatprep.subr.bf16.mxu1 %v1109_v39  ;;  %v1164_v38 = vcombine.low %v107_v28, %v111_v29  ;;  %v1171_v39 = vcombine.high %v114_v34, %v118_v56  ;;  %v1173_v40 = vcombine.high %v115_v35, %v119_v36 }
  0x56   :  { %931 = vmatpush1.bf16.msra.mxu0 %v1106_v44  ;;  %974 = vmatpush1.bf16.msra.mxu1 %v1108_v45  ;;  %v127_v44 = vld [vmem:[%s1666_s1 + $0x378] sm:$0xff]  ;;  %v1170_v45 = vcombine.low %v114_v34, %v118_v56 }
  0x57   :  { %932 = vmatprep.subr.bf16.mxu0 %v1115_v46  ;;  %975 = vmatprep.subr.bf16.mxu1 %v1117_v47  ;;  %v1172_v46 = vcombine.low %v115_v35, %v119_v36  ;;  %v1179_v47 = vcombine.high %v122_v41, %v126_v42  ;;  %v1181_v48 = vcombine.high %v123_v43, %v127_v44 }
  0x5a   :  { %933 = vmatpush1.bf16.msra.mxu0 %v1114_v52  ;;  %976 = vmatpush1.bf16.msra.mxu1 %v1116_v53  ;;  %v135_v52 = vld [vmem:[%s1666_s1 + $0x3b8] sm:$0xff]  ;;  %v1178_v53 = vcombine.low %v122_v41, %v126_v42 }
  0x5b   :  { %934 = vmatprep.subr.bf16.mxu0 %v1123_v54  ;;  %977 = vmatprep.subr.bf16.mxu1 %v1125_v55  ;;  %v1180_v54 = vcombine.low %v123_v43, %v127_v44  ;;  %v1187_v55 = vcombine.high %v130_v49, %v134_v50  ;;  %v1189_v57 = vcombine.high %v131_v51, %v135_v52 }
  0x5e   :  { %935 = vmatpush1.bf16.msra.mxu0 %v1122_v61  ;;  %978 = vmatpush1.bf16.msra.mxu1 %v1124_v62  ;;  %v143_v61 = vld [vmem:[%s1666_s1 + $0x3f8] sm:$0xff]  ;;  %v1186_v62 = vcombine.low %v130_v49, %v134_v50 }
  0x5f   :  { %936 = vmatprep.subr.bf16.mxu0 %v1131_v63  ;;  %979 = vmatprep.subr.bf16.mxu1 %v1133_v0  ;;  %v1188_v63 = vcombine.low %v131_v51, %v135_v52  ;;  %v1195_v0 = vcombine.high %v138_v58, %v142_v59  ;;  %v1197_v1 = vcombine.high %v139_v60, %v143_v61 }
  0x60   :  { %v1196_v3 = vcombine.low %v139_v60, %v143_v61 }
  0x62   :  { %937 = vmatpush1.bf16.msra.mxu0 %v1130_v5  ;;  %980 = vmatpush1.bf16.msra.mxu1 %v1132_v6  ;;  %v147_v5 = vshrl.u32 %v146_v4, 7 }
  0x63   :  { %938 = vmatprep.subr.bf16.mxu0 %v1139_v7  ;;  %981 = vmatprep.subr.bf16.mxu1 %v1141_v8  ;;  %v144_v7 = vld [vmem:[%s1668_s2] sm:$0xff] }
  0x64   :  { %v148_v6 = vsub.s32 0, %v147_v5  ;;  %v156_v8 = vsub.s32 2, %v147_v5  ;;  %v152_v9 = vsub.s32 1, %v147_v5  ;;  %v160_v11 = vsub.s32 3, %v147_v5 }
  0x65   :  { %v164_v56 = vsub.s32 4, %v147_v5  ;;  %v172_v35 = vsub.s32 6, %v147_v5  ;;  %v168_v36 = vsub.s32 5, %v147_v5 }
  0x66   :  { %939 = vmatpush1.bf16.msra.mxu0 %v1138_v14  ;;  %982 = vmatpush1.bf16.msra.mxu1 %v1140_v15  ;;  %v149_v12 = vrot.slane %v144_v7, %v148_v6  ;;  %v157_v13 = vrot.slane %v144_v7, %v156_v8  ;;  %v153_v14 = vrot.slane %v144_v7, %v152_v9 }
  0x67   :  { %940 = vmatprep.subr.bf16.mxu0 %v1147_v16  ;;  %983 = vmatprep.subr.bf16.mxu1 %v1149_v17  ;;  %v161_v15 = vrot.slane %v144_v7, %v160_v11 }
  0x6a   :  { %941 = vmatpush1.bf16.msra.mxu0 %v1146_v22  ;;  %984 = vmatpush1.bf16.msra.mxu1 %v1148_v23 }
  0x6b   :  { %942 = vmatprep.subr.bf16.mxu0 %v1155_v24  ;;  %985 = vmatprep.subr.bf16.mxu1 %v1157_v25 }
  0x6e   :  { %943 = vmatpush1.bf16.msra.mxu0 %v1154_v30  ;;  %986 = vmatpush1.bf16.msra.mxu1 %v1156_v31 }
  0x6f   :  { %944 = vmatprep.subr.bf16.mxu0 %v1163_v32  ;;  %987 = vmatprep.subr.bf16.mxu1 %v1165_v33 }
  0x72   :  { %945 = vmatpush1.bf16.msra.mxu0 %v1162_v37  ;;  %988 = vmatpush1.bf16.msra.mxu1 %v1164_v38  ;;  %v176_v37 = vsub.s32 7, %v147_v5  ;;  %v165_v38 = vrot.slane %v144_v7, %v164_v56 }
  0x73   :  { %946 = vmatprep.subr.bf16.mxu0 %v1171_v39  ;;  %989 = vmatprep.subr.bf16.mxu1 %v1173_v40  ;;  %v173_v39 = vrot.slane %v144_v7, %v172_v35  ;;  %v169_v40 = vrot.slane %v144_v7, %v168_v36 }
  0x74   :  { %v177_v41 = vrot.slane %v144_v7, %v176_v37 }
  0x76   :  { %947 = vmatpush1.bf16.msra.mxu0 %v1170_v45  ;;  %990 = vmatpush1.bf16.msra.mxu1 %v1172_v46 }
  0x77   :  { %948 = vmatprep.subr.bf16.mxu0 %v1179_v47  ;;  %991 = vmatprep.subr.bf16.mxu1 %v1181_v48 }
  0x7a   :  { %949 = vmatpush1.bf16.msra.mxu0 %v1178_v53  ;;  %992 = vmatpush1.bf16.msra.mxu1 %v1180_v54 }
  0x7b   :  { %950 = vmatprep.subr.bf16.mxu0 %v1187_v55  ;;  %993 = vmatprep.subr.bf16.mxu1 %v1189_v57 }
  0x7e   :  { %951 = vmatpush1.bf16.msra.mxu0 %v1186_v62  ;;  %994 = vmatpush1.bf16.msra.mxu1 %v1188_v63 }
  0x7f   :  { %952 = vmatprep.subr.bf16.mxu0 %v1195_v0  ;;  %995 = vmatprep.subr.bf16.mxu1 %v1197_v1 }
  0x82   :  { %953 = vmatpush1.bf16.msra.mxu0 %v1194_v2  ;;  %996 = vmatpush1.bf16.msra.mxu1 %v1196_v3 }
  0x85   :  { %955 = vmatmul.mubr.bf16.vlgmr.msra.gmra.mrb[4].mxu0 %v1457_v10  ;;  %998 = vmatmul.mubr.bf16.vlgmr.msra.gmra.mrb[4].mxu1 %v1457_v10 }
 0x118   :  { %v870_v16 = vpop.f32.mrb[0].mxu0  ;;  %v913_v18 = vpop.f32.mrb[0].mxu1 }
 0x119   :  { %v871_v17 = vadd.f32 %v870_v16, %v149_v12  ;;  %v872_v19 = vpop.f32.mrb[1].mxu0  ;;  %v914_v20 = vadd.f32 %v913_v18, %v157_v13  ;;  %v915_v21 = vpop.f32.mrb[1].mxu1 }
 0x11a   :  { %v873_v10 = vadd.f32 %v872_v19, %v153_v14  ;;  %v874_v22 = vpop.f32.mrb[2].mxu0  ;;  %v916_v23 = vadd.f32 %v915_v21, %v161_v15  ;;  %v917_v25 = vpop.f32.mrb[2].mxu1 }
 0x11b   :  { %v875_v24 = vadd.f32 %v874_v22, %v149_v12  ;;  %v876_v26 = vpop.f32.mrb[3].mxu0  ;;  %v918_v28 = vadd.f32 %v917_v25, %v157_v13  ;;  %v919_v30 = vpop.f32.mrb[3].mxu1 }
 0x11c   :  { %v1206_v27 = vpack.c.bf16 %v873_v10, %v871_v17  ;;  %v877_v29 = vadd.f32 %v876_v26, %v153_v14  ;;  %v1207_v31 = vpack.c.bf16 %v916_v23, %v914_v20  ;;  %v920_v32 = vadd.f32 %v919_v30, %v161_v15 }
 0x11e   :  { %1056 = vst [vmem:[%s1669_s3] sm:$0xff] %v1206_v27  ;;  %v1210_v33 = vpack.c.bf16 %v877_v29, %v875_v24  ;;  %1057 = vst [vmem:[%s1669_s3 + $0x8] sm:$0xff] %v1207_v31  ;;  %v1211_v34 = vpack.c.bf16 %v920_v32, %v918_v28 }
 0x120   :  { %1060 = vst [vmem:[%s1669_s3 + $0x20] sm:$0xff] %v1210_v33  ;;  %1061 = vst [vmem:[%s1669_s3 + $0x28] sm:$0xff] %v1211_v34 }
 0x158   :  { %v956_v42 = vpop.f32.mrb[4].mxu0  ;;  %v999_v44 = vpop.f32.mrb[4].mxu1 }
 0x159   :  { %v957_v43 = vadd.f32 %v956_v42, %v165_v38  ;;  %v958_v45 = vpop.f32.mrb[5].mxu0  ;;  %v1000_v46 = vadd.f32 %v999_v44, %v173_v39  ;;  %v1001_v48 = vpop.f32.mrb[5].mxu1 }
 0x15a   :  { %v959_v47 = vadd.f32 %v958_v45, %v169_v40  ;;  %v960_v49 = vpop.f32.mrb[6].mxu0  ;;  %v1002_v50 = vadd.f32 %v1001_v48, %v177_v41  ;;  %v1003_v52 = vpop.f32.mrb[6].mxu1 }
 0x15b   :  { %v961_v51 = vadd.f32 %v960_v49, %v165_v38  ;;  %v962_v53 = vpop.f32.mrb[7].mxu0  ;;  %v1004_v55 = vadd.f32 %v1003_v52, %v173_v39  ;;  %v1005_v58 = vpop.f32.mrb[7].mxu1 }
 0x15c   :  { %v1208_v54 = vpack.c.bf16 %v959_v47, %v957_v43  ;;  %v963_v57 = vadd.f32 %v962_v53, %v169_v40  ;;  %v1209_v59 = vpack.c.bf16 %v1002_v50, %v1000_v46  ;;  %v1006_v60 = vadd.f32 %v1005_v58, %v177_v41 }
 0x15e   :  { %1058 = vst [vmem:[%s1669_s3 + $0x10] sm:$0xff] %v1208_v54  ;;  %v1212_v61 = vpack.c.bf16 %v963_v57, %v961_v51  ;;  %1059 = vst [vmem:[%s1669_s3 + $0x18] sm:$0xff] %v1209_v59  ;;  %v1213_v62 = vpack.c.bf16 %v1006_v60, %v1004_v55 }
 0x160   :  { %1062 = vst [vmem:[%s1669_s3 + $0x30] sm:$0xff] %v1212_v61  ;;  %1063 = vst [vmem:[%s1669_s3 + $0x38] sm:$0xff] %v1213_v62 }

// kernel: forward.15
= control target key start
LH: loop header
LB: loop body
LE: loop exit
PB: predicated region body
PF: predicated region fallthrough
CT: control target
= control target key end

     0   :  { %v1432_v3 = vmov 0   ;;  %s1900_s3 = inlined_call_operand.vmem [shape: bf16[128,1024], index: 3, kind: input, shape index: {}]   ;;  %s1901_s1 = inlined_call_operand.vmem [shape: bf16[16,128], index: 1, kind: input, shape index: {}]   ;;  %s1902_s0 = inlined_call_operand.vmem [shape: bf16[16,128], index: 0, kind: input, shape index: {}]   ;;  %s1903_s2 = inlined_call_operand.vmem [shape: bf16[128,1024], index: 2, kind: input, shape index: {}]   ;;  %s1904_s4 = inlined_call_operand.vmem [shape: f32[1,1024], index: 4, kind: input, shape index: {}]   ;;  %s1905_s5 = inlined_call_operand.vmem [shape: bf16[16,1024], index: 5, kind: output, shape index: {}]  }
   0x1   :  { %v89_v0 = vld [vmem:[%s1900_s3] sm:$0xff]  ;;  %v90_v2 = vld [vmem:[%s1900_s3 + $0x8] sm:$0xff]  ;;  %511 = vmatprep.mubr.bf16.mxu0 %v1432_v3  ;;  %554 = vmatprep.mubr.bf16.mxu1 %v1432_v3  ;;  %v91_v63 = vld [vmem:[%s1900_s3 + $0x10] sm:$0xff] }
   0x2   :  { %v93_v1 = vld [vmem:[%s1900_s3 + $0x20] sm:$0xff]  ;;  %v94_v5 = vld [vmem:[%s1900_s3 + $0x28] sm:$0xff] }
   0x3   :  { %v1269_v4 = vcombine.high %v89_v0, %v93_v1  ;;  %v1268_v6 = vcombine.low %v89_v0, %v93_v1  ;;  %v97_v7 = vld [vmem:[%s1900_s3 + $0x40] sm:$0xff]  ;;  %v1271_v9 = vcombine.high %v90_v2, %v94_v5  ;;  %v1270_v10 = vcombine.low %v90_v2, %v94_v5  ;;  %v98_v12 = vld [vmem:[%s1900_s3 + $0x48] sm:$0xff]  ;;  %v95_v0 = vld [vmem:[%s1900_s3 + $0x30] sm:$0xff] }
   0x4   :  { %v101_v8 = vld [vmem:[%s1900_s3 + $0x60] sm:$0xff]  ;;  %v102_v13 = vld [vmem:[%s1900_s3 + $0x68] sm:$0xff]  ;;  %v92_v1 = vld [vmem:[%s1900_s3 + $0x18] sm:$0xff] }
   0x5   :  { %v1277_v11 = vcombine.high %v97_v7, %v101_v8  ;;  %v105_v14 = vld [vmem:[%s1900_s3 + $0x80] sm:$0xff]  ;;  %479 = vmatprep.subr.bf16.mxu0 %v1269_v4  ;;  %v1279_v15 = vcombine.high %v98_v12, %v102_v13  ;;  %v106_v17 = vld [vmem:[%s1900_s3 + $0x88] sm:$0xff]  ;;  %522 = vmatprep.subr.bf16.mxu1 %v1271_v9  ;;  %v1276_v19 = vcombine.low %v97_v7, %v101_v8  ;;  %v96_v2 = vld [vmem:[%s1900_s3 + $0x38] sm:$0xff] }
   0x6   :  { %v109_v16 = vld [vmem:[%s1900_s3 + $0xa0] sm:$0xff]  ;;  %v110_v18 = vld [vmem:[%s1900_s3 + $0xa8] sm:$0xff]  ;;  %480 = vmatpush1.bf16.msra.mxu0 %v1268_v6  ;;  %523 = vmatpush1.bf16.msra.mxu1 %v1270_v10  ;;  %v1278_v20 = vcombine.low %v98_v12, %v102_v13  ;;  %v1273_v6 = vcombine.high %v91_v63, %v95_v0  ;;  %v1275_v7 = vcombine.high %v92_v1, %v96_v2  ;;  %v99_v8 = vld [vmem:[%s1900_s3 + $0x50] sm:$0xff] }
   0x7   :  { %481 = vmatprep.subr.bf16.mxu0 %v1277_v11  ;;  %v1285_v21 = vcombine.high %v105_v14, %v109_v16  ;;  %524 = vmatprep.subr.bf16.mxu1 %v1279_v15  ;;  %v1287_v22 = vcombine.high %v106_v17, %v110_v18  ;;  %v113_v23 = vld [vmem:[%s1900_s3 + $0xc0] sm:$0xff]  ;;  %v114_v25 = vld [vmem:[%s1900_s3 + $0xc8] sm:$0xff]  ;;  %v1284_v27 = vcombine.low %v105_v14, %v109_v16  ;;  %v103_v9 = vld [vmem:[%s1900_s3 + $0x70] sm:$0xff] }
   0x8   :  { %v117_v24 = vld [vmem:[%s1900_s3 + $0xe0] sm:$0xff]  ;;  %v118_v26 = vld [vmem:[%s1900_s3 + $0xe8] sm:$0xff]  ;;  %v1286_v28 = vcombine.low %v106_v17, %v110_v18  ;;  %v100_v11 = vld [vmem:[%s1900_s3 + $0x58] sm:$0xff]  ;;  %v1272_v13 = vcombine.low %v91_v63, %v95_v0  ;;  %v1274_v14 = vcombine.low %v92_v1, %v96_v2  ;;  %v1281_v15 = vcombine.high %v99_v8, %v103_v9 }
   0x9   :  { %v1293_v29 = vcombine.high %v113_v23, %v117_v24  ;;  %v1295_v30 = vcombine.high %v114_v25, %v118_v26  ;;  %v121_v31 = vld [vmem:[%s1900_s3 + $0x100] sm:$0xff]  ;;  %v122_v33 = vld [vmem:[%s1900_s3 + $0x108] sm:$0xff]  ;;  %v1292_v35 = vcombine.low %v113_v23, %v117_v24  ;;  %v1294_v36 = vcombine.low %v114_v25, %v118_v26  ;;  %v104_v12 = vld [vmem:[%s1900_s3 + $0x78] sm:$0xff] }
   0xa   :  { %482 = vmatpush1.bf16.msra.mxu0 %v1276_v19  ;;  %525 = vmatpush1.bf16.msra.mxu1 %v1278_v20  ;;  %v125_v32 = vld [vmem:[%s1900_s3 + $0x120] sm:$0xff]  ;;  %v126_v34 = vld [vmem:[%s1900_s3 + $0x128] sm:$0xff]  ;;  %v1283_v16 = vcombine.high %v100_v11, %v104_v12  ;;  %v107_v17 = vld [vmem:[%s1900_s3 + $0x90] sm:$0xff] }
   0xb   :  { %483 = vmatprep.subr.bf16.mxu0 %v1285_v21  ;;  %526 = vmatprep.subr.bf16.mxu1 %v1287_v22  ;;  %v1301_v37 = vcombine.high %v121_v31, %v125_v32  ;;  %v1303_v38 = vcombine.high %v122_v33, %v126_v34  ;;  %v129_v39 = vld [vmem:[%s1900_s3 + $0x140] sm:$0xff]  ;;  %v130_v41 = vld [vmem:[%s1900_s3 + $0x148] sm:$0xff]  ;;  %v1300_v43 = vcombine.low %v121_v31, %v125_v32  ;;  %v111_v18 = vld [vmem:[%s1900_s3 + $0xb0] sm:$0xff] }
   0xc   :  { %v133_v40 = vld [vmem:[%s1900_s3 + $0x160] sm:$0xff]  ;;  %v134_v42 = vld [vmem:[%s1900_s3 + $0x168] sm:$0xff]  ;;  %v1302_v44 = vcombine.low %v122_v33, %v126_v34  ;;  %v108_v19 = vld [vmem:[%s1900_s3 + $0x98] sm:$0xff]  ;;  %v1280_v21 = vcombine.low %v99_v8, %v103_v9  ;;  %v1282_v22 = vcombine.low %v100_v11, %v104_v12  ;;  %v1289_v23 = vcombine.high %v107_v17, %v111_v18 }
   0xd   :  { %v1309_v45 = vcombine.high %v129_v39, %v133_v40  ;;  %v1311_v46 = vcombine.high %v130_v41, %v134_v42  ;;  %v137_v47 = vld [vmem:[%s1900_s3 + $0x180] sm:$0xff]  ;;  %v138_v49 = vld [vmem:[%s1900_s3 + $0x188] sm:$0xff]  ;;  %v1308_v51 = vcombine.low %v129_v39, %v133_v40  ;;  %v1310_v52 = vcombine.low %v130_v41, %v134_v42  ;;  %v112_v20 = vld [vmem:[%s1900_s3 + $0xb8] sm:$0xff] }
   0xe   :  { %484 = vmatpush1.bf16.msra.mxu0 %v1284_v27  ;;  %527 = vmatpush1.bf16.msra.mxu1 %v1286_v28  ;;  %v141_v48 = vld [vmem:[%s1900_s3 + $0x1a0] sm:$0xff]  ;;  %v142_v50 = vld [vmem:[%s1900_s3 + $0x1a8] sm:$0xff]  ;;  %v1291_v24 = vcombine.high %v108_v19, %v112_v20  ;;  %v115_v25 = vld [vmem:[%s1900_s3 + $0xd0] sm:$0xff] }
   0xf   :  { %485 = vmatprep.subr.bf16.mxu0 %v1293_v29  ;;  %528 = vmatprep.subr.bf16.mxu1 %v1295_v30  ;;  %v1317_v53 = vcombine.high %v137_v47, %v141_v48  ;;  %v1319_v54 = vcombine.high %v138_v49, %v142_v50  ;;  %v145_v55 = vld [vmem:[%s1900_s3 + $0x1c0] sm:$0xff]  ;;  %v146_v57 = vld [vmem:[%s1900_s3 + $0x1c8] sm:$0xff]  ;;  %v1316_v59 = vcombine.low %v137_v47, %v141_v48  ;;  %v119_v26 = vld [vmem:[%s1900_s3 + $0xf0] sm:$0xff] }
  0x10   :  { %v149_v56 = vld [vmem:[%s1900_s3 + $0x1e0] sm:$0xff]  ;;  %v150_v58 = vld [vmem:[%s1900_s3 + $0x1e8] sm:$0xff]  ;;  %v1318_v60 = vcombine.low %v138_v49, %v142_v50  ;;  %v116_v27 = vld [vmem:[%s1900_s3 + $0xd8] sm:$0xff]  ;;  %v1288_v29 = vcombine.low %v107_v17, %v111_v18  ;;  %v1290_v30 = vcombine.low %v108_v19, %v112_v20  ;;  %v1297_v31 = vcombine.high %v115_v25, %v119_v26 }
  0x11   :  { %v1325_v61 = vcombine.high %v145_v55, %v149_v56  ;;  %v1327_v62 = vcombine.high %v146_v57, %v150_v58  ;;  %v1324_v4 = vcombine.low %v145_v55, %v149_v56  ;;  %v1326_v5 = vcombine.low %v146_v57, %v150_v58  ;;  %v1582_v10 = vld [vmem:[%s1901_s1] sm:$0xff]   ;;  %v120_v28 = vld [vmem:[%s1900_s3 + $0xf8] sm:$0xff]  ;;  %v123_v33 = vld [vmem:[%s1900_s3 + $0x110] sm:$0xff] }
  0x12   :  { %486 = vmatpush1.bf16.msra.mxu0 %v1292_v35  ;;  %529 = vmatpush1.bf16.msra.mxu1 %v1294_v36  ;;  %v1299_v32 = vcombine.high %v116_v27, %v120_v28  ;;  %v127_v34 = vld [vmem:[%s1900_s3 + $0x130] sm:$0xff]  ;;  %v124_v35 = vld [vmem:[%s1900_s3 + $0x118] sm:$0xff]  ;;  %v23_v1 = vld [vmem:[%s1903_s2] sm:$0xff] }
  0x13   :  { %487 = vmatprep.subr.bf16.mxu0 %v1301_v37  ;;  %530 = vmatprep.subr.bf16.mxu1 %v1303_v38  ;;  %v128_v36 = vld [vmem:[%s1900_s3 + $0x138] sm:$0xff]  ;;  %v1296_v37 = vcombine.low %v115_v25, %v119_v26  ;;  %v1298_v38 = vcombine.low %v116_v27, %v120_v28  ;;  %v1305_v39 = vcombine.high %v123_v33, %v127_v34  ;;  %v131_v41 = vld [vmem:[%s1900_s3 + $0x150] sm:$0xff]  ;;  %v27_v2 = vld [vmem:[%s1903_s2 + $0x20] sm:$0xff] }
  0x14   :  { %v1307_v40 = vcombine.high %v124_v35, %v128_v36  ;;  %v135_v42 = vld [vmem:[%s1900_s3 + $0x170] sm:$0xff]  ;;  %v1334_v8 = vcombine.high %v23_v1, %v27_v2  ;;  %v31_v11 = vld [vmem:[%s1903_s2 + $0x40] sm:$0xff] }
  0x15   :  { %v1313_v47 = vcombine.high %v131_v41, %v135_v42  ;;  %v139_v49 = vld [vmem:[%s1900_s3 + $0x190] sm:$0xff]  ;;  %v35_v12 = vld [vmem:[%s1903_s2 + $0x60] sm:$0xff] }
  0x16   :  { %488 = vmatpush1.bf16.msra.mxu0 %v1300_v43  ;;  %531 = vmatpush1.bf16.msra.mxu1 %v1302_v44  ;;  %v132_v43 = vld [vmem:[%s1900_s3 + $0x158] sm:$0xff]  ;;  %v143_v50 = vld [vmem:[%s1900_s3 + $0x1b0] sm:$0xff]  ;;  %v1342_v17 = vcombine.high %v31_v11, %v35_v12  ;;  %v39_v19 = vld [vmem:[%s1903_s2 + $0x80] sm:$0xff] }
  0x17   :  { %489 = vmatprep.subr.bf16.mxu0 %v1309_v45  ;;  %532 = vmatprep.subr.bf16.mxu1 %v1311_v46  ;;  %v136_v44 = vld [vmem:[%s1900_s3 + $0x178] sm:$0xff]  ;;  %v1304_v45 = vcombine.low %v123_v33, %v127_v34  ;;  %v1306_v46 = vcombine.low %v124_v35, %v128_v36  ;;  %v1321_v55 = vcombine.high %v139_v49, %v143_v50  ;;  %v147_v57 = vld [vmem:[%s1900_s3 + $0x1d0] sm:$0xff]  ;;  %v43_v20 = vld [vmem:[%s1903_s2 + $0xa0] sm:$0xff] }
  0x18   :  { %v1315_v48 = vcombine.high %v132_v43, %v136_v44  ;;  %v151_v58 = vld [vmem:[%s1900_s3 + $0x1f0] sm:$0xff]  ;;  %v1350_v25 = vcombine.high %v39_v19, %v43_v20  ;;  %v47_v27 = vld [vmem:[%s1903_s2 + $0xc0] sm:$0xff]  ;;  %v56_v36 = vld [vmem:[%s1903_s2 + $0x108] sm:$0xff] }
  0x19   :  { %v1329_v63 = vcombine.high %v147_v57, %v151_v58  ;;  %v51_v28 = vld [vmem:[%s1903_s2 + $0xe0] sm:$0xff] }
  0x1a   :  { %490 = vmatpush1.bf16.msra.mxu0 %v1308_v51  ;;  %533 = vmatpush1.bf16.msra.mxu1 %v1310_v52  ;;  %v140_v51 = vld [vmem:[%s1900_s3 + $0x198] sm:$0xff]  ;;  %v55_v34 = vld [vmem:[%s1903_s2 + $0x100] sm:$0xff] }
  0x1b   :  { %491 = vmatprep.subr.bf16.mxu0 %v1317_v53  ;;  %534 = vmatprep.subr.bf16.mxu1 %v1319_v54  ;;  %v144_v52 = vld [vmem:[%s1900_s3 + $0x1b8] sm:$0xff]  ;;  %v1312_v53 = vcombine.low %v131_v41, %v135_v42  ;;  %v1314_v54 = vcombine.low %v132_v43, %v136_v44  ;;  %v59_v35 = vld [vmem:[%s1903_s2 + $0x120] sm:$0xff]  ;;  %v64_v44 = vld [vmem:[%s1903_s2 + $0x148] sm:$0xff] }
  0x1c   :  { %v1323_v56 = vcombine.high %v140_v51, %v144_v52  ;;  %v63_v42 = vld [vmem:[%s1903_s2 + $0x140] sm:$0xff] }
  0x1d   :  { %v67_v43 = vld [vmem:[%s1903_s2 + $0x160] sm:$0xff] }
  0x1e   :  { %492 = vmatpush1.bf16.msra.mxu0 %v1316_v59  ;;  %535 = vmatpush1.bf16.msra.mxu1 %v1318_v60  ;;  %v148_v59 = vld [vmem:[%s1900_s3 + $0x1d8] sm:$0xff] }
  0x1f   :  { %493 = vmatprep.subr.bf16.mxu0 %v1325_v61  ;;  %536 = vmatprep.subr.bf16.mxu1 %v1327_v62  ;;  %v152_v60 = vld [vmem:[%s1900_s3 + $0x1f8] sm:$0xff]  ;;  %v1320_v61 = vcombine.low %v139_v49, %v143_v50  ;;  %v1322_v62 = vcombine.low %v140_v51, %v144_v52  ;;  %v71_v50 = vld [vmem:[%s1903_s2 + $0x180] sm:$0xff]  ;;  %v72_v52 = vld [vmem:[%s1903_s2 + $0x188] sm:$0xff] }
  0x20   :  { %v1331_v0 = vcombine.high %v148_v59, %v152_v60  ;;  %v75_v51 = vld [vmem:[%s1903_s2 + $0x1a0] sm:$0xff] }
  0x22   :  { %494 = vmatpush1.bf16.msra.mxu0 %v1324_v4  ;;  %537 = vmatpush1.bf16.msra.mxu1 %v1326_v5  ;;  %v24_v4 = vld [vmem:[%s1903_s2 + $0x8] sm:$0xff] }
  0x23   :  { %565 = vmatprep.subr.bf16.mxu0 %v1273_v6  ;;  %608 = vmatprep.subr.bf16.mxu1 %v1275_v7  ;;  %v28_v5 = vld [vmem:[%s1903_s2 + $0x28] sm:$0xff]  ;;  %v1328_v6 = vcombine.low %v147_v57, %v151_v58  ;;  %v1330_v7 = vcombine.low %v148_v59, %v152_v60  ;;  %v79_v58 = vld [vmem:[%s1903_s2 + $0x1c0] sm:$0xff] }
  0x24   :  { %v1336_v9 = vcombine.high %v24_v4, %v28_v5  ;;  %v83_v59 = vld [vmem:[%s1903_s2 + $0x1e0] sm:$0xff]  ;;  %v80_v60 = vld [vmem:[%s1903_s2 + $0x1c8] sm:$0xff] }
  0x25   :  { %512 = vmatmul.mubr.bf16.vlgmr.msra.gmra.mrb[0].mxu0 %v1582_v10  ;;  %555 = vmatmul.mubr.bf16.vlgmr.msra.gmra.mrb[0].mxu1 %v1582_v10 }
  0x26   :  { %566 = vmatpush1.bf16.msra.mxu0 %v1272_v13  ;;  %609 = vmatpush1.bf16.msra.mxu1 %v1274_v14  ;;  %v32_v13 = vld [vmem:[%s1903_s2 + $0x48] sm:$0xff] }
  0x27   :  { %567 = vmatprep.subr.bf16.mxu0 %v1281_v15  ;;  %610 = vmatprep.subr.bf16.mxu1 %v1283_v16  ;;  %v36_v14 = vld [vmem:[%s1903_s2 + $0x68] sm:$0xff]  ;;  %v1333_v15 = vcombine.low %v23_v1, %v27_v2  ;;  %v1335_v16 = vcombine.low %v24_v4, %v28_v5  ;;  %v25_v2 = vld [vmem:[%s1903_s2 + $0x10] sm:$0xff]  ;;  %v26_v5 = vld [vmem:[%s1903_s2 + $0x18] sm:$0xff] }
  0x28   :  { %597 = vmatprep.mubr.bf16.mxu0 %v1432_v3  ;;  %640 = vmatprep.mubr.bf16.mxu1 %v1432_v3  ;;  %v1344_v18 = vcombine.high %v32_v13, %v36_v14  ;;  %v29_v4 = vld [vmem:[%s1903_s2 + $0x30] sm:$0xff] }
  0x2a   :  { %568 = vmatpush1.bf16.msra.mxu0 %v1280_v21  ;;  %611 = vmatpush1.bf16.msra.mxu1 %v1282_v22  ;;  %v40_v21 = vld [vmem:[%s1903_s2 + $0x88] sm:$0xff] }
  0x2b   :  { %569 = vmatprep.subr.bf16.mxu0 %v1289_v23  ;;  %612 = vmatprep.subr.bf16.mxu1 %v1291_v24  ;;  %v44_v22 = vld [vmem:[%s1903_s2 + $0xa8] sm:$0xff]  ;;  %v1341_v23 = vcombine.low %v31_v11, %v35_v12  ;;  %v1343_v24 = vcombine.low %v32_v13, %v36_v14  ;;  %v33_v12 = vld [vmem:[%s1903_s2 + $0x50] sm:$0xff]  ;;  %v1787_v14 = vld [vmem:[%s1902_s0] sm:$0xff]  }
  0x2c   :  { %v1352_v26 = vcombine.high %v40_v21, %v44_v22  ;;  %v37_v13 = vld [vmem:[%s1903_s2 + $0x70] sm:$0xff] }
  0x2e   :  { %570 = vmatpush1.bf16.msra.mxu0 %v1288_v29  ;;  %613 = vmatpush1.bf16.msra.mxu1 %v1290_v30  ;;  %v52_v29 = vld [vmem:[%s1903_s2 + $0xe8] sm:$0xff]  ;;  %v1349_v30 = vcombine.low %v39_v19, %v43_v20  ;;  %v1346_v19 = vcombine.high %v33_v12, %v37_v13 }
  0x2f   :  { %571 = vmatprep.subr.bf16.mxu0 %v1297_v31  ;;  %614 = vmatprep.subr.bf16.mxu1 %v1299_v32  ;;  %v1351_v31 = vcombine.low %v40_v21, %v44_v22  ;;  %v1358_v32 = vcombine.high %v47_v27, %v51_v28  ;;  %v41_v21 = vld [vmem:[%s1903_s2 + $0x90] sm:$0xff] }
  0x30   :  { %v45_v22 = vld [vmem:[%s1903_s2 + $0xb0] sm:$0xff] }
  0x32   :  { %572 = vmatpush1.bf16.msra.mxu0 %v1296_v37  ;;  %615 = vmatpush1.bf16.msra.mxu1 %v1298_v38  ;;  %v60_v37 = vld [vmem:[%s1903_s2 + $0x128] sm:$0xff]  ;;  %v1357_v38 = vcombine.low %v47_v27, %v51_v28  ;;  %v1354_v27 = vcombine.high %v41_v21, %v45_v22 }
  0x33   :  { %573 = vmatprep.subr.bf16.mxu0 %v1305_v39  ;;  %616 = vmatprep.subr.bf16.mxu1 %v1307_v40  ;;  %v1366_v40 = vcombine.high %v55_v34, %v59_v35  ;;  %v1368_v41 = vcombine.high %v56_v36, %v60_v37 }
  0x36   :  { %574 = vmatpush1.bf16.msra.mxu0 %v1304_v45  ;;  %617 = vmatpush1.bf16.msra.mxu1 %v1306_v46  ;;  %v68_v45 = vld [vmem:[%s1903_s2 + $0x168] sm:$0xff]  ;;  %v1365_v46 = vcombine.low %v55_v34, %v59_v35 }
  0x37   :  { %575 = vmatprep.subr.bf16.mxu0 %v1313_v47  ;;  %618 = vmatprep.subr.bf16.mxu1 %v1315_v48  ;;  %v1367_v47 = vcombine.low %v56_v36, %v60_v37  ;;  %v1374_v48 = vcombine.high %v63_v42, %v67_v43  ;;  %v1376_v49 = vcombine.high %v64_v44, %v68_v45  ;;  %v57_v36 = vld [vmem:[%s1903_s2 + $0x110] sm:$0xff] }
  0x38   :  { %v61_v37 = vld [vmem:[%s1903_s2 + $0x130] sm:$0xff] }
  0x3a   :  { %576 = vmatpush1.bf16.msra.mxu0 %v1312_v53  ;;  %619 = vmatpush1.bf16.msra.mxu1 %v1314_v54  ;;  %v76_v53 = vld [vmem:[%s1903_s2 + $0x1a8] sm:$0xff]  ;;  %v1373_v54 = vcombine.low %v63_v42, %v67_v43  ;;  %v65_v43 = vld [vmem:[%s1903_s2 + $0x150] sm:$0xff] }
  0x3b   :  { %577 = vmatprep.subr.bf16.mxu0 %v1321_v55  ;;  %620 = vmatprep.subr.bf16.mxu1 %v1323_v56  ;;  %v1375_v55 = vcombine.low %v64_v44, %v68_v45  ;;  %v1382_v56 = vcombine.high %v71_v50, %v75_v51  ;;  %v1384_v57 = vcombine.high %v72_v52, %v76_v53  ;;  %v69_v44 = vld [vmem:[%s1903_s2 + $0x170] sm:$0xff]  ;;  %v66_v45 = vld [vmem:[%s1903_s2 + $0x158] sm:$0xff] }
  0x3e   :  { %578 = vmatpush1.bf16.msra.mxu0 %v1320_v61  ;;  %621 = vmatpush1.bf16.msra.mxu1 %v1322_v62  ;;  %v84_v61 = vld [vmem:[%s1903_s2 + $0x1e8] sm:$0xff]  ;;  %v1381_v62 = vcombine.low %v71_v50, %v75_v51  ;;  %v73_v51 = vld [vmem:[%s1903_s2 + $0x190] sm:$0xff] }
  0x3f   :  { %579 = vmatprep.subr.bf16.mxu0 %v1329_v63  ;;  %622 = vmatprep.subr.bf16.mxu1 %v1331_v0  ;;  %v1383_v63 = vcombine.low %v72_v52, %v76_v53  ;;  %v1390_v0 = vcombine.high %v79_v58, %v83_v59  ;;  %v1392_v1 = vcombine.high %v80_v60, %v84_v61  ;;  %v77_v52 = vld [vmem:[%s1903_s2 + $0x1b0] sm:$0xff]  ;;  %v74_v53 = vld [vmem:[%s1903_s2 + $0x198] sm:$0xff] }
  0x42   :  { %580 = vmatpush1.bf16.msra.mxu0 %v1328_v6  ;;  %623 = vmatpush1.bf16.msra.mxu1 %v1330_v7  ;;  %v30_v6 = vld [vmem:[%s1903_s2 + $0x38] sm:$0xff]  ;;  %v1389_v7 = vcombine.low %v79_v58, %v83_v59  ;;  %v81_v59 = vld [vmem:[%s1903_s2 + $0x1d0] sm:$0xff] }
  0x43   :  { %977 = vmatprep.subr.bf16.mxu0 %v1334_v8  ;;  %1020 = vmatprep.subr.bf16.mxu1 %v1336_v9  ;;  %v1391_v8 = vcombine.low %v80_v60, %v84_v61  ;;  %v1338_v9 = vcombine.high %v25_v2, %v29_v4  ;;  %v1340_v11 = vcombine.high %v26_v5, %v30_v6  ;;  %v85_v60 = vld [vmem:[%s1903_s2 + $0x1f0] sm:$0xff]  ;;  %v82_v61 = vld [vmem:[%s1903_s2 + $0x1d8] sm:$0xff] }
  0x45   :  { %598 = vmatmul.mubr.bf16.vlgmr.msra.gmra.mrb[4].mxu0 %v1582_v10  ;;  %641 = vmatmul.mubr.bf16.vlgmr.msra.gmra.mrb[4].mxu1 %v1582_v10  ;;  %v48_v10 = vld [vmem:[%s1903_s2 + $0xc8] sm:$0xff] }
  0x46   :  { %978 = vmatpush1.bf16.msra.mxu0 %v1333_v15  ;;  %1021 = vmatpush1.bf16.msra.mxu1 %v1335_v16  ;;  %v1360_v33 = vcombine.high %v48_v10, %v52_v29  ;;  %v1359_v39 = vcombine.low %v48_v10, %v52_v29  ;;  %v34_v15 = vld [vmem:[%s1903_s2 + $0x58] sm:$0xff]  ;;  %v49_v10 = vld [vmem:[%s1903_s2 + $0xd0] sm:$0xff] }
  0x47   :  { %979 = vmatprep.subr.bf16.mxu0 %v1342_v17  ;;  %1022 = vmatprep.subr.bf16.mxu1 %v1344_v18  ;;  %v38_v16 = vld [vmem:[%s1903_s2 + $0x78] sm:$0xff]  ;;  %v1337_v17 = vcombine.low %v25_v2, %v29_v4  ;;  %v1339_v18 = vcombine.low %v26_v5, %v30_v6  ;;  %v53_v29 = vld [vmem:[%s1903_s2 + $0xf0] sm:$0xff]  ;;  %v1393_v4 = vcombine.low %v81_v59, %v85_v60  ;;  %v1151_v6 = vlaneseq }
  0x48   :  { %1009 = vmatprep.mubr.bf16.mxu0 %v1432_v3  ;;  %1052 = vmatprep.mubr.bf16.mxu1 %v1432_v3  ;;  %v1348_v20 = vcombine.high %v34_v15, %v38_v16  ;;  %v1362_v34 = vcombine.high %v49_v10, %v53_v29 }
  0x4a   :  { %980 = vmatpush1.bf16.msra.mxu0 %v1341_v23  ;;  %1023 = vmatpush1.bf16.msra.mxu1 %v1343_v24  ;;  %v42_v23 = vld [vmem:[%s1903_s2 + $0x98] sm:$0xff] }
  0x4b   :  { %981 = vmatprep.subr.bf16.mxu0 %v1350_v25  ;;  %1024 = vmatprep.subr.bf16.mxu1 %v1352_v26  ;;  %v46_v24 = vld [vmem:[%s1903_s2 + $0xb8] sm:$0xff]  ;;  %v1345_v25 = vcombine.low %v33_v12, %v37_v13  ;;  %v1347_v26 = vcombine.low %v34_v15, %v38_v16 }
  0x4c   :  { %v1356_v28 = vcombine.high %v42_v23, %v46_v24 }
  0x4e   :  { %982 = vmatpush1.bf16.msra.mxu0 %v1349_v30  ;;  %1025 = vmatpush1.bf16.msra.mxu1 %v1351_v31  ;;  %v50_v30 = vld [vmem:[%s1903_s2 + $0xd8] sm:$0xff] }
  0x4f   :  { %983 = vmatprep.subr.bf16.mxu0 %v1358_v32  ;;  %1026 = vmatprep.subr.bf16.mxu1 %v1360_v33  ;;  %v54_v31 = vld [vmem:[%s1903_s2 + $0xf8] sm:$0xff]  ;;  %v1353_v32 = vcombine.low %v41_v21, %v45_v22  ;;  %v1355_v33 = vcombine.low %v42_v23, %v46_v24 }
  0x50   :  { %v1364_v35 = vcombine.high %v50_v30, %v54_v31 }
  0x52   :  { %984 = vmatpush1.bf16.msra.mxu0 %v1357_v38  ;;  %1027 = vmatpush1.bf16.msra.mxu1 %v1359_v39  ;;  %v62_v38 = vld [vmem:[%s1903_s2 + $0x138] sm:$0xff]  ;;  %v1361_v39 = vcombine.low %v49_v10, %v53_v29 }
  0x53   :  { %985 = vmatprep.subr.bf16.mxu0 %v1366_v40  ;;  %1028 = vmatprep.subr.bf16.mxu1 %v1368_v41  ;;  %v1363_v40 = vcombine.low %v50_v30, %v54_v31  ;;  %v1370_v41 = vcombine.high %v57_v36, %v61_v37 }
  0x56   :  { %986 = vmatpush1.bf16.msra.mxu0 %v1365_v46  ;;  %1029 = vmatpush1.bf16.msra.mxu1 %v1367_v47  ;;  %v70_v46 = vld [vmem:[%s1903_s2 + $0x178] sm:$0xff]  ;;  %v1369_v47 = vcombine.low %v57_v36, %v61_v37 }
  0x57   :  { %987 = vmatprep.subr.bf16.mxu0 %v1374_v48  ;;  %1030 = vmatprep.subr.bf16.mxu1 %v1376_v49  ;;  %v1378_v49 = vcombine.high %v65_v43, %v69_v44  ;;  %v1380_v50 = vcombine.high %v66_v45, %v70_v46 }
  0x5a   :  { %988 = vmatpush1.bf16.msra.mxu0 %v1373_v54  ;;  %1031 = vmatpush1.bf16.msra.mxu1 %v1375_v55  ;;  %v78_v54 = vld [vmem:[%s1903_s2 + $0x1b8] sm:$0xff]  ;;  %v1377_v55 = vcombine.low %v65_v43, %v69_v44 }
  0x5b   :  { %989 = vmatprep.subr.bf16.mxu0 %v1382_v56  ;;  %1032 = vmatprep.subr.bf16.mxu1 %v1384_v57  ;;  %v1379_v56 = vcombine.low %v66_v45, %v70_v46  ;;  %v1386_v57 = vcombine.high %v73_v51, %v77_v52  ;;  %v1388_v58 = vcombine.high %v74_v53, %v78_v54 }
  0x5e   :  { %990 = vmatpush1.bf16.msra.mxu0 %v1381_v62  ;;  %1033 = vmatpush1.bf16.msra.mxu1 %v1383_v63  ;;  %v86_v62 = vld [vmem:[%s1903_s2 + $0x1f8] sm:$0xff]  ;;  %v1385_v63 = vcombine.low %v73_v51, %v77_v52 }
  0x5f   :  { %991 = vmatprep.subr.bf16.mxu0 %v1390_v0  ;;  %1034 = vmatprep.subr.bf16.mxu1 %v1392_v1  ;;  %v1387_v0 = vcombine.low %v74_v53, %v78_v54  ;;  %v1394_v1 = vcombine.high %v81_v59, %v85_v60  ;;  %v1396_v2 = vcombine.high %v82_v61, %v86_v62 }
  0x60   :  { %v1395_v5 = vcombine.low %v82_v61, %v86_v62 }
  0x62   :  { %992 = vmatpush1.bf16.msra.mxu0 %v1389_v7  ;;  %1035 = vmatpush1.bf16.msra.mxu1 %v1391_v8  ;;  %v1152_v7 = vshrl.u32 %v1151_v6, 7 }
  0x63   :  { %1063 = vmatprep.subr.bf16.mxu0 %v1338_v9  ;;  %1106 = vmatprep.subr.bf16.mxu1 %v1340_v11  ;;  %v1149_v9 = vld [vmem:[%s1904_s4] sm:$0xff] }
  0x64   :  { %v1153_v8 = vsub.s32 0, %v1152_v7  ;;  %v1161_v11 = vsub.s32 2, %v1152_v7  ;;  %v1157_v12 = vsub.s32 1, %v1152_v7  ;;  %v1165_v13 = vsub.s32 3, %v1152_v7 }
  0x65   :  { %1010 = vmatmul.mubr.bf16.vlgmr.msra.gmra.mrb[0].mxu0 %v1787_v14  ;;  %1053 = vmatmul.mubr.bf16.vlgmr.msra.gmra.mrb[0].mxu1 %v1787_v14  ;;  %v1169_v37 = vsub.s32 4, %v1152_v7 }
  0x66   :  { %1064 = vmatpush1.bf16.msra.mxu0 %v1337_v17  ;;  %1107 = vmatpush1.bf16.msra.mxu1 %v1339_v18  ;;  %v1154_v15 = vrot.slane %v1149_v9, %v1153_v8  ;;  %v1162_v16 = vrot.slane %v1149_v9, %v1161_v11  ;;  %v1158_v17 = vrot.slane %v1149_v9, %v1157_v12 }
  0x67   :  { %1065 = vmatprep.subr.bf16.mxu0 %v1346_v19  ;;  %1108 = vmatprep.subr.bf16.mxu1 %v1348_v20  ;;  %v1166_v18 = vrot.slane %v1149_v9, %v1165_v13 }
  0x68   :  { %1095 = vmatprep.mubr.bf16.mxu0 %v1432_v3  ;;  %1138 = vmatprep.mubr.bf16.mxu1 %v1432_v3  ;;  %v58_v3 = vld [vmem:[%s1903_s2 + $0x118] sm:$0xff] }
  0x69   :  { %v1372_v42 = vcombine.high %v58_v3, %v62_v38  ;;  %v1371_v48 = vcombine.low %v58_v3, %v62_v38  ;;  %v1177_v3 = vsub.s32 6, %v1152_v7  ;;  %v1173_v38 = vsub.s32 5, %v1152_v7 }
  0x6a   :  { %1066 = vmatpush1.bf16.msra.mxu0 %v1345_v25  ;;  %1109 = vmatpush1.bf16.msra.mxu1 %v1347_v26 }
  0x6b   :  { %1067 = vmatprep.subr.bf16.mxu0 %v1354_v27  ;;  %1110 = vmatprep.subr.bf16.mxu1 %v1356_v28 }
  0x6e   :  { %1068 = vmatpush1.bf16.msra.mxu0 %v1353_v32  ;;  %1111 = vmatpush1.bf16.msra.mxu1 %v1355_v33 }
  0x6f   :  { %1069 = vmatprep.subr.bf16.mxu0 %v1362_v34  ;;  %1112 = vmatprep.subr.bf16.mxu1 %v1364_v35 }
  0x72   :  { %1070 = vmatpush1.bf16.msra.mxu0 %v1361_v39  ;;  %1113 = vmatpush1.bf16.msra.mxu1 %v1363_v40  ;;  %v1181_v39 = vsub.s32 7, %v1152_v7  ;;  %v1170_v40 = vrot.slane %v1149_v9, %v1169_v37 }
  0x73   :  { %1071 = vmatprep.subr.bf16.mxu0 %v1370_v41  ;;  %1114 = vmatprep.subr.bf16.mxu1 %v1372_v42  ;;  %v1178_v41 = vrot.slane %v1149_v9, %v1177_v3  ;;  %v1174_v42 = vrot.slane %v1149_v9, %v1173_v38 }
  0x74   :  { %v1182_v43 = vrot.slane %v1149_v9, %v1181_v39 }
  0x76   :  { %1072 = vmatpush1.bf16.msra.mxu0 %v1369_v47  ;;  %1115 = vmatpush1.bf16.msra.mxu1 %v1371_v48 }
  0x77   :  { %1073 = vmatprep.subr.bf16.mxu0 %v1378_v49  ;;  %1116 = vmatprep.subr.bf16.mxu1 %v1380_v50 }
  0x7a   :  { %1074 = vmatpush1.bf16.msra.mxu0 %v1377_v55  ;;  %1117 = vmatpush1.bf16.msra.mxu1 %v1379_v56 }
  0x7b   :  { %1075 = vmatprep.subr.bf16.mxu0 %v1386_v57  ;;  %1118 = vmatprep.subr.bf16.mxu1 %v1388_v58 }
  0x7e   :  { %1076 = vmatpush1.bf16.msra.mxu0 %v1385_v63  ;;  %1119 = vmatpush1.bf16.msra.mxu1 %v1387_v0 }
  0x7f   :  { %1077 = vmatprep.subr.bf16.mxu0 %v1394_v1  ;;  %1120 = vmatprep.subr.bf16.mxu1 %v1396_v2 }
  0x82   :  { %1078 = vmatpush1.bf16.msra.mxu0 %v1393_v4  ;;  %1121 = vmatpush1.bf16.msra.mxu1 %v1395_v5 }
  0x85   :  { %1096 = vmatmul.mubr.bf16.vlgmr.msra.gmra.mrb[4].mxu0 %v1787_v14  ;;  %1139 = vmatmul.mubr.bf16.vlgmr.msra.gmra.mrb[4].mxu1 %v1787_v14 }
 0x138   :  { %v1011_v19 = vpop.f32.mrb[0].mxu0  ;;  %v1054_v21 = vpop.f32.mrb[0].mxu1 }
 0x139   :  { %v1191_v20 = vadd.f32 %v1154_v15, %v1011_v19  ;;  %v1013_v22 = vpop.f32.mrb[1].mxu0  ;;  %v1193_v23 = vadd.f32 %v1162_v16, %v1054_v21  ;;  %v1056_v24 = vpop.f32.mrb[1].mxu1 }
 0x13a   :  { %v1192_v14 = vadd.f32 %v1158_v17, %v1013_v22  ;;  %v1015_v25 = vpop.f32.mrb[2].mxu0  ;;  %v1194_v26 = vadd.f32 %v1166_v18, %v1056_v24  ;;  %v1058_v28 = vpop.f32.mrb[2].mxu1 }
 0x13b   :  { %v1199_v27 = vadd.f32 %v1154_v15, %v1015_v25  ;;  %v1017_v10 = vpop.f32.mrb[3].mxu0  ;;  %v1201_v30 = vadd.f32 %v1162_v16, %v1058_v28  ;;  %v1060_v32 = vpop.f32.mrb[3].mxu1 }
 0x13c   :  { %v1405_v29 = vpack.c.bf16 %v1192_v14, %v1191_v20  ;;  %v1200_v31 = vadd.f32 %v1158_v17, %v1017_v10  ;;  %v1406_v33 = vpack.c.bf16 %v1194_v26, %v1193_v23  ;;  %v1202_v34 = vadd.f32 %v1166_v18, %v1060_v32 }
 0x13e   :  { %1255 = vst [vmem:[%s1905_s5] sm:$0xff] %v1405_v29  ;;  %v1409_v35 = vpack.c.bf16 %v1200_v31, %v1199_v27  ;;  %1256 = vst [vmem:[%s1905_s5 + $0x8] sm:$0xff] %v1406_v33  ;;  %v1410_v36 = vpack.c.bf16 %v1202_v34, %v1201_v30 }
 0x140   :  { %1259 = vst [vmem:[%s1905_s5 + $0x20] sm:$0xff] %v1409_v35  ;;  %1260 = vst [vmem:[%s1905_s5 + $0x28] sm:$0xff] %v1410_v36 }
 0x158   :  { %v1097_v44 = vpop.f32.mrb[4].mxu0  ;;  %v1140_v46 = vpop.f32.mrb[4].mxu1 }
 0x159   :  { %v1195_v45 = vadd.f32 %v1170_v40, %v1097_v44  ;;  %v1099_v47 = vpop.f32.mrb[5].mxu0  ;;  %v1197_v48 = vadd.f32 %v1178_v41, %v1140_v46  ;;  %v1142_v50 = vpop.f32.mrb[5].mxu1 }
 0x15a   :  { %v1196_v49 = vadd.f32 %v1174_v42, %v1099_v47  ;;  %v1101_v51 = vpop.f32.mrb[6].mxu0  ;;  %v1198_v52 = vadd.f32 %v1182_v43, %v1142_v50  ;;  %v1144_v54 = vpop.f32.mrb[6].mxu1 }
 0x15b   :  { %v1203_v53 = vadd.f32 %v1170_v40, %v1101_v51  ;;  %v1103_v55 = vpop.f32.mrb[7].mxu0  ;;  %v1205_v57 = vadd.f32 %v1178_v41, %v1144_v54  ;;  %v1146_v59 = vpop.f32.mrb[7].mxu1 }
 0x15c   :  { %v1407_v56 = vpack.c.bf16 %v1196_v49, %v1195_v45  ;;  %v1204_v58 = vadd.f32 %v1174_v42, %v1103_v55  ;;  %v1408_v60 = vpack.c.bf16 %v1198_v52, %v1197_v48  ;;  %v1206_v61 = vadd.f32 %v1182_v43, %v1146_v59 }
 0x15e   :  { %1257 = vst [vmem:[%s1905_s5 + $0x10] sm:$0xff] %v1407_v56  ;;  %v1411_v62 = vpack.c.bf16 %v1204_v58, %v1203_v53  ;;  %1258 = vst [vmem:[%s1905_s5 + $0x18] sm:$0xff] %v1408_v60  ;;  %v1412_v63 = vpack.c.bf16 %v1206_v61, %v1205_v57 }
 0x160   :  { %1261 = vst [vmem:[%s1905_s5 + $0x30] sm:$0xff] %v1411_v62  ;;  %1262 = vst [vmem:[%s1905_s5 + $0x38] sm:$0xff] %v1412_v63 }

// kernel: forward.17
= control target key start
LH: loop header
LB: loop body
LE: loop exit
PB: predicated region body
PF: predicated region fallthrough
CT: control target
= control target key end

     0   :  { %v387_v0 = vmov 0.0   ;;  %vm388_vm0 = vmmov 0   ;;  %s482_s3 = inlined_call_operand.vmem [shape: bf16[128,128], index: 3, kind: input, shape index: {}]   ;;  %s483_s2 = inlined_call_operand.vmem [shape: bf16[128,128], index: 2, kind: input, shape index: {}]   ;;  %s484_s1 = inlined_call_operand.vmem [shape: bf16[16,128], index: 1, kind: input, shape index: {}]   ;;  %s485_s0 = inlined_call_operand.vmem [shape: bf16[16,128], index: 0, kind: input, shape index: {}]   ;;  %s486_s4 = inlined_call_operand.vmem [shape: f32[1,128], index: 4, kind: input, shape index: {}]   ;;  %s487_s5 = inlined_call_operand.vmem [shape: f32[16,128], index: 5, kind: output, shape index: {}]  }
   0x1   :  { %319 = vmatprep.subr.bf16.mxu0 %v387_v0  ;;  %339 = vmatprep.subr.bf16.mxu1 %v387_v0  ;;  %v361_v1 = vld [vmem:[%s482_s3] sm:$0xff]   ;;  %v363_v3 = vld [vmem:[%s482_s3 + $0x8] sm:$0xff]   ;;  %v365_v5 = vld [vmem:[%s482_s3 + $0x10] sm:$0xff]  }
   0x2   :  { %v362_v2 = vld [vmem:[%s483_s2] sm:$0xff]   ;;  %335 = vmatprep.mubr.msk.bf16.mxu0 %vm388_vm0, %v387_v0  ;;  %355 = vmatprep.mubr.msk.bf16.mxu1 %vm388_vm0, %v387_v0  ;;  %v364_v4 = vld [vmem:[%s483_s2 + $0x8] sm:$0xff]   ;;  %v366_v6 = vld [vmem:[%s483_s2 + $0x10] sm:$0xff]  }
   0x3   :  { %320 = vmatpush3.bf16.msra.mxu0 %v361_v1  ;;  %340 = vmatpush3.bf16.msra.mxu1 %v362_v2  ;;  %v367_v7 = vld [vmem:[%s482_s3 + $0x18] sm:$0xff]   ;;  %v369_v9 = vld [vmem:[%s482_s3 + $0x20] sm:$0xff]   ;;  %v371_v11 = vld [vmem:[%s482_s3 + $0x28] sm:$0xff]  }
   0x4   :  { %321 = vmatprep.subr.bf16.mxu0 %v387_v0  ;;  %341 = vmatprep.subr.bf16.mxu1 %v387_v0  ;;  %v368_v8 = vld [vmem:[%s483_s2 + $0x18] sm:$0xff]   ;;  %v370_v10 = vld [vmem:[%s483_s2 + $0x20] sm:$0xff]   ;;  %v372_v12 = vld [vmem:[%s483_s2 + $0x28] sm:$0xff]  }
   0x5   :  { %v373_v13 = vld [vmem:[%s482_s3 + $0x30] sm:$0xff]   ;;  %v375_v15 = vld [vmem:[%s482_s3 + $0x38] sm:$0xff]   ;;  %v377_v17 = vld [vmem:[%s484_s1] sm:$0xff]  }
   0x6   :  { %v374_v14 = vld [vmem:[%s483_s2 + $0x30] sm:$0xff]   ;;  %v376_v16 = vld [vmem:[%s483_s2 + $0x38] sm:$0xff]   ;;  %v378_v18 = vld [vmem:[%s485_s0] sm:$0xff]  }
   0x7   :  { %322 = vmatpush3.bf16.msra.mxu0 %v363_v3  ;;  %342 = vmatpush3.bf16.msra.mxu1 %v364_v4  ;;  %v300_v22 = vld [vmem:[%s486_s4] ss:$0 sm:$0xff] }
   0x8   :  { %323 = vmatprep.subr.bf16.mxu0 %v387_v0  ;;  %343 = vmatprep.subr.bf16.mxu1 %v387_v0 }
   0xb   :  { %324 = vmatpush3.bf16.msra.mxu0 %v365_v5  ;;  %344 = vmatpush3.bf16.msra.mxu1 %v366_v6 }
   0xc   :  { %325 = vmatprep.subr.bf16.mxu0 %v387_v0  ;;  %345 = vmatprep.subr.bf16.mxu1 %v387_v0 }
   0xf   :  { %326 = vmatpush3.bf16.msra.mxu0 %v367_v7  ;;  %346 = vmatpush3.bf16.msra.mxu1 %v368_v8 }
  0x10   :  { %327 = vmatprep.subr.bf16.mxu0 %v387_v0  ;;  %347 = vmatprep.subr.bf16.mxu1 %v387_v0 }
  0x13   :  { %328 = vmatpush3.bf16.msra.mxu0 %v369_v9  ;;  %348 = vmatpush3.bf16.msra.mxu1 %v370_v10 }
  0x14   :  { %329 = vmatprep.subr.bf16.mxu0 %v387_v0  ;;  %349 = vmatprep.subr.bf16.mxu1 %v387_v0 }
  0x17   :  { %330 = vmatpush3.bf16.msra.mxu0 %v371_v11  ;;  %350 = vmatpush3.bf16.msra.mxu1 %v372_v12 }
  0x18   :  { %331 = vmatprep.subr.bf16.mxu0 %v387_v0  ;;  %351 = vmatprep.subr.bf16.mxu1 %v387_v0 }
  0x1b   :  { %332 = vmatpush3.bf16.msra.mxu0 %v373_v13  ;;  %352 = vmatpush3.bf16.msra.mxu1 %v374_v14 }
  0x1c   :  { %333 = vmatprep.subr.bf16.mxu0 %v387_v0  ;;  %353 = vmatprep.subr.bf16.mxu1 %v387_v0 }
  0x1f   :  { %334 = vmatpush3.bf16.msra.mxu0 %v375_v15  ;;  %354 = vmatpush3.bf16.msra.mxu1 %v376_v16 }
  0x22   :  { %336 = vmatmul.mubr.bf16.vlgmr.msra.gmra.mrb[0].mxu0 %v377_v17  ;;  %356 = vmatmul.mubr.bf16.vlgmr.msra.gmra.mrb[0].mxu1 %v378_v18 }
  0xf5   :  { %v145_v19 = vpop.f32.mrb[0].mxu0  ;;  %v240_v20 = vpop.f32.mrb[0].mxu1 }
  0xf6   :  { %v337_v21 = vpop.f32.mrb[1].mxu0  ;;  %v241_v23 = vadd.f32 %v240_v20, %v145_v19  ;;  %v357_v24 = vpop.f32.mrb[1].mxu1 }
  0xf7   :  { %v148_v25 = vpop.f32.mrb[2].mxu0  ;;  %v243_v26 = vpop.f32.mrb[2].mxu1 }
  0xf8   :  { %v338_v27 = vpop.f32.mrb[3].mxu0  ;;  %v244_v28 = vadd.f32 %v243_v26, %v148_v25  ;;  %v358_v29 = vpop.f32.mrb[3].mxu1  ;;  %v254_v30 = vadd.f32 %v300_v22, %v241_v23 }
  0xfa   :  { %256 = vmax.xlane.f32.xlu0 %v254_v30  ;;  %v255_v31 = vadd.f32 %v300_v22, %v244_v28 }
  0xfe   :  { %258 = vmax.xlane.f32.xlu0 %v255_v31 }
 0x187   :  { %v257_v32 = vpop.xlane.xlu0 %256 }
 0x188   :  { %v260_v33 = vsub.f32 %v254_v30, %v257_v32 }
 0x18a   :  { %v262_v34 = vmul.f32 1.442695, %v260_v33 }
 0x18b   :  { %v259_v35 = vpop.xlane.xlu0 %258 }
 0x18c   :  { %v261_v36 = vsub.f32 %v255_v31, %v259_v35  ;;  %379 = vpow2.f32 %v262_v34 }
 0x18e   :  { %v264_v37 = vmul.f32 1.442695, %v261_v36 }
 0x190   :  { %381 = vpow2.f32 %v264_v37 }
 0x196   :  { %v380_v38 = vpop.eup %379 }
 0x197   :  { %266 = vadd.xlane.f32.xlu1 %v380_v38 }
 0x19a   :  { %v382_v39 = vpop.eup %381 }
 0x19b   :  { %268 = vadd.xlane.f32.xlu1 %v382_v39 }
 0x224   :  { %v267_v40 = vpop.xlane.xlu1 %266 }
 0x225   :  { %383 = vlog2.f32 %v267_v40 }
 0x228   :  { %v269_v41 = vpop.xlane.xlu1 %268 }
 0x229   :  { %385 = vlog2.f32 %v269_v41 }
 0x22f   :  { %v384_v42 = vpop.eup %383 }
 0x230   :  { %v271_v43 = vmul.f32 0.6931472, %v384_v42 }
 0x232   :  { %v274_v44 = vsub.f32 %v260_v33, %v271_v43 }
 0x233   :  { %v386_v45 = vpop.eup %385 }
 0x234   :  { %276 = vst [vmem:[%s487_s5] sm:$0xff] %v274_v44  ;;  %v273_v46 = vmul.f32 0.6931472, %v386_v45 }
 0x236   :  { %v275_v47 = vsub.f32 %v261_v36, %v273_v46 }
 0x238   :  { %277 = vst [vmem:[%s487_s5 + $0x8] sm:$0xff] %v275_v47 }

// kernel: forward.14
= control target key start
LH: loop header
LB: loop body
LE: loop exit
PB: predicated region body
PF: predicated region fallthrough
CT: control target
= control target key end

     0   :  { %v8781_v2 = vmov 0   ;;  %v6789_v3 = vmov 0.0   ;;  %s8775_s0 = inlined_call_operand.vmem [shape: bf16[8,2,1024], index: 0, kind: input, shape index: {}, may-alias: {0,1}]   ;;  %s8776_s1 = inlined_call_operand.vmem [shape: bf16[8,2,1024], index: 1, kind: input, shape index: {}, may-alias: {0,1}]   ;;  %s8777_s2 = inlined_call_operand.vmem [shape: bf16[2,128,512], index: 2, kind: input, shape index: {}, may-alias: {2,3}]   ;;  %s8778_s3 = inlined_call_operand.vmem [shape: bf16[2,128,512], index: 3, kind: input, shape index: {}, may-alias: {2,3}]   ;;  %s8779_s4 = inlined_call_operand.vmem [shape: bf16[8,2,128], index: 4, kind: output, shape index: {0}]   ;;  %s8780_s5 = inlined_call_operand.vmem [shape: bf16[8,2,128], index: 5, kind: output, shape index: {1}]  }
   0x1   :  { %v6824_v0 = vld [vmem:[%s8777_s2 + $0x4] ss:$16 sps:$4 sm:$0xff]   ;;  %v6829_v1 = vld [vmem:[%s8777_s2 + $0xc] ss:$16 sps:$4 sm:$0xff]   ;;  %416 = vmatprep.mubr.bf16.mxu0 %v8781_v2  ;;  %457 = vmatprep.mubr.bf16.mxu1 %v8781_v2  ;;  %184 = vst [vmem:[#allocation2] sm:$0x3] %v6789_v3 }
   0x2   :  { %185 = vst [vmem:[#allocation3] sm:$0x3] %v6789_v3  ;;  %186 = vst [vmem:[#allocation4] sm:$0x3] %v6789_v3  ;;  %384 = vmatprep.subr.bf16.mxu0 %v6824_v0  ;;  %v6837_v4 = vld [vmem:[%s8777_s2] ss:$16 sps:$4 sm:$0xff]   ;;  %425 = vmatprep.subr.bf16.mxu1 %v6829_v1 }
   0x3   :  { %187 = vst [vmem:[#allocation5] sm:$0x3] %v6789_v3  ;;  %v6842_v5 = vld [vmem:[%s8777_s2 + $0x8] ss:$16 sps:$4 sm:$0xff]   ;;  %v6848_v6 = vld [vmem:[%s8777_s2 + $0x24] ss:$16 sps:$4 sm:$0xff]   ;;  %385 = vmatpush1.bf16.msra.mxu0 %v6837_v4 }
   0x4   :  { %426 = vmatpush1.bf16.msra.mxu1 %v6842_v5  ;;  %v6855_v7 = vld [vmem:[%s8777_s2 + $0x2c] ss:$16 sps:$4 sm:$0xff]   ;;  %v6860_v8 = vld [vmem:[%s8777_s2 + $0x20] ss:$16 sps:$4 sm:$0xff]   ;;  %386 = vmatprep.subr.bf16.mxu0 %v6848_v6  ;;  %v6866_v9 = vld [vmem:[%s8777_s2 + $0x28] ss:$16 sps:$4 sm:$0xff]  }
   0x5   :  { %427 = vmatprep.subr.bf16.mxu1 %v6855_v7  ;;  %v6872_v10 = vld [vmem:[%s8777_s2 + $0x44] ss:$16 sps:$4 sm:$0xff]   ;;  %v6877_v11 = vld [vmem:[%s8777_s2 + $0x4c] ss:$16 sps:$4 sm:$0xff]   ;;  %v6882_v12 = vld [vmem:[%s8777_s2 + $0x40] ss:$16 sps:$4 sm:$0xff]  }
   0x6   :  { %v6887_v13 = vld [vmem:[%s8777_s2 + $0x48] ss:$16 sps:$4 sm:$0xff]   ;;  %v6894_v14 = vld [vmem:[%s8777_s2 + $0x64] ss:$16 sps:$4 sm:$0xff]   ;;  %v6901_v15 = vld [vmem:[%s8777_s2 + $0x6c] ss:$16 sps:$4 sm:$0xff]  }
   0x7   :  { %387 = vmatpush1.bf16.msra.mxu0 %v6860_v8  ;;  %v6906_v16 = vld [vmem:[%s8777_s2 + $0x60] ss:$16 sps:$4 sm:$0xff]   ;;  %v6913_v17 = vld [vmem:[%s8777_s2 + $0x68] ss:$16 sps:$4 sm:$0xff]   ;;  %v6918_v18 = vld [vmem:[%s8777_s2 + $0x84] ss:$16 sps:$4 sm:$0xff]  }
   0x8   :  { %428 = vmatpush1.bf16.msra.mxu1 %v6866_v9  ;;  %388 = vmatprep.subr.bf16.mxu0 %v6872_v10  ;;  %v6925_v19 = vld [vmem:[%s8777_s2 + $0x8c] ss:$16 sps:$4 sm:$0xff]   ;;  %v6930_v20 = vld [vmem:[%s8777_s2 + $0x80] ss:$16 sps:$4 sm:$0xff]   ;;  %v6935_v21 = vld [vmem:[%s8777_s2 + $0x88] ss:$16 sps:$4 sm:$0xff]  }
   0x9   :  { %429 = vmatprep.subr.bf16.mxu1 %v6877_v11  ;;  %v6942_v22 = vld [vmem:[%s8777_s2 + $0xa4] ss:$16 sps:$4 sm:$0xff]   ;;  %v6949_v23 = vld [vmem:[%s8777_s2 + $0xac] ss:$16 sps:$4 sm:$0xff]   ;;  %v6956_v24 = vld [vmem:[%s8777_s2 + $0xa0] ss:$16 sps:$4 sm:$0xff]  }
   0xa   :  { %v6961_v25 = vld [vmem:[%s8777_s2 + $0xa8] ss:$16 sps:$4 sm:$0xff]   ;;  %v6968_v26 = vld [vmem:[%s8777_s2 + $0xc4] ss:$16 sps:$4 sm:$0xff]   ;;  %v6973_v27 = vld [vmem:[%s8777_s2 + $0xcc] ss:$16 sps:$4 sm:$0xff]  }
   0xb   :  { %389 = vmatpush1.bf16.msra.mxu0 %v6882_v12  ;;  %v6978_v28 = vld [vmem:[%s8777_s2 + $0xc0] ss:$16 sps:$4 sm:$0xff]   ;;  %v6985_v29 = vld [vmem:[%s8777_s2 + $0xc8] ss:$16 sps:$4 sm:$0xff]   ;;  %v6992_v30 = vld [vmem:[%s8777_s2 + $0xe4] ss:$16 sps:$4 sm:$0xff]  }
   0xc   :  { %430 = vmatpush1.bf16.msra.mxu1 %v6887_v13  ;;  %390 = vmatprep.subr.bf16.mxu0 %v6894_v14  ;;  %v6997_v31 = vld [vmem:[%s8777_s2 + $0xec] ss:$16 sps:$4 sm:$0xff]   ;;  %v7002_v32 = vld [vmem:[%s8777_s2 + $0xe0] ss:$16 sps:$4 sm:$0xff]   ;;  %v7007_v33 = vld [vmem:[%s8777_s2 + $0xe8] ss:$16 sps:$4 sm:$0xff]  }
   0xd   :  { %431 = vmatprep.subr.bf16.mxu1 %v6901_v15  ;;  %v190_v34 = vld [vmem:[#allocation2] sm:$0x3]  ;;  %v7016_v35 = vld [vmem:[%s8778_s3 + $0x104] ss:$16 sps:$4 sm:$0xff]   ;;  %v7021_v36 = vld [vmem:[%s8778_s3 + $0x10c] ss:$16 sps:$4 sm:$0xff]  }
   0xe   :  { %v191_v37 = vpack.c.bf16 %v190_v34, %v190_v34  ;;  %v7026_v38 = vld [vmem:[%s8778_s3 + $0x100] ss:$16 sps:$4 sm:$0xff]   ;;  %v7033_v39 = vld [vmem:[%s8778_s3 + $0x108] ss:$16 sps:$4 sm:$0xff]   ;;  %v7040_v40 = vld [vmem:[%s8778_s3 + $0x124] ss:$16 sps:$4 sm:$0xff]  }
   0xf   :  { %391 = vmatpush1.bf16.msra.mxu0 %v6906_v16  ;;  %v7045_v41 = vld [vmem:[%s8778_s3 + $0x12c] ss:$16 sps:$4 sm:$0xff]   ;;  %v7050_v42 = vld [vmem:[%s8778_s3 + $0x120] ss:$16 sps:$4 sm:$0xff]   ;;  %v7057_v43 = vld [vmem:[%s8778_s3 + $0x128] ss:$16 sps:$4 sm:$0xff]  }
  0x10   :  { %432 = vmatpush1.bf16.msra.mxu1 %v6913_v17  ;;  %392 = vmatprep.subr.bf16.mxu0 %v6918_v18  ;;  %v7064_v44 = vld [vmem:[%s8778_s3 + $0x144] ss:$16 sps:$4 sm:$0xff]   ;;  %v7069_v45 = vld [vmem:[%s8778_s3 + $0x14c] ss:$16 sps:$4 sm:$0xff]   ;;  %v7076_v46 = vld [vmem:[%s8778_s3 + $0x140] ss:$16 sps:$4 sm:$0xff]  }
  0x11   :  { %433 = vmatprep.subr.bf16.mxu1 %v6925_v19  ;;  %v7083_v47 = vld [vmem:[%s8778_s3 + $0x148] ss:$16 sps:$4 sm:$0xff]   ;;  %v7090_v48 = vld [vmem:[%s8778_s3 + $0x164] ss:$16 sps:$4 sm:$0xff]   ;;  %v7095_v49 = vld [vmem:[%s8778_s3 + $0x16c] ss:$16 sps:$4 sm:$0xff]  }
  0x12   :  { %v7100_v50 = vld [vmem:[%s8778_s3 + $0x160] ss:$16 sps:$4 sm:$0xff]   ;;  %v7105_v51 = vld [vmem:[%s8778_s3 + $0x168] ss:$16 sps:$4 sm:$0xff]   ;;  %v7110_v52 = vld [vmem:[%s8778_s3 + $0x184] ss:$16 sps:$4 sm:$0xff]  }
  0x13   :  { %393 = vmatpush1.bf16.msra.mxu0 %v6930_v20  ;;  %v7115_v53 = vld [vmem:[%s8778_s3 + $0x18c] ss:$16 sps:$4 sm:$0xff]   ;;  %v7124_v54 = vld [vmem:[%s8778_s3 + $0x180] ss:$16 sps:$4 sm:$0xff]   ;;  %v7129_v55 = vld [vmem:[%s8778_s3 + $0x188] ss:$16 sps:$4 sm:$0xff]  }
  0x14   :  { %434 = vmatpush1.bf16.msra.mxu1 %v6935_v21  ;;  %394 = vmatprep.subr.bf16.mxu0 %v6942_v22  ;;  %v7134_v56 = vld [vmem:[%s8778_s3 + $0x1a4] ss:$16 sps:$4 sm:$0xff]   ;;  %v7139_v57 = vld [vmem:[%s8778_s3 + $0x1ac] ss:$16 sps:$4 sm:$0xff]   ;;  %v7148_v58 = vld [vmem:[%s8778_s3 + $0x1a0] ss:$16 sps:$4 sm:$0xff]  }
  0x15   :  { %435 = vmatprep.subr.bf16.mxu1 %v6949_v23  ;;  %8798 = vst [vmem:[#allocation8_spill] sm:$0xff] %v7139_v57  ;;  %v7153_v59 = vld [vmem:[%s8778_s3 + $0x1a8] ss:$16 sps:$4 sm:$0xff]   ;;  %v7158_v60 = vld [vmem:[%s8778_s3 + $0x1c4] ss:$16 sps:$4 sm:$0xff]  }
  0x16   :  { %v7163_v61 = vld [vmem:[%s8778_s3 + $0x1cc] ss:$16 sps:$4 sm:$0xff]   ;;  %v7172_v62 = vld [vmem:[%s8778_s3 + $0x1c0] ss:$16 sps:$4 sm:$0xff]   ;;  %v7177_v63 = vld [vmem:[%s8778_s3 + $0x1c8] ss:$16 sps:$4 sm:$0xff]  }
  0x17   :  { %395 = vmatpush1.bf16.msra.mxu0 %v6956_v24  ;;  %8799 = vst [vmem:[#allocation9_spill] sm:$0xff] %v7163_v61  ;;  %v7182_v3 = vld [vmem:[%s8778_s3 + $0x1e4] ss:$16 sps:$4 sm:$0xff]   ;;  %v7187_v34 = vld [vmem:[%s8778_s3 + $0x1ec] ss:$16 sps:$4 sm:$0xff]  }
  0x18   :  { %436 = vmatpush1.bf16.msra.mxu1 %v6961_v25  ;;  %396 = vmatprep.subr.bf16.mxu0 %v6968_v26  ;;  %8800 = vst [vmem:[#allocation10_spill] sm:$0xff] %v7187_v34 }
  0x19   :  { %437 = vmatprep.subr.bf16.mxu1 %v6973_v27 }
  0x1b   :  { %397 = vmatpush1.bf16.msra.mxu0 %v6978_v28 }
  0x1c   :  { %438 = vmatpush1.bf16.msra.mxu1 %v6985_v29  ;;  %398 = vmatprep.subr.bf16.mxu0 %v6992_v30 }
  0x1d   :  { %439 = vmatprep.subr.bf16.mxu1 %v6997_v31 }
  0x1f   :  { %399 = vmatpush1.bf16.msra.mxu0 %v7002_v32 }
  0x20   :  { %440 = vmatpush1.bf16.msra.mxu1 %v7007_v33  ;;  %686 = vmatprep.subr.bf16.mxu0 %v7016_v35 }
  0x21   :  { %727 = vmatprep.subr.bf16.mxu1 %v7021_v36 }
  0x22   :  { %417 = vmatmul.mubr.bf16.vlgmr.msra.gmra.mrb[0].mxu0 %v191_v37 }
  0x23   :  { %458 = vmatmul.mubr.bf16.vlgmr.msra.gmra.mrb[0].mxu1 %v191_v37  ;;  %687 = vmatpush1.bf16.msra.mxu0 %v7026_v38  ;;  %v7196_v37 = vld [vmem:[%s8778_s3 + $0x1e0] ss:$16 sps:$4 sm:$0xff]  }
  0x24   :  { %728 = vmatpush1.bf16.msra.mxu1 %v7033_v39  ;;  %688 = vmatprep.subr.bf16.mxu0 %v7040_v40 }
  0x25   :  { %729 = vmatprep.subr.bf16.mxu1 %v7045_v41  ;;  %718 = vmatprep.mubr.bf16.mxu0 %v8781_v2 }
  0x26   :  { %759 = vmatprep.mubr.bf16.mxu1 %v8781_v2  ;;  %v7201_v2 = vld [vmem:[%s8778_s3 + $0x1e8] ss:$16 sps:$4 sm:$0xff]  }
  0x27   :  { %689 = vmatpush1.bf16.msra.mxu0 %v7050_v42 }
  0x28   :  { %730 = vmatpush1.bf16.msra.mxu1 %v7057_v43  ;;  %690 = vmatprep.subr.bf16.mxu0 %v7064_v44 }
  0x29   :  { %731 = vmatprep.subr.bf16.mxu1 %v7069_v45 }
  0x2b   :  { %691 = vmatpush1.bf16.msra.mxu0 %v7076_v46 }
  0x2c   :  { %732 = vmatpush1.bf16.msra.mxu1 %v7083_v47  ;;  %692 = vmatprep.subr.bf16.mxu0 %v7090_v48 }
  0x2d   :  { %733 = vmatprep.subr.bf16.mxu1 %v7095_v49 }
  0x2f   :  { %693 = vmatpush1.bf16.msra.mxu0 %v7100_v50 }
  0x30   :  { %734 = vmatpush1.bf16.msra.mxu1 %v7105_v51  ;;  %694 = vmatprep.subr.bf16.mxu0 %v7110_v52 }
  0x31   :  { %735 = vmatprep.subr.bf16.mxu1 %v7115_v53 }
  0x33   :  { %695 = vmatpush1.bf16.msra.mxu0 %v7124_v54 }
  0x34   :  { %736 = vmatpush1.bf16.msra.mxu1 %v7129_v55  ;;  %696 = vmatprep.subr.bf16.mxu0 %v7134_v56 }
  0x35   :  { %737 = vmatprep.subr.bf16.mxu1 %v7139_v57  ;;  %v492_v57 = vld [vmem:[#allocation4] sm:$0x3] }
  0x37   :  { %697 = vmatpush1.bf16.msra.mxu0 %v7148_v58 }
  0x38   :  { %738 = vmatpush1.bf16.msra.mxu1 %v7153_v59  ;;  %698 = vmatprep.subr.bf16.mxu0 %v7158_v60 }
  0x39   :  { %739 = vmatprep.subr.bf16.mxu1 %v7163_v61  ;;  %v493_v61 = vpack.c.bf16 %v492_v57, %v492_v57 }
  0x3b   :  { %699 = vmatpush1.bf16.msra.mxu0 %v7172_v62 }
  0x3c   :  { %740 = vmatpush1.bf16.msra.mxu1 %v7177_v63  ;;  %700 = vmatprep.subr.bf16.mxu0 %v7182_v3 }
  0x3d   :  { %741 = vmatprep.subr.bf16.mxu1 %v7187_v34  ;;  %v8801_v34 = vmov 0  }
  0x3f   :  { %701 = vmatpush1.bf16.msra.mxu0 %v7196_v37 }
  0x40   :  { %742 = vmatpush1.bf16.msra.mxu1 %v7201_v2  ;;  %1039 = vmatprep.subr.bf16.mxu0 %v6824_v0  ;;  %v28_v0 = vld [vmem:[%s8775_s0] sm:$0xf] }
  0x41   :  { %1080 = vmatprep.subr.bf16.mxu1 %v6829_v1  ;;  %29 = vst [vmem:[#allocation6] sm:$0xf] %v28_v0  ;;  %v5474_v1 = vld [vmem:[%s8776_s1 + $0x3c] sm:$0xf] }
  0x42   :  { %719 = vmatmul.mubr.bf16.vlgmr.msra.gmra.mrb[4].mxu0 %v493_v61  ;;  %117 = vst [vmem:[#allocation7 + $0x1c] sm:$0xf] %v5474_v1 }
  0x43   :  { %760 = vmatmul.mubr.bf16.vlgmr.msra.gmra.mrb[4].mxu1 %v493_v61  ;;  %1040 = vmatpush1.bf16.msra.mxu0 %v6837_v4  ;;  %v6790_v4 = vmov 1983009808  }
  0x44   :  { %1081 = vmatpush1.bf16.msra.mxu1 %v6842_v5  ;;  %1041 = vmatprep.subr.bf16.mxu0 %v6848_v6  ;;  %v473_v5 = vunpack.c.l.s4 %v6790_v4  ;;  %v475_v6 = vlaneseq  ;;  %v791_v4 = vld [vmem:[#allocation3] sm:$0x3] }
  0x45   :  { %1082 = vmatprep.subr.bf16.mxu1 %v6855_v7  ;;  %1071 = vmatprep.mubr.bf16.mxu0 %v8801_v34 }
  0x46   :  { %1112 = vmatprep.mubr.bf16.mxu1 %v8801_v34  ;;  %v474_v7 = vunpack.c.0.s8 %v473_v5 }
  0x47   :  { %1042 = vmatpush1.bf16.msra.mxu0 %v6860_v8  ;;  %v476_v8 = vshrl.u32 %v475_v6, 7 }
  0x48   :  { %1083 = vmatpush1.bf16.msra.mxu1 %v6866_v9  ;;  %1043 = vmatprep.subr.bf16.mxu0 %v6872_v10 }
  0x49   :  { %1084 = vmatprep.subr.bf16.mxu1 %v6877_v11  ;;  %v7251_v11 = vsub.s32 %v474_v7, %v476_v8 }
  0x4b   :  { %1044 = vmatpush1.bf16.msra.mxu0 %v6882_v12 }
  0x4c   :  { %1085 = vmatpush1.bf16.msra.mxu1 %v6887_v13  ;;  %1045 = vmatprep.subr.bf16.mxu0 %v6894_v14  ;;  %v188_v13 = vld [vmem:[#allocation6] sm:$0xf] }
  0x4d   :  { %1086 = vmatprep.subr.bf16.mxu1 %v6901_v15 }
  0x4f   :  { %1046 = vmatpush1.bf16.msra.mxu0 %v6906_v16 }
  0x50   :  { %1087 = vmatpush1.bf16.msra.mxu1 %v6913_v17  ;;  %1047 = vmatprep.subr.bf16.mxu0 %v6918_v18 }
  0x51   :  { %1088 = vmatprep.subr.bf16.mxu1 %v6925_v19 }
  0x53   :  { %1048 = vmatpush1.bf16.msra.mxu0 %v6930_v20 }
  0x54   :  { %1089 = vmatpush1.bf16.msra.mxu1 %v6935_v21  ;;  %1049 = vmatprep.subr.bf16.mxu0 %v6942_v22  ;;  %v189_v22 = vunpack.c.l.bf16 %v188_v13 }
  0x55   :  { %1090 = vmatprep.subr.bf16.mxu1 %v6949_v23 }
  0x57   :  { %1050 = vmatpush1.bf16.msra.mxu0 %v6956_v24 }
  0x58   :  { %1091 = vmatpush1.bf16.msra.mxu1 %v6961_v25  ;;  %1051 = vmatprep.subr.bf16.mxu0 %v6968_v26 }
  0x59   :  { %1092 = vmatprep.subr.bf16.mxu1 %v6973_v27 }
  0x5b   :  { %1052 = vmatpush1.bf16.msra.mxu0 %v6978_v28 }
  0x5c   :  { %1093 = vmatpush1.bf16.msra.mxu1 %v6985_v29  ;;  %1053 = vmatprep.subr.bf16.mxu0 %v6992_v30 }
  0x5d   :  { %1094 = vmatprep.subr.bf16.mxu1 %v6997_v31 }
  0x5f   :  { %1054 = vmatpush1.bf16.msra.mxu0 %v7002_v32 }
  0x60   :  { %1095 = vmatpush1.bf16.msra.mxu1 %v7007_v33  ;;  %1341 = vmatprep.subr.bf16.mxu0 %v7016_v35 }
  0x61   :  { %1382 = vmatprep.subr.bf16.mxu1 %v7021_v36  ;;  %v490_v36 = vld [vmem:[#allocation7 + $0x1c] sm:$0xf] }
  0xf5   :  { %v418_v9 = vpop.f32.mrb[0].mxu0 }
  0xf6   :  { %v459_v10 = vpop.f32.mrb[0].mxu1  ;;  %v420_v12 = vpop.f32.mrb[1].mxu0 }
  0xf7   :  { %v461_v14 = vpop.f32.mrb[1].mxu1  ;;  %v470_v15 = vcombine.low %v418_v9, %v420_v12  ;;  %v422_v17 = vpop.f32.mrb[2].mxu0 }
  0xf8   :  { %v471_v16 = vcombine.low %v459_v10, %v461_v14  ;;  %v463_v18 = vpop.f32.mrb[2].mxu1  ;;  %v423_v19 = vpop.f32.mrb[3].mxu0  ;;  %v491_v10 = vunpack.c.l.bf16 %v490_v36  ;;  %v7402_v36 = vld [vmem:[%s8777_s2 + $0x84] ss:$16 sps:$4 sm:$0xff]  }
  0xf9   :  { %v464_v20 = vpop.f32.mrb[3].mxu1  ;;  %v478_v21 = vrot.slane %v470_v15, %v7251_v11 }
  0xfa   :  { %v485_v23 = vrot.slane %v471_v16, %v7251_v11 }
  0xfc   :  { %v486_v24 = vcombine.low %v478_v21, %v485_v23 }
  0xfe   :  { %v488_v25 = vadd.f32 %v486_v24, %v189_v22 }
 0x100   :  { %v5571_v26 = vmul.f32 -1.442695, %v488_v25  ;;  %v799_v29 = vrot.slane %v488_v25, 6 }
 0x102   :  { %6660 = vpow2.f32 %v5571_v26 }
 0x10c   :  { %v6661_v27 = vpop.eup %6660 }
 0x10d   :  { %v795_v28 = vadd.f32 1.0, %v6661_v27 }
 0x10f   :  { %6662 = vrcp.f32 %v795_v28 }
 0x110   :  { %6664 = vtanh.f32 %v799_v29  ;;  %v812_v29 = vld [vmem:[#allocation5] sm:$0x3] }
 0x115   :  { %v720_v30 = vpop.f32.mrb[4].mxu0 }
 0x116   :  { %v761_v31 = vpop.f32.mrb[4].mxu1  ;;  %v722_v32 = vpop.f32.mrb[5].mxu0 }
 0x117   :  { %v763_v33 = vpop.f32.mrb[5].mxu1  ;;  %v772_v35 = vcombine.low %v720_v30, %v722_v32  ;;  %v724_v61 = vpop.f32.mrb[6].mxu0 }
 0x118   :  { %v773_v57 = vcombine.low %v761_v31, %v763_v33  ;;  %v765_v0 = vpop.f32.mrb[6].mxu1  ;;  %v725_v5 = vpop.f32.mrb[7].mxu0  ;;  %v7388_v33 = vld [vmem:[%s8777_s2 + $0x60] ss:$16 sps:$4 sm:$0xff]  }
 0x119   :  { %v6663_v1 = vpop.eup %6662  ;;  %v766_v6 = vpop.f32.mrb[7].mxu1  ;;  %v780_v8 = vrot.slane %v772_v35, %v7251_v11  ;;  %v7393_v35 = vld [vmem:[%s8777_s2 + $0x68] ss:$16 sps:$4 sm:$0xff]   ;;  %v7412_v61 = vld [vmem:[%s8777_s2 + $0x80] ss:$16 sps:$4 sm:$0xff]  }
 0x11a   :  { %v803_v7 = vrot.slane %v6663_v1, 2  ;;  %v6665_v9 = vpop.eup %6664  ;;  %v787_v12 = vrot.slane %v773_v57, %v7251_v11  ;;  %v809_v19 = vrot.slane %v6663_v1, 4  ;;  %v7407_v57 = vld [vmem:[%s8777_s2 + $0x8c] ss:$16 sps:$4 sm:$0xff]   ;;  %v7417_v0 = vld [vmem:[%s8777_s2 + $0x88] ss:$16 sps:$4 sm:$0xff]  }
 0x11b   :  { %v806_v14 = vmul.f32 %v6665_v9, %v6663_v1  ;;  %v7426_v1 = vld [vmem:[%s8777_s2 + $0xa4] ss:$16 sps:$4 sm:$0xff]   ;;  %v7436_v5 = vld [vmem:[%s8777_s2 + $0xa0] ss:$16 sps:$4 sm:$0xff]   ;;  %v7441_v6 = vld [vmem:[%s8777_s2 + $0xa8] ss:$16 sps:$4 sm:$0xff]  }
 0x11c   :  { %v805_v13 = vmul.f32 %v803_v7, %v791_v4  ;;  %v788_v15 = vcombine.low %v780_v8, %v787_v12  ;;  %v7431_v4 = vld [vmem:[%s8777_s2 + $0xac] ss:$16 sps:$4 sm:$0xff]   ;;  %v7450_v7 = vld [vmem:[%s8777_s2 + $0xc4] ss:$16 sps:$4 sm:$0xff]   ;;  %v7460_v9 = vld [vmem:[%s8777_s2 + $0xc0] ss:$16 sps:$4 sm:$0xff]  }
 0x11d   :  { %v7455_v8 = vld [vmem:[%s8777_s2 + $0xcc] ss:$16 sps:$4 sm:$0xff]   ;;  %v7474_v12 = vld [vmem:[%s8777_s2 + $0xe4] ss:$16 sps:$4 sm:$0xff]  }
 0x11e   :  { %v807_v16 = vadd.f32 %v806_v14, %v805_v13  ;;  %v790_v17 = vadd.f32 %v788_v15, %v491_v10  ;;  %v7465_v10 = vld [vmem:[%s8777_s2 + $0xc8] ss:$16 sps:$4 sm:$0xff]   ;;  %v7479_v13 = vld [vmem:[%s8777_s2 + $0xec] ss:$16 sps:$4 sm:$0xff]   ;;  %v7484_v14 = vld [vmem:[%s8777_s2 + $0xe0] ss:$16 sps:$4 sm:$0xff]  }
 0x11f   :  { %v7489_v15 = vld [vmem:[%s8777_s2 + $0xe8] ss:$16 sps:$4 sm:$0xff]  }
 0x120   :  { %6666 = vtanh.f32 %v807_v16  ;;  %834 = vst [vmem:[#allocation3] sm:$0x3] %v807_v16  ;;  %v5572_v18 = vmul.f32 -1.442695, %v790_v17  ;;  %v820_v25 = vrot.slane %v790_v17, 6 }
 0x121   :  { %v7498_v16 = vld [vmem:[%s8778_s3 + $0x104] ss:$16 sps:$4 sm:$0xff]   ;;  %v7503_v17 = vld [vmem:[%s8778_s3 + $0x10c] ss:$16 sps:$4 sm:$0xff]  }
 0x122   :  { %6668 = vpow2.f32 %v5572_v18 }
 0x12a   :  { %v6667_v20 = vpop.eup %6666 }
 0x12b   :  { %v811_v21 = vmul.f32 %v6667_v20, %v809_v19 }
 0x12c   :  { %v6669_v22 = vpop.eup %6668 }
 0x12d   :  { %833 = vst [vmem:[#allocation2] sm:$0x3] %v811_v21  ;;  %v837_v23 = vpack.c.bf16 %v811_v21, %v811_v21  ;;  %v816_v24 = vadd.f32 1.0, %v6669_v22 }
 0x12f   :  { %838 = vst [vmem:[%s8779_s4] sm:$0x1] %v837_v23  ;;  %6670 = vrcp.f32 %v816_v24 }
 0x130   :  { %6672 = vtanh.f32 %v820_v25 }
 0x134   :  { %v845_v26 = vld [vmem:[#allocation2] sm:$0x3] }
 0x135   :  { %v846_v27 = vpack.c.bf16 %v845_v26, %v845_v26 }
 0x137   :  { %1072 = vmatmul.mubr.bf16.vlgmr.msra.gmra.mrb[8].mxu0 %v846_v27  ;;  %1113 = vmatmul.mubr.bf16.vlgmr.msra.gmra.mrb[8].mxu1 %v846_v27 }
 0x138   :  { %1342 = vmatpush1.bf16.msra.mxu0 %v7026_v38  ;;  %1383 = vmatpush1.bf16.msra.mxu1 %v7033_v39 }
 0x139   :  { %1343 = vmatprep.subr.bf16.mxu0 %v7040_v40  ;;  %1384 = vmatprep.subr.bf16.mxu1 %v7045_v41  ;;  %v6671_v28 = vpop.eup %6670  ;;  %v8802_v40 = vld [vmem:[#allocation8_spill] sm:$0xff] }
 0x13a   :  { %1373 = vmatprep.mubr.bf16.mxu0 %v8801_v34  ;;  %1414 = vmatprep.mubr.bf16.mxu1 %v8801_v34  ;;  %v824_v30 = vrot.slane %v6671_v28, 2  ;;  %v6673_v31 = vpop.eup %6672  ;;  %v830_v41 = vrot.slane %v6671_v28, 4 }
 0x13b   :  { %v827_v38 = vmul.f32 %v6673_v31, %v6671_v28 }
 0x13c   :  { %1344 = vmatpush1.bf16.msra.mxu0 %v7050_v42  ;;  %1385 = vmatpush1.bf16.msra.mxu1 %v7057_v43  ;;  %v826_v32 = vmul.f32 %v824_v30, %v812_v29 }
 0x13d   :  { %1345 = vmatprep.subr.bf16.mxu0 %v7064_v44  ;;  %1386 = vmatprep.subr.bf16.mxu1 %v7069_v45  ;;  %v8803_v44 = vld [vmem:[#allocation9_spill] sm:$0xff] }
 0x13e   :  { %v828_v39 = vadd.f32 %v827_v38, %v826_v32 }
 0x140   :  { %1346 = vmatpush1.bf16.msra.mxu0 %v7076_v46  ;;  %1387 = vmatpush1.bf16.msra.mxu1 %v7083_v47  ;;  %6674 = vtanh.f32 %v828_v39  ;;  %836 = vst [vmem:[#allocation5] sm:$0x3] %v828_v39  ;;  %v8804_v46 = vld [vmem:[#allocation10_spill] sm:$0xff] }
 0x141   :  { %1347 = vmatprep.subr.bf16.mxu0 %v7090_v48  ;;  %1388 = vmatprep.subr.bf16.mxu1 %v7095_v49  ;;  %v30_v49 = vld [vmem:[%s8775_s0 + $0x8] sm:$0xf] }
 0x142   :  { %31 = vst [vmem:[#allocation6 + $0x4] sm:$0xf] %v30_v49 }
 0x144   :  { %1348 = vmatpush1.bf16.msra.mxu0 %v7100_v50  ;;  %1389 = vmatpush1.bf16.msra.mxu1 %v7105_v51  ;;  %v5473_v50 = vld [vmem:[%s8776_s1 + $0x34] sm:$0xf]  ;;  %v7311_v51 = vld [vmem:[%s8777_s2 + $0xc] ss:$16 sps:$4 sm:$0xff]  }
 0x145   :  { %1349 = vmatprep.subr.bf16.mxu0 %v7110_v52  ;;  %1390 = vmatprep.subr.bf16.mxu1 %v7115_v53  ;;  %115 = vst [vmem:[#allocation7 + $0x18] sm:$0xf] %v5473_v50  ;;  %v7316_v52 = vld [vmem:[%s8777_s2] ss:$16 sps:$4 sm:$0xff]   ;;  %v7321_v53 = vld [vmem:[%s8777_s2 + $0x8] ss:$16 sps:$4 sm:$0xff]  }
 0x148   :  { %1350 = vmatpush1.bf16.msra.mxu0 %v7124_v54  ;;  %1391 = vmatpush1.bf16.msra.mxu1 %v7129_v55  ;;  %v7330_v54 = vld [vmem:[%s8777_s2 + $0x24] ss:$16 sps:$4 sm:$0xff]   ;;  %v7335_v55 = vld [vmem:[%s8777_s2 + $0x2c] ss:$16 sps:$4 sm:$0xff]  }
 0x149   :  { %1351 = vmatprep.subr.bf16.mxu0 %v7134_v56  ;;  %1392 = vmatprep.subr.bf16.mxu1 %v8802_v40  ;;  %v7340_v56 = vld [vmem:[%s8777_s2 + $0x20] ss:$16 sps:$4 sm:$0xff]   ;;  %v843_v21 = vld [vmem:[#allocation6 + $0x4] sm:$0xf] }
 0x14a   :  { %v6675_v42 = vpop.eup %6674  ;;  %v844_v30 = vunpack.c.l.bf16 %v843_v21 }
 0x14b   :  { %v832_v43 = vmul.f32 %v6675_v42, %v830_v41 }
 0x14c   :  { %1352 = vmatpush1.bf16.msra.mxu0 %v7148_v58  ;;  %1393 = vmatpush1.bf16.msra.mxu1 %v7153_v59  ;;  %v7345_v58 = vld [vmem:[%s8777_s2 + $0x28] ss:$16 sps:$4 sm:$0xff]   ;;  %v7354_v59 = vld [vmem:[%s8777_s2 + $0x44] ss:$16 sps:$4 sm:$0xff]  }
 0x14d   :  { %1353 = vmatprep.subr.bf16.mxu0 %v7158_v60  ;;  %1394 = vmatprep.subr.bf16.mxu1 %v8803_v44  ;;  %835 = vst [vmem:[#allocation4] sm:$0x3] %v832_v43  ;;  %v839_v45 = vpack.c.bf16 %v832_v43, %v832_v43  ;;  %v7359_v60 = vld [vmem:[%s8777_s2 + $0x4c] ss:$16 sps:$4 sm:$0xff]  }
 0x14f   :  { %5573 = vst [vmem:[%s8780_s5 + $0x7] sm:$0x1] %v839_v45 }
 0x150   :  { %1354 = vmatpush1.bf16.msra.mxu0 %v7172_v62  ;;  %1395 = vmatpush1.bf16.msra.mxu1 %v7177_v63  ;;  %v7364_v62 = vld [vmem:[%s8777_s2 + $0x40] ss:$16 sps:$4 sm:$0xff]   ;;  %v7369_v63 = vld [vmem:[%s8777_s2 + $0x48] ss:$16 sps:$4 sm:$0xff]  }
 0x151   :  { %1355 = vmatprep.subr.bf16.mxu0 %v7182_v3  ;;  %1396 = vmatprep.subr.bf16.mxu1 %v8804_v46  ;;  %v7378_v3 = vld [vmem:[%s8777_s2 + $0x64] ss:$16 sps:$4 sm:$0xff]   ;;  %v1145_v46 = vld [vmem:[#allocation7 + $0x18] sm:$0xf] }
 0x154   :  { %1356 = vmatpush1.bf16.msra.mxu0 %v7196_v37  ;;  %1397 = vmatpush1.bf16.msra.mxu1 %v7201_v2  ;;  %v1147_v47 = vld [vmem:[#allocation4] sm:$0x3]  ;;  %v7383_v37 = vld [vmem:[%s8777_s2 + $0x6c] ss:$16 sps:$4 sm:$0xff]  }
 0x155   :  { %v1148_v48 = vpack.c.bf16 %v1147_v47, %v1147_v47  ;;  %v7306_v2 = vld [vmem:[%s8777_s2 + $0x4] ss:$16 sps:$4 sm:$0xff]   ;;  %1736 = vmatprep.subr.bf16.mxu1 %v7311_v51 }
 0x156   :  { %1695 = vmatprep.subr.bf16.mxu0 %v7306_v2 }
 0x157   :  { %1374 = vmatmul.mubr.bf16.vlgmr.msra.gmra.mrb[12].mxu0 %v1148_v48  ;;  %1415 = vmatmul.mubr.bf16.vlgmr.msra.gmra.mrb[12].mxu1 %v1148_v48 }
 0x158   :  { %1727 = vmatprep.mubr.bf16.mxu0 %v8801_v34  ;;  %1768 = vmatprep.mubr.bf16.mxu1 %v8801_v34 }
 0x159   :  { %1696 = vmatpush1.bf16.msra.mxu0 %v7316_v52  ;;  %1737 = vmatpush1.bf16.msra.mxu1 %v7321_v53 }
 0x15a   :  { %1697 = vmatprep.subr.bf16.mxu0 %v7330_v54  ;;  %1738 = vmatprep.subr.bf16.mxu1 %v7335_v55 }
 0x15d   :  { %1698 = vmatpush1.bf16.msra.mxu0 %v7340_v56  ;;  %1739 = vmatpush1.bf16.msra.mxu1 %v7345_v58 }
 0x15e   :  { %1699 = vmatprep.subr.bf16.mxu0 %v7354_v59  ;;  %1740 = vmatprep.subr.bf16.mxu1 %v7359_v60 }
 0x161   :  { %1700 = vmatpush1.bf16.msra.mxu0 %v7364_v62  ;;  %1741 = vmatpush1.bf16.msra.mxu1 %v7369_v63 }
 0x162   :  { %1701 = vmatprep.subr.bf16.mxu0 %v7378_v3  ;;  %1742 = vmatprep.subr.bf16.mxu1 %v7383_v37 }
 0x165   :  { %1702 = vmatpush1.bf16.msra.mxu0 %v7388_v33  ;;  %1743 = vmatpush1.bf16.msra.mxu1 %v7393_v35 }
 0x166   :  { %1703 = vmatprep.subr.bf16.mxu0 %v7402_v36  ;;  %1744 = vmatprep.subr.bf16.mxu1 %v7407_v57 }
 0x169   :  { %1704 = vmatpush1.bf16.msra.mxu0 %v7412_v61  ;;  %1745 = vmatpush1.bf16.msra.mxu1 %v7417_v0 }
 0x16a   :  { %1705 = vmatprep.subr.bf16.mxu0 %v7426_v1  ;;  %1746 = vmatprep.subr.bf16.mxu1 %v7431_v4 }
 0x16d   :  { %1706 = vmatpush1.bf16.msra.mxu0 %v7436_v5  ;;  %1747 = vmatpush1.bf16.msra.mxu1 %v7441_v6 }
 0x16e   :  { %1707 = vmatprep.subr.bf16.mxu0 %v7450_v7  ;;  %1748 = vmatprep.subr.bf16.mxu1 %v7455_v8 }
 0x171   :  { %1708 = vmatpush1.bf16.msra.mxu0 %v7460_v9  ;;  %1749 = vmatpush1.bf16.msra.mxu1 %v7465_v10 }
 0x172   :  { %1709 = vmatprep.subr.bf16.mxu0 %v7474_v12  ;;  %1750 = vmatprep.subr.bf16.mxu1 %v7479_v13 }
 0x175   :  { %1710 = vmatpush1.bf16.msra.mxu0 %v7484_v14  ;;  %1751 = vmatpush1.bf16.msra.mxu1 %v7489_v15 }
 0x176   :  { %1997 = vmatprep.subr.bf16.mxu0 %v7498_v16  ;;  %2038 = vmatprep.subr.bf16.mxu1 %v7503_v17 }
 0x20a   :  { %v1073_v18 = vpop.f32.mrb[8].mxu0  ;;  %v1114_v19 = vpop.f32.mrb[8].mxu1 }
 0x20b   :  { %v1075_v20 = vpop.f32.mrb[9].mxu0  ;;  %v1116_v22 = vpop.f32.mrb[9].mxu1 }
 0x20c   :  { %v1125_v23 = vcombine.low %v1073_v18, %v1075_v20  ;;  %v1126_v24 = vcombine.low %v1114_v19, %v1116_v22  ;;  %v1077_v25 = vpop.f32.mrb[10].mxu0  ;;  %v1118_v26 = vpop.f32.mrb[10].mxu1 }
 0x20d   :  { %v1078_v27 = vpop.f32.mrb[11].mxu0  ;;  %v1119_v28 = vpop.f32.mrb[11].mxu1  ;;  %v1146_v26 = vunpack.c.l.bf16 %v1145_v46 }
 0x20e   :  { %v1133_v29 = vrot.slane %v1125_v23, %v7251_v11  ;;  %v1140_v31 = vrot.slane %v1126_v24, %v7251_v11  ;;  %v1446_v24 = vld [vmem:[#allocation3] sm:$0x3] }
 0x210   :  { %v1141_v32 = vcombine.low %v1133_v29, %v1140_v31 }
 0x212   :  { %v1143_v38 = vadd.f32 %v1141_v32, %v844_v30 }
 0x214   :  { %v5670_v39 = vmul.f32 -1.442695, %v1143_v38  ;;  %v1454_v42 = vrot.slane %v1143_v38, 6 }
 0x216   :  { %6676 = vpow2.f32 %v5670_v39 }
 0x220   :  { %v6677_v40 = vpop.eup %6676 }
 0x221   :  { %v1450_v41 = vadd.f32 1.0, %v6677_v40 }
 0x223   :  { %6678 = vrcp.f32 %v1450_v41 }
 0x224   :  { %6680 = vtanh.f32 %v1454_v42 }
 0x22a   :  { %v1375_v43 = vpop.f32.mrb[12].mxu0  ;;  %v1416_v44 = vpop.f32.mrb[12].mxu1 }
 0x22b   :  { %v1377_v45 = vpop.f32.mrb[13].mxu0  ;;  %v1418_v47 = vpop.f32.mrb[13].mxu1 }
 0x22c   :  { %v1427_v49 = vcombine.low %v1375_v43, %v1377_v45  ;;  %v1428_v50 = vcombine.low %v1416_v44, %v1418_v47  ;;  %v1379_v18 = vpop.f32.mrb[14].mxu0  ;;  %v1420_v19 = vpop.f32.mrb[14].mxu1  ;;  %v7517_v47 = vld [vmem:[%s8778_s3 + $0x100] ss:$16 sps:$4 sm:$0xff]  }
 0x22d   :  { %v6679_v48 = vpop.eup %6678  ;;  %v1380_v21 = vpop.f32.mrb[15].mxu0  ;;  %v7532_v18 = vld [vmem:[%s8778_s3 + $0x12c] ss:$16 sps:$4 sm:$0xff]   ;;  %v7539_v19 = vld [vmem:[%s8778_s3 + $0x120] ss:$16 sps:$4 sm:$0xff]  }
 0x22e   :  { %v1458_v20 = vrot.slane %v6679_v48, 2  ;;  %v1421_v22 = vpop.f32.mrb[15].mxu1  ;;  %v6681_v23 = vpop.eup %6680  ;;  %v1435_v25 = vrot.slane %v1427_v49, %v7251_v11  ;;  %v1442_v27 = vrot.slane %v1428_v50, %v7251_v11  ;;  %v1464_v39 = vrot.slane %v6679_v48, 4  ;;  %v7527_v50 = vld [vmem:[%s8778_s3 + $0x124] ss:$16 sps:$4 sm:$0xff]  }
 0x22f   :  { %v1461_v29 = vmul.f32 %v6681_v23, %v6679_v48  ;;  %v7522_v48 = vld [vmem:[%s8778_s3 + $0x108] ss:$16 sps:$4 sm:$0xff]   ;;  %v7551_v21 = vld [vmem:[%s8778_s3 + $0x144] ss:$16 sps:$4 sm:$0xff]   ;;  %v7556_v22 = vld [vmem:[%s8778_s3 + $0x14c] ss:$16 sps:$4 sm:$0xff]  }
 0x230   :  { %v1460_v28 = vmul.f32 %v1458_v20, %v1446_v24  ;;  %v1443_v30 = vcombine.low %v1435_v25, %v1442_v27  ;;  %v7544_v20 = vld [vmem:[%s8778_s3 + $0x128] ss:$16 sps:$4 sm:$0xff]   ;;  %v7565_v27 = vld [vmem:[%s8778_s3 + $0x140] ss:$16 sps:$4 sm:$0xff]  }
 0x232   :  { %v1462_v31 = vadd.f32 %v1461_v29, %v1460_v28  ;;  %v1445_v32 = vadd.f32 %v1443_v30, %v1146_v26  ;;  %v1467_v26 = vld [vmem:[#allocation5] sm:$0x3]  ;;  %v7570_v28 = vld [vmem:[%s8778_s3 + $0x148] ss:$16 sps:$4 sm:$0xff]  }
 0x234   :  { %6682 = vtanh.f32 %v1462_v31  ;;  %1489 = vst [vmem:[#allocation3] sm:$0x3] %v1462_v31  ;;  %v5671_v38 = vmul.f32 -1.442695, %v1445_v32  ;;  %v1475_v45 = vrot.slane %v1445_v32, 6 }
 0x235   :  { %v7577_v31 = vld [vmem:[%s8778_s3 + $0x164] ss:$16 sps:$4 sm:$0xff]   ;;  %v7582_v32 = vld [vmem:[%s8778_s3 + $0x16c] ss:$16 sps:$4 sm:$0xff]  }
 0x236   :  { %6684 = vpow2.f32 %v5671_v38 }
 0x23e   :  { %v6683_v40 = vpop.eup %6682 }
 0x23f   :  { %v1466_v41 = vmul.f32 %v6683_v40, %v1464_v39  ;;  %v7589_v39 = vld [vmem:[%s8778_s3 + $0x160] ss:$16 sps:$4 sm:$0xff]   ;;  %v7594_v40 = vld [vmem:[%s8778_s3 + $0x168] ss:$16 sps:$4 sm:$0xff]  }
 0x240   :  { %v6685_v42 = vpop.eup %6684 }
 0x241   :  { %1488 = vst [vmem:[#allocation2] sm:$0x3] %v1466_v41  ;;  %v1492_v43 = vpack.c.bf16 %v1466_v41, %v1466_v41  ;;  %v1471_v44 = vadd.f32 1.0, %v6685_v42  ;;  %v7601_v41 = vld [vmem:[%s8778_s3 + $0x184] ss:$16 sps:$4 sm:$0xff]  }
 0x242   :  { %v7606_v42 = vld [vmem:[%s8778_s3 + $0x18c] ss:$16 sps:$4 sm:$0xff]  }
 0x243   :  { %5672 = vst [vmem:[%s8779_s4 + $0x1] sm:$0x1] %v1492_v43  ;;  %6686 = vrcp.f32 %v1471_v44  ;;  %v7613_v43 = vld [vmem:[%s8778_s3 + $0x180] ss:$16 sps:$4 sm:$0xff]   ;;  %v7618_v44 = vld [vmem:[%s8778_s3 + $0x188] ss:$16 sps:$4 sm:$0xff]  }
 0x244   :  { %6688 = vtanh.f32 %v1475_v45  ;;  %v7625_v45 = vld [vmem:[%s8778_s3 + $0x1a4] ss:$16 sps:$4 sm:$0xff]  }
 0x245   :  { %8805 = vst [vmem:[#allocation8_spill] sm:$0xff] %v7625_v45 }
 0x248   :  { %v1501_v46 = vld [vmem:[#allocation2] sm:$0x3] }
 0x249   :  { %v1502_v49 = vpack.c.bf16 %v1501_v46, %v1501_v46  ;;  %v7630_v46 = vld [vmem:[%s8778_s3 + $0x1ac] ss:$16 sps:$4 sm:$0xff]  }
 0x24a   :  { %8806 = vst [vmem:[#allocation9_spill] sm:$0xff] %v7630_v46 }
 0x24b   :  { %1728 = vmatmul.mubr.bf16.vlgmr.msra.gmra.mrb[16].mxu0 %v1502_v49  ;;  %1769 = vmatmul.mubr.bf16.vlgmr.msra.gmra.mrb[16].mxu1 %v1502_v49  ;;  %v7637_v49 = vld [vmem:[%s8778_s3 + $0x1a0] ss:$16 sps:$4 sm:$0xff]  }
 0x24c   :  { %1998 = vmatpush1.bf16.msra.mxu0 %v7517_v47  ;;  %2039 = vmatpush1.bf16.msra.mxu1 %v7522_v48 }
 0x24d   :  { %1999 = vmatprep.subr.bf16.mxu0 %v7527_v50  ;;  %2040 = vmatprep.subr.bf16.mxu1 %v7532_v18  ;;  %v6687_v23 = vpop.eup %6686 }
 0x24e   :  { %2029 = vmatprep.mubr.bf16.mxu0 %v8801_v34  ;;  %2070 = vmatprep.mubr.bf16.mxu1 %v8801_v34  ;;  %v1479_v24 = vrot.slane %v6687_v23, 2  ;;  %v6689_v25 = vpop.eup %6688 }
 0x24f   :  { %v1482_v30 = vmul.f32 %v6689_v25, %v6687_v23  ;;  %v7649_v25 = vld [vmem:[%s8778_s3 + $0x1c4] ss:$16 sps:$4 sm:$0xff]  }
 0x250   :  { %2000 = vmatpush1.bf16.msra.mxu0 %v7539_v19  ;;  %2041 = vmatpush1.bf16.msra.mxu1 %v7544_v20  ;;  %v1481_v29 = vmul.f32 %v1479_v24, %v1467_v26  ;;  %v7642_v24 = vld [vmem:[%s8778_s3 + $0x1a8] ss:$16 sps:$4 sm:$0xff]   ;;  %8807 = vst [vmem:[#allocation10_spill] sm:$0xff] %v7649_v25  ;;  %v7654_v26 = vld [vmem:[%s8778_s3 + $0x1cc] ss:$16 sps:$4 sm:$0xff]  }
 0x251   :  { %2001 = vmatprep.subr.bf16.mxu0 %v7551_v21  ;;  %2042 = vmatprep.subr.bf16.mxu1 %v7556_v22  ;;  %8808 = vst [vmem:[#allocation11_spill] sm:$0xff] %v7654_v26 }
 0x252   :  { %v1483_v38 = vadd.f32 %v1482_v30, %v1481_v29  ;;  %v1485_v29 = vrot.slane %v6687_v23, 4  ;;  %v7673_v23 = vld [vmem:[%s8778_s3 + $0x1e4] ss:$16 sps:$4 sm:$0xff]  }
 0x254   :  { %2002 = vmatpush1.bf16.msra.mxu0 %v7565_v27  ;;  %2043 = vmatpush1.bf16.msra.mxu1 %v7570_v28  ;;  %6690 = vtanh.f32 %v1483_v38  ;;  %1491 = vst [vmem:[#allocation5] sm:$0x3] %v1483_v38 }
 0x255   :  { %2003 = vmatprep.subr.bf16.mxu0 %v7577_v31  ;;  %2044 = vmatprep.subr.bf16.mxu1 %v7582_v32 }
 0x258   :  { %2004 = vmatpush1.bf16.msra.mxu0 %v7589_v39  ;;  %2045 = vmatpush1.bf16.msra.mxu1 %v7594_v40 }
 0x259   :  { %2005 = vmatprep.subr.bf16.mxu0 %v7601_v41  ;;  %2046 = vmatprep.subr.bf16.mxu1 %v7606_v42 }
 0x25c   :  { %2006 = vmatpush1.bf16.msra.mxu0 %v7613_v43  ;;  %2047 = vmatpush1.bf16.msra.mxu1 %v7618_v44 }
 0x25d   :  { %2007 = vmatprep.subr.bf16.mxu0 %v7625_v45  ;;  %2048 = vmatprep.subr.bf16.mxu1 %v7630_v46  ;;  %v7661_v46 = vld [vmem:[%s8778_s3 + $0x1c0] ss:$16 sps:$4 sm:$0xff]   ;;  %v7666_v45 = vld [vmem:[%s8778_s3 + $0x1c8] ss:$16 sps:$4 sm:$0xff]  }
 0x25e   :  { %v6691_v30 = vpop.eup %6690 }
 0x25f   :  { %v1487_v38 = vmul.f32 %v6691_v30, %v1485_v29  ;;  %v7678_v29 = vld [vmem:[%s8778_s3 + $0x1ec] ss:$16 sps:$4 sm:$0xff]  }
 0x260   :  { %2008 = vmatpush1.bf16.msra.mxu0 %v7637_v49  ;;  %2049 = vmatpush1.bf16.msra.mxu1 %v7642_v24 }
 0x261   :  { %2009 = vmatprep.subr.bf16.mxu0 %v7649_v25  ;;  %2050 = vmatprep.subr.bf16.mxu1 %v7654_v26  ;;  %1490 = vst [vmem:[#allocation4] sm:$0x3] %v1487_v38  ;;  %v1495_v30 = vpack.c.bf16 %v1487_v38, %v1487_v38  ;;  %v7688_v26 = vld [vmem:[%s8778_s3 + $0x1e0] ss:$16 sps:$4 sm:$0xff]   ;;  %v7693_v25 = vld [vmem:[%s8778_s3 + $0x1e8] ss:$16 sps:$4 sm:$0xff]  }
 0x263   :  { %5673 = vst [vmem:[%s8780_s5 + $0x6] sm:$0x1] %v1495_v30 }
 0x264   :  { %2010 = vmatpush1.bf16.msra.mxu0 %v7661_v46  ;;  %2051 = vmatpush1.bf16.msra.mxu1 %v7666_v45 }
 0x265   :  { %2011 = vmatprep.subr.bf16.mxu0 %v7673_v23  ;;  %2052 = vmatprep.subr.bf16.mxu1 %v7678_v29 }
 0x268   :  { %2012 = vmatpush1.bf16.msra.mxu0 %v7688_v26  ;;  %2053 = vmatpush1.bf16.msra.mxu1 %v7693_v25  ;;  %v1803_v38 = vld [vmem:[#allocation4] sm:$0x3] }
 0x269   :  { %2351 = vmatprep.subr.bf16.mxu0 %v7306_v2  ;;  %2392 = vmatprep.subr.bf16.mxu1 %v7311_v51  ;;  %v1804_v30 = vpack.c.bf16 %v1803_v38, %v1803_v38  ;;  %v32_v2 = vld [vmem:[%s8775_s0 + $0x10] sm:$0xf]  ;;  %v5472_v51 = vld [vmem:[%s8776_s1 + $0x2c] sm:$0xf] }
 0x26a   :  { %33 = vst [vmem:[#allocation6 + $0x8] sm:$0xf] %v32_v2  ;;  %113 = vst [vmem:[#allocation7 + $0x14] sm:$0xf] %v5472_v51  ;;  %v2102_v2 = vld [vmem:[#allocation3] sm:$0x3] }
 0x26b   :  { %2030 = vmatmul.mubr.bf16.vlgmr.msra.gmra.mrb[20].mxu0 %v1804_v30  ;;  %2071 = vmatmul.mubr.bf16.vlgmr.msra.gmra.mrb[20].mxu1 %v1804_v30 }
 0x26c   :  { %2352 = vmatpush1.bf16.msra.mxu0 %v7316_v52  ;;  %2393 = vmatpush1.bf16.msra.mxu1 %v7321_v53 }
 0x26d   :  { %2353 = vmatprep.subr.bf16.mxu0 %v7330_v54  ;;  %2394 = vmatprep.subr.bf16.mxu1 %v7335_v55 }
 0x26e   :  { %2383 = vmatprep.mubr.bf16.mxu0 %v8801_v34  ;;  %2424 = vmatprep.mubr.bf16.mxu1 %v8801_v34 }
 0x270   :  { %2354 = vmatpush1.bf16.msra.mxu0 %v7340_v56  ;;  %2395 = vmatpush1.bf16.msra.mxu1 %v7345_v58 }
 0x271   :  { %2355 = vmatprep.subr.bf16.mxu0 %v7354_v59  ;;  %2396 = vmatprep.subr.bf16.mxu1 %v7359_v60  ;;  %v1499_v55 = vld [vmem:[#allocation6 + $0x8] sm:$0xf] }
 0x274   :  { %2356 = vmatpush1.bf16.msra.mxu0 %v7364_v62  ;;  %2397 = vmatpush1.bf16.msra.mxu1 %v7369_v63 }
 0x275   :  { %2357 = vmatprep.subr.bf16.mxu0 %v7378_v3  ;;  %2398 = vmatprep.subr.bf16.mxu1 %v7383_v37 }
 0x278   :  { %2358 = vmatpush1.bf16.msra.mxu0 %v7388_v33  ;;  %2399 = vmatpush1.bf16.msra.mxu1 %v7393_v35  ;;  %v1500_v33 = vunpack.c.l.bf16 %v1499_v55 }
 0x279   :  { %2359 = vmatprep.subr.bf16.mxu0 %v7402_v36  ;;  %2400 = vmatprep.subr.bf16.mxu1 %v7407_v57 }
 0x27c   :  { %2360 = vmatpush1.bf16.msra.mxu0 %v7412_v61  ;;  %2401 = vmatpush1.bf16.msra.mxu1 %v7417_v0 }
 0x27d   :  { %2361 = vmatprep.subr.bf16.mxu0 %v7426_v1  ;;  %2402 = vmatprep.subr.bf16.mxu1 %v7431_v4 }
 0x280   :  { %2362 = vmatpush1.bf16.msra.mxu0 %v7436_v5  ;;  %2403 = vmatpush1.bf16.msra.mxu1 %v7441_v6 }
 0x281   :  { %2363 = vmatprep.subr.bf16.mxu0 %v7450_v7  ;;  %2404 = vmatprep.subr.bf16.mxu1 %v7455_v8  ;;  %v1801_v8 = vld [vmem:[#allocation7 + $0x14] sm:$0xf] }
 0x284   :  { %2364 = vmatpush1.bf16.msra.mxu0 %v7460_v9  ;;  %2405 = vmatpush1.bf16.msra.mxu1 %v7465_v10 }
 0x285   :  { %2365 = vmatprep.subr.bf16.mxu0 %v7474_v12  ;;  %2406 = vmatprep.subr.bf16.mxu1 %v7479_v13 }
 0x288   :  { %2366 = vmatpush1.bf16.msra.mxu0 %v7484_v14  ;;  %2407 = vmatpush1.bf16.msra.mxu1 %v7489_v15 }
 0x289   :  { %2653 = vmatprep.subr.bf16.mxu0 %v7498_v16  ;;  %2694 = vmatprep.subr.bf16.mxu1 %v7503_v17 }
 0x31e   :  { %v1729_v52 = vpop.f32.mrb[16].mxu0  ;;  %v1770_v53 = vpop.f32.mrb[16].mxu1 }
 0x31f   :  { %v1731_v54 = vpop.f32.mrb[17].mxu0  ;;  %v1772_v56 = vpop.f32.mrb[17].mxu1 }
 0x320   :  { %v1781_v58 = vcombine.low %v1729_v52, %v1731_v54  ;;  %v1782_v59 = vcombine.low %v1770_v53, %v1772_v56  ;;  %v1733_v60 = vpop.f32.mrb[18].mxu0  ;;  %v1774_v62 = vpop.f32.mrb[18].mxu1  ;;  %v1802_v52 = vunpack.c.l.bf16 %v1801_v8  ;;  %v7871_v8 = vld [vmem:[%s8777_s2 + $0x6c] ss:$16 sps:$4 sm:$0xff]  }
 0x321   :  { %v1734_v63 = vpop.f32.mrb[19].mxu0  ;;  %v1775_v3 = vpop.f32.mrb[19].mxu1 }
 0x322   :  { %v1789_v37 = vrot.slane %v1781_v58, %v7251_v11  ;;  %v1796_v35 = vrot.slane %v1782_v59, %v7251_v11 }
 0x324   :  { %v1797_v36 = vcombine.low %v1789_v37, %v1796_v35 }
 0x326   :  { %v1799_v57 = vadd.f32 %v1797_v36, %v1500_v33 }
 0x328   :  { %v5770_v61 = vmul.f32 -1.442695, %v1799_v57  ;;  %v2110_v4 = vrot.slane %v1799_v57, 6 }
 0x32a   :  { %6692 = vpow2.f32 %v5770_v61 }
 0x334   :  { %v6693_v0 = vpop.eup %6692 }
 0x335   :  { %v2106_v1 = vadd.f32 1.0, %v6693_v0 }
 0x337   :  { %6694 = vrcp.f32 %v2106_v1 }
 0x338   :  { %6696 = vtanh.f32 %v2110_v4 }
 0x33e   :  { %v2031_v5 = vpop.f32.mrb[20].mxu0  ;;  %v2072_v6 = vpop.f32.mrb[20].mxu1 }
 0x33f   :  { %v2033_v7 = vpop.f32.mrb[21].mxu0  ;;  %v2074_v9 = vpop.f32.mrb[21].mxu1 }
 0x340   :  { %v2083_v12 = vcombine.low %v2031_v5, %v2033_v7  ;;  %v2084_v13 = vcombine.low %v2072_v6, %v2074_v9  ;;  %v2035_v14 = vpop.f32.mrb[22].mxu0  ;;  %v2076_v15 = vpop.f32.mrb[22].mxu1  ;;  %v2123_v5 = vld [vmem:[#allocation5] sm:$0x3]  ;;  %v7876_v9 = vld [vmem:[%s8777_s2 + $0x60] ss:$16 sps:$4 sm:$0xff]  }
 0x341   :  { %v6695_v10 = vpop.eup %6694  ;;  %v2036_v17 = vpop.f32.mrb[23].mxu0  ;;  %v7866_v7 = vld [vmem:[%s8777_s2 + $0x64] ss:$16 sps:$4 sm:$0xff]   ;;  %v7900_v14 = vld [vmem:[%s8777_s2 + $0x80] ss:$16 sps:$4 sm:$0xff]  }
 0x342   :  { %v2114_v16 = vrot.slane %v6695_v10, 2  ;;  %v2077_v38 = vpop.f32.mrb[23].mxu1  ;;  %v6697_v30 = vpop.eup %6696  ;;  %v2091_v51 = vrot.slane %v2083_v12, %v7251_v11  ;;  %v2098_v53 = vrot.slane %v2084_v13, %v7251_v11  ;;  %v2120_v62 = vrot.slane %v6695_v10, 4  ;;  %v7890_v12 = vld [vmem:[%s8777_s2 + $0x84] ss:$16 sps:$4 sm:$0xff]  }
 0x343   :  { %v2117_v55 = vmul.f32 %v6697_v30, %v6695_v10  ;;  %v7881_v10 = vld [vmem:[%s8777_s2 + $0x68] ss:$16 sps:$4 sm:$0xff]   ;;  %v7895_v13 = vld [vmem:[%s8777_s2 + $0x8c] ss:$16 sps:$4 sm:$0xff]   ;;  %v7924_v38 = vld [vmem:[%s8777_s2 + $0xa0] ss:$16 sps:$4 sm:$0xff]  }
 0x344   :  { %v2116_v54 = vmul.f32 %v2114_v16, %v2102_v2  ;;  %v2099_v56 = vcombine.low %v2091_v51, %v2098_v53  ;;  %v7905_v15 = vld [vmem:[%s8777_s2 + $0x88] ss:$16 sps:$4 sm:$0xff]   ;;  %v7914_v16 = vld [vmem:[%s8777_s2 + $0xa4] ss:$16 sps:$4 sm:$0xff]   ;;  %v7919_v17 = vld [vmem:[%s8777_s2 + $0xac] ss:$16 sps:$4 sm:$0xff]  }
 0x345   :  { %v7929_v30 = vld [vmem:[%s8777_s2 + $0xa8] ss:$16 sps:$4 sm:$0xff]   ;;  %v7938_v2 = vld [vmem:[%s8777_s2 + $0xc4] ss:$16 sps:$4 sm:$0xff]   ;;  %v7943_v51 = vld [vmem:[%s8777_s2 + $0xcc] ss:$16 sps:$4 sm:$0xff]  }
 0x346   :  { %v2118_v58 = vadd.f32 %v2117_v55, %v2116_v54  ;;  %v2101_v59 = vadd.f32 %v2099_v56, %v1802_v52  ;;  %v7948_v52 = vld [vmem:[%s8777_s2 + $0xc0] ss:$16 sps:$4 sm:$0xff]   ;;  %v7953_v53 = vld [vmem:[%s8777_s2 + $0xc8] ss:$16 sps:$4 sm:$0xff]   ;;  %v7962_v54 = vld [vmem:[%s8777_s2 + $0xe4] ss:$16 sps:$4 sm:$0xff]  }
 0x347   :  { %v7967_v55 = vld [vmem:[%s8777_s2 + $0xec] ss:$16 sps:$4 sm:$0xff]   ;;  %v7972_v56 = vld [vmem:[%s8777_s2 + $0xe0] ss:$16 sps:$4 sm:$0xff]  }
 0x348   :  { %6698 = vtanh.f32 %v2118_v58  ;;  %2145 = vst [vmem:[#allocation3] sm:$0x3] %v2118_v58  ;;  %v5771_v60 = vmul.f32 -1.442695, %v2101_v59  ;;  %v2131_v36 = vrot.slane %v2101_v59, 6 }
 0x349   :  { %v7977_v58 = vld [vmem:[%s8777_s2 + $0xe8] ss:$16 sps:$4 sm:$0xff]   ;;  %v7986_v59 = vld [vmem:[%s8778_s3 + $0x104] ss:$16 sps:$4 sm:$0xff]  }
 0x34a   :  { %6700 = vpow2.f32 %v5771_v60  ;;  %v7991_v60 = vld [vmem:[%s8778_s3 + $0x10c] ss:$16 sps:$4 sm:$0xff]  }
 0x352   :  { %v6699_v63 = vpop.eup %6698 }
 0x353   :  { %v2122_v3 = vmul.f32 %v6699_v63, %v2120_v62 }
 0x354   :  { %v6701_v37 = vpop.eup %6700 }
 0x355   :  { %2144 = vst [vmem:[#allocation2] sm:$0x3] %v2122_v3  ;;  %v2148_v33 = vpack.c.bf16 %v2122_v3, %v2122_v3  ;;  %v2127_v35 = vadd.f32 1.0, %v6701_v37 }
 0x357   :  { %5772 = vst [vmem:[%s8779_s4 + $0x2] sm:$0x1] %v2148_v33  ;;  %6702 = vrcp.f32 %v2127_v35 }
 0x358   :  { %6704 = vtanh.f32 %v2131_v36 }
 0x35c   :  { %v2157_v57 = vld [vmem:[#allocation2] sm:$0x3] }
 0x35d   :  { %v2158_v61 = vpack.c.bf16 %v2157_v57, %v2157_v57 }
 0x35f   :  { %2384 = vmatmul.mubr.bf16.vlgmr.msra.gmra.mrb[24].mxu0 %v2158_v61  ;;  %2425 = vmatmul.mubr.bf16.vlgmr.msra.gmra.mrb[24].mxu1 %v2158_v61 }
 0x360   :  { %2654 = vmatpush1.bf16.msra.mxu0 %v7517_v47  ;;  %2695 = vmatpush1.bf16.msra.mxu1 %v7522_v48 }
 0x361   :  { %2655 = vmatprep.subr.bf16.mxu0 %v7527_v50  ;;  %2696 = vmatprep.subr.bf16.mxu1 %v7532_v18  ;;  %v6703_v0 = vpop.eup %6702  ;;  %v8809_v50 = vld [vmem:[#allocation8_spill] sm:$0xff]  ;;  %v8810_v18 = vld [vmem:[#allocation9_spill] sm:$0xff] }
 0x362   :  { %2685 = vmatprep.mubr.bf16.mxu0 %v8801_v34  ;;  %2726 = vmatprep.mubr.bf16.mxu1 %v8801_v34  ;;  %v2135_v1 = vrot.slane %v6703_v0, 2  ;;  %v6705_v4 = vpop.eup %6704 }
 0x363   :  { %v2138_v47 = vmul.f32 %v6705_v4, %v6703_v0 }
 0x364   :  { %2656 = vmatpush1.bf16.msra.mxu0 %v7539_v19  ;;  %2697 = vmatpush1.bf16.msra.mxu1 %v7544_v20  ;;  %v2137_v6 = vmul.f32 %v2135_v1, %v2123_v5  ;;  %v2141_v19 = vrot.slane %v6703_v0, 4 }
 0x365   :  { %2657 = vmatprep.subr.bf16.mxu0 %v7551_v21  ;;  %2698 = vmatprep.subr.bf16.mxu1 %v7556_v22  ;;  %v8811_v22 = vld [vmem:[#allocation10_spill] sm:$0xff] }
 0x366   :  { %v2139_v48 = vadd.f32 %v2138_v47, %v2137_v6 }
 0x368   :  { %2658 = vmatpush1.bf16.msra.mxu0 %v7565_v27  ;;  %2699 = vmatpush1.bf16.msra.mxu1 %v7570_v28  ;;  %6706 = vtanh.f32 %v2139_v48  ;;  %2147 = vst [vmem:[#allocation5] sm:$0x3] %v2139_v48  ;;  %v8812_v27 = vld [vmem:[#allocation11_spill] sm:$0xff] }
 0x369   :  { %2659 = vmatprep.subr.bf16.mxu0 %v7577_v31  ;;  %2700 = vmatprep.subr.bf16.mxu1 %v7582_v32 }
 0x36c   :  { %2660 = vmatpush1.bf16.msra.mxu0 %v7589_v39  ;;  %2701 = vmatpush1.bf16.msra.mxu1 %v7594_v40  ;;  %v34_v39 = vld [vmem:[%s8775_s0 + $0x18] sm:$0xf]  ;;  %v5471_v40 = vld [vmem:[%s8776_s1 + $0x24] sm:$0xf] }
 0x36d   :  { %2661 = vmatprep.subr.bf16.mxu0 %v7601_v41  ;;  %2702 = vmatprep.subr.bf16.mxu1 %v7606_v42  ;;  %35 = vst [vmem:[#allocation6 + $0xc] sm:$0xf] %v34_v39  ;;  %111 = vst [vmem:[#allocation7 + $0x10] sm:$0xf] %v5471_v40  ;;  %v7794_v41 = vld [vmem:[%s8777_s2 + $0x4] ss:$16 sps:$4 sm:$0xff]  }
 0x36e   :  { %v7799_v42 = vld [vmem:[%s8777_s2 + $0xc] ss:$16 sps:$4 sm:$0xff]  }
 0x370   :  { %2662 = vmatpush1.bf16.msra.mxu0 %v7613_v43  ;;  %2703 = vmatpush1.bf16.msra.mxu1 %v7618_v44  ;;  %v7804_v43 = vld [vmem:[%s8777_s2] ss:$16 sps:$4 sm:$0xff]   ;;  %v7809_v44 = vld [vmem:[%s8777_s2 + $0x8] ss:$16 sps:$4 sm:$0xff]  }
 0x371   :  { %2663 = vmatprep.subr.bf16.mxu0 %v8809_v50  ;;  %2704 = vmatprep.subr.bf16.mxu1 %v8810_v18 }
 0x372   :  { %v6707_v20 = vpop.eup %6706 }
 0x373   :  { %v2143_v21 = vmul.f32 %v6707_v20, %v2141_v19 }
 0x374   :  { %2664 = vmatpush1.bf16.msra.mxu0 %v7637_v49  ;;  %2705 = vmatpush1.bf16.msra.mxu1 %v7642_v24  ;;  %v7828_v49 = vld [vmem:[%s8777_s2 + $0x20] ss:$16 sps:$4 sm:$0xff]   ;;  %v7833_v24 = vld [vmem:[%s8777_s2 + $0x28] ss:$16 sps:$4 sm:$0xff]   ;;  %v2155_v37 = vld [vmem:[#allocation6 + $0xc] sm:$0xf] }
 0x375   :  { %2665 = vmatprep.subr.bf16.mxu0 %v8811_v22  ;;  %2706 = vmatprep.subr.bf16.mxu1 %v8812_v27  ;;  %2146 = vst [vmem:[#allocation4] sm:$0x3] %v2143_v21  ;;  %v2151_v28 = vpack.c.bf16 %v2143_v21, %v2143_v21  ;;  %v2156_v5 = vunpack.c.l.bf16 %v2155_v37 }
 0x377   :  { %5773 = vst [vmem:[%s8780_s5 + $0x5] sm:$0x1] %v2151_v28  ;;  %v2457_v28 = vld [vmem:[#allocation7 + $0x10] sm:$0xf] }
 0x378   :  { %2666 = vmatpush1.bf16.msra.mxu0 %v7661_v46  ;;  %2707 = vmatpush1.bf16.msra.mxu1 %v7666_v45  ;;  %v7818_v45 = vld [vmem:[%s8777_s2 + $0x24] ss:$16 sps:$4 sm:$0xff]   ;;  %v7823_v46 = vld [vmem:[%s8777_s2 + $0x2c] ss:$16 sps:$4 sm:$0xff]  }
 0x379   :  { %2667 = vmatprep.subr.bf16.mxu0 %v7673_v23  ;;  %2708 = vmatprep.subr.bf16.mxu1 %v7678_v29  ;;  %v7852_v23 = vld [vmem:[%s8777_s2 + $0x40] ss:$16 sps:$4 sm:$0xff]   ;;  %v7857_v29 = vld [vmem:[%s8777_s2 + $0x48] ss:$16 sps:$4 sm:$0xff]  }
 0x37c   :  { %2668 = vmatpush1.bf16.msra.mxu0 %v7688_v26  ;;  %2709 = vmatpush1.bf16.msra.mxu1 %v7693_v25  ;;  %v2459_v31 = vld [vmem:[#allocation4] sm:$0x3]  ;;  %v7847_v26 = vld [vmem:[%s8777_s2 + $0x4c] ss:$16 sps:$4 sm:$0xff]  }
 0x37d   :  { %v2460_v32 = vpack.c.bf16 %v2459_v31, %v2459_v31  ;;  %3007 = vmatprep.subr.bf16.mxu0 %v7794_v41  ;;  %3048 = vmatprep.subr.bf16.mxu1 %v7799_v42  ;;  %v7842_v25 = vld [vmem:[%s8777_s2 + $0x44] ss:$16 sps:$4 sm:$0xff]  }
 0x37f   :  { %2686 = vmatmul.mubr.bf16.vlgmr.msra.gmra.mrb[28].mxu0 %v2460_v32  ;;  %2727 = vmatmul.mubr.bf16.vlgmr.msra.gmra.mrb[28].mxu1 %v2460_v32 }
 0x380   :  { %3039 = vmatprep.mubr.bf16.mxu0 %v8801_v34  ;;  %3080 = vmatprep.mubr.bf16.mxu1 %v8801_v34 }
 0x381   :  { %3008 = vmatpush1.bf16.msra.mxu0 %v7804_v43  ;;  %3049 = vmatpush1.bf16.msra.mxu1 %v7809_v44 }
 0x382   :  { %3009 = vmatprep.subr.bf16.mxu0 %v7818_v45  ;;  %3050 = vmatprep.subr.bf16.mxu1 %v7823_v46 }
 0x385   :  { %3010 = vmatpush1.bf16.msra.mxu0 %v7828_v49  ;;  %3051 = vmatpush1.bf16.msra.mxu1 %v7833_v24 }
 0x386   :  { %3011 = vmatprep.subr.bf16.mxu0 %v7842_v25  ;;  %3052 = vmatprep.subr.bf16.mxu1 %v7847_v26 }
 0x389   :  { %3012 = vmatpush1.bf16.msra.mxu0 %v7852_v23  ;;  %3053 = vmatpush1.bf16.msra.mxu1 %v7857_v29 }
 0x38a   :  { %3013 = vmatprep.subr.bf16.mxu0 %v7866_v7  ;;  %3054 = vmatprep.subr.bf16.mxu1 %v7871_v8 }
 0x38d   :  { %3014 = vmatpush1.bf16.msra.mxu0 %v7876_v9  ;;  %3055 = vmatpush1.bf16.msra.mxu1 %v7881_v10 }
 0x38e   :  { %3015 = vmatprep.subr.bf16.mxu0 %v7890_v12  ;;  %3056 = vmatprep.subr.bf16.mxu1 %v7895_v13 }
 0x391   :  { %3016 = vmatpush1.bf16.msra.mxu0 %v7900_v14  ;;  %3057 = vmatpush1.bf16.msra.mxu1 %v7905_v15 }
 0x392   :  { %3017 = vmatprep.subr.bf16.mxu0 %v7914_v16  ;;  %3058 = vmatprep.subr.bf16.mxu1 %v7919_v17 }
 0x395   :  { %3018 = vmatpush1.bf16.msra.mxu0 %v7924_v38  ;;  %3059 = vmatpush1.bf16.msra.mxu1 %v7929_v30 }
 0x396   :  { %3019 = vmatprep.subr.bf16.mxu0 %v7938_v2  ;;  %3060 = vmatprep.subr.bf16.mxu1 %v7943_v51 }
 0x399   :  { %3020 = vmatpush1.bf16.msra.mxu0 %v7948_v52  ;;  %3061 = vmatpush1.bf16.msra.mxu1 %v7953_v53 }
 0x39a   :  { %3021 = vmatprep.subr.bf16.mxu0 %v7962_v54  ;;  %3062 = vmatprep.subr.bf16.mxu1 %v7967_v55 }
 0x39d   :  { %3022 = vmatpush1.bf16.msra.mxu0 %v7972_v56  ;;  %3063 = vmatpush1.bf16.msra.mxu1 %v7977_v58 }
 0x39e   :  { %3309 = vmatprep.subr.bf16.mxu0 %v7986_v59  ;;  %3350 = vmatprep.subr.bf16.mxu1 %v7991_v60 }
 0x432   :  { %v2385_v62 = vpop.f32.mrb[24].mxu0  ;;  %v2426_v63 = vpop.f32.mrb[24].mxu1 }
 0x433   :  { %v2387_v3 = vpop.f32.mrb[25].mxu0  ;;  %v2428_v33 = vpop.f32.mrb[25].mxu1 }
 0x434   :  { %v2437_v35 = vcombine.low %v2385_v62, %v2387_v3  ;;  %v2438_v36 = vcombine.low %v2426_v63, %v2428_v33  ;;  %v2389_v57 = vpop.f32.mrb[26].mxu0  ;;  %v2430_v61 = vpop.f32.mrb[26].mxu1 }
 0x435   :  { %v2390_v0 = vpop.f32.mrb[27].mxu0  ;;  %v2431_v1 = vpop.f32.mrb[27].mxu1  ;;  %v2458_v61 = vunpack.c.l.bf16 %v2457_v28 }
 0x436   :  { %v2445_v4 = vrot.slane %v2437_v35, %v7251_v11  ;;  %v2452_v6 = vrot.slane %v2438_v36, %v7251_v11  ;;  %v2758_v36 = vld [vmem:[#allocation3] sm:$0x3] }
 0x438   :  { %v2453_v47 = vcombine.low %v2445_v4, %v2452_v6 }
 0x43a   :  { %v2455_v48 = vadd.f32 %v2453_v47, %v2156_v5 }
 0x43c   :  { %v5870_v50 = vmul.f32 -1.442695, %v2455_v48  ;;  %v2766_v20 = vrot.slane %v2455_v48, 6 }
 0x43e   :  { %6708 = vpow2.f32 %v5870_v50 }
 0x448   :  { %v6709_v18 = vpop.eup %6708 }
 0x449   :  { %v2762_v19 = vadd.f32 1.0, %v6709_v18 }
 0x44b   :  { %6710 = vrcp.f32 %v2762_v19 }
 0x44c   :  { %6712 = vtanh.f32 %v2766_v20 }
 0x452   :  { %v2687_v21 = vpop.f32.mrb[28].mxu0  ;;  %v2728_v22 = vpop.f32.mrb[28].mxu1 }
 0x453   :  { %v2689_v27 = vpop.f32.mrb[29].mxu0  ;;  %v2730_v31 = vpop.f32.mrb[29].mxu1 }
 0x454   :  { %v2739_v39 = vcombine.low %v2687_v21, %v2689_v27  ;;  %v2740_v40 = vcombine.low %v2728_v22, %v2730_v31  ;;  %v2691_v62 = vpop.f32.mrb[30].mxu0  ;;  %v2732_v63 = vpop.f32.mrb[30].mxu1  ;;  %v8005_v31 = vld [vmem:[%s8778_s3 + $0x100] ss:$16 sps:$4 sm:$0xff]  }
 0x455   :  { %v6711_v32 = vpop.eup %6710  ;;  %v2692_v37 = vpop.f32.mrb[31].mxu0  ;;  %v8020_v62 = vld [vmem:[%s8778_s3 + $0x12c] ss:$16 sps:$4 sm:$0xff]   ;;  %v8027_v63 = vld [vmem:[%s8778_s3 + $0x120] ss:$16 sps:$4 sm:$0xff]  }
 0x456   :  { %v2770_v3 = vrot.slane %v6711_v32, 2  ;;  %v2733_v33 = vpop.f32.mrb[31].mxu1  ;;  %v6713_v35 = vpop.eup %6712  ;;  %v2747_v57 = vrot.slane %v2739_v39, %v7251_v11  ;;  %v2754_v0 = vrot.slane %v2740_v40, %v7251_v11  ;;  %v2776_v50 = vrot.slane %v6711_v32, 4  ;;  %v8015_v40 = vld [vmem:[%s8778_s3 + $0x124] ss:$16 sps:$4 sm:$0xff]  }
 0x457   :  { %v2773_v4 = vmul.f32 %v6713_v35, %v6711_v32  ;;  %v8010_v32 = vld [vmem:[%s8778_s3 + $0x108] ss:$16 sps:$4 sm:$0xff]   ;;  %v8039_v37 = vld [vmem:[%s8778_s3 + $0x144] ss:$16 sps:$4 sm:$0xff]   ;;  %v8044_v33 = vld [vmem:[%s8778_s3 + $0x14c] ss:$16 sps:$4 sm:$0xff]  }
 0x458   :  { %v2772_v1 = vmul.f32 %v2770_v3, %v2758_v36  ;;  %v2755_v5 = vcombine.low %v2747_v57, %v2754_v0  ;;  %v8032_v3 = vld [vmem:[%s8778_s3 + $0x128] ss:$16 sps:$4 sm:$0xff]   ;;  %v8053_v0 = vld [vmem:[%s8778_s3 + $0x140] ss:$16 sps:$4 sm:$0xff]  }
 0x45a   :  { %v2774_v6 = vadd.f32 %v2773_v4, %v2772_v1  ;;  %v2757_v47 = vadd.f32 %v2755_v5, %v2458_v61  ;;  %v2779_v61 = vld [vmem:[#allocation5] sm:$0x3]  ;;  %v8058_v1 = vld [vmem:[%s8778_s3 + $0x148] ss:$16 sps:$4 sm:$0xff]  }
 0x45c   :  { %6714 = vtanh.f32 %v2774_v6  ;;  %2801 = vst [vmem:[#allocation3] sm:$0x3] %v2774_v6  ;;  %v5871_v48 = vmul.f32 -1.442695, %v2757_v47  ;;  %v2787_v27 = vrot.slane %v2757_v47, 6 }
 0x45d   :  { %v8065_v6 = vld [vmem:[%s8778_s3 + $0x164] ss:$16 sps:$4 sm:$0xff]   ;;  %v8070_v47 = vld [vmem:[%s8778_s3 + $0x16c] ss:$16 sps:$4 sm:$0xff]  }
 0x45e   :  { %6716 = vpow2.f32 %v5871_v48 }
 0x466   :  { %v6715_v18 = vpop.eup %6714 }
 0x467   :  { %v2778_v19 = vmul.f32 %v6715_v18, %v2776_v50  ;;  %v8077_v50 = vld [vmem:[%s8778_s3 + $0x160] ss:$16 sps:$4 sm:$0xff]   ;;  %v8082_v18 = vld [vmem:[%s8778_s3 + $0x168] ss:$16 sps:$4 sm:$0xff]  }
 0x468   :  { %v6717_v20 = vpop.eup %6716 }
 0x469   :  { %v2804_v21 = vpack.c.bf16 %v2778_v19, %v2778_v19  ;;  %2800 = vst [vmem:[#allocation2] sm:$0x3] %v2778_v19  ;;  %v2783_v22 = vadd.f32 1.0, %v6717_v20  ;;  %v8089_v19 = vld [vmem:[%s8778_s3 + $0x184] ss:$16 sps:$4 sm:$0xff]  }
 0x46a   :  { %v8094_v20 = vld [vmem:[%s8778_s3 + $0x18c] ss:$16 sps:$4 sm:$0xff]  }
 0x46b   :  { %5872 = vst [vmem:[%s8779_s4 + $0x3] sm:$0x1] %v2804_v21  ;;  %6718 = vrcp.f32 %v2783_v22  ;;  %v8101_v21 = vld [vmem:[%s8778_s3 + $0x180] ss:$16 sps:$4 sm:$0xff]   ;;  %v8106_v22 = vld [vmem:[%s8778_s3 + $0x188] ss:$16 sps:$4 sm:$0xff]  }
 0x46c   :  { %6720 = vtanh.f32 %v2787_v27  ;;  %v8113_v27 = vld [vmem:[%s8778_s3 + $0x1a4] ss:$16 sps:$4 sm:$0xff]  }
 0x46d   :  { %8813 = vst [vmem:[#allocation8_spill] sm:$0xff] %v8113_v27 }
 0x470   :  { %v2813_v28 = vld [vmem:[#allocation2] sm:$0x3] }
 0x471   :  { %v2814_v39 = vpack.c.bf16 %v2813_v28, %v2813_v28  ;;  %v8118_v28 = vld [vmem:[%s8778_s3 + $0x1ac] ss:$16 sps:$4 sm:$0xff]  }
 0x472   :  { %8814 = vst [vmem:[#allocation9_spill] sm:$0xff] %v8118_v28 }
 0x473   :  { %3040 = vmatmul.mubr.bf16.vlgmr.msra.gmra.mrb[32].mxu0 %v2814_v39  ;;  %3081 = vmatmul.mubr.bf16.vlgmr.msra.gmra.mrb[32].mxu1 %v2814_v39  ;;  %v8125_v39 = vld [vmem:[%s8778_s3 + $0x1a0] ss:$16 sps:$4 sm:$0xff]  }
 0x474   :  { %3310 = vmatpush1.bf16.msra.mxu0 %v8005_v31  ;;  %3351 = vmatpush1.bf16.msra.mxu1 %v8010_v32 }
 0x475   :  { %3311 = vmatprep.subr.bf16.mxu0 %v8015_v40  ;;  %3352 = vmatprep.subr.bf16.mxu1 %v8020_v62  ;;  %v6719_v35 = vpop.eup %6718 }
 0x476   :  { %3341 = vmatprep.mubr.bf16.mxu0 %v8801_v34  ;;  %3382 = vmatprep.mubr.bf16.mxu1 %v8801_v34  ;;  %v2791_v36 = vrot.slane %v6719_v35, 2  ;;  %v6721_v57 = vpop.eup %6720 }
 0x477   :  { %v2794_v5 = vmul.f32 %v6721_v57, %v6719_v35  ;;  %v8137_v57 = vld [vmem:[%s8778_s3 + $0x1c4] ss:$16 sps:$4 sm:$0xff]  }
 0x478   :  { %3312 = vmatpush1.bf16.msra.mxu0 %v8027_v63  ;;  %3353 = vmatpush1.bf16.msra.mxu1 %v8032_v3  ;;  %v2793_v4 = vmul.f32 %v2791_v36, %v2779_v61  ;;  %v8130_v36 = vld [vmem:[%s8778_s3 + $0x1a8] ss:$16 sps:$4 sm:$0xff]   ;;  %8815 = vst [vmem:[#allocation10_spill] sm:$0xff] %v8137_v57  ;;  %v8142_v61 = vld [vmem:[%s8778_s3 + $0x1cc] ss:$16 sps:$4 sm:$0xff]  }
 0x479   :  { %3313 = vmatprep.subr.bf16.mxu0 %v8039_v37  ;;  %3354 = vmatprep.subr.bf16.mxu1 %v8044_v33  ;;  %8816 = vst [vmem:[#allocation11_spill] sm:$0xff] %v8142_v61 }
 0x47a   :  { %v2795_v48 = vadd.f32 %v2794_v5, %v2793_v4  ;;  %v2797_v4 = vrot.slane %v6719_v35, 4  ;;  %v8161_v35 = vld [vmem:[%s8778_s3 + $0x1e4] ss:$16 sps:$4 sm:$0xff]  }
 0x47c   :  { %3314 = vmatpush1.bf16.msra.mxu0 %v8053_v0  ;;  %3355 = vmatpush1.bf16.msra.mxu1 %v8058_v1  ;;  %6722 = vtanh.f32 %v2795_v48  ;;  %2803 = vst [vmem:[#allocation5] sm:$0x3] %v2795_v48 }
 0x47d   :  { %3315 = vmatprep.subr.bf16.mxu0 %v8065_v6  ;;  %3356 = vmatprep.subr.bf16.mxu1 %v8070_v47 }
 0x480   :  { %3316 = vmatpush1.bf16.msra.mxu0 %v8077_v50  ;;  %3357 = vmatpush1.bf16.msra.mxu1 %v8082_v18 }
 0x481   :  { %3317 = vmatprep.subr.bf16.mxu0 %v8089_v19  ;;  %3358 = vmatprep.subr.bf16.mxu1 %v8094_v20 }
 0x484   :  { %3318 = vmatpush1.bf16.msra.mxu0 %v8101_v21  ;;  %3359 = vmatpush1.bf16.msra.mxu1 %v8106_v22 }
 0x485   :  { %3319 = vmatprep.subr.bf16.mxu0 %v8113_v27  ;;  %3360 = vmatprep.subr.bf16.mxu1 %v8118_v28  ;;  %v8149_v28 = vld [vmem:[%s8778_s3 + $0x1c0] ss:$16 sps:$4 sm:$0xff]   ;;  %v8154_v27 = vld [vmem:[%s8778_s3 + $0x1c8] ss:$16 sps:$4 sm:$0xff]  }
 0x486   :  { %v6723_v5 = vpop.eup %6722 }
 0x487   :  { %v2799_v48 = vmul.f32 %v6723_v5, %v2797_v4  ;;  %v8166_v4 = vld [vmem:[%s8778_s3 + $0x1ec] ss:$16 sps:$4 sm:$0xff]  }
 0x488   :  { %3320 = vmatpush1.bf16.msra.mxu0 %v8125_v39  ;;  %3361 = vmatpush1.bf16.msra.mxu1 %v8130_v36 }
 0x489   :  { %3321 = vmatprep.subr.bf16.mxu0 %v8137_v57  ;;  %3362 = vmatprep.subr.bf16.mxu1 %v8142_v61  ;;  %v2807_v5 = vpack.c.bf16 %v2799_v48, %v2799_v48  ;;  %2802 = vst [vmem:[#allocation4] sm:$0x3] %v2799_v48  ;;  %v8176_v61 = vld [vmem:[%s8778_s3 + $0x1e0] ss:$16 sps:$4 sm:$0xff]   ;;  %v8181_v57 = vld [vmem:[%s8778_s3 + $0x1e8] ss:$16 sps:$4 sm:$0xff]  }
 0x48b   :  { %5873 = vst [vmem:[%s8780_s5 + $0x4] sm:$0x1] %v2807_v5 }
 0x48c   :  { %3322 = vmatpush1.bf16.msra.mxu0 %v8149_v28  ;;  %3363 = vmatpush1.bf16.msra.mxu1 %v8154_v27 }
 0x48d   :  { %3323 = vmatprep.subr.bf16.mxu0 %v8161_v35  ;;  %3364 = vmatprep.subr.bf16.mxu1 %v8166_v4 }
 0x490   :  { %3324 = vmatpush1.bf16.msra.mxu0 %v8176_v61  ;;  %3365 = vmatpush1.bf16.msra.mxu1 %v8181_v57  ;;  %v3115_v48 = vld [vmem:[#allocation4] sm:$0x3] }
 0x491   :  { %3663 = vmatprep.subr.bf16.mxu0 %v7794_v41  ;;  %3704 = vmatprep.subr.bf16.mxu1 %v7799_v42  ;;  %v3116_v5 = vpack.c.bf16 %v3115_v48, %v3115_v48  ;;  %v36_v41 = vld [vmem:[%s8775_s0 + $0x20] sm:$0xf]  ;;  %v5470_v42 = vld [vmem:[%s8776_s1 + $0x1c] sm:$0xf] }
 0x492   :  { %37 = vst [vmem:[#allocation6 + $0x10] sm:$0xf] %v36_v41  ;;  %109 = vst [vmem:[#allocation7 + $0xc] sm:$0xf] %v5470_v42  ;;  %v3414_v41 = vld [vmem:[#allocation3] sm:$0x3] }
 0x493   :  { %3342 = vmatmul.mubr.bf16.vlgmr.msra.gmra.mrb[36].mxu0 %v3116_v5  ;;  %3383 = vmatmul.mubr.bf16.vlgmr.msra.gmra.mrb[36].mxu1 %v3116_v5 }
 0x494   :  { %3664 = vmatpush1.bf16.msra.mxu0 %v7804_v43  ;;  %3705 = vmatpush1.bf16.msra.mxu1 %v7809_v44 }
 0x495   :  { %3665 = vmatprep.subr.bf16.mxu0 %v7818_v45  ;;  %3706 = vmatprep.subr.bf16.mxu1 %v7823_v46 }
 0x496   :  { %3695 = vmatprep.mubr.bf16.mxu0 %v8801_v34  ;;  %3736 = vmatprep.mubr.bf16.mxu1 %v8801_v34 }
 0x498   :  { %3666 = vmatpush1.bf16.msra.mxu0 %v7828_v49  ;;  %3707 = vmatpush1.bf16.msra.mxu1 %v7833_v24 }
 0x499   :  { %3667 = vmatprep.subr.bf16.mxu0 %v7842_v25  ;;  %3708 = vmatprep.subr.bf16.mxu1 %v7847_v26  ;;  %v2811_v46 = vld [vmem:[#allocation6 + $0x10] sm:$0xf] }
 0x49c   :  { %3668 = vmatpush1.bf16.msra.mxu0 %v7852_v23  ;;  %3709 = vmatpush1.bf16.msra.mxu1 %v7857_v29 }
 0x49d   :  { %3669 = vmatprep.subr.bf16.mxu0 %v7866_v7  ;;  %3710 = vmatprep.subr.bf16.mxu1 %v7871_v8 }
 0x4a0   :  { %3670 = vmatpush1.bf16.msra.mxu0 %v7876_v9  ;;  %3711 = vmatpush1.bf16.msra.mxu1 %v7881_v10  ;;  %v2812_v9 = vunpack.c.l.bf16 %v2811_v46 }
 0x4a1   :  { %3671 = vmatprep.subr.bf16.mxu0 %v7890_v12  ;;  %3712 = vmatprep.subr.bf16.mxu1 %v7895_v13 }
 0x4a4   :  { %3672 = vmatpush1.bf16.msra.mxu0 %v7900_v14  ;;  %3713 = vmatpush1.bf16.msra.mxu1 %v7905_v15 }
 0x4a5   :  { %3673 = vmatprep.subr.bf16.mxu0 %v7914_v16  ;;  %3714 = vmatprep.subr.bf16.mxu1 %v7919_v17 }
 0x4a8   :  { %3674 = vmatpush1.bf16.msra.mxu0 %v7924_v38  ;;  %3715 = vmatpush1.bf16.msra.mxu1 %v7929_v30 }
 0x4a9   :  { %3675 = vmatprep.subr.bf16.mxu0 %v7938_v2  ;;  %3716 = vmatprep.subr.bf16.mxu1 %v7943_v51  ;;  %v3113_v51 = vld [vmem:[#allocation7 + $0xc] sm:$0xf] }
 0x4ac   :  { %3676 = vmatpush1.bf16.msra.mxu0 %v7948_v52  ;;  %3717 = vmatpush1.bf16.msra.mxu1 %v7953_v53 }
 0x4ad   :  { %3677 = vmatprep.subr.bf16.mxu0 %v7962_v54  ;;  %3718 = vmatprep.subr.bf16.mxu1 %v7967_v55 }
 0x4b0   :  { %3678 = vmatpush1.bf16.msra.mxu0 %v7972_v56  ;;  %3719 = vmatpush1.bf16.msra.mxu1 %v7977_v58 }
 0x4b1   :  { %3965 = vmatprep.subr.bf16.mxu0 %v7986_v59  ;;  %4006 = vmatprep.subr.bf16.mxu1 %v7991_v60 }
 0x546   :  { %v3041_v43 = vpop.f32.mrb[32].mxu0  ;;  %v3082_v44 = vpop.f32.mrb[32].mxu1 }
 0x547   :  { %v3043_v45 = vpop.f32.mrb[33].mxu0  ;;  %v3084_v49 = vpop.f32.mrb[33].mxu1 }
 0x548   :  { %v3093_v24 = vcombine.low %v3041_v43, %v3043_v45  ;;  %v3094_v25 = vcombine.low %v3082_v44, %v3084_v49  ;;  %v3045_v26 = vpop.f32.mrb[34].mxu0  ;;  %v3086_v23 = vpop.f32.mrb[34].mxu1  ;;  %v3114_v43 = vunpack.c.l.bf16 %v3113_v51  ;;  %v8359_v51 = vld [vmem:[%s8777_s2 + $0x6c] ss:$16 sps:$4 sm:$0xff]  }
 0x549   :  { %v3046_v29 = vpop.f32.mrb[35].mxu0  ;;  %v3087_v7 = vpop.f32.mrb[35].mxu1 }
 0x54a   :  { %v3101_v8 = vrot.slane %v3093_v24, %v7251_v11  ;;  %v3108_v10 = vrot.slane %v3094_v25, %v7251_v11 }
 0x54c   :  { %v3109_v12 = vcombine.low %v3101_v8, %v3108_v10 }
 0x54e   :  { %v3111_v13 = vadd.f32 %v3109_v12, %v2812_v9 }
 0x550   :  { %v5970_v14 = vmul.f32 -1.442695, %v3111_v13  ;;  %v3422_v17 = vrot.slane %v3111_v13, 6 }
 0x552   :  { %6724 = vpow2.f32 %v5970_v14 }
 0x55c   :  { %v6725_v15 = vpop.eup %6724 }
 0x55d   :  { %v3418_v16 = vadd.f32 1.0, %v6725_v15 }
 0x55f   :  { %6726 = vrcp.f32 %v3418_v16 }
 0x560   :  { %6728 = vtanh.f32 %v3422_v17 }
 0x566   :  { %v3343_v38 = vpop.f32.mrb[36].mxu0  ;;  %v3384_v30 = vpop.f32.mrb[36].mxu1 }
 0x567   :  { %v3345_v2 = vpop.f32.mrb[37].mxu0  ;;  %v3386_v52 = vpop.f32.mrb[37].mxu1 }
 0x568   :  { %v3395_v54 = vcombine.low %v3343_v38, %v3345_v2  ;;  %v3396_v55 = vcombine.low %v3384_v30, %v3386_v52  ;;  %v3347_v56 = vpop.f32.mrb[38].mxu0  ;;  %v3388_v58 = vpop.f32.mrb[38].mxu1  ;;  %v3435_v38 = vld [vmem:[#allocation5] sm:$0x3]  ;;  %v8364_v52 = vld [vmem:[%s8777_s2 + $0x60] ss:$16 sps:$4 sm:$0xff]  }
 0x569   :  { %v6727_v53 = vpop.eup %6726  ;;  %v3348_v60 = vpop.f32.mrb[39].mxu0  ;;  %v8354_v2 = vld [vmem:[%s8777_s2 + $0x64] ss:$16 sps:$4 sm:$0xff]   ;;  %v8388_v56 = vld [vmem:[%s8777_s2 + $0x80] ss:$16 sps:$4 sm:$0xff]  }
 0x56a   :  { %v3426_v59 = vrot.slane %v6727_v53, 2  ;;  %v3389_v48 = vpop.f32.mrb[39].mxu1  ;;  %v6729_v5 = vpop.eup %6728  ;;  %v3403_v42 = vrot.slane %v3395_v54, %v7251_v11  ;;  %v3410_v44 = vrot.slane %v3396_v55, %v7251_v11  ;;  %v3432_v23 = vrot.slane %v6727_v53, 4  ;;  %v8378_v54 = vld [vmem:[%s8777_s2 + $0x84] ss:$16 sps:$4 sm:$0xff]  }
 0x56b   :  { %v3429_v46 = vmul.f32 %v6729_v5, %v6727_v53  ;;  %v8369_v53 = vld [vmem:[%s8777_s2 + $0x68] ss:$16 sps:$4 sm:$0xff]   ;;  %v8383_v55 = vld [vmem:[%s8777_s2 + $0x8c] ss:$16 sps:$4 sm:$0xff]   ;;  %v8412_v48 = vld [vmem:[%s8777_s2 + $0xa0] ss:$16 sps:$4 sm:$0xff]  }
 0x56c   :  { %v3428_v45 = vmul.f32 %v3426_v59, %v3414_v41  ;;  %v3411_v49 = vcombine.low %v3403_v42, %v3410_v44  ;;  %v8393_v58 = vld [vmem:[%s8777_s2 + $0x88] ss:$16 sps:$4 sm:$0xff]   ;;  %v8402_v59 = vld [vmem:[%s8777_s2 + $0xa4] ss:$16 sps:$4 sm:$0xff]   ;;  %v8407_v60 = vld [vmem:[%s8777_s2 + $0xac] ss:$16 sps:$4 sm:$0xff]  }
 0x56d   :  { %v8417_v5 = vld [vmem:[%s8777_s2 + $0xa8] ss:$16 sps:$4 sm:$0xff]   ;;  %v8426_v41 = vld [vmem:[%s8777_s2 + $0xc4] ss:$16 sps:$4 sm:$0xff]   ;;  %v8431_v42 = vld [vmem:[%s8777_s2 + $0xcc] ss:$16 sps:$4 sm:$0xff]  }
 0x56e   :  { %v3430_v24 = vadd.f32 %v3429_v46, %v3428_v45  ;;  %v3413_v25 = vadd.f32 %v3411_v49, %v3114_v43  ;;  %v8436_v43 = vld [vmem:[%s8777_s2 + $0xc0] ss:$16 sps:$4 sm:$0xff]   ;;  %v8441_v44 = vld [vmem:[%s8777_s2 + $0xc8] ss:$16 sps:$4 sm:$0xff]   ;;  %v8450_v45 = vld [vmem:[%s8777_s2 + $0xe4] ss:$16 sps:$4 sm:$0xff]  }
 0x56f   :  { %v8455_v46 = vld [vmem:[%s8777_s2 + $0xec] ss:$16 sps:$4 sm:$0xff]   ;;  %v8460_v49 = vld [vmem:[%s8777_s2 + $0xe0] ss:$16 sps:$4 sm:$0xff]  }
 0x570   :  { %6730 = vtanh.f32 %v3430_v24  ;;  %3457 = vst [vmem:[#allocation3] sm:$0x3] %v3430_v24  ;;  %v5971_v26 = vmul.f32 -1.442695, %v3413_v25  ;;  %v3443_v12 = vrot.slane %v3413_v25, 6 }
 0x571   :  { %v8465_v24 = vld [vmem:[%s8777_s2 + $0xe8] ss:$16 sps:$4 sm:$0xff]   ;;  %v8474_v25 = vld [vmem:[%s8778_s3 + $0x104] ss:$16 sps:$4 sm:$0xff]  }
 0x572   :  { %6732 = vpow2.f32 %v5971_v26  ;;  %v8479_v26 = vld [vmem:[%s8778_s3 + $0x10c] ss:$16 sps:$4 sm:$0xff]  }
 0x57a   :  { %v6731_v29 = vpop.eup %6730 }
 0x57b   :  { %v3434_v7 = vmul.f32 %v6731_v29, %v3432_v23 }
 0x57c   :  { %v6733_v8 = vpop.eup %6732 }
 0x57d   :  { %v3460_v9 = vpack.c.bf16 %v3434_v7, %v3434_v7  ;;  %3456 = vst [vmem:[#allocation2] sm:$0x3] %v3434_v7  ;;  %v3439_v10 = vadd.f32 1.0, %v6733_v8 }
 0x57f   :  { %5972 = vst [vmem:[%s8779_s4 + $0x4] sm:$0x1] %v3460_v9  ;;  %6734 = vrcp.f32 %v3439_v10 }
 0x580   :  { %6736 = vtanh.f32 %v3443_v12 }
 0x584   :  { %v3469_v13 = vld [vmem:[#allocation2] sm:$0x3] }
 0x585   :  { %v3470_v14 = vpack.c.bf16 %v3469_v13, %v3469_v13 }
 0x587   :  { %3696 = vmatmul.mubr.bf16.vlgmr.msra.gmra.mrb[40].mxu0 %v3470_v14  ;;  %3737 = vmatmul.mubr.bf16.vlgmr.msra.gmra.mrb[40].mxu1 %v3470_v14 }
 0x588   :  { %3966 = vmatpush1.bf16.msra.mxu0 %v8005_v31  ;;  %4007 = vmatpush1.bf16.msra.mxu1 %v8010_v32 }
 0x589   :  { %3967 = vmatprep.subr.bf16.mxu0 %v8015_v40  ;;  %4008 = vmatprep.subr.bf16.mxu1 %v8020_v62  ;;  %v6735_v15 = vpop.eup %6734  ;;  %v8817_v40 = vld [vmem:[#allocation8_spill] sm:$0xff]  ;;  %v8818_v62 = vld [vmem:[#allocation9_spill] sm:$0xff] }
 0x58a   :  { %3997 = vmatprep.mubr.bf16.mxu0 %v8801_v34  ;;  %4038 = vmatprep.mubr.bf16.mxu1 %v8801_v34  ;;  %v3447_v16 = vrot.slane %v6735_v15, 2  ;;  %v6737_v17 = vpop.eup %6736 }
 0x58b   :  { %v3450_v31 = vmul.f32 %v6737_v17, %v6735_v15 }
 0x58c   :  { %3968 = vmatpush1.bf16.msra.mxu0 %v8027_v63  ;;  %4009 = vmatpush1.bf16.msra.mxu1 %v8032_v3  ;;  %v3449_v30 = vmul.f32 %v3447_v16, %v3435_v38  ;;  %v3453_v63 = vrot.slane %v6735_v15, 4 }
 0x58d   :  { %3969 = vmatprep.subr.bf16.mxu0 %v8039_v37  ;;  %4010 = vmatprep.subr.bf16.mxu1 %v8044_v33  ;;  %v8819_v33 = vld [vmem:[#allocation10_spill] sm:$0xff] }
 0x58e   :  { %v3451_v32 = vadd.f32 %v3450_v31, %v3449_v30 }
 0x590   :  { %3970 = vmatpush1.bf16.msra.mxu0 %v8053_v0  ;;  %4011 = vmatpush1.bf16.msra.mxu1 %v8058_v1  ;;  %6738 = vtanh.f32 %v3451_v32  ;;  %3459 = vst [vmem:[#allocation5] sm:$0x3] %v3451_v32  ;;  %v8820_v0 = vld [vmem:[#allocation11_spill] sm:$0xff] }
 0x591   :  { %3971 = vmatprep.subr.bf16.mxu0 %v8065_v6  ;;  %4012 = vmatprep.subr.bf16.mxu1 %v8070_v47 }
 0x594   :  { %3972 = vmatpush1.bf16.msra.mxu0 %v8077_v50  ;;  %4013 = vmatpush1.bf16.msra.mxu1 %v8082_v18  ;;  %v38_v50 = vld [vmem:[%s8775_s0 + $0x28] sm:$0xf]  ;;  %v5469_v18 = vld [vmem:[%s8776_s1 + $0x14] sm:$0xf] }
 0x595   :  { %3973 = vmatprep.subr.bf16.mxu0 %v8089_v19  ;;  %4014 = vmatprep.subr.bf16.mxu1 %v8094_v20  ;;  %39 = vst [vmem:[#allocation6 + $0x14] sm:$0xf] %v38_v50  ;;  %107 = vst [vmem:[#allocation7 + $0x8] sm:$0xf] %v5469_v18  ;;  %v8282_v19 = vld [vmem:[%s8777_s2 + $0x4] ss:$16 sps:$4 sm:$0xff]  }
 0x596   :  { %v8287_v20 = vld [vmem:[%s8777_s2 + $0xc] ss:$16 sps:$4 sm:$0xff]  }
 0x598   :  { %3974 = vmatpush1.bf16.msra.mxu0 %v8101_v21  ;;  %4015 = vmatpush1.bf16.msra.mxu1 %v8106_v22  ;;  %v8292_v21 = vld [vmem:[%s8777_s2] ss:$16 sps:$4 sm:$0xff]   ;;  %v8297_v22 = vld [vmem:[%s8777_s2 + $0x8] ss:$16 sps:$4 sm:$0xff]  }
 0x599   :  { %3975 = vmatprep.subr.bf16.mxu0 %v8817_v40  ;;  %4016 = vmatprep.subr.bf16.mxu1 %v8818_v62 }
 0x59a   :  { %v6739_v3 = vpop.eup %6738 }
 0x59b   :  { %v3455_v37 = vmul.f32 %v6739_v3, %v3453_v63 }
 0x59c   :  { %3976 = vmatpush1.bf16.msra.mxu0 %v8125_v39  ;;  %4017 = vmatpush1.bf16.msra.mxu1 %v8130_v36  ;;  %v8316_v39 = vld [vmem:[%s8777_s2 + $0x20] ss:$16 sps:$4 sm:$0xff]   ;;  %v8321_v36 = vld [vmem:[%s8777_s2 + $0x28] ss:$16 sps:$4 sm:$0xff]   ;;  %v3467_v8 = vld [vmem:[#allocation6 + $0x14] sm:$0xf] }
 0x59d   :  { %3977 = vmatprep.subr.bf16.mxu0 %v8819_v33  ;;  %4018 = vmatprep.subr.bf16.mxu1 %v8820_v0  ;;  %v3463_v1 = vpack.c.bf16 %v3455_v37, %v3455_v37  ;;  %3458 = vst [vmem:[#allocation4] sm:$0x3] %v3455_v37  ;;  %v3468_v38 = vunpack.c.l.bf16 %v3467_v8 }
 0x59f   :  { %5973 = vst [vmem:[%s8780_s5 + $0x3] sm:$0x1] %v3463_v1  ;;  %v3769_v1 = vld [vmem:[#allocation7 + $0x8] sm:$0xf] }
 0x5a0   :  { %3978 = vmatpush1.bf16.msra.mxu0 %v8149_v28  ;;  %4019 = vmatpush1.bf16.msra.mxu1 %v8154_v27  ;;  %v8306_v27 = vld [vmem:[%s8777_s2 + $0x24] ss:$16 sps:$4 sm:$0xff]   ;;  %v8311_v28 = vld [vmem:[%s8777_s2 + $0x2c] ss:$16 sps:$4 sm:$0xff]  }
 0x5a1   :  { %3979 = vmatprep.subr.bf16.mxu0 %v8161_v35  ;;  %4020 = vmatprep.subr.bf16.mxu1 %v8166_v4  ;;  %v8340_v35 = vld [vmem:[%s8777_s2 + $0x40] ss:$16 sps:$4 sm:$0xff]   ;;  %v8345_v4 = vld [vmem:[%s8777_s2 + $0x48] ss:$16 sps:$4 sm:$0xff]  }
 0x5a4   :  { %3980 = vmatpush1.bf16.msra.mxu0 %v8176_v61  ;;  %4021 = vmatpush1.bf16.msra.mxu1 %v8181_v57  ;;  %v3771_v6 = vld [vmem:[#allocation4] sm:$0x3]  ;;  %v8335_v61 = vld [vmem:[%s8777_s2 + $0x4c] ss:$16 sps:$4 sm:$0xff]  }
 0x5a5   :  { %v3772_v47 = vpack.c.bf16 %v3771_v6, %v3771_v6  ;;  %4319 = vmatprep.subr.bf16.mxu0 %v8282_v19  ;;  %4360 = vmatprep.subr.bf16.mxu1 %v8287_v20  ;;  %v8330_v57 = vld [vmem:[%s8777_s2 + $0x44] ss:$16 sps:$4 sm:$0xff]  }
 0x5a7   :  { %3998 = vmatmul.mubr.bf16.vlgmr.msra.gmra.mrb[44].mxu0 %v3772_v47  ;;  %4039 = vmatmul.mubr.bf16.vlgmr.msra.gmra.mrb[44].mxu1 %v3772_v47 }
 0x5a8   :  { %4351 = vmatprep.mubr.bf16.mxu0 %v8801_v34  ;;  %4392 = vmatprep.mubr.bf16.mxu1 %v8801_v34 }
 0x5a9   :  { %4320 = vmatpush1.bf16.msra.mxu0 %v8292_v21  ;;  %4361 = vmatpush1.bf16.msra.mxu1 %v8297_v22 }
 0x5aa   :  { %4321 = vmatprep.subr.bf16.mxu0 %v8306_v27  ;;  %4362 = vmatprep.subr.bf16.mxu1 %v8311_v28 }
 0x5ad   :  { %4322 = vmatpush1.bf16.msra.mxu0 %v8316_v39  ;;  %4363 = vmatpush1.bf16.msra.mxu1 %v8321_v36 }
 0x5ae   :  { %4323 = vmatprep.subr.bf16.mxu0 %v8330_v57  ;;  %4364 = vmatprep.subr.bf16.mxu1 %v8335_v61 }
 0x5b1   :  { %4324 = vmatpush1.bf16.msra.mxu0 %v8340_v35  ;;  %4365 = vmatpush1.bf16.msra.mxu1 %v8345_v4 }
 0x5b2   :  { %4325 = vmatprep.subr.bf16.mxu0 %v8354_v2  ;;  %4366 = vmatprep.subr.bf16.mxu1 %v8359_v51 }
 0x5b5   :  { %4326 = vmatpush1.bf16.msra.mxu0 %v8364_v52  ;;  %4367 = vmatpush1.bf16.msra.mxu1 %v8369_v53 }
 0x5b6   :  { %4327 = vmatprep.subr.bf16.mxu0 %v8378_v54  ;;  %4368 = vmatprep.subr.bf16.mxu1 %v8383_v55 }
 0x5b9   :  { %4328 = vmatpush1.bf16.msra.mxu0 %v8388_v56  ;;  %4369 = vmatpush1.bf16.msra.mxu1 %v8393_v58 }
 0x5ba   :  { %4329 = vmatprep.subr.bf16.mxu0 %v8402_v59  ;;  %4370 = vmatprep.subr.bf16.mxu1 %v8407_v60 }
 0x5bd   :  { %4330 = vmatpush1.bf16.msra.mxu0 %v8412_v48  ;;  %4371 = vmatpush1.bf16.msra.mxu1 %v8417_v5 }
 0x5be   :  { %4331 = vmatprep.subr.bf16.mxu0 %v8426_v41  ;;  %4372 = vmatprep.subr.bf16.mxu1 %v8431_v42 }
 0x5c1   :  { %4332 = vmatpush1.bf16.msra.mxu0 %v8436_v43  ;;  %4373 = vmatpush1.bf16.msra.mxu1 %v8441_v44 }
 0x5c2   :  { %4333 = vmatprep.subr.bf16.mxu0 %v8450_v45  ;;  %4374 = vmatprep.subr.bf16.mxu1 %v8455_v46 }
 0x5c5   :  { %4334 = vmatpush1.bf16.msra.mxu0 %v8460_v49  ;;  %4375 = vmatpush1.bf16.msra.mxu1 %v8465_v24 }
 0x5c6   :  { %4621 = vmatprep.subr.bf16.mxu0 %v8474_v25  ;;  %4662 = vmatprep.subr.bf16.mxu1 %v8479_v26 }
 0x65a   :  { %v3697_v23 = vpop.f32.mrb[40].mxu0  ;;  %v3738_v29 = vpop.f32.mrb[40].mxu1 }
 0x65b   :  { %v3699_v7 = vpop.f32.mrb[41].mxu0  ;;  %v3740_v9 = vpop.f32.mrb[41].mxu1 }
 0x65c   :  { %v3749_v10 = vcombine.low %v3697_v23, %v3699_v7  ;;  %v3750_v12 = vcombine.low %v3738_v29, %v3740_v9  ;;  %v3701_v13 = vpop.f32.mrb[42].mxu0  ;;  %v3742_v14 = vpop.f32.mrb[42].mxu1 }
 0x65d   :  { %v3702_v15 = vpop.f32.mrb[43].mxu0  ;;  %v3743_v16 = vpop.f32.mrb[43].mxu1  ;;  %v3770_v14 = vunpack.c.l.bf16 %v3769_v1 }
 0x65e   :  { %v3757_v17 = vrot.slane %v3749_v10, %v7251_v11  ;;  %v3764_v30 = vrot.slane %v3750_v12, %v7251_v11  ;;  %v4070_v12 = vld [vmem:[#allocation3] sm:$0x3] }
 0x660   :  { %v3765_v31 = vcombine.low %v3757_v17, %v3764_v30 }
 0x662   :  { %v3767_v32 = vadd.f32 %v3765_v31, %v3468_v38 }
 0x664   :  { %v6070_v40 = vmul.f32 -1.442695, %v3767_v32  ;;  %v4078_v3 = vrot.slane %v3767_v32, 6 }
 0x666   :  { %6740 = vpow2.f32 %v6070_v40 }
 0x670   :  { %v6741_v62 = vpop.eup %6740 }
 0x671   :  { %v4074_v63 = vadd.f32 1.0, %v6741_v62 }
 0x673   :  { %6742 = vrcp.f32 %v4074_v63 }
 0x674   :  { %6744 = vtanh.f32 %v4078_v3 }
 0x67a   :  { %v3999_v37 = vpop.f32.mrb[44].mxu0  ;;  %v4040_v33 = vpop.f32.mrb[44].mxu1 }
 0x67b   :  { %v4001_v0 = vpop.f32.mrb[45].mxu0  ;;  %v4042_v6 = vpop.f32.mrb[45].mxu1 }
 0x67c   :  { %v4051_v50 = vcombine.low %v3999_v37, %v4001_v0  ;;  %v4052_v18 = vcombine.low %v4040_v33, %v4042_v6  ;;  %v4003_v23 = vpop.f32.mrb[46].mxu0  ;;  %v4044_v29 = vpop.f32.mrb[46].mxu1  ;;  %v8493_v6 = vld [vmem:[%s8778_s3 + $0x100] ss:$16 sps:$4 sm:$0xff]  }
 0x67d   :  { %v6743_v47 = vpop.eup %6742  ;;  %v4004_v8 = vpop.f32.mrb[47].mxu0  ;;  %v8508_v23 = vld [vmem:[%s8778_s3 + $0x12c] ss:$16 sps:$4 sm:$0xff]   ;;  %v8515_v29 = vld [vmem:[%s8778_s3 + $0x120] ss:$16 sps:$4 sm:$0xff]  }
 0x67e   :  { %v4082_v7 = vrot.slane %v6743_v47, 2  ;;  %v4045_v9 = vpop.f32.mrb[47].mxu1  ;;  %v6745_v10 = vpop.eup %6744  ;;  %v4059_v13 = vrot.slane %v4051_v50, %v7251_v11  ;;  %v4066_v15 = vrot.slane %v4052_v18, %v7251_v11  ;;  %v4088_v40 = vrot.slane %v6743_v47, 4  ;;  %v8503_v18 = vld [vmem:[%s8778_s3 + $0x124] ss:$16 sps:$4 sm:$0xff]  }
 0x67f   :  { %v4085_v17 = vmul.f32 %v6745_v10, %v6743_v47  ;;  %v8498_v47 = vld [vmem:[%s8778_s3 + $0x108] ss:$16 sps:$4 sm:$0xff]   ;;  %v8527_v8 = vld [vmem:[%s8778_s3 + $0x144] ss:$16 sps:$4 sm:$0xff]   ;;  %v8532_v9 = vld [vmem:[%s8778_s3 + $0x14c] ss:$16 sps:$4 sm:$0xff]  }
 0x680   :  { %v4084_v16 = vmul.f32 %v4082_v7, %v4070_v12  ;;  %v4067_v38 = vcombine.low %v4059_v13, %v4066_v15  ;;  %v8520_v7 = vld [vmem:[%s8778_s3 + $0x128] ss:$16 sps:$4 sm:$0xff]   ;;  %v8541_v15 = vld [vmem:[%s8778_s3 + $0x140] ss:$16 sps:$4 sm:$0xff]  }
 0x682   :  { %v4086_v30 = vadd.f32 %v4085_v17, %v4084_v16  ;;  %v4069_v31 = vadd.f32 %v4067_v38, %v3770_v14  ;;  %v4091_v14 = vld [vmem:[#allocation5] sm:$0x3]  ;;  %v8546_v16 = vld [vmem:[%s8778_s3 + $0x148] ss:$16 sps:$4 sm:$0xff]  }
 0x684   :  { %6746 = vtanh.f32 %v4086_v30  ;;  %4113 = vst [vmem:[#allocation3] sm:$0x3] %v4086_v30  ;;  %v6071_v32 = vmul.f32 -1.442695, %v4069_v31  ;;  %v4099_v0 = vrot.slane %v4069_v31, 6 }
 0x685   :  { %v8553_v30 = vld [vmem:[%s8778_s3 + $0x164] ss:$16 sps:$4 sm:$0xff]   ;;  %v8558_v31 = vld [vmem:[%s8778_s3 + $0x16c] ss:$16 sps:$4 sm:$0xff]  }
 0x686   :  { %6748 = vpow2.f32 %v6071_v32 }
 0x68e   :  { %v6747_v62 = vpop.eup %6746 }
 0x68f   :  { %v4090_v63 = vmul.f32 %v6747_v62, %v4088_v40  ;;  %v8565_v40 = vld [vmem:[%s8778_s3 + $0x160] ss:$16 sps:$4 sm:$0xff]   ;;  %v8570_v62 = vld [vmem:[%s8778_s3 + $0x168] ss:$16 sps:$4 sm:$0xff]  }
 0x690   :  { %v6749_v3 = vpop.eup %6748 }
 0x691   :  { %v4116_v37 = vpack.c.bf16 %v4090_v63, %v4090_v63  ;;  %4112 = vst [vmem:[#allocation2] sm:$0x3] %v4090_v63  ;;  %v4095_v33 = vadd.f32 1.0, %v6749_v3  ;;  %v8577_v63 = vld [vmem:[%s8778_s3 + $0x184] ss:$16 sps:$4 sm:$0xff]  }
 0x692   :  { %v8582_v3 = vld [vmem:[%s8778_s3 + $0x18c] ss:$16 sps:$4 sm:$0xff]  }
 0x693   :  { %6072 = vst [vmem:[%s8779_s4 + $0x5] sm:$0x1] %v4116_v37  ;;  %6750 = vrcp.f32 %v4095_v33  ;;  %v8589_v37 = vld [vmem:[%s8778_s3 + $0x180] ss:$16 sps:$4 sm:$0xff]   ;;  %v8594_v33 = vld [vmem:[%s8778_s3 + $0x188] ss:$16 sps:$4 sm:$0xff]  }
 0x694   :  { %6752 = vtanh.f32 %v4099_v0  ;;  %v8601_v0 = vld [vmem:[%s8778_s3 + $0x1a4] ss:$16 sps:$4 sm:$0xff]  }
 0x695   :  { %8821 = vst [vmem:[#allocation8_spill] sm:$0xff] %v8601_v0 }
 0x698   :  { %v4125_v1 = vld [vmem:[#allocation2] sm:$0x3] }
 0x699   :  { %v4126_v50 = vpack.c.bf16 %v4125_v1, %v4125_v1  ;;  %v8606_v1 = vld [vmem:[%s8778_s3 + $0x1ac] ss:$16 sps:$4 sm:$0xff]  }
 0x69a   :  { %8822 = vst [vmem:[#allocation9_spill] sm:$0xff] %v8606_v1 }
 0x69b   :  { %4352 = vmatmul.mubr.bf16.vlgmr.msra.gmra.mrb[48].mxu0 %v4126_v50  ;;  %4393 = vmatmul.mubr.bf16.vlgmr.msra.gmra.mrb[48].mxu1 %v4126_v50  ;;  %v8613_v50 = vld [vmem:[%s8778_s3 + $0x1a0] ss:$16 sps:$4 sm:$0xff]  }
 0x69c   :  { %4622 = vmatpush1.bf16.msra.mxu0 %v8493_v6  ;;  %4663 = vmatpush1.bf16.msra.mxu1 %v8498_v47 }
 0x69d   :  { %4623 = vmatprep.subr.bf16.mxu0 %v8503_v18  ;;  %4664 = vmatprep.subr.bf16.mxu1 %v8508_v23  ;;  %v6751_v10 = vpop.eup %6750 }
 0x69e   :  { %4653 = vmatprep.mubr.bf16.mxu0 %v8801_v34  ;;  %4694 = vmatprep.mubr.bf16.mxu1 %v8801_v34  ;;  %v4103_v12 = vrot.slane %v6751_v10, 2  ;;  %v6753_v13 = vpop.eup %6752 }
 0x69f   :  { %v4106_v38 = vmul.f32 %v6753_v13, %v6751_v10  ;;  %v8625_v13 = vld [vmem:[%s8778_s3 + $0x1c4] ss:$16 sps:$4 sm:$0xff]  }
 0x6a0   :  { %4624 = vmatpush1.bf16.msra.mxu0 %v8515_v29  ;;  %4665 = vmatpush1.bf16.msra.mxu1 %v8520_v7  ;;  %v4105_v17 = vmul.f32 %v4103_v12, %v4091_v14  ;;  %v8618_v12 = vld [vmem:[%s8778_s3 + $0x1a8] ss:$16 sps:$4 sm:$0xff]   ;;  %8823 = vst [vmem:[#allocation10_spill] sm:$0xff] %v8625_v13  ;;  %v8630_v14 = vld [vmem:[%s8778_s3 + $0x1cc] ss:$16 sps:$4 sm:$0xff]  }
 0x6a1   :  { %4625 = vmatprep.subr.bf16.mxu0 %v8527_v8  ;;  %4666 = vmatprep.subr.bf16.mxu1 %v8532_v9  ;;  %8824 = vst [vmem:[#allocation11_spill] sm:$0xff] %v8630_v14 }
 0x6a2   :  { %v4107_v32 = vadd.f32 %v4106_v38, %v4105_v17  ;;  %v4109_v17 = vrot.slane %v6751_v10, 4  ;;  %v8649_v10 = vld [vmem:[%s8778_s3 + $0x1e4] ss:$16 sps:$4 sm:$0xff]  }
 0x6a4   :  { %4626 = vmatpush1.bf16.msra.mxu0 %v8541_v15  ;;  %4667 = vmatpush1.bf16.msra.mxu1 %v8546_v16  ;;  %6754 = vtanh.f32 %v4107_v32  ;;  %4115 = vst [vmem:[#allocation5] sm:$0x3] %v4107_v32 }
 0x6a5   :  { %4627 = vmatprep.subr.bf16.mxu0 %v8553_v30  ;;  %4668 = vmatprep.subr.bf16.mxu1 %v8558_v31 }
 0x6a8   :  { %4628 = vmatpush1.bf16.msra.mxu0 %v8565_v40  ;;  %4669 = vmatpush1.bf16.msra.mxu1 %v8570_v62 }
 0x6a9   :  { %4629 = vmatprep.subr.bf16.mxu0 %v8577_v63  ;;  %4670 = vmatprep.subr.bf16.mxu1 %v8582_v3 }
 0x6ac   :  { %4630 = vmatpush1.bf16.msra.mxu0 %v8589_v37  ;;  %4671 = vmatpush1.bf16.msra.mxu1 %v8594_v33 }
 0x6ad   :  { %4631 = vmatprep.subr.bf16.mxu0 %v8601_v0  ;;  %4672 = vmatprep.subr.bf16.mxu1 %v8606_v1  ;;  %v8637_v1 = vld [vmem:[%s8778_s3 + $0x1c0] ss:$16 sps:$4 sm:$0xff]   ;;  %v8642_v0 = vld [vmem:[%s8778_s3 + $0x1c8] ss:$16 sps:$4 sm:$0xff]  }
 0x6ae   :  { %v6755_v38 = vpop.eup %6754 }
 0x6af   :  { %v4111_v32 = vmul.f32 %v6755_v38, %v4109_v17  ;;  %v8654_v17 = vld [vmem:[%s8778_s3 + $0x1ec] ss:$16 sps:$4 sm:$0xff]  }
 0x6b0   :  { %4632 = vmatpush1.bf16.msra.mxu0 %v8613_v50  ;;  %4673 = vmatpush1.bf16.msra.mxu1 %v8618_v12 }
 0x6b1   :  { %4633 = vmatprep.subr.bf16.mxu0 %v8625_v13  ;;  %4674 = vmatprep.subr.bf16.mxu1 %v8630_v14  ;;  %v4119_v38 = vpack.c.bf16 %v4111_v32, %v4111_v32  ;;  %4114 = vst [vmem:[#allocation4] sm:$0x3] %v4111_v32  ;;  %v8664_v14 = vld [vmem:[%s8778_s3 + $0x1e0] ss:$16 sps:$4 sm:$0xff]   ;;  %v8669_v13 = vld [vmem:[%s8778_s3 + $0x1e8] ss:$16 sps:$4 sm:$0xff]  }
 0x6b3   :  { %6073 = vst [vmem:[%s8780_s5 + $0x2] sm:$0x1] %v4119_v38 }
 0x6b4   :  { %4634 = vmatpush1.bf16.msra.mxu0 %v8637_v1  ;;  %4675 = vmatpush1.bf16.msra.mxu1 %v8642_v0 }
 0x6b5   :  { %4635 = vmatprep.subr.bf16.mxu0 %v8649_v10  ;;  %4676 = vmatprep.subr.bf16.mxu1 %v8654_v17 }
 0x6b8   :  { %4636 = vmatpush1.bf16.msra.mxu0 %v8664_v14  ;;  %4677 = vmatpush1.bf16.msra.mxu1 %v8669_v13  ;;  %v4427_v32 = vld [vmem:[#allocation4] sm:$0x3] }
 0x6b9   :  { %4975 = vmatprep.subr.bf16.mxu0 %v8282_v19  ;;  %5016 = vmatprep.subr.bf16.mxu1 %v8287_v20  ;;  %v4428_v38 = vpack.c.bf16 %v4427_v32, %v4427_v32  ;;  %v40_v19 = vld [vmem:[%s8775_s0 + $0x30] sm:$0xf]  ;;  %v5468_v20 = vld [vmem:[%s8776_s1 + $0xc] sm:$0xf] }
 0x6ba   :  { %41 = vst [vmem:[#allocation6 + $0x18] sm:$0xf] %v40_v19  ;;  %105 = vst [vmem:[#allocation7 + $0x4] sm:$0xf] %v5468_v20  ;;  %v4726_v19 = vld [vmem:[#allocation3] sm:$0x3] }
 0x6bb   :  { %4654 = vmatmul.mubr.bf16.vlgmr.msra.gmra.mrb[52].mxu0 %v4428_v38  ;;  %4695 = vmatmul.mubr.bf16.vlgmr.msra.gmra.mrb[52].mxu1 %v4428_v38 }
 0x6bc   :  { %4976 = vmatpush1.bf16.msra.mxu0 %v8292_v21  ;;  %5017 = vmatpush1.bf16.msra.mxu1 %v8297_v22 }
 0x6bd   :  { %4977 = vmatprep.subr.bf16.mxu0 %v8306_v27  ;;  %5018 = vmatprep.subr.bf16.mxu1 %v8311_v28 }
 0x6be   :  { %5007 = vmatprep.mubr.bf16.mxu0 %v8801_v34  ;;  %5048 = vmatprep.mubr.bf16.mxu1 %v8801_v34 }
 0x6c0   :  { %4978 = vmatpush1.bf16.msra.mxu0 %v8316_v39  ;;  %5019 = vmatpush1.bf16.msra.mxu1 %v8321_v36 }
 0x6c1   :  { %4979 = vmatprep.subr.bf16.mxu0 %v8330_v57  ;;  %5020 = vmatprep.subr.bf16.mxu1 %v8335_v61  ;;  %v4123_v28 = vld [vmem:[#allocation6 + $0x18] sm:$0xf] }
 0x6c4   :  { %4980 = vmatpush1.bf16.msra.mxu0 %v8340_v35  ;;  %5021 = vmatpush1.bf16.msra.mxu1 %v8345_v4 }
 0x6c5   :  { %4981 = vmatprep.subr.bf16.mxu0 %v8354_v2  ;;  %5022 = vmatprep.subr.bf16.mxu1 %v8359_v51 }
 0x6c8   :  { %4982 = vmatpush1.bf16.msra.mxu0 %v8364_v52  ;;  %5023 = vmatpush1.bf16.msra.mxu1 %v8369_v53  ;;  %v4124_v52 = vunpack.c.l.bf16 %v4123_v28 }
 0x6c9   :  { %4983 = vmatprep.subr.bf16.mxu0 %v8378_v54  ;;  %5024 = vmatprep.subr.bf16.mxu1 %v8383_v55 }
 0x6cc   :  { %4984 = vmatpush1.bf16.msra.mxu0 %v8388_v56  ;;  %5025 = vmatpush1.bf16.msra.mxu1 %v8393_v58 }
 0x6cd   :  { %4985 = vmatprep.subr.bf16.mxu0 %v8402_v59  ;;  %5026 = vmatprep.subr.bf16.mxu1 %v8407_v60 }
 0x6d0   :  { %4986 = vmatpush1.bf16.msra.mxu0 %v8412_v48  ;;  %5027 = vmatpush1.bf16.msra.mxu1 %v8417_v5 }
 0x6d1   :  { %4987 = vmatprep.subr.bf16.mxu0 %v8426_v41  ;;  %5028 = vmatprep.subr.bf16.mxu1 %v8431_v42  ;;  %v4425_v42 = vld [vmem:[#allocation7 + $0x4] sm:$0xf] }
 0x6d4   :  { %4988 = vmatpush1.bf16.msra.mxu0 %v8436_v43  ;;  %5029 = vmatpush1.bf16.msra.mxu1 %v8441_v44 }
 0x6d5   :  { %4989 = vmatprep.subr.bf16.mxu0 %v8450_v45  ;;  %5030 = vmatprep.subr.bf16.mxu1 %v8455_v46 }
 0x6d8   :  { %4990 = vmatpush1.bf16.msra.mxu0 %v8460_v49  ;;  %5031 = vmatpush1.bf16.msra.mxu1 %v8465_v24 }
 0x6d9   :  { %5276 = vmatprep.subr.bf16.mxu0 %v8474_v25  ;;  %5317 = vmatprep.subr.bf16.mxu1 %v8479_v26 }
 0x76e   :  { %v4353_v21 = vpop.f32.mrb[48].mxu0  ;;  %v4394_v22 = vpop.f32.mrb[48].mxu1 }
 0x76f   :  { %v4355_v27 = vpop.f32.mrb[49].mxu0  ;;  %v4396_v39 = vpop.f32.mrb[49].mxu1 }
 0x770   :  { %v4405_v36 = vcombine.low %v4353_v21, %v4355_v27  ;;  %v4406_v57 = vcombine.low %v4394_v22, %v4396_v39  ;;  %v4357_v61 = vpop.f32.mrb[50].mxu0  ;;  %v4398_v35 = vpop.f32.mrb[50].mxu1  ;;  %v4426_v21 = vunpack.c.l.bf16 %v4425_v42 }
 0x771   :  { %v4358_v4 = vpop.f32.mrb[51].mxu0  ;;  %v4399_v2 = vpop.f32.mrb[51].mxu1 }
 0x772   :  { %v4413_v51 = vrot.slane %v4405_v36, %v7251_v11  ;;  %v4420_v53 = vrot.slane %v4406_v57, %v7251_v11 }
 0x774   :  { %v4421_v54 = vcombine.low %v4413_v51, %v4420_v53 }
 0x776   :  { %v4423_v55 = vadd.f32 %v4421_v54, %v4124_v52 }
 0x778   :  { %v6170_v56 = vmul.f32 -1.442695, %v4423_v55  ;;  %v4734_v60 = vrot.slane %v4423_v55, 6 }
 0x77a   :  { %6756 = vpow2.f32 %v6170_v56 }
 0x784   :  { %v6757_v58 = vpop.eup %6756 }
 0x785   :  { %v4730_v59 = vadd.f32 1.0, %v6757_v58 }
 0x787   :  { %6758 = vrcp.f32 %v4730_v59 }
 0x788   :  { %6760 = vtanh.f32 %v4734_v60 }
 0x78e   :  { %v4655_v48 = vpop.f32.mrb[52].mxu0  ;;  %v4696_v5 = vpop.f32.mrb[52].mxu1 }
 0x78f   :  { %v4657_v41 = vpop.f32.mrb[53].mxu0  ;;  %v4698_v43 = vpop.f32.mrb[53].mxu1 }
 0x790   :  { %v4707_v45 = vcombine.low %v4655_v48, %v4657_v41  ;;  %v4708_v46 = vcombine.low %v4696_v5, %v4698_v43  ;;  %v4659_v49 = vpop.f32.mrb[54].mxu0  ;;  %v4700_v24 = vpop.f32.mrb[54].mxu1  ;;  %v4747_v48 = vld [vmem:[#allocation5] sm:$0x3] }
 0x791   :  { %v6759_v44 = vpop.eup %6758  ;;  %v4660_v26 = vpop.f32.mrb[55].mxu0 }
 0x792   :  { %v4738_v25 = vrot.slane %v6759_v44, 2  ;;  %v4701_v32 = vpop.f32.mrb[55].mxu1  ;;  %v6761_v38 = vpop.eup %6760  ;;  %v4715_v20 = vrot.slane %v4707_v45, %v7251_v11  ;;  %v4722_v22 = vrot.slane %v4708_v46, %v7251_v11  ;;  %v4744_v35 = vrot.slane %v6759_v44, 4 }
 0x793   :  { %v4741_v28 = vmul.f32 %v6761_v38, %v6759_v44 }
 0x794   :  { %v4740_v27 = vmul.f32 %v4738_v25, %v4726_v19  ;;  %v4723_v39 = vcombine.low %v4715_v20, %v4722_v22 }
 0x796   :  { %v4742_v36 = vadd.f32 %v4741_v28, %v4740_v27  ;;  %v4725_v57 = vadd.f32 %v4723_v39, %v4426_v21 }
 0x798   :  { %6762 = vtanh.f32 %v4742_v36  ;;  %4769 = vst [vmem:[#allocation3] sm:$0x3] %v4742_v36  ;;  %v6171_v61 = vmul.f32 -1.442695, %v4725_v57  ;;  %v4755_v54 = vrot.slane %v4725_v57, 6 }
 0x79a   :  { %6764 = vpow2.f32 %v6171_v61 }
 0x79f   :  { %v5381_v61 = vld [vmem:[#allocation3] sm:$0x3] }
 0x7a2   :  { %v6763_v4 = vpop.eup %6762 }
 0x7a3   :  { %v4746_v2 = vmul.f32 %v6763_v4, %v4744_v35 }
 0x7a4   :  { %v6765_v51 = vpop.eup %6764 }
 0x7a5   :  { %v4772_v52 = vpack.c.bf16 %v4746_v2, %v4746_v2  ;;  %4768 = vst [vmem:[#allocation2] sm:$0x3] %v4746_v2  ;;  %v4751_v53 = vadd.f32 1.0, %v6765_v51 }
 0x7a7   :  { %6172 = vst [vmem:[%s8779_s4 + $0x6] sm:$0x1] %v4772_v52  ;;  %6766 = vrcp.f32 %v4751_v53 }
 0x7a8   :  { %6768 = vtanh.f32 %v4755_v54 }
 0x7ac   :  { %v4781_v55 = vld [vmem:[#allocation2] sm:$0x3] }
 0x7ad   :  { %v4782_v56 = vpack.c.bf16 %v4781_v55, %v4781_v55 }
 0x7af   :  { %5008 = vmatmul.mubr.bf16.vlgmr.msra.gmra.mrb[56].mxu0 %v4782_v56  ;;  %5049 = vmatmul.mubr.bf16.vlgmr.msra.gmra.mrb[56].mxu1 %v4782_v56 }
 0x7b0   :  { %5277 = vmatpush1.bf16.msra.mxu0 %v8493_v6  ;;  %5318 = vmatpush1.bf16.msra.mxu1 %v8498_v47 }
 0x7b1   :  { %5278 = vmatprep.subr.bf16.mxu0 %v8503_v18  ;;  %5319 = vmatprep.subr.bf16.mxu1 %v8508_v23  ;;  %v6767_v58 = vpop.eup %6766  ;;  %v8826_v18 = vld [vmem:[#allocation9_spill] sm:$0xff] }
 0x7b2   :  { %5308 = vmatprep.mubr.bf16.mxu0 %v8801_v34  ;;  %5349 = vmatprep.mubr.bf16.mxu1 %v8801_v34  ;;  %v4759_v59 = vrot.slane %v6767_v58, 2  ;;  %v6769_v60 = vpop.eup %6768  ;;  %v8825_v34 = vld [vmem:[#allocation8_spill] sm:$0xff]  ;;  %v4765_v23 = vrot.slane %v6767_v58, 4 }
 0x7b3   :  { %v4762_v6 = vmul.f32 %v6769_v60, %v6767_v58 }
 0x7b4   :  { %5279 = vmatpush1.bf16.msra.mxu0 %v8515_v29  ;;  %5320 = vmatpush1.bf16.msra.mxu1 %v8520_v7  ;;  %v4761_v5 = vmul.f32 %v4759_v59, %v4747_v48 }
 0x7b5   :  { %5280 = vmatprep.subr.bf16.mxu0 %v8527_v8  ;;  %5321 = vmatprep.subr.bf16.mxu1 %v8532_v9  ;;  %v8827_v8 = vld [vmem:[#allocation10_spill] sm:$0xff]  ;;  %v8828_v9 = vld [vmem:[#allocation11_spill] sm:$0xff] }
 0x7b6   :  { %v4763_v47 = vadd.f32 %v4762_v6, %v4761_v5 }
 0x7b8   :  { %5281 = vmatpush1.bf16.msra.mxu0 %v8541_v15  ;;  %5322 = vmatpush1.bf16.msra.mxu1 %v8546_v16  ;;  %6770 = vtanh.f32 %v4763_v47  ;;  %4771 = vst [vmem:[#allocation5] sm:$0x3] %v4763_v47 }
 0x7b9   :  { %5282 = vmatprep.subr.bf16.mxu0 %v8553_v30  ;;  %5323 = vmatprep.subr.bf16.mxu1 %v8558_v31  ;;  %v42_v31 = vld [vmem:[%s8775_s0 + $0x38] sm:$0xf] }
 0x7ba   :  { %43 = vst [vmem:[#allocation6 + $0x1c] sm:$0xf] %v42_v31 }
 0x7bc   :  { %5283 = vmatpush1.bf16.msra.mxu0 %v8565_v40  ;;  %5324 = vmatpush1.bf16.msra.mxu1 %v8570_v62  ;;  %v5467_v40 = vld [vmem:[%s8776_s1 + $0x4] sm:$0xf] }
 0x7bd   :  { %5284 = vmatprep.subr.bf16.mxu0 %v8577_v63  ;;  %5325 = vmatprep.subr.bf16.mxu1 %v8582_v3  ;;  %103 = vst [vmem:[#allocation7] sm:$0xf] %v5467_v40 }
 0x7c0   :  { %5285 = vmatpush1.bf16.msra.mxu0 %v8589_v37  ;;  %5326 = vmatpush1.bf16.msra.mxu1 %v8594_v33 }
 0x7c1   :  { %5286 = vmatprep.subr.bf16.mxu0 %v8825_v34  ;;  %5327 = vmatprep.subr.bf16.mxu1 %v8826_v18  ;;  %v4779_v37 = vld [vmem:[#allocation6 + $0x1c] sm:$0xf] }
 0x7c2   :  { %v6771_v29 = vpop.eup %6770 }
 0x7c3   :  { %v4767_v7 = vmul.f32 %v6771_v29, %v4765_v23  ;;  %v5402_v23 = vld [vmem:[#allocation5] sm:$0x3] }
 0x7c4   :  { %5287 = vmatpush1.bf16.msra.mxu0 %v8613_v50  ;;  %5328 = vmatpush1.bf16.msra.mxu1 %v8618_v12  ;;  %v5080_v32 = vld [vmem:[#allocation7] sm:$0xf] }
 0x7c5   :  { %5288 = vmatprep.subr.bf16.mxu0 %v8827_v8  ;;  %5329 = vmatprep.subr.bf16.mxu1 %v8828_v9  ;;  %v4775_v15 = vpack.c.bf16 %v4767_v7, %v4767_v7  ;;  %4770 = vst [vmem:[#allocation4] sm:$0x3] %v4767_v7  ;;  %v5081_v4 = vunpack.c.l.bf16 %v5080_v32 }
 0x7c7   :  { %6173 = vst [vmem:[%s8780_s5 + $0x1] sm:$0x1] %v4775_v15 }
 0x7c8   :  { %5289 = vmatpush1.bf16.msra.mxu0 %v8637_v1  ;;  %5330 = vmatpush1.bf16.msra.mxu1 %v8642_v0 }
 0x7c9   :  { %5290 = vmatprep.subr.bf16.mxu0 %v8649_v10  ;;  %5331 = vmatprep.subr.bf16.mxu1 %v8654_v17  ;;  %v4780_v17 = vunpack.c.l.bf16 %v4779_v37 }
 0x7cc   :  { %5291 = vmatpush1.bf16.msra.mxu0 %v8664_v14  ;;  %5332 = vmatpush1.bf16.msra.mxu1 %v8669_v13  ;;  %v5082_v16 = vld [vmem:[#allocation4] sm:$0x3] }
 0x7cd   :  { %v5083_v30 = vpack.c.bf16 %v5082_v16, %v5082_v16 }
 0x7cf   :  { %5309 = vmatmul.mubr.bf16.vlgmr.msra.gmra.mrb[60].mxu0 %v5083_v30  ;;  %5350 = vmatmul.mubr.bf16.vlgmr.msra.gmra.mrb[60].mxu1 %v5083_v30 }
 0x882   :  { %v5009_v62 = vpop.f32.mrb[56].mxu0  ;;  %v5050_v63 = vpop.f32.mrb[56].mxu1 }
 0x883   :  { %v5011_v3 = vpop.f32.mrb[57].mxu0  ;;  %v5052_v33 = vpop.f32.mrb[57].mxu1 }
 0x884   :  { %v5061_v0 = vcombine.low %v5009_v62, %v5011_v3  ;;  %v5062_v1 = vcombine.low %v5050_v63, %v5052_v33  ;;  %v5013_v50 = vpop.f32.mrb[58].mxu0  ;;  %v5054_v12 = vpop.f32.mrb[58].mxu1 }
 0x885   :  { %v5014_v13 = vpop.f32.mrb[59].mxu0  ;;  %v5055_v14 = vpop.f32.mrb[59].mxu1 }
 0x886   :  { %v5069_v10 = vrot.slane %v5061_v0, %v7251_v11  ;;  %v5076_v41 = vrot.slane %v5062_v1, %v7251_v11 }
 0x888   :  { %v5077_v42 = vcombine.low %v5069_v10, %v5076_v41 }
 0x88a   :  { %v5079_v43 = vadd.f32 %v5077_v42, %v4780_v17 }
 0x88c   :  { %v6270_v44 = vmul.f32 -1.442695, %v5079_v43  ;;  %v5389_v49 = vrot.slane %v5079_v43, 6 }
 0x88e   :  { %6772 = vpow2.f32 %v6270_v44 }
 0x898   :  { %v6773_v45 = vpop.eup %6772 }
 0x899   :  { %v5385_v46 = vadd.f32 1.0, %v6773_v45 }
 0x89b   :  { %6774 = vrcp.f32 %v5385_v46 }
 0x89c   :  { %6776 = vtanh.f32 %v5389_v49 }
 0x8a2   :  { %v5310_v24 = vpop.f32.mrb[60].mxu0  ;;  %v5351_v25 = vpop.f32.mrb[60].mxu1 }
 0x8a3   :  { %v5312_v26 = vpop.f32.mrb[61].mxu0  ;;  %v5353_v38 = vpop.f32.mrb[61].mxu1 }
 0x8a4   :  { %v5362_v20 = vcombine.low %v5310_v24, %v5312_v26  ;;  %v5363_v21 = vcombine.low %v5351_v25, %v5353_v38  ;;  %v5314_v22 = vpop.f32.mrb[62].mxu0  ;;  %v5355_v27 = vpop.f32.mrb[62].mxu1 }
 0x8a5   :  { %v6775_v19 = vpop.eup %6774  ;;  %v5315_v39 = vpop.f32.mrb[63].mxu0 }
 0x8a6   :  { %v5393_v28 = vrot.slane %v6775_v19, 2  ;;  %v5356_v36 = vpop.f32.mrb[63].mxu1  ;;  %v6777_v57 = vpop.eup %6776  ;;  %v5370_v35 = vrot.slane %v5362_v20, %v7251_v11  ;;  %v5377_v2 = vrot.slane %v5363_v21, %v7251_v11  ;;  %v5399_v58 = vrot.slane %v6775_v19, 4 }
 0x8a7   :  { %v5396_v52 = vmul.f32 %v6777_v57, %v6775_v19 }
 0x8a8   :  { %v5395_v51 = vmul.f32 %v5393_v28, %v5381_v61  ;;  %v5378_v53 = vcombine.low %v5370_v35, %v5377_v2 }
 0x8aa   :  { %v5397_v54 = vadd.f32 %v5396_v52, %v5395_v51  ;;  %v5380_v55 = vadd.f32 %v5378_v53, %v5081_v4 }
 0x8ac   :  { %6778 = vtanh.f32 %v5397_v54  ;;  %5424 = vst [vmem:[#allocation3] sm:$0x3] %v5397_v54  ;;  %v6271_v56 = vmul.f32 -1.442695, %v5380_v55  ;;  %v5410_v47 = vrot.slane %v5380_v55, 6 }
 0x8ae   :  { %6780 = vpow2.f32 %v6271_v56 }
 0x8b6   :  { %v6779_v59 = vpop.eup %6778 }
 0x8b7   :  { %v5401_v60 = vmul.f32 %v6779_v59, %v5399_v58 }
 0x8b8   :  { %v6781_v48 = vpop.eup %6780 }
 0x8b9   :  { %5423 = vst [vmem:[#allocation2] sm:$0x3] %v5401_v60  ;;  %v5427_v5 = vpack.c.bf16 %v5401_v60, %v5401_v60  ;;  %v5406_v6 = vadd.f32 1.0, %v6781_v48 }
 0x8bb   :  { %6272 = vst [vmem:[%s8779_s4 + $0x7] sm:$0x1] %v5427_v5  ;;  %6782 = vrcp.f32 %v5406_v6 }
 0x8bc   :  { %6784 = vtanh.f32 %v5410_v47 }
 0x8c5   :  { %v6783_v11 = vpop.eup %6782 }
 0x8c6   :  { %v5414_v34 = vrot.slane %v6783_v11, 2  ;;  %v6785_v18 = vpop.eup %6784  ;;  %v5420_v9 = vrot.slane %v6783_v11, 4 }
 0x8c7   :  { %v5417_v7 = vmul.f32 %v6785_v18, %v6783_v11 }
 0x8c8   :  { %v5416_v29 = vmul.f32 %v5414_v34, %v5402_v23 }
 0x8ca   :  { %v5418_v8 = vadd.f32 %v5417_v7, %v5416_v29 }
 0x8cc   :  { %6786 = vtanh.f32 %v5418_v8  ;;  %5426 = vst [vmem:[#allocation5] sm:$0x3] %v5418_v8 }
 0x8d6   :  { %v6787_v15 = vpop.eup %6786 }
 0x8d7   :  { %v5422_v16 = vmul.f32 %v6787_v15, %v5420_v9 }
 0x8d9   :  { %5425 = vst [vmem:[#allocation4] sm:$0x3] %v5422_v16  ;;  %v5430_v30 = vpack.c.bf16 %v5422_v16, %v5422_v16 }
 0x8db   :  { %5431 = vst [vmem:[%s8780_s5] sm:$0x1] %v5430_v30 }

</bundles_post_ra>
